<compile_context>
chip_gen: v7x
topology: tpu7x:2x2x1
jax: 0.10.0
libtpu: 0.0.40
codegen_flags: <defaults>
</compile_context>

<pallas_src>
import jax
import jax.numpy as jnp
from jax import lax
from jax.experimental import pallas as pl
from jax.experimental.pallas import tpu as pltpu


# ----------------------------------------------------------------------------
# Fused kernel: trunk (3 x conv3x3+bias+ReLU) + both heads (two 1x1 layers each)
# ----------------------------------------------------------------------------

def _fused_kernel(x_ref,
                  w1_ref, b1_ref, w2_ref, b2_ref, w3_ref, b3_ref,
                  wh1_ref, bh1_ref, wh2_ref, bh2_ref,
                  wp1_ref, bp1_ref, wp2_ref, bp2_ref,
                  heat_ref, paf_ref,
                  padx_ref, padc_ref):
    _, H, W, Cin = x_ref.shape
    Cm = w1_ref.shape[-1]

    def conv3x3_relu(pad_ref, w_ref, b_ref, cin, cout):
        # pad_ref: (H+2, W+2, cin) zero-padded activation kept entirely in VMEM.
        # 9 shifted matmuls accumulated in f32 on the MXU; no im2col in HBM.
        acc = jnp.zeros((H * W, cout), jnp.float32)
        for i in range(3):
            for j in range(3):
                patch = pad_ref[i:i + H, j:j + W, :].reshape(H * W, cin)
                acc = acc + jnp.dot(patch, w_ref[3 * i + j],
                                    preferred_element_type=jnp.float32)
        return jnp.maximum(acc + b_ref[...], 0.0)          # (H*W, cout)

    # ---- trunk layer 1: Cin -> Cm ----
    padx_ref[...] = jnp.zeros_like(padx_ref)
    padx_ref[1:H + 1, 1:W + 1, :] = x_ref[0]
    a = conv3x3_relu(padx_ref, w1_ref, b1_ref, Cin, Cm)

    # ---- trunk layer 2: Cm -> Cm  (intermediate never leaves VMEM) ----
    padc_ref[...] = jnp.zeros_like(padc_ref)
    padc_ref[1:H + 1, 1:W + 1, :] = a.reshape(H, W, Cm)
    a = conv3x3_relu(padc_ref, w2_ref, b2_ref, Cm, Cm)

    # ---- trunk layer 3: Cm -> Cm  (reuse padded scratch; borders still zero) ----
    padc_ref[1:H + 1, 1:W + 1, :] = a.reshape(H, W, Cm)
    t = conv3x3_relu(padc_ref, w3_ref, b3_ref, Cm, Cm)      # (H*W, Cm) trunk feats

    # ---- heatmaps head: 1x1 (Cm->512)+ReLU, 1x1 (512->Ph) ----
    hh = jnp.maximum(
        jnp.dot(t, wh1_ref[...], preferred_element_type=jnp.float32) + bh1_ref[...],
        0.0)
    heat = jnp.dot(hh, wh2_ref[...], preferred_element_type=jnp.float32) + bh2_ref[...]
    heat_ref[0] = heat.reshape(H, W, heat_ref.shape[-1])

    # ---- pafs head: 1x1 (Cm->512)+ReLU, 1x1 (512->Pp) ----
    hp = jnp.maximum(
        jnp.dot(t, wp1_ref[...], preferred_element_type=jnp.float32) + bp1_ref[...],
        0.0)
    paf = jnp.dot(hp, wp2_ref[...], preferred_element_type=jnp.float32) + bp2_ref[...]
    paf_ref[0] = paf.reshape(H, W, paf_ref.shape[-1])


def _fused_forward(x_nhwc, w1, b1, w2, b2, w3, b3,
                   wh1, bh1, wh2p, bh2p, wp1, bp1, wp2p, bp2p):
    N, H, W, Cin = x_nhwc.shape
    Cm = w1.shape[-1]
    Hd = wh1.shape[1]
    Ph = wh2p.shape[1]      # lane-padded head widths (multiples of 128)
    Pp = wp2p.shape[1]
    const = lambda *_: tuple(0 for _ in _ ) if False else None  # unused
    return pl.pallas_call(
        _fused_kernel,
        out_shape=(jax.ShapeDtypeStruct((N, H, W, Ph), jnp.float32),
                   jax.ShapeDtypeStruct((N, H, W, Pp), jnp.float32)),
        grid=(N,),
        in_specs=[
            pl.BlockSpec((1, H, W, Cin), lambda n: (n, 0, 0, 0)),
            pl.BlockSpec((9, Cin, Cm), lambda n: (0, 0, 0)),
            pl.BlockSpec((1, Cm), lambda n: (0, 0)),
            pl.BlockSpec((9, Cm, Cm), lambda n: (0, 0, 0)),
            pl.BlockSpec((1, Cm), lambda n: (0, 0)),
            pl.BlockSpec((9, Cm, Cm), lambda n: (0, 0, 0)),
            pl.BlockSpec((1, Cm), lambda n: (0, 0)),
            pl.BlockSpec((Cm, Hd), lambda n: (0, 0)),
            pl.BlockSpec((1, Hd), lambda n: (0, 0)),
            pl.BlockSpec((Hd, Ph), lambda n: (0, 0)),
            pl.BlockSpec((1, Ph), lambda n: (0, 0)),
            pl.BlockSpec((Cm, Hd), lambda n: (0, 0)),
            pl.BlockSpec((1, Hd), lambda n: (0, 0)),
            pl.BlockSpec((Hd, Pp), lambda n: (0, 0)),
            pl.BlockSpec((1, Pp), lambda n: (0, 0)),
        ],
        out_specs=(pl.BlockSpec((1, H, W, Ph), lambda n: (n, 0, 0, 0)),
                   pl.BlockSpec((1, H, W, Pp), lambda n: (n, 0, 0, 0))),
        scratch_shapes=[
            pltpu.VMEM((H + 2, W + 2, Cin), jnp.float32),
            pltpu.VMEM((H + 2, W + 2, Cm), jnp.float32),
        ],
        compiler_params=pltpu.CompilerParams(
            dimension_semantics=("parallel",)),
    )(x_nhwc, w1, b1, w2, b2, w3, b3, wh1, bh1, wh2p, bh2p, wp1, bp1, wp2p, bp2p)


# ----------------------------------------------------------------------------
# Wrapper glue
# ----------------------------------------------------------------------------

def _pad_lanes(w, b, lane=128):
    """Zero-pad the output-channel dim to a multiple of 128 for lane-dense stores."""
    pad = (-w.shape[1]) % lane
    if pad:
        w = jnp.pad(w, ((0, 0), (0, pad)))
        b = jnp.pad(b, ((0, 0), (0, pad)))
    return w, b


@jax.jit
def initial_stage_forward(x_nchw, params):
    x = jnp.transpose(x_nchw, (0, 2, 3, 1)).astype(jnp.float32)     # NHWC
    nh = params["h2_w"].shape[1]
    npf = params["p2_w"].shape[1]

    wh2p, bh2p = _pad_lanes(params["h2_w"], params["h2_b"])
    wp2p, bp2p = _pad_lanes(params["p2_w"], params["p2_b"])

    heat_p, paf_p = _fused_forward(
        x,
        params["t1_w"], params["t1_b"],
        params["t2_w"], params["t2_b"],
        params["t3_w"], params["t3_b"],
        params["h1_w"], params["h1_b"], wh2p, bh2p,
        params["p1_w"], params["p1_b"], wp2p, bp2p)

    heat = jnp.transpose(heat_p[:, :, :, :nh], (0, 3, 1, 2))        # NCHW
    pafs = jnp.transpose(paf_p[:, :, :, :npf], (0, 3, 1, 2))
    return heat, pafs


# ----------------------------------------------------------------------------
# Pure-JAX reference (same parameterization) for correctness check
# ----------------------------------------------------------------------------

def reference_forward(x_nchw, params):
    x = jnp.transpose(x_nchw, (0, 2, 3, 1)).astype(jnp.float32)

    def conv3x3_relu(t, w, b):
        cin, cout = w.shape[1], w.shape[2]
        wh = w.reshape(3, 3, cin, cout)                             # HWIO
        y = lax.conv_general_dilated(t, wh, window_strides=(1, 1), padding="SAME",
                                     dimension_numbers=("NHWC", "HWIO", "NHWC"))
        return jnp.maximum(y + b.reshape(1, 1, 1, cout), 0.0)

    t = conv3x3_relu(x, params["t1_w"], params["t1_b"])
    t = conv3x3_relu(t, params["t2_w"], params["t2_b"])
    t = conv3x3_relu(t, params["t3_w"], params["t3_b"])

    def head(feat, w1, b1, w2, b2):
        h = jnp.maximum(jnp.einsum("nhwc,cd->nhwd", feat, w1)
                        + b1.reshape(1, 1, 1, -1), 0.0)
        return jnp.einsum("nhwc,cd->nhwd", h, w2) + b2.reshape(1, 1, 1, -1)

    heat = head(t, params["h1_w"], params["h1_b"], params["h2_w"], params["h2_b"])
    pafs = head(t, params["p1_w"], params["p1_b"], params["p2_w"], params["p2_b"])
    return (jnp.transpose(heat, (0, 3, 1, 2)), jnp.transpose(pafs, (0, 3, 1, 2)))


# ----------------------------------------------------------------------------
# Deterministic parameter init + run
# ----------------------------------------------------------------------------

def init_params(key, c_in, c_mid, hidden, n_heat, n_paf):
    ks = jax.random.split(key, 14)
    s = 0.05
    w = lambda k, shape: s * jax.random.normal(k, shape, jnp.float32)
    return {
        # trunk 3x3 weights stored tap-major: (9, Cin, Cout), tap k = 3*i + j
        "t1_w": w(ks[0], (9, c_in, c_mid)),   "t1_b": w(ks[1], (1, c_mid)),
        "t2_w": w(ks[2], (9, c_mid, c_mid)),  "t2_b": w(ks[3], (1, c_mid)),
        "t3_w": w(ks[4], (9, c_mid, c_mid)),  "t3_b": w(ks[5], (1, c_mid)),
        # heads: 1x1 convs as (Cin, Cout) matmuls
        "h1_w": w(ks[6], (c_mid, hidden)),    "h1_b": w(ks[7], (1, hidden)),
        "h2_w": w(ks[8], (hidden, n_heat)),   "h2_b": w(ks[9], (1, n_heat)),
        "p1_w": w(ks[10], (c_mid, hidden)),   "p1_b": w(ks[11], (1, hidden)),
        "p2_w": w(ks[12], (hidden, n_paf)),   "p2_b": w(ks[13], (1, n_paf)),
    }


if __name__ == "__main__":
    IN_C, NUM_C = 32, 128            # num_channels=128 as in lightweight-OpenPose
    NUM_HEATMAPS, NUM_PAFS = 19, 38
    HIDDEN = 512                     # hardcoded in the PyTorch module
    N, H, W = 2, 16, 16

    root = jax.random.PRNGKey(0)
    kx, kp = jax.random.split(root)
    x = jax.random.normal(kx, (N, IN_C, H, W), jnp.float32)       # NCHW like PyTorch
    params = init_params(kp, IN_C, NUM_C, HIDDEN, NUM_HEATMAPS, NUM_PAFS)

    heat, pafs = jax.block_until_ready(initial_stage_forward(x, params))
    ref_heat, ref_pafs = reference_forward(x, params)

    assert heat.shape == (N, NUM_HEATMAPS, H, W), heat.shape
    assert pafs.shape == (N, NUM_PAFS, H, W), pafs.shape
    max_err = max(float(jnp.max(jnp.abs(heat - ref_heat))),
                  float(jnp.max(jnp.abs(pafs - ref_pafs))))
    assert max_err < 5e-3, f"mismatch vs reference: {max_err}"

    print("KERNEL_OK")
</pallas_src>

<mosaic_0001>
module attributes {stable_mosaic.version = 11 : i64} {
  func.func @_fused_kernel(%arg0: i32, %arg1: memref<1x16x16x32xf32, #tpu.memory_space<vmem>>, %arg2: memref<9x32x128xf32, #tpu.memory_space<vmem>>, %arg3: memref<1x128xf32, #tpu.memory_space<vmem>>, %arg4: memref<9x128x128xf32, #tpu.memory_space<vmem>>, %arg5: memref<1x128xf32, #tpu.memory_space<vmem>>, %arg6: memref<9x128x128xf32, #tpu.memory_space<vmem>>, %arg7: memref<1x128xf32, #tpu.memory_space<vmem>>, %arg8: memref<128x512xf32, #tpu.memory_space<vmem>>, %arg9: memref<1x512xf32, #tpu.memory_space<vmem>>, %arg10: memref<512x128xf32, #tpu.memory_space<vmem>>, %arg11: memref<1x128xf32, #tpu.memory_space<vmem>>, %arg12: memref<128x512xf32, #tpu.memory_space<vmem>>, %arg13: memref<1x512xf32, #tpu.memory_space<vmem>>, %arg14: memref<512x128xf32, #tpu.memory_space<vmem>>, %arg15: memref<1x128xf32, #tpu.memory_space<vmem>>, %arg16: memref<1x16x16x128xf32, #tpu.memory_space<vmem>>, %arg17: memref<1x16x16x128xf32, #tpu.memory_space<vmem>>, %arg18: memref<18x18x32xf32, #tpu.memory_space<vmem>>, %arg19: memref<18x18x128xf32, #tpu.memory_space<vmem>>) attributes {dimension_semantics = [#tpu.dimension_semantics<parallel>], iteration_bounds = array<i64: 2>, scalar_prefetch = 0 : i64, scratch_operands = 2 : i64, tpu.core_type = #tpu.core_type<tc>, window_params = [{transform_indices = @transform_0, window_bounds = array<i64: 1, 16, 16, 32>}, {pipeline_mode = #tpu.pipeline_mode<synchronous>, transform_indices = @transform_1, window_bounds = array<i64: 9, 32, 128>}, {pipeline_mode = #tpu.pipeline_mode<synchronous>, transform_indices = @transform_2, window_bounds = array<i64: 1, 128>}, {pipeline_mode = #tpu.pipeline_mode<synchronous>, transform_indices = @transform_3, window_bounds = array<i64: 9, 128, 128>}, {pipeline_mode = #tpu.pipeline_mode<synchronous>, transform_indices = @transform_4, window_bounds = array<i64: 1, 128>}, {pipeline_mode = #tpu.pipeline_mode<synchronous>, transform_indices = @transform_5, window_bounds = array<i64: 9, 128, 128>}, {pipeline_mode = #tpu.pipeline_mode<synchronous>, transform_indices = @transform_6, window_bounds = array<i64: 1, 128>}, {pipeline_mode = #tpu.pipeline_mode<synchronous>, transform_indices = @transform_7, window_bounds = array<i64: 128, 512>}, {pipeline_mode = #tpu.pipeline_mode<synchronous>, transform_indices = @transform_8, window_bounds = array<i64: 1, 512>}, {pipeline_mode = #tpu.pipeline_mode<synchronous>, transform_indices = @transform_9, window_bounds = array<i64: 512, 128>}, {pipeline_mode = #tpu.pipeline_mode<synchronous>, transform_indices = @transform_10, window_bounds = array<i64: 1, 128>}, {pipeline_mode = #tpu.pipeline_mode<synchronous>, transform_indices = @transform_11, window_bounds = array<i64: 128, 512>}, {pipeline_mode = #tpu.pipeline_mode<synchronous>, transform_indices = @transform_12, window_bounds = array<i64: 1, 512>}, {pipeline_mode = #tpu.pipeline_mode<synchronous>, transform_indices = @transform_13, window_bounds = array<i64: 512, 128>}, {pipeline_mode = #tpu.pipeline_mode<synchronous>, transform_indices = @transform_14, window_bounds = array<i64: 1, 128>}, {transform_indices = @transform_15, window_bounds = array<i64: 1, 16, 16, 128>}, {transform_indices = @transform_16, window_bounds = array<i64: 1, 16, 16, 128>}]} {
    %cst = arith.constant 0.000000e+00 : f32
    %0 = vector.broadcast %cst : f32 to vector<18x18x32xf32>
    %c0 = arith.constant 0 : index
    %c0_0 = arith.constant 0 : index
    %c0_1 = arith.constant 0 : index
    %1 = vector.load %arg18[%c0, %c0_0, %c0_1] : memref<18x18x32xf32, #tpu.memory_space<vmem>>, vector<18x18x32xf32>
    tpu.vector_store %arg18[%c0, %c0_0, %c0_1], %0 {strides = array<i32>} : memref<18x18x32xf32, #tpu.memory_space<vmem>>, vector<18x18x32xf32>,
    %c0_2 = arith.constant 0 : index
    %c0_3 = arith.constant 0 : index
    %c0_4 = arith.constant 0 : index
    %c0_5 = arith.constant 0 : index
    %2 = vector.load %arg1[%c0_2, %c0_3, %c0_4, %c0_5] : memref<1x16x16x32xf32, #tpu.memory_space<vmem>>, vector<1x16x16x32xf32>
    %3 = vector.shape_cast %2 : vector<1x16x16x32xf32> to vector<16x16x32xf32>
    %c1 = arith.constant 1 : index
    %c1_6 = arith.constant 1 : index
    %c0_7 = arith.constant 0 : index
    %4 = vector.load %arg18[%c1, %c1_6, %c0_7] : memref<18x18x32xf32, #tpu.memory_space<vmem>>, vector<16x16x32xf32>
    tpu.vector_store %arg18[%c1, %c1_6, %c0_7], %3 {strides = array<i32>} : memref<18x18x32xf32, #tpu.memory_space<vmem>>, vector<16x16x32xf32>,
    %cst_8 = arith.constant 0.000000e+00 : f32
    %5 = vector.broadcast %cst_8 : f32 to vector<256x128xf32>
    %c0_9 = arith.constant 0 : index
    %c0_10 = arith.constant 0 : index
    %c0_11 = arith.constant 0 : index
    %6 = vector.load %arg18[%c0_9, %c0_10, %c0_11] : memref<18x18x32xf32, #tpu.memory_space<vmem>>, vector<16x16x32xf32>
    %7 = vector.shape_cast %6 : vector<16x16x32xf32> to vector<256x32xf32>
    %c0_12 = arith.constant 0 : index
    %c0_13 = arith.constant 0 : index
    %c0_14 = arith.constant 0 : index
    %8 = vector.load %arg2[%c0_12, %c0_13, %c0_14] : memref<9x32x128xf32, #tpu.memory_space<vmem>>, vector<1x32x128xf32>
    %9 = vector.shape_cast %8 : vector<1x32x128xf32> to vector<32x128xf32>
    %cst_15 = arith.constant dense<0.000000e+00> : vector<256x128xf32>
    %10 = tpu.matmul %7, %9, %cst_15 {dimension_numbers = #tpu.dot_dimension_numbers<[1], [0], [0], [1], [0, 0, 1, 1], [], []>} : vector<256x32xf32>, vector<32x128xf32>, vector<256x128xf32> -> vector<256x128xf32>
    %11 = arith.addf %5, %10 : vector<256x128xf32>
    %c0_16 = arith.constant 0 : index
    %c1_17 = arith.constant 1 : index
    %c0_18 = arith.constant 0 : index
    %12 = vector.load %arg18[%c0_16, %c1_17, %c0_18] : memref<18x18x32xf32, #tpu.memory_space<vmem>>, vector<16x16x32xf32>
    %13 = vector.shape_cast %12 : vector<16x16x32xf32> to vector<256x32xf32>
    %c1_19 = arith.constant 1 : index
    %c0_20 = arith.constant 0 : index
    %c0_21 = arith.constant 0 : index
    %14 = vector.load %arg2[%c1_19, %c0_20, %c0_21] : memref<9x32x128xf32, #tpu.memory_space<vmem>>, vector<1x32x128xf32>
    %15 = vector.shape_cast %14 : vector<1x32x128xf32> to vector<32x128xf32>
    %cst_22 = arith.constant dense<0.000000e+00> : vector<256x128xf32>
    %16 = tpu.matmul %13, %15, %cst_22 {dimension_numbers = #tpu.dot_dimension_numbers<[1], [0], [0], [1], [0, 0, 1, 1], [], []>} : vector<256x32xf32>, vector<32x128xf32>, vector<256x128xf32> -> vector<256x128xf32>
    %17 = arith.addf %11, %16 : vector<256x128xf32>
    %c0_23 = arith.constant 0 : index
    %c2 = arith.constant 2 : index
    %c0_24 = arith.constant 0 : index
    %18 = vector.load %arg18[%c0_23, %c2, %c0_24] : memref<18x18x32xf32, #tpu.memory_space<vmem>>, vector<16x16x32xf32>
    %19 = vector.shape_cast %18 : vector<16x16x32xf32> to vector<256x32xf32>
    %c2_25 = arith.constant 2 : index
    %c0_26 = arith.constant 0 : index
    %c0_27 = arith.constant 0 : index
    %20 = vector.load %arg2[%c2_25, %c0_26, %c0_27] : memref<9x32x128xf32, #tpu.memory_space<vmem>>, vector<1x32x128xf32>
    %21 = vector.shape_cast %20 : vector<1x32x128xf32> to vector<32x128xf32>
    %cst_28 = arith.constant dense<0.000000e+00> : vector<256x128xf32>
    %22 = tpu.matmul %19, %21, %cst_28 {dimension_numbers = #tpu.dot_dimension_numbers<[1], [0], [0], [1], [0, 0, 1, 1], [], []>} : vector<256x32xf32>, vector<32x128xf32>, vector<256x128xf32> -> vector<256x128xf32>
    %23 = arith.addf %17, %22 : vector<256x128xf32>
    %c1_29 = arith.constant 1 : index
    %c0_30 = arith.constant 0 : index
    %c0_31 = arith.constant 0 : index
    %24 = vector.load %arg18[%c1_29, %c0_30, %c0_31] : memref<18x18x32xf32, #tpu.memory_space<vmem>>, vector<16x16x32xf32>
    %25 = vector.shape_cast %24 : vector<16x16x32xf32> to vector<256x32xf32>
    %c3 = arith.constant 3 : index
    %c0_32 = arith.constant 0 : index
    %c0_33 = arith.constant 0 : index
    %26 = vector.load %arg2[%c3, %c0_32, %c0_33] : memref<9x32x128xf32, #tpu.memory_space<vmem>>, vector<1x32x128xf32>
    %27 = vector.shape_cast %26 : vector<1x32x128xf32> to vector<32x128xf32>
    %cst_34 = arith.constant dense<0.000000e+00> : vector<256x128xf32>
    %28 = tpu.matmul %25, %27, %cst_34 {dimension_numbers = #tpu.dot_dimension_numbers<[1], [0], [0], [1], [0, 0, 1, 1], [], []>} : vector<256x32xf32>, vector<32x128xf32>, vector<256x128xf32> -> vector<256x128xf32>
    %29 = arith.addf %23, %28 : vector<256x128xf32>
    %c1_35 = arith.constant 1 : index
    %c1_36 = arith.constant 1 : index
    %c0_37 = arith.constant 0 : index
    %30 = vector.load %arg18[%c1_35, %c1_36, %c0_37] : memref<18x18x32xf32, #tpu.memory_space<vmem>>, vector<16x16x32xf32>
    %31 = vector.shape_cast %30 : vector<16x16x32xf32> to vector<256x32xf32>
    %c4 = arith.constant 4 : index
    %c0_38 = arith.constant 0 : index
    %c0_39 = arith.constant 0 : index
    %32 = vector.load %arg2[%c4, %c0_38, %c0_39] : memref<9x32x128xf32, #tpu.memory_space<vmem>>, vector<1x32x128xf32>
    %33 = vector.shape_cast %32 : vector<1x32x128xf32> to vector<32x128xf32>
    %cst_40 = arith.constant dense<0.000000e+00> : vector<256x128xf32>
    %34 = tpu.matmul %31, %33, %cst_40 {dimension_numbers = #tpu.dot_dimension_numbers<[1], [0], [0], [1], [0, 0, 1, 1], [], []>} : vector<256x32xf32>, vector<32x128xf32>, vector<256x128xf32> -> vector<256x128xf32>
    %35 = arith.addf %29, %34 : vector<256x128xf32>
    %c1_41 = arith.constant 1 : index
    %c2_42 = arith.constant 2 : index
    %c0_43 = arith.constant 0 : index
    %36 = vector.load %arg18[%c1_41, %c2_42, %c0_43] : memref<18x18x32xf32, #tpu.memory_space<vmem>>, vector<16x16x32xf32>
    %37 = vector.shape_cast %36 : vector<16x16x32xf32> to vector<256x32xf32>
    %c5 = arith.constant 5 : index
    %c0_44 = arith.constant 0 : index
    %c0_45 = arith.constant 0 : index
    %38 = vector.load %arg2[%c5, %c0_44, %c0_45] : memref<9x32x128xf32, #tpu.memory_space<vmem>>, vector<1x32x128xf32>
    %39 = vector.shape_cast %38 : vector<1x32x128xf32> to vector<32x128xf32>
    %cst_46 = arith.constant dense<0.000000e+00> : vector<256x128xf32>
    %40 = tpu.matmul %37, %39, %cst_46 {dimension_numbers = #tpu.dot_dimension_numbers<[1], [0], [0], [1], [0, 0, 1, 1], [], []>} : vector<256x32xf32>, vector<32x128xf32>, vector<256x128xf32> -> vector<256x128xf32>
    %41 = arith.addf %35, %40 : vector<256x128xf32>
    %c2_47 = arith.constant 2 : index
    %c0_48 = arith.constant 0 : index
    %c0_49 = arith.constant 0 : index
    %42 = vector.load %arg18[%c2_47, %c0_48, %c0_49] : memref<18x18x32xf32, #tpu.memory_space<vmem>>, vector<16x16x32xf32>
    %43 = vector.shape_cast %42 : vector<16x16x32xf32> to vector<256x32xf32>
    %c6 = arith.constant 6 : index
    %c0_50 = arith.constant 0 : index
    %c0_51 = arith.constant 0 : index
    %44 = vector.load %arg2[%c6, %c0_50, %c0_51] : memref<9x32x128xf32, #tpu.memory_space<vmem>>, vector<1x32x128xf32>
    %45 = vector.shape_cast %44 : vector<1x32x128xf32> to vector<32x128xf32>
    %cst_52 = arith.constant dense<0.000000e+00> : vector<256x128xf32>
    %46 = tpu.matmul %43, %45, %cst_52 {dimension_numbers = #tpu.dot_dimension_numbers<[1], [0], [0], [1], [0, 0, 1, 1], [], []>} : vector<256x32xf32>, vector<32x128xf32>, vector<256x128xf32> -> vector<256x128xf32>
    %47 = arith.addf %41, %46 : vector<256x128xf32>
    %c2_53 = arith.constant 2 : index
    %c1_54 = arith.constant 1 : index
    %c0_55 = arith.constant 0 : index
    %48 = vector.load %arg18[%c2_53, %c1_54, %c0_55] : memref<18x18x32xf32, #tpu.memory_space<vmem>>, vector<16x16x32xf32>
    %49 = vector.shape_cast %48 : vector<16x16x32xf32> to vector<256x32xf32>
    %c7 = arith.constant 7 : index
    %c0_56 = arith.constant 0 : index
    %c0_57 = arith.constant 0 : index
    %50 = vector.load %arg2[%c7, %c0_56, %c0_57] : memref<9x32x128xf32, #tpu.memory_space<vmem>>, vector<1x32x128xf32>
    %51 = vector.shape_cast %50 : vector<1x32x128xf32> to vector<32x128xf32>
    %cst_58 = arith.constant dense<0.000000e+00> : vector<256x128xf32>
    %52 = tpu.matmul %49, %51, %cst_58 {dimension_numbers = #tpu.dot_dimension_numbers<[1], [0], [0], [1], [0, 0, 1, 1], [], []>} : vector<256x32xf32>, vector<32x128xf32>, vector<256x128xf32> -> vector<256x128xf32>
    %53 = arith.addf %47, %52 : vector<256x128xf32>
    %c2_59 = arith.constant 2 : index
    %c2_60 = arith.constant 2 : index
    %c0_61 = arith.constant 0 : index
    %54 = vector.load %arg18[%c2_59, %c2_60, %c0_61] : memref<18x18x32xf32, #tpu.memory_space<vmem>>, vector<16x16x32xf32>
    %55 = vector.shape_cast %54 : vector<16x16x32xf32> to vector<256x32xf32>
    %c8 = arith.constant 8 : index
    %c0_62 = arith.constant 0 : index
    %c0_63 = arith.constant 0 : index
    %56 = vector.load %arg2[%c8, %c0_62, %c0_63] : memref<9x32x128xf32, #tpu.memory_space<vmem>>, vector<1x32x128xf32>
    %57 = vector.shape_cast %56 : vector<1x32x128xf32> to vector<32x128xf32>
    %cst_64 = arith.constant dense<0.000000e+00> : vector<256x128xf32>
    %58 = tpu.matmul %55, %57, %cst_64 {dimension_numbers = #tpu.dot_dimension_numbers<[1], [0], [0], [1], [0, 0, 1, 1], [], []>} : vector<256x32xf32>, vector<32x128xf32>, vector<256x128xf32> -> vector<256x128xf32>
    %59 = arith.addf %53, %58 : vector<256x128xf32>
    %c0_65 = arith.constant 0 : index
    %c0_66 = arith.constant 0 : index
    %60 = vector.load %arg3[%c0_65, %c0_66] : memref<1x128xf32, #tpu.memory_space<vmem>>, vector<1x128xf32>
    %61 = vector.broadcast %60 : vector<1x128xf32> to vector<256x128xf32>
    %62 = arith.addf %59, %61 : vector<256x128xf32>
    %cst_67 = arith.constant 0.000000e+00 : f32
    %63 = vector.broadcast %cst_67 : f32 to vector<256x128xf32>
    %64 = arith.maximumf %62, %63 : vector<256x128xf32>
    %cst_68 = arith.constant 0.000000e+00 : f32
    %65 = vector.broadcast %cst_68 : f32 to vector<18x18x128xf32>
    %c0_69 = arith.constant 0 : index
    %c0_70 = arith.constant 0 : index
    %c0_71 = arith.constant 0 : index
    %66 = vector.load %arg19[%c0_69, %c0_70, %c0_71] : memref<18x18x128xf32, #tpu.memory_space<vmem>>, vector<18x18x128xf32>
    tpu.vector_store %arg19[%c0_69, %c0_70, %c0_71], %65 {strides = array<i32>} : memref<18x18x128xf32, #tpu.memory_space<vmem>>, vector<18x18x128xf32>,
    %67 = vector.shape_cast %64 : vector<256x128xf32> to vector<16x16x128xf32>
    %c1_72 = arith.constant 1 : index
    %c1_73 = arith.constant 1 : index
    %c0_74 = arith.constant 0 : index
    %68 = vector.load %arg19[%c1_72, %c1_73, %c0_74] : memref<18x18x128xf32, #tpu.memory_space<vmem>>, vector<16x16x128xf32>
    tpu.vector_store %arg19[%c1_72, %c1_73, %c0_74], %67 {strides = array<i32>} : memref<18x18x128xf32, #tpu.memory_space<vmem>>, vector<16x16x128xf32>,
    %cst_75 = arith.constant 0.000000e+00 : f32
    %69 = vector.broadcast %cst_75 : f32 to vector<256x128xf32>
    %c0_76 = arith.constant 0 : index
    %c0_77 = arith.constant 0 : index
    %c0_78 = arith.constant 0 : index
    %70 = vector.load %arg19[%c0_76, %c0_77, %c0_78] : memref<18x18x128xf32, #tpu.memory_space<vmem>>, vector<16x16x128xf32>
    %71 = vector.shape_cast %70 : vector<16x16x128xf32> to vector<256x128xf32>
    %c0_79 = arith.constant 0 : index
    %c0_80 = arith.constant 0 : index
    %c0_81 = arith.constant 0 : index
    %72 = vector.load %arg4[%c0_79, %c0_80, %c0_81] : memref<9x128x128xf32, #tpu.memory_space<vmem>>, vector<1x128x128xf32>
    %73 = vector.shape_cast %72 : vector<1x128x128xf32> to vector<128x128xf32>
    %cst_82 = arith.constant dense<0.000000e+00> : vector<256x128xf32>
    %74 = tpu.matmul %71, %73, %cst_82 {dimension_numbers = #tpu.dot_dimension_numbers<[1], [0], [0], [1], [0, 0, 1, 1], [], []>} : vector<256x128xf32>, vector<128x128xf32>, vector<256x128xf32> -> vector<256x128xf32>
    %75 = arith.addf %69, %74 : vector<256x128xf32>
    %c0_83 = arith.constant 0 : index
    %c1_84 = arith.constant 1 : index
    %c0_85 = arith.constant 0 : index
    %76 = vector.load %arg19[%c0_83, %c1_84, %c0_85] : memref<18x18x128xf32, #tpu.memory_space<vmem>>, vector<16x16x128xf32>
    %77 = vector.shape_cast %76 : vector<16x16x128xf32> to vector<256x128xf32>
    %c1_86 = arith.constant 1 : index
    %c0_87 = arith.constant 0 : index
    %c0_88 = arith.constant 0 : index
    %78 = vector.load %arg4[%c1_86, %c0_87, %c0_88] : memref<9x128x128xf32, #tpu.memory_space<vmem>>, vector<1x128x128xf32>
    %79 = vector.shape_cast %78 : vector<1x128x128xf32> to vector<128x128xf32>
    %cst_89 = arith.constant dense<0.000000e+00> : vector<256x128xf32>
    %80 = tpu.matmul %77, %79, %cst_89 {dimension_numbers = #tpu.dot_dimension_numbers<[1], [0], [0], [1], [0, 0, 1, 1], [], []>} : vector<256x128xf32>, vector<128x128xf32>, vector<256x128xf32> -> vector<256x128xf32>
    %81 = arith.addf %75, %80 : vector<256x128xf32>
    %c0_90 = arith.constant 0 : index
    %c2_91 = arith.constant 2 : index
    %c0_92 = arith.constant 0 : index
    %82 = vector.load %arg19[%c0_90, %c2_91, %c0_92] : memref<18x18x128xf32, #tpu.memory_space<vmem>>, vector<16x16x128xf32>
    %83 = vector.shape_cast %82 : vector<16x16x128xf32> to vector<256x128xf32>
    %c2_93 = arith.constant 2 : index
    %c0_94 = arith.constant 0 : index
    %c0_95 = arith.constant 0 : index
    %84 = vector.load %arg4[%c2_93, %c0_94, %c0_95] : memref<9x128x128xf32, #tpu.memory_space<vmem>>, vector<1x128x128xf32>
    %85 = vector.shape_cast %84 : vector<1x128x128xf32> to vector<128x128xf32>
    %cst_96 = arith.constant dense<0.000000e+00> : vector<256x128xf32>
    %86 = tpu.matmul %83, %85, %cst_96 {dimension_numbers = #tpu.dot_dimension_numbers<[1], [0], [0], [1], [0, 0, 1, 1], [], []>} : vector<256x128xf32>, vector<128x128xf32>, vector<256x128xf32> -> vector<256x128xf32>
    %87 = arith.addf %81, %86 : vector<256x128xf32>
    %c1_97 = arith.constant 1 : index
    %c0_98 = arith.constant 0 : index
    %c0_99 = arith.constant 0 : index
    %88 = vector.load %arg19[%c1_97, %c0_98, %c0_99] : memref<18x18x128xf32, #tpu.memory_space<vmem>>, vector<16x16x128xf32>
    %89 = vector.shape_cast %88 : vector<16x16x128xf32> to vector<256x128xf32>
    %c3_100 = arith.constant 3 : index
    %c0_101 = arith.constant 0 : index
    %c0_102 = arith.constant 0 : index
    %90 = vector.load %arg4[%c3_100, %c0_101, %c0_102] : memref<9x128x128xf32, #tpu.memory_space<vmem>>, vector<1x128x128xf32>
    %91 = vector.shape_cast %90 : vector<1x128x128xf32> to vector<128x128xf32>
    %cst_103 = arith.constant dense<0.000000e+00> : vector<256x128xf32>
    %92 = tpu.matmul %89, %91, %cst_103 {dimension_numbers = #tpu.dot_dimension_numbers<[1], [0], [0], [1], [0, 0, 1, 1], [], []>} : vector<256x128xf32>, vector<128x128xf32>, vector<256x128xf32> -> vector<256x128xf32>
    %93 = arith.addf %87, %92 : vector<256x128xf32>
    %c1_104 = arith.constant 1 : index
    %c1_105 = arith.constant 1 : index
    %c0_106 = arith.constant 0 : index
    %94 = vector.load %arg19[%c1_104, %c1_105, %c0_106] : memref<18x18x128xf32, #tpu.memory_space<vmem>>, vector<16x16x128xf32>
    %95 = vector.shape_cast %94 : vector<16x16x128xf32> to vector<256x128xf32>
    %c4_107 = arith.constant 4 : index
    %c0_108 = arith.constant 0 : index
    %c0_109 = arith.constant 0 : index
    %96 = vector.load %arg4[%c4_107, %c0_108, %c0_109] : memref<9x128x128xf32, #tpu.memory_space<vmem>>, vector<1x128x128xf32>
    %97 = vector.shape_cast %96 : vector<1x128x128xf32> to vector<128x128xf32>
    %cst_110 = arith.constant dense<0.000000e+00> : vector<256x128xf32>
    %98 = tpu.matmul %95, %97, %cst_110 {dimension_numbers = #tpu.dot_dimension_numbers<[1], [0], [0], [1], [0, 0, 1, 1], [], []>} : vector<256x128xf32>, vector<128x128xf32>, vector<256x128xf32> -> vector<256x128xf32>
    %99 = arith.addf %93, %98 : vector<256x128xf32>
    %c1_111 = arith.constant 1 : index
    %c2_112 = arith.constant 2 : index
    %c0_113 = arith.constant 0 : index
    %100 = vector.load %arg19[%c1_111, %c2_112, %c0_113] : memref<18x18x128xf32, #tpu.memory_space<vmem>>, vector<16x16x128xf32>
    %101 = vector.shape_cast %100 : vector<16x16x128xf32> to vector<256x128xf32>
    %c5_114 = arith.constant 5 : index
    %c0_115 = arith.constant 0 : index
    %c0_116 = arith.constant 0 : index
    %102 = vector.load %arg4[%c5_114, %c0_115, %c0_116] : memref<9x128x128xf32, #tpu.memory_space<vmem>>, vector<1x128x128xf32>
    %103 = vector.shape_cast %102 : vector<1x128x128xf32> to vector<128x128xf32>
    %cst_117 = arith.constant dense<0.000000e+00> : vector<256x128xf32>
    %104 = tpu.matmul %101, %103, %cst_117 {dimension_numbers = #tpu.dot_dimension_numbers<[1], [0], [0], [1], [0, 0, 1, 1], [], []>} : vector<256x128xf32>, vector<128x128xf32>, vector<256x128xf32> -> vector<256x128xf32>
    %105 = arith.addf %99, %104 : vector<256x128xf32>
    %c2_118 = arith.constant 2 : index
    %c0_119 = arith.constant 0 : index
    %c0_120 = arith.constant 0 : index
    %106 = vector.load %arg19[%c2_118, %c0_119, %c0_120] : memref<18x18x128xf32, #tpu.memory_space<vmem>>, vector<16x16x128xf32>
    %107 = vector.shape_cast %106 : vector<16x16x128xf32> to vector<256x128xf32>
    %c6_121 = arith.constant 6 : index
    %c0_122 = arith.constant 0 : index
    %c0_123 = arith.constant 0 : index
    %108 = vector.load %arg4[%c6_121, %c0_122, %c0_123] : memref<9x128x128xf32, #tpu.memory_space<vmem>>, vector<1x128x128xf32>
    %109 = vector.shape_cast %108 : vector<1x128x128xf32> to vector<128x128xf32>
    %cst_124 = arith.constant dense<0.000000e+00> : vector<256x128xf32>
    %110 = tpu.matmul %107, %109, %cst_124 {dimension_numbers = #tpu.dot_dimension_numbers<[1], [0], [0], [1], [0, 0, 1, 1], [], []>} : vector<256x128xf32>, vector<128x128xf32>, vector<256x128xf32> -> vector<256x128xf32>
    %111 = arith.addf %105, %110 : vector<256x128xf32>
    %c2_125 = arith.constant 2 : index
    %c1_126 = arith.constant 1 : index
    %c0_127 = arith.constant 0 : index
    %112 = vector.load %arg19[%c2_125, %c1_126, %c0_127] : memref<18x18x128xf32, #tpu.memory_space<vmem>>, vector<16x16x128xf32>
    %113 = vector.shape_cast %112 : vector<16x16x128xf32> to vector<256x128xf32>
    %c7_128 = arith.constant 7 : index
    %c0_129 = arith.constant 0 : index
    %c0_130 = arith.constant 0 : index
    %114 = vector.load %arg4[%c7_128, %c0_129, %c0_130] : memref<9x128x128xf32, #tpu.memory_space<vmem>>, vector<1x128x128xf32>
    %115 = vector.shape_cast %114 : vector<1x128x128xf32> to vector<128x128xf32>
    %cst_131 = arith.constant dense<0.000000e+00> : vector<256x128xf32>
    %116 = tpu.matmul %113, %115, %cst_131 {dimension_numbers = #tpu.dot_dimension_numbers<[1], [0], [0], [1], [0, 0, 1, 1], [], []>} : vector<256x128xf32>, vector<128x128xf32>, vector<256x128xf32> -> vector<256x128xf32>
    %117 = arith.addf %111, %116 : vector<256x128xf32>
    %c2_132 = arith.constant 2 : index
    %c2_133 = arith.constant 2 : index
    %c0_134 = arith.constant 0 : index
    %118 = vector.load %arg19[%c2_132, %c2_133, %c0_134] : memref<18x18x128xf32, #tpu.memory_space<vmem>>, vector<16x16x128xf32>
    %119 = vector.shape_cast %118 : vector<16x16x128xf32> to vector<256x128xf32>
    %c8_135 = arith.constant 8 : index
    %c0_136 = arith.constant 0 : index
    %c0_137 = arith.constant 0 : index
    %120 = vector.load %arg4[%c8_135, %c0_136, %c0_137] : memref<9x128x128xf32, #tpu.memory_space<vmem>>, vector<1x128x128xf32>
    %121 = vector.shape_cast %120 : vector<1x128x128xf32> to vector<128x128xf32>
    %cst_138 = arith.constant dense<0.000000e+00> : vector<256x128xf32>
    %122 = tpu.matmul %119, %121, %cst_138 {dimension_numbers = #tpu.dot_dimension_numbers<[1], [0], [0], [1], [0, 0, 1, 1], [], []>} : vector<256x128xf32>, vector<128x128xf32>, vector<256x128xf32> -> vector<256x128xf32>
    %123 = arith.addf %117, %122 : vector<256x128xf32>
    %c0_139 = arith.constant 0 : index
    %c0_140 = arith.constant 0 : index
    %124 = vector.load %arg5[%c0_139, %c0_140] : memref<1x128xf32, #tpu.memory_space<vmem>>, vector<1x128xf32>
    %125 = vector.broadcast %124 : vector<1x128xf32> to vector<256x128xf32>
    %126 = arith.addf %123, %125 : vector<256x128xf32>
    %cst_141 = arith.constant 0.000000e+00 : f32
    %127 = vector.broadcast %cst_141 : f32 to vector<256x128xf32>
    %128 = arith.maximumf %126, %127 : vector<256x128xf32>
    %129 = vector.shape_cast %128 : vector<256x128xf32> to vector<16x16x128xf32>
    %c1_142 = arith.constant 1 : index
    %c1_143 = arith.constant 1 : index
    %c0_144 = arith.constant 0 : index
    %130 = vector.load %arg19[%c1_142, %c1_143, %c0_144] : memref<18x18x128xf32, #tpu.memory_space<vmem>>, vector<16x16x128xf32>
    tpu.vector_store %arg19[%c1_142, %c1_143, %c0_144], %129 {strides = array<i32>} : memref<18x18x128xf32, #tpu.memory_space<vmem>>, vector<16x16x128xf32>,
    %cst_145 = arith.constant 0.000000e+00 : f32
    %131 = vector.broadcast %cst_145 : f32 to vector<256x128xf32>
    %c0_146 = arith.constant 0 : index
    %c0_147 = arith.constant 0 : index
    %c0_148 = arith.constant 0 : index
    %132 = vector.load %arg19[%c0_146, %c0_147, %c0_148] : memref<18x18x128xf32, #tpu.memory_space<vmem>>, vector<16x16x128xf32>
    %133 = vector.shape_cast %132 : vector<16x16x128xf32> to vector<256x128xf32>
    %c0_149 = arith.constant 0 : index
    %c0_150 = arith.constant 0 : index
    %c0_151 = arith.constant 0 : index
    %134 = vector.load %arg6[%c0_149, %c0_150, %c0_151] : memref<9x128x128xf32, #tpu.memory_space<vmem>>, vector<1x128x128xf32>
    %135 = vector.shape_cast %134 : vector<1x128x128xf32> to vector<128x128xf32>
    %cst_152 = arith.constant dense<0.000000e+00> : vector<256x128xf32>
    %136 = tpu.matmul %133, %135, %cst_152 {dimension_numbers = #tpu.dot_dimension_numbers<[1], [0], [0], [1], [0, 0, 1, 1], [], []>} : vector<256x128xf32>, vector<128x128xf32>, vector<256x128xf32> -> vector<256x128xf32>
    %137 = arith.addf %131, %136 : vector<256x128xf32>
    %c0_153 = arith.constant 0 : index
    %c1_154 = arith.constant 1 : index
    %c0_155 = arith.constant 0 : index
    %138 = vector.load %arg19[%c0_153, %c1_154, %c0_155] : memref<18x18x128xf32, #tpu.memory_space<vmem>>, vector<16x16x128xf32>
    %139 = vector.shape_cast %138 : vector<16x16x128xf32> to vector<256x128xf32>
    %c1_156 = arith.constant 1 : index
    %c0_157 = arith.constant 0 : index
    %c0_158 = arith.constant 0 : index
    %140 = vector.load %arg6[%c1_156, %c0_157, %c0_158] : memref<9x128x128xf32, #tpu.memory_space<vmem>>, vector<1x128x128xf32>
    %141 = vector.shape_cast %140 : vector<1x128x128xf32> to vector<128x128xf32>
    %cst_159 = arith.constant dense<0.000000e+00> : vector<256x128xf32>
    %142 = tpu.matmul %139, %141, %cst_159 {dimension_numbers = #tpu.dot_dimension_numbers<[1], [0], [0], [1], [0, 0, 1, 1], [], []>} : vector<256x128xf32>, vector<128x128xf32>, vector<256x128xf32> -> vector<256x128xf32>
    %143 = arith.addf %137, %142 : vector<256x128xf32>
    %c0_160 = arith.constant 0 : index
    %c2_161 = arith.constant 2 : index
    %c0_162 = arith.constant 0 : index
    %144 = vector.load %arg19[%c0_160, %c2_161, %c0_162] : memref<18x18x128xf32, #tpu.memory_space<vmem>>, vector<16x16x128xf32>
    %145 = vector.shape_cast %144 : vector<16x16x128xf32> to vector<256x128xf32>
    %c2_163 = arith.constant 2 : index
    %c0_164 = arith.constant 0 : index
    %c0_165 = arith.constant 0 : index
    %146 = vector.load %arg6[%c2_163, %c0_164, %c0_165] : memref<9x128x128xf32, #tpu.memory_space<vmem>>, vector<1x128x128xf32>
    %147 = vector.shape_cast %146 : vector<1x128x128xf32> to vector<128x128xf32>
    %cst_166 = arith.constant dense<0.000000e+00> : vector<256x128xf32>
    %148 = tpu.matmul %145, %147, %cst_166 {dimension_numbers = #tpu.dot_dimension_numbers<[1], [0], [0], [1], [0, 0, 1, 1], [], []>} : vector<256x128xf32>, vector<128x128xf32>, vector<256x128xf32> -> vector<256x128xf32>
    %149 = arith.addf %143, %148 : vector<256x128xf32>
    %c1_167 = arith.constant 1 : index
    %c0_168 = arith.constant 0 : index
    %c0_169 = arith.constant 0 : index
    %150 = vector.load %arg19[%c1_167, %c0_168, %c0_169] : memref<18x18x128xf32, #tpu.memory_space<vmem>>, vector<16x16x128xf32>
    %151 = vector.shape_cast %150 : vector<16x16x128xf32> to vector<256x128xf32>
    %c3_170 = arith.constant 3 : index
    %c0_171 = arith.constant 0 : index
    %c0_172 = arith.constant 0 : index
    %152 = vector.load %arg6[%c3_170, %c0_171, %c0_172] : memref<9x128x128xf32, #tpu.memory_space<vmem>>, vector<1x128x128xf32>
    %153 = vector.shape_cast %152 : vector<1x128x128xf32> to vector<128x128xf32>
    %cst_173 = arith.constant dense<0.000000e+00> : vector<256x128xf32>
    %154 = tpu.matmul %151, %153, %cst_173 {dimension_numbers = #tpu.dot_dimension_numbers<[1], [0], [0], [1], [0, 0, 1, 1], [], []>} : vector<256x128xf32>, vector<128x128xf32>, vector<256x128xf32> -> vector<256x128xf32>
    %155 = arith.addf %149, %154 : vector<256x128xf32>
    %c1_174 = arith.constant 1 : index
    %c1_175 = arith.constant 1 : index
    %c0_176 = arith.constant 0 : index
    %156 = vector.load %arg19[%c1_174, %c1_175, %c0_176] : memref<18x18x128xf32, #tpu.memory_space<vmem>>, vector<16x16x128xf32>
    %157 = vector.shape_cast %156 : vector<16x16x128xf32> to vector<256x128xf32>
    %c4_177 = arith.constant 4 : index
    %c0_178 = arith.constant 0 : index
    %c0_179 = arith.constant 0 : index
    %158 = vector.load %arg6[%c4_177, %c0_178, %c0_179] : memref<9x128x128xf32, #tpu.memory_space<vmem>>, vector<1x128x128xf32>
    %159 = vector.shape_cast %158 : vector<1x128x128xf32> to vector<128x128xf32>
    %cst_180 = arith.constant dense<0.000000e+00> : vector<256x128xf32>
    %160 = tpu.matmul %157, %159, %cst_180 {dimension_numbers = #tpu.dot_dimension_numbers<[1], [0], [0], [1], [0, 0, 1, 1], [], []>} : vector<256x128xf32>, vector<128x128xf32>, vector<256x128xf32> -> vector<256x128xf32>
    %161 = arith.addf %155, %160 : vector<256x128xf32>
    %c1_181 = arith.constant 1 : index
    %c2_182 = arith.constant 2 : index
    %c0_183 = arith.constant 0 : index
    %162 = vector.load %arg19[%c1_181, %c2_182, %c0_183] : memref<18x18x128xf32, #tpu.memory_space<vmem>>, vector<16x16x128xf32>
    %163 = vector.shape_cast %162 : vector<16x16x128xf32> to vector<256x128xf32>
    %c5_184 = arith.constant 5 : index
    %c0_185 = arith.constant 0 : index
    %c0_186 = arith.constant 0 : index
    %164 = vector.load %arg6[%c5_184, %c0_185, %c0_186] : memref<9x128x128xf32, #tpu.memory_space<vmem>>, vector<1x128x128xf32>
    %165 = vector.shape_cast %164 : vector<1x128x128xf32> to vector<128x128xf32>
    %cst_187 = arith.constant dense<0.000000e+00> : vector<256x128xf32>
    %166 = tpu.matmul %163, %165, %cst_187 {dimension_numbers = #tpu.dot_dimension_numbers<[1], [0], [0], [1], [0, 0, 1, 1], [], []>} : vector<256x128xf32>, vector<128x128xf32>, vector<256x128xf32> -> vector<256x128xf32>
    %167 = arith.addf %161, %166 : vector<256x128xf32>
    %c2_188 = arith.constant 2 : index
    %c0_189 = arith.constant 0 : index
    %c0_190 = arith.constant 0 : index
    %168 = vector.load %arg19[%c2_188, %c0_189, %c0_190] : memref<18x18x128xf32, #tpu.memory_space<vmem>>, vector<16x16x128xf32>
    %169 = vector.shape_cast %168 : vector<16x16x128xf32> to vector<256x128xf32>
    %c6_191 = arith.constant 6 : index
    %c0_192 = arith.constant 0 : index
    %c0_193 = arith.constant 0 : index
    %170 = vector.load %arg6[%c6_191, %c0_192, %c0_193] : memref<9x128x128xf32, #tpu.memory_space<vmem>>, vector<1x128x128xf32>
    %171 = vector.shape_cast %170 : vector<1x128x128xf32> to vector<128x128xf32>
    %cst_194 = arith.constant dense<0.000000e+00> : vector<256x128xf32>
    %172 = tpu.matmul %169, %171, %cst_194 {dimension_numbers = #tpu.dot_dimension_numbers<[1], [0], [0], [1], [0, 0, 1, 1], [], []>} : vector<256x128xf32>, vector<128x128xf32>, vector<256x128xf32> -> vector<256x128xf32>
    %173 = arith.addf %167, %172 : vector<256x128xf32>
    %c2_195 = arith.constant 2 : index
    %c1_196 = arith.constant 1 : index
    %c0_197 = arith.constant 0 : index
    %174 = vector.load %arg19[%c2_195, %c1_196, %c0_197] : memref<18x18x128xf32, #tpu.memory_space<vmem>>, vector<16x16x128xf32>
    %175 = vector.shape_cast %174 : vector<16x16x128xf32> to vector<256x128xf32>
    %c7_198 = arith.constant 7 : index
    %c0_199 = arith.constant 0 : index
    %c0_200 = arith.constant 0 : index
    %176 = vector.load %arg6[%c7_198, %c0_199, %c0_200] : memref<9x128x128xf32, #tpu.memory_space<vmem>>, vector<1x128x128xf32>
    %177 = vector.shape_cast %176 : vector<1x128x128xf32> to vector<128x128xf32>
    %cst_201 = arith.constant dense<0.000000e+00> : vector<256x128xf32>
    %178 = tpu.matmul %175, %177, %cst_201 {dimension_numbers = #tpu.dot_dimension_numbers<[1], [0], [0], [1], [0, 0, 1, 1], [], []>} : vector<256x128xf32>, vector<128x128xf32>, vector<256x128xf32> -> vector<256x128xf32>
    %179 = arith.addf %173, %178 : vector<256x128xf32>
    %c2_202 = arith.constant 2 : index
    %c2_203 = arith.constant 2 : index
    %c0_204 = arith.constant 0 : index
    %180 = vector.load %arg19[%c2_202, %c2_203, %c0_204] : memref<18x18x128xf32, #tpu.memory_space<vmem>>, vector<16x16x128xf32>
    %181 = vector.shape_cast %180 : vector<16x16x128xf32> to vector<256x128xf32>
    %c8_205 = arith.constant 8 : index
    %c0_206 = arith.constant 0 : index
    %c0_207 = arith.constant 0 : index
    %182 = vector.load %arg6[%c8_205, %c0_206, %c0_207] : memref<9x128x128xf32, #tpu.memory_space<vmem>>, vector<1x128x128xf32>
    %183 = vector.shape_cast %182 : vector<1x128x128xf32> to vector<128x128xf32>
    %cst_208 = arith.constant dense<0.000000e+00> : vector<256x128xf32>
    %184 = tpu.matmul %181, %183, %cst_208 {dimension_numbers = #tpu.dot_dimension_numbers<[1], [0], [0], [1], [0, 0, 1, 1], [], []>} : vector<256x128xf32>, vector<128x128xf32>, vector<256x128xf32> -> vector<256x128xf32>
    %185 = arith.addf %179, %184 : vector<256x128xf32>
    %c0_209 = arith.constant 0 : index
    %c0_210 = arith.constant 0 : index
    %186 = vector.load %arg7[%c0_209, %c0_210] : memref<1x128xf32, #tpu.memory_space<vmem>>, vector<1x128xf32>
    %187 = vector.broadcast %186 : vector<1x128xf32> to vector<256x128xf32>
    %188 = arith.addf %185, %187 : vector<256x128xf32>
    %cst_211 = arith.constant 0.000000e+00 : f32
    %189 = vector.broadcast %cst_211 : f32 to vector<256x128xf32>
    %190 = arith.maximumf %188, %189 : vector<256x128xf32>
    %c0_212 = arith.constant 0 : index
    %c0_213 = arith.constant 0 : index
    %191 = vector.load %arg8[%c0_212, %c0_213] : memref<128x512xf32, #tpu.memory_space<vmem>>, vector<128x512xf32>
    %cst_214 = arith.constant dense<0.000000e+00> : vector<256x512xf32>
    %192 = tpu.matmul %190, %191, %cst_214 {dimension_numbers = #tpu.dot_dimension_numbers<[1], [0], [0], [1], [0, 0, 1, 1], [], []>} : vector<256x128xf32>, vector<128x512xf32>, vector<256x512xf32> -> vector<256x512xf32>
    %c0_215 = arith.constant 0 : index
    %c0_216 = arith.constant 0 : index
    %193 = vector.load %arg9[%c0_215, %c0_216] : memref<1x512xf32, #tpu.memory_space<vmem>>, vector<1x512xf32>
    %194 = vector.broadcast %193 : vector<1x512xf32> to vector<256x512xf32>
    %195 = arith.addf %192, %194 : vector<256x512xf32>
    %cst_217 = arith.constant 0.000000e+00 : f32
    %196 = vector.broadcast %cst_217 : f32 to vector<256x512xf32>
    %197 = arith.maximumf %195, %196 : vector<256x512xf32>
    %c0_218 = arith.constant 0 : index
    %c0_219 = arith.constant 0 : index
    %198 = vector.load %arg10[%c0_218, %c0_219] : memref<512x128xf32, #tpu.memory_space<vmem>>, vector<512x128xf32>
    %cst_220 = arith.constant dense<0.000000e+00> : vector<256x128xf32>
    %199 = tpu.matmul %197, %198, %cst_220 {dimension_numbers = #tpu.dot_dimension_numbers<[1], [0], [0], [1], [0, 0, 1, 1], [], []>} : vector<256x512xf32>, vector<512x128xf32>, vector<256x128xf32> -> vector<256x128xf32>
    %c0_221 = arith.constant 0 : index
    %c0_222 = arith.constant 0 : index
    %200 = vector.load %arg11[%c0_221, %c0_222] : memref<1x128xf32, #tpu.memory_space<vmem>>, vector<1x128xf32>
    %201 = vector.broadcast %200 : vector<1x128xf32> to vector<256x128xf32>
    %202 = arith.addf %199, %201 : vector<256x128xf32>
    %203 = vector.shape_cast %202 : vector<256x128xf32> to vector<16x16x128xf32>
    %c0_223 = arith.constant 0 : index
    %c0_224 = arith.constant 0 : index
    %c0_225 = arith.constant 0 : index
    %c0_226 = arith.constant 0 : index
    %204 = vector.load %arg16[%c0_223, %c0_224, %c0_225, %c0_226] : memref<1x16x16x128xf32, #tpu.memory_space<vmem>>, vector<1x16x16x128xf32>
    %205 = vector.shape_cast %204 : vector<1x16x16x128xf32> to vector<16x16x128xf32>
    %206 = vector.shape_cast %203 : vector<16x16x128xf32> to vector<1x16x16x128xf32>
    tpu.vector_store %arg16[%c0_223, %c0_224, %c0_225, %c0_226], %206 {strides = array<i32>} : memref<1x16x16x128xf32, #tpu.memory_space<vmem>>, vector<1x16x16x128xf32>,
    %c0_227 = arith.constant 0 : index
    %c0_228 = arith.constant 0 : index
    %207 = vector.load %arg12[%c0_227, %c0_228] : memref<128x512xf32, #tpu.memory_space<vmem>>, vector<128x512xf32>
    %cst_229 = arith.constant dense<0.000000e+00> : vector<256x512xf32>
    %208 = tpu.matmul %190, %207, %cst_229 {dimension_numbers = #tpu.dot_dimension_numbers<[1], [0], [0], [1], [0, 0, 1, 1], [], []>} : vector<256x128xf32>, vector<128x512xf32>, vector<256x512xf32> -> vector<256x512xf32>
    %c0_230 = arith.constant 0 : index
    %c0_231 = arith.constant 0 : index
    %209 = vector.load %arg13[%c0_230, %c0_231] : memref<1x512xf32, #tpu.memory_space<vmem>>, vector<1x512xf32>
    %210 = vector.broadcast %209 : vector<1x512xf32> to vector<256x512xf32>
    %211 = arith.addf %208, %210 : vector<256x512xf32>
    %cst_232 = arith.constant 0.000000e+00 : f32
    %212 = vector.broadcast %cst_232 : f32 to vector<256x512xf32>
    %213 = arith.maximumf %211, %212 : vector<256x512xf32>
    %c0_233 = arith.constant 0 : index
    %c0_234 = arith.constant 0 : index
    %214 = vector.load %arg14[%c0_233, %c0_234] : memref<512x128xf32, #tpu.memory_space<vmem>>, vector<512x128xf32>
    %cst_235 = arith.constant dense<0.000000e+00> : vector<256x128xf32>
    %215 = tpu.matmul %213, %214, %cst_235 {dimension_numbers = #tpu.dot_dimension_numbers<[1], [0], [0], [1], [0, 0, 1, 1], [], []>} : vector<256x512xf32>, vector<512x128xf32>, vector<256x128xf32> -> vector<256x128xf32>
    %c0_236 = arith.constant 0 : index
    %c0_237 = arith.constant 0 : index
    %216 = vector.load %arg15[%c0_236, %c0_237] : memref<1x128xf32, #tpu.memory_space<vmem>>, vector<1x128xf32>
    %217 = vector.broadcast %216 : vector<1x128xf32> to vector<256x128xf32>
    %218 = arith.addf %215, %217 : vector<256x128xf32>
    %219 = vector.shape_cast %218 : vector<256x128xf32> to vector<16x16x128xf32>
    %c0_238 = arith.constant 0 : index
    %c0_239 = arith.constant 0 : index
    %c0_240 = arith.constant 0 : index
    %c0_241 = arith.constant 0 : index
    %220 = vector.load %arg17[%c0_238, %c0_239, %c0_240, %c0_241] : memref<1x16x16x128xf32, #tpu.memory_space<vmem>>, vector<1x16x16x128xf32>
    %221 = vector.shape_cast %220 : vector<1x16x16x128xf32> to vector<16x16x128xf32>
    %222 = vector.shape_cast %219 : vector<16x16x128xf32> to vector<1x16x16x128xf32>
    tpu.vector_store %arg17[%c0_238, %c0_239, %c0_240, %c0_241], %222 {strides = array<i32>} : memref<1x16x16x128xf32, #tpu.memory_space<vmem>>, vector<1x16x16x128xf32>,
    return
  }
  func.func @transform_0(%arg0: i32) -> (i32, i32, i32, i32) {
    %c0_i32 = arith.constant 0 : i32
    %c0_i32_0 = arith.constant 0 : i32
    %c0_i32_1 = arith.constant 0 : i32
    %c0_i32_2 = arith.constant 0 : i32
    return %arg0, %c0_i32, %c0_i32_0, %c0_i32_1 : i32, i32, i32, i32
  }
  func.func @transform_1(%arg0: i32) -> (i32, i32, i32) {
    %c0_i32 = arith.constant 0 : i32
    %c0_i32_0 = arith.constant 0 : i32
    %c0_i32_1 = arith.constant 0 : i32
    %c0_i32_2 = arith.constant 0 : i32
    return %c0_i32, %c0_i32_0, %c0_i32_1 : i32, i32, i32
  }
  func.func @transform_2(%arg0: i32) -> (i32, i32) {
    %c0_i32 = arith.constant 0 : i32
    %c0_i32_0 = arith.constant 0 : i32
    %c0_i32_1 = arith.constant 0 : i32
    return %c0_i32, %c0_i32_0 : i32, i32
  }
  func.func @transform_3(%arg0: i32) -> (i32, i32, i32) {
    %c0_i32 = arith.constant 0 : i32
    %c0_i32_0 = arith.constant 0 : i32
    %c0_i32_1 = arith.constant 0 : i32
    %c0_i32_2 = arith.constant 0 : i32
    return %c0_i32, %c0_i32_0, %c0_i32_1 : i32, i32, i32
  }
  func.func @transform_4(%arg0: i32) -> (i32, i32) {
    %c0_i32 = arith.constant 0 : i32
    %c0_i32_0 = arith.constant 0 : i32
    %c0_i32_1 = arith.constant 0 : i32
    return %c0_i32, %c0_i32_0 : i32, i32
  }
  func.func @transform_5(%arg0: i32) -> (i32, i32, i32) {
    %c0_i32 = arith.constant 0 : i32
    %c0_i32_0 = arith.constant 0 : i32
    %c0_i32_1 = arith.constant 0 : i32
    %c0_i32_2 = arith.constant 0 : i32
    return %c0_i32, %c0_i32_0, %c0_i32_1 : i32, i32, i32
  }
  func.func @transform_6(%arg0: i32) -> (i32, i32) {
    %c0_i32 = arith.constant 0 : i32
    %c0_i32_0 = arith.constant 0 : i32
    %c0_i32_1 = arith.constant 0 : i32
    return %c0_i32, %c0_i32_0 : i32, i32
  }
  func.func @transform_7(%arg0: i32) -> (i32, i32) {
    %c0_i32 = arith.constant 0 : i32
    %c0_i32_0 = arith.constant 0 : i32
    %c0_i32_1 = arith.constant 0 : i32
    return %c0_i32, %c0_i32_0 : i32, i32
  }
  func.func @transform_8(%arg0: i32) -> (i32, i32) {
    %c0_i32 = arith.constant 0 : i32
    %c0_i32_0 = arith.constant 0 : i32
    %c0_i32_1 = arith.constant 0 : i32
    return %c0_i32, %c0_i32_0 : i32, i32
  }
  func.func @transform_9(%arg0: i32) -> (i32, i32) {
    %c0_i32 = arith.constant 0 : i32
    %c0_i32_0 = arith.constant 0 : i32
    %c0_i32_1 = arith.constant 0 : i32
    return %c0_i32, %c0_i32_0 : i32, i32
  }
  func.func @transform_10(%arg0: i32) -> (i32, i32) {
    %c0_i32 = arith.constant 0 : i32
    %c0_i32_0 = arith.constant 0 : i32
    %c0_i32_1 = arith.constant 0 : i32
    return %c0_i32, %c0_i32_0 : i32, i32
  }
  func.func @transform_11(%arg0: i32) -> (i32, i32) {
    %c0_i32 = arith.constant 0 : i32
    %c0_i32_0 = arith.constant 0 : i32
    %c0_i32_1 = arith.constant 0 : i32
    return %c0_i32, %c0_i32_0 : i32, i32
  }
  func.func @transform_12(%arg0: i32) -> (i32, i32) {
    %c0_i32 = arith.constant 0 : i32
    %c0_i32_0 = arith.constant 0 : i32
    %c0_i32_1 = arith.constant 0 : i32
    return %c0_i32, %c0_i32_0 : i32, i32
  }
  func.func @transform_13(%arg0: i32) -> (i32, i32) {
    %c0_i32 = arith.constant 0 : i32
    %c0_i32_0 = arith.constant 0 : i32
    %c0_i32_1 = arith.constant 0 : i32
    return %c0_i32, %c0_i32_0 : i32, i32
  }
  func.func @transform_14(%arg0: i32) -> (i32, i32) {
    %c0_i32 = arith.constant 0 : i32
    %c0_i32_0 = arith.constant 0 : i32
    %c0_i32_1 = arith.constant 0 : i32
    return %c0_i32, %c0_i32_0 : i32, i32
  }
  func.func @transform_15(%arg0: i32) -> (i32, i32, i32, i32) {
    %c0_i32 = arith.constant 0 : i32
    %c0_i32_0 = arith.constant 0 : i32
    %c0_i32_1 = arith.constant 0 : i32
    %c0_i32_2 = arith.constant 0 : i32
    return %arg0, %c0_i32, %c0_i32_0, %c0_i32_1 : i32, i32, i32, i32
  }
  func.func @transform_16(%arg0: i32) -> (i32, i32, i32, i32) {
    %c0_i32 = arith.constant 0 : i32
    %c0_i32_0 = arith.constant 0 : i32
    %c0_i32_1 = arith.constant 0 : i32
    %c0_i32_2 = arith.constant 0 : i32
    return %arg0, %c0_i32, %c0_i32_0, %c0_i32_1 : i32, i32, i32, i32
  }
}

</mosaic_0001>

<bundles_post_ra>
// kernel: initial_stage_forward.1
= control target key start
LH: loop header
LB: loop body
LE: loop exit
PB: predicated region body
PF: predicated region fallthrough
CT: control target
= control target key end

     0   :  { %s23499_s0 = inlined_call_operand.vmem [shape: f32[2,16,16,32], index: 0, kind: input, shape index: {}]   ;;  %s23500_s1 = inlined_call_operand.hbm [shape: f32[9,32,128], index: 1, kind: input, shape index: {}]   ;;  %s23501_s2 = inlined_call_operand.vmem [shape: f32[1,128], index: 2, kind: input, shape index: {}]   ;;  %s23502_s3 = inlined_call_operand.vmem [shape: f32[9,128,128], index: 3, kind: input, shape index: {}]   ;;  %s23503_s4 = inlined_call_operand.vmem [shape: f32[1,128], index: 4, kind: input, shape index: {}]   ;;  %s23504_s5 = inlined_call_operand.vmem [shape: f32[9,128,128], index: 5, kind: input, shape index: {}]   ;;  %s23505_s6 = inlined_call_operand.vmem [shape: f32[1,128], index: 6, kind: input, shape index: {}]   ;;  %s23506_s7 = inlined_call_operand.vmem [shape: f32[128,512], index: 7, kind: input, shape index: {}]   ;;  %s23507_s8 = inlined_call_operand.hbm [shape: f32[1,512], index: 8, kind: input, shape index: {}]   ;;  %s23508_s9 = inlined_call_operand.vmem [shape: f32[512,128], index: 9, kind: input, shape index: {}]   ;;  %s23509_s10 = inlined_call_operand.vmem [shape: f32[1,128], index: 10, kind: input, shape index: {}]   ;;  %s23510_s11 = inlined_call_operand.hbm [shape: f32[128,512], index: 11, kind: input, shape index: {}]   ;;  %s23511_s12 = inlined_call_operand.hbm [shape: f32[1,512], index: 12, kind: input, shape index: {}]   ;;  %s23512_s13 = inlined_call_operand.vmem [shape: f32[512,128], index: 13, kind: input, shape index: {}]   ;;  %s23513_s14 = inlined_call_operand.vmem [shape: f32[1,128], index: 14, kind: input, shape index: {}]   ;;  %s23514_s15 = inlined_call_operand.vmem [shape: f32[2,16,16,128], index: 15, kind: output, shape index: {0}]   ;;  %s23515_s16 = inlined_call_operand.vmem [shape: f32[2,16,16,128], index: 16, kind: output, shape index: {1}]  }
   0x1   :  { %23688 = sst [smem:[#allocation56_spill]] %s23499_s0 }
   0x2   :  { %23689 = sst [smem:[#allocation57_spill]] %s23500_s1 }
   0x3   :  { %23690 = sst [smem:[#allocation58_spill]] %s23507_s8 }
   0x4   :  { %23691 = sst [smem:[#allocation59_spill]] %s23515_s16 }
   0x5   :  { %22 = vsyncpa [#allocation5], 0 }
   0x6   :  { %23 = vsyncpa [#allocation7], 0 }
   0x7   :  { %24 = vsyncpa [#allocation10], 0  ;;  %s18486_s21 = smov 0  }
   0x8 LB: > { %23692 = sst [smem:[#allocation14_spill]] %s18389_s21  ;;  %s18391_s22 = smov [#allocation6]   ;;  %s18389_s21 = sphi %s18486_s21, %s30_s21  }
   0x9   : > { %s451_s23 = sshll.u32 %s18391_s22, 4  ;;  %s18492_s24 = sadd.s32 4294967295, %s18389_s21   ;;  %s452_s23 = int_to_ptr.vmem [resolvable:$true] %s451_s23 }
   0xa   : > { %p12561_p0 = scmp.ge.s32.totalorder %s18389_s21, 1  ;;  %p407_p1 = scmp.lt.s32.totalorder %s18389_s21, 3 }
   0xb   : > { %p23516_p2 = scmp.eq.s32.totalorder %s18492_s24, 0  ;;  %s18392_s26 = smov [#allocation4]  }
   0xc   : > { %p18497_p3 = pnand %p12561_p0, %p407_p1  ;;  %s419_s27 = sshll.u32 %s18392_s26, 4  ;;  %s18503_s27 = int_to_ptr.vmem [resolvable:$true] %s419_s27 }
   0xd   : > { %s18393_s29 = smov [#allocation8]   ;;  %s23695_s8 = sld [smem:[#allocation58_spill]] }
   0xe   : > { %s23693_s25 = scalar_select %p18497_p3, 1, 0 }
   0xf   : > { %p18213_p4 = pneg %p18497_p3  ;;  %s467_s30 = sshll.u32 %s18393_s29, 4  ;;  %s18511_s30 = int_to_ptr.vmem [resolvable:$true] %s467_s30 }
  0x11   : > { %p18507_p5 = pnand %p23516_p2, %p18213_p4 }
  0x13   : > { %s18259_s18 = scalar_lea.hbm %s23695_s8, 64  ;;  %p18521_p7 = pneg %p18507_p5 }
  0x14   : > { %p18260_p6 = scmp.ne.s32.totalorder %s23695_s8, %s18259_s18  ;;  %p18266_p10 = scmp.lt.u32.totalorder %s18259_s18, %s23695_s8 }
  0x16   : > { %p18262_p8 = pnand %p18521_p7, %p18260_p6 }
  0x18   : > { %p18263_p9 = pneg %p18262_p8 }
  0x1a   : > { %p18268_p11 = pnand %p18266_p10, %p18263_p9 }
  0x1c   : > { %18271 = shalt.err (!%p18268_p11)
}
  0x1d   : > { %s18272_s0 = scalar_lea.vmem %s452_s23, 64  ;;  %p18280_p1 = scmp.lt.s32.totalorder %s452_s23, %s452_s23 }
  0x1e   : > { %p18273_p12 = scmp.ne.s32.totalorder %s452_s23, %s18272_s0  ;;  %p18281_p4 = scmp.lt.s32.totalorder %s18272_s0, %s18272_s0 }
  0x20   : > { %p18275_p13 = pnand %p18273_p12, %p18521_p7  ;;  %p18282_p2 = por %p18281_p4, %p18280_p1 }
  0x22   : > { %p18276_p0 = pneg %p18275_p13 }
  0x24   : > { %p18283_p3 = pnand %p18282_p2, %p18276_p0 }
  0x26   : > { %18286 = shalt.err (!%p18283_p3)
}
  0x27   : > { %18219 = dma.hbm_to_vmem [thread:$0]  (!%p18507_p5), %s23695_s8, 64, %s452_s23, [#allocation7]  }
  0x28   : > { %s23697_s1 = sld [smem:[#allocation57_spill]] }
  0x2e   : > { %s18287_s26 = scalar_lea.hbm %s23697_s1, 4608 }
  0x2f   : > { %p18288_p6 = scmp.ne.s32.totalorder %s23697_s1, %s18287_s26  ;;  %p18294_p2 = scmp.lt.u32.totalorder %s18287_s26, %s23697_s1 }
  0x31   : > { %p18290_p8 = pnand %p18288_p6, %p18521_p7 }
  0x33   : > { %p18291_p9 = pneg %p18290_p8 }
  0x35   : > { %p18296_p3 = pnand %p18294_p2, %p18291_p9 }
  0x37   : > { %18299 = shalt.err (!%p18296_p3)
}
  0x38   : > { %s18300_s23 = scalar_lea.vmem %s18503_s27, 4608  ;;  %p18308_p13 = scmp.lt.s32.totalorder %s18503_s27, %s18503_s27 }
  0x39   : > { %p18301_p10 = scmp.ne.s32.totalorder %s18503_s27, %s18300_s23  ;;  %p18309_p0 = scmp.lt.s32.totalorder %s18300_s23, %s18300_s23 }
  0x3b   : > { %p18303_p11 = pnand %p18301_p10, %p18521_p7  ;;  %p18310_p1 = por %p18309_p0, %p18308_p13 }
  0x3d   : > { %p18304_p12 = pneg %p18303_p11 }
  0x3f   : > { %p18311_p4 = pnand %p18310_p1, %p18304_p12 }
  0x41   : > { %18314 = shalt.err (!%p18311_p4)
}
  0x42   : > { %s18394_s21 = smov 128   ;;  %s18395_s16 = smov 8  }
  0x43   : > { %18216 = dma.hbm_to_vmem [thread:$0]  (!%p18507_p5), %s23697_s1, 4608, %s18503_s27, [#allocation5], %s18394_s21, %s18394_s21, %s18395_s16  }
  0x44   : > { %s18315_s26 = scalar_lea.hbm %s23510_s11, 8192 }
  0x45   : > { %p18316_p6 = scmp.ne.s32.totalorder %s23510_s11, %s18315_s26  ;;  %p18322_p2 = scmp.lt.u32.totalorder %s18315_s26, %s23510_s11 }
  0x47   : > { %p18318_p8 = pnand %p18316_p6, %p18521_p7 }
  0x49   : > { %p18319_p9 = pneg %p18318_p8 }
  0x4b   : > { %p18324_p3 = pnand %p18322_p2, %p18319_p9 }
  0x4d   : > { %18327 = shalt.err (!%p18324_p3)
}
  0x4e   : > { %s18328_s27 = scalar_lea.vmem %s18511_s30, 8192  ;;  %p18336_p13 = scmp.lt.s32.totalorder %s18511_s30, %s18511_s30 }
  0x4f   : > { %p18329_p10 = scmp.ne.s32.totalorder %s18511_s30, %s18328_s27  ;;  %p18337_p0 = scmp.lt.s32.totalorder %s18328_s27, %s18328_s27 }
  0x51   : > { %p18331_p11 = pnand %p18329_p10, %p18521_p7  ;;  %p18338_p1 = por %p18337_p0, %p18336_p13 }
  0x53   : > { %p18332_p12 = pneg %p18331_p11 }
  0x55   : > { %p18339_p4 = pnand %p18338_p1, %p18332_p12 }
  0x57   : > { %18342 = shalt.err (!%p18339_p4)
}
  0x58   : > { %s18396_s21 = smov 512   ;;  %s18397_s8 = smov 32  }
  0x59   : > { %18222 = dma.hbm_to_vmem [thread:$0]  (!%p18507_p5), %s23510_s11, 8192, %s18511_s30, [#allocation7], %s18396_s21, %s18396_s21, %s18397_s8  }
  0x5a   : > { %s18398_s19 = smov [#allocation9]   ;;  %s18343_s29 = scalar_lea.hbm %s23511_s12, 64 }
  0x5b   : > { %s481_s18 = sshll.u32 %s18398_s19, 4  ;;  %p18344_p6 = scmp.ne.s32.totalorder %s23511_s12, %s18343_s29  ;;  %s482_s18 = int_to_ptr.vmem [resolvable:$true] %s481_s18 }
  0x5c   : > { %p18350_p2 = scmp.lt.u32.totalorder %s18343_s29, %s23511_s12 }
  0x5d   : > { %p18346_p8 = pnand %p18344_p6, %p18521_p7 }
  0x5f   : > { %p18347_p9 = pneg %p18346_p8 }
  0x61   : > { %p18352_p3 = pnand %p18350_p2, %p18347_p9 }
  0x63   : > { %18355 = shalt.err (!%p18352_p3)
}
  0x64   : > { %s18356_s30 = scalar_lea.vmem %s482_s18, 64  ;;  %p18364_p13 = scmp.lt.s32.totalorder %s482_s18, %s482_s18 }
  0x65   : > { %p18357_p10 = scmp.ne.s32.totalorder %s482_s18, %s18356_s30  ;;  %p18365_p0 = scmp.lt.s32.totalorder %s18356_s30, %s18356_s30 }
  0x67   : > { %p18359_p11 = pnand %p18357_p10, %p18521_p7  ;;  %p18366_p1 = por %p18365_p0, %p18364_p13 }
  0x69   : > { %p18360_p12 = pneg %p18359_p11 }
  0x6b   : > { %p18367_p4 = pnand %p18366_p1, %p18360_p12 }
  0x6d   : > { %18370 = shalt.err (!%p18367_p4)
}
  0x6e   : > { %18225 = dma.hbm_to_vmem [thread:$0]  (!%p18507_p5), %s23511_s12, 64, %s482_s18, [#allocation10]  }
  0x6f   : > { %p23698_p6 = scmp.ne.s32.totalorder %s23693_s25, 0 }
  0x71   : > { %508 = sbr.rel (%p23698_p6) target bundleno = 3460 (0xd84), region = 80 }
  0x78   : > { %p23699_p8 = scmp.eq.s32.totalorder %s18492_s24, 0 }
  0x7a   : > { %18376 = dma.done.wait (%p23699_p8), [#allocation5], 4608   ;;  %p23700_p7 = pmov %p23699_p8 }
  0x7c   : > { %18378 = vsyncadd (%p23700_p7), [#allocation5], 4294962688  ;;  %p23701_p9 = pmov %p23700_p7 }
  0x7d   : > { %p23702_p2 = pmov %p23700_p7 }
  0x7e   : > { %18380 = dma.done.wait (%p23701_p9), [#allocation7], 8256  }
  0x7f   : > { %18382 = vsyncadd (%p23702_p2), [#allocation7], 4294959040  ;;  %p23703_p3 = pmov %p23702_p2 }
  0x80   : > { %p23704_p5 = pmov %p23702_p2 }
  0x81   : > { %18384 = dma.done.wait (%p23703_p3), [#allocation10], 64  }
  0x82   : > { %18386 = vsyncadd (%p23704_p5), [#allocation10], 4294967232  ;;  %vm590_vm0 = vcmask 261120   ;;  %vm593_vm1 = vcmask 254976   ;;  %p575_p10 = scmp.lt.s32.totalorder %s18492_s24, 1  ;;  %v18399_v0 = vmov 0.0  }
  0x83   : > { %591 = vst.msk [vmem:[#allocation2] sm:$0xff] %vm590_vm0, %v18399_v0  ;;  %592 = vst.msk [vmem:[#allocation2 + $0x8] sm:$0xff] %vm590_vm0, %v18399_v0  ;;  %s23705_s22 = sld [smem:[#allocation56_spill]]  ;;  %v780_v1 = vld [vmem:[#allocation4 + $0x20] sm:$0xff]  ;;  %v781_v2 = vld [vmem:[#allocation4 + $0x28] sm:$0xff]  ;;  %s24003_s29 = sld [smem:[#allocation59_spill]] }
  0x84   : > { %595 = vst.msk [vmem:[#allocation2 + $0x18] sm:$0xff] %vm590_vm0, %v18399_v0  ;;  %596 = vst.msk [vmem:[#allocation2 + $0x20] sm:$0xff] %vm590_vm0, %v18399_v0  ;;  %s24007_s24 = smov (!%p575_p10, %s18492_s24), 1  ;;  %v782_v3 = vld [vmem:[#allocation4 + $0x30] sm:$0xff]  ;;  %v16264_v4 = vpack.c.bf16 %v781_v2, %v780_v1  ;;  %v783_v5 = vld [vmem:[#allocation4 + $0x38] sm:$0xff] }
  0x85   : > { %598 = vst.msk [vmem:[#allocation2 + $0x30] sm:$0xff] %vm590_vm0, %v18399_v0  ;;  %599 = vst.msk [vmem:[#allocation2 + $0x38] sm:$0xff] %vm590_vm0, %v18399_v0  ;;  %s18781_s1 = sshll.u32 %s24007_s24, 8  ;;  %v16268_v7 = vpack.c.bf16 %v783_v5, %v782_v3  ;;  %v743_v8 = vld [vmem:[#allocation4] sm:$0xff]  ;;  %v744_v9 = vld [vmem:[#allocation4 + $0x8] sm:$0xff] }
  0x86   : > { %601 = vst.msk [vmem:[#allocation2 + $0x48] sm:$0xff] %vm590_vm0, %v18399_v0  ;;  %602 = vst.msk [vmem:[#allocation2 + $0x50] sm:$0xff] %vm590_vm0, %v18399_v0  ;;  %16265 = vmatprep.subr.bf16.mxu0 %v16264_v4  ;;  %v16272_v17 = vpack.c.bf16 %v744_v9, %v743_v8  ;;  %v745_v28 = vld [vmem:[#allocation4 + $0x10] sm:$0xff]  ;;  %v746_v29 = vld [vmem:[#allocation4 + $0x18] sm:$0xff]  ;;  %s23177_s28 = scalar_lea.vmem %s23514_s15, %s18781_s1 }
  0x87   : > { %604 = vst.msk [vmem:[#allocation2 + $0x60] sm:$0xff] %vm590_vm0, %v18399_v0  ;;  %605 = vst.msk [vmem:[#allocation2 + $0x68] sm:$0xff] %vm590_vm0, %v18399_v0  ;;  %16267 = vmatpush3.bf16.msra.mxu0 %v16264_v4  ;;  %v16276_v31 = vpack.c.bf16 %v746_v29, %v745_v28  ;;  %v1459_v52 = vld [vmem:[#allocation4 + $0x40] sm:$0xff]  ;;  %v1460_v53 = vld [vmem:[#allocation4 + $0x48] sm:$0xff] }
  0x88   : > { %607 = vst.msk [vmem:[#allocation2 + $0x78] sm:$0xff] %vm590_vm0, %v18399_v0  ;;  %608 = vst.msk [vmem:[#allocation2 + $0x80] sm:$0xff] %vm590_vm0, %v18399_v0  ;;  %16269 = vmatprep.subr.bf16.mxu0 %v16268_v7  ;;  %v16280_v54 = vpack.c.bf16 %v1460_v53, %v1459_v52 }
  0x89   : > { %610 = vst.msk [vmem:[#allocation2 + $0x90] sm:$0xff] %vm590_vm0, %v18399_v0  ;;  %611 = vst.msk [vmem:[#allocation2 + $0x98] sm:$0xff] %vm590_vm0, %v18399_v0  ;;  %s18787_s16 = scalar_lea.vmem %s23705_s22, %s18781_s1  ;;  %s23404_s0 = scalar_lea.vmem %s24003_s29, %s18781_s1 }
  0x8a   : > { %613 = vst.msk [vmem:[#allocation2 + $0xa8] sm:$0xff] %vm590_vm0, %v18399_v0  ;;  %614 = vst.msk [vmem:[#allocation2 + $0xb0] sm:$0xff] %vm590_vm0, %v18399_v0  ;;  %v747_v6 = vld [vmem:[#allocation2 + $0x1] sm:$0xff]  ;;  %v648_v12 = vld [vmem:[%s18787_s16 + $0x10] sm:$0xff] }
  0x8b   : > { %616 = vst.msk [vmem:[#allocation2 + $0xc0] sm:$0xff] %vm590_vm0, %v18399_v0  ;;  %617 = vst.msk [vmem:[#allocation2 + $0xc8] sm:$0xff] %vm590_vm0, %v18399_v0  ;;  %14328 = vmatprep.mubr.msk.f32.mxu0 %vm590_vm0, %v747_v6  ;;  %v646_v10 = vld [vmem:[%s18787_s16] sm:$0xff]  ;;  %v647_v11 = vld [vmem:[%s18787_s16 + $0x8] sm:$0xff]  ;;  %16271 = vmatpush3.bf16.msra.mxu0 %v16268_v7 }
  0x8c   : > { %619 = vst.msk [vmem:[#allocation2 + $0xd8] sm:$0xff] %vm590_vm0, %v18399_v0  ;;  %620 = vst.msk [vmem:[#allocation2 + $0xe0] sm:$0xff] %vm590_vm0, %v18399_v0  ;;  %v649_v13 = vld [vmem:[%s18787_s16 + $0x18] sm:$0xff]  ;;  %v650_v14 = vld [vmem:[%s18787_s16 + $0x20] sm:$0xff]  ;;  %16273 = vmatprep.subr.bf16.mxu0 %v16272_v17 }
  0x8d   : > { %622 = vst.msk [vmem:[#allocation2 + $0xf0] sm:$0xff] %vm590_vm0, %v18399_v0  ;;  %623 = vst.msk [vmem:[#allocation2 + $0xf8] sm:$0xff] %vm590_vm0, %v18399_v0  ;;  %v651_v15 = vld [vmem:[%s18787_s16 + $0x28] sm:$0xff]  ;;  %v652_v16 = vld [vmem:[%s18787_s16 + $0x30] sm:$0xff] }
  0x8e   : > { %625 = vst.msk [vmem:[#allocation2 + $0x108] sm:$0xff] %vm590_vm0, %v18399_v0  ;;  %626 = vst.msk [vmem:[#allocation2 + $0x110] sm:$0xff] %vm590_vm0, %v18399_v0  ;;  %v653_v18 = vld [vmem:[%s18787_s16 + $0x38] sm:$0xff]  ;;  %v654_v19 = vld [vmem:[%s18787_s16 + $0x40] sm:$0xff] }
  0x8f   : > { %628 = vst.msk [vmem:[#allocation2 + $0x120] sm:$0xff] %vm590_vm0, %v18399_v0  ;;  %629 = vst.msk [vmem:[#allocation2 + $0x128] sm:$0xff] %vm590_vm0, %v18399_v0  ;;  %v655_v20 = vld [vmem:[%s18787_s16 + $0x48] sm:$0xff]  ;;  %v656_v22 = vld [vmem:[%s18787_s16 + $0x50] sm:$0xff] }
  0x90   : > { %631 = vst.msk [vmem:[#allocation2 + $0x138] sm:$0xff] %vm590_vm0, %v18399_v0  ;;  %632 = vst.msk [vmem:[#allocation2 + $0x140] sm:$0xff] %vm590_vm0, %v18399_v0  ;;  %v657_v23 = vld [vmem:[%s18787_s16 + $0x58] sm:$0xff]  ;;  %v658_v24 = vld [vmem:[%s18787_s16 + $0x60] sm:$0xff] }
  0x91   : > { %634 = vst.msk [vmem:[#allocation2 + $0x150] sm:$0xff] %vm590_vm0, %v18399_v0  ;;  %635 = vst.msk [vmem:[#allocation2 + $0x158] sm:$0xff] %vm590_vm0, %v18399_v0  ;;  %v659_v25 = vld [vmem:[%s18787_s16 + $0x68] sm:$0xff]  ;;  %v660_v26 = vld [vmem:[%s18787_s16 + $0x70] sm:$0xff] }
  0x92   : > { %637 = vst.msk [vmem:[#allocation2 + $0x168] sm:$0xff] %vm590_vm0, %v18399_v0  ;;  %638 = vst.msk [vmem:[#allocation2 + $0x170] sm:$0xff] %vm590_vm0, %v18399_v0  ;;  %v661_v27 = vld [vmem:[%s18787_s16 + $0x78] sm:$0xff]  ;;  %v662_v30 = vld [vmem:[%s18787_s16 + $0x80] sm:$0xff] }
  0x93   : > { %640 = vst.msk [vmem:[#allocation2 + $0x180] sm:$0xff] %vm590_vm0, %v18399_v0  ;;  %641 = vst.msk [vmem:[#allocation2 + $0x188] sm:$0xff] %vm590_vm0, %v18399_v0  ;;  %v663_v32 = vld [vmem:[%s18787_s16 + $0x88] sm:$0xff]  ;;  %v664_v33 = vld [vmem:[%s18787_s16 + $0x90] sm:$0xff] }
  0x94   : > { %643 = vst.msk [vmem:[#allocation2 + $0x198] sm:$0xff] %vm590_vm0, %v18399_v0  ;;  %644 = vst.msk [vmem:[#allocation2 + $0x1a0] sm:$0xff] %vm590_vm0, %v18399_v0  ;;  %v665_v34 = vld [vmem:[%s18787_s16 + $0x98] sm:$0xff]  ;;  %v666_v36 = vld [vmem:[%s18787_s16 + $0xa0] sm:$0xff] }
  0x95   : > { %4228 = vst [vmem:[#allocation3] sm:$0xff] %v18399_v0  ;;  %4229 = vst [vmem:[#allocation3 + $0x8] sm:$0xff] %v18399_v0  ;;  %v667_v37 = vld [vmem:[%s18787_s16 + $0xa8] sm:$0xff]  ;;  %v668_v41 = vld [vmem:[%s18787_s16 + $0xb0] sm:$0xff] }
  0x96   : > { %4230 = vst [vmem:[#allocation3 + $0x10] sm:$0x3] %v18399_v0  ;;  %4231 = vst [vmem:[#allocation3 + $0x18] sm:$0xff] %v18399_v0  ;;  %v669_v42 = vld [vmem:[%s18787_s16 + $0xb8] sm:$0xff]  ;;  %v670_v44 = vld [vmem:[%s18787_s16 + $0xc0] sm:$0xff] }
  0x97   : > { %4232 = vst [vmem:[#allocation3 + $0x20] sm:$0xff] %v18399_v0  ;;  %4233 = vst [vmem:[#allocation3 + $0x28] sm:$0x3] %v18399_v0  ;;  %v671_v45 = vld [vmem:[%s18787_s16 + $0xc8] sm:$0xff]  ;;  %v672_v46 = vld [vmem:[%s18787_s16 + $0xd0] sm:$0xff] }
  0x98   : > { %4234 = vst [vmem:[#allocation3 + $0x30] sm:$0xff] %v18399_v0  ;;  %4235 = vst [vmem:[#allocation3 + $0x38] sm:$0xff] %v18399_v0  ;;  %v673_v47 = vld [vmem:[%s18787_s16 + $0xd8] sm:$0xff]  ;;  %v674_v49 = vld [vmem:[%s18787_s16 + $0xe0] sm:$0xff] }
  0x99   : > { %4236 = vst [vmem:[#allocation3 + $0x40] sm:$0x3] %v18399_v0  ;;  %4237 = vst [vmem:[#allocation3 + $0x48] sm:$0xff] %v18399_v0  ;;  %v675_v50 = vld [vmem:[%s18787_s16 + $0xe8] sm:$0xff] }
  0x9a   : > { %4238 = vst [vmem:[#allocation3 + $0x50] sm:$0xff] %v18399_v0  ;;  %4239 = vst [vmem:[#allocation3 + $0x58] sm:$0x3] %v18399_v0 }
  0x9b   : > { %4240 = vst [vmem:[#allocation3 + $0x60] sm:$0xff] %v18399_v0  ;;  %4241 = vst [vmem:[#allocation3 + $0x68] sm:$0xff] %v18399_v0 }
  0x9c   : > { %4242 = vst [vmem:[#allocation3 + $0x70] sm:$0x3] %v18399_v0  ;;  %4243 = vst [vmem:[#allocation3 + $0x78] sm:$0xff] %v18399_v0 }
  0x9d   : > { %4244 = vst [vmem:[#allocation3 + $0x80] sm:$0xff] %v18399_v0  ;;  %4245 = vst [vmem:[#allocation3 + $0x88] sm:$0x3] %v18399_v0 }
  0x9e   : > { %4246 = vst [vmem:[#allocation3 + $0x90] sm:$0xff] %v18399_v0  ;;  %4247 = vst [vmem:[#allocation3 + $0x98] sm:$0xff] %v18399_v0 }
  0x9f   : > { %4248 = vst [vmem:[#allocation3 + $0xa0] sm:$0x3] %v18399_v0  ;;  %4249 = vst [vmem:[#allocation3 + $0xa8] sm:$0xff] %v18399_v0 }
  0xa0   : > { %4250 = vst [vmem:[#allocation3 + $0xb0] sm:$0xff] %v18399_v0  ;;  %4251 = vst [vmem:[#allocation3 + $0xb8] sm:$0x3] %v18399_v0 }
  0xa1   : > { %4252 = vst [vmem:[#allocation3 + $0xc0] sm:$0xff] %v18399_v0  ;;  %4253 = vst [vmem:[#allocation3 + $0xc8] sm:$0xff] %v18399_v0 }
  0xa2   : > { %4254 = vst [vmem:[#allocation3 + $0xd0] sm:$0x3] %v18399_v0  ;;  %4255 = vst [vmem:[#allocation3 + $0xd8] sm:$0xff] %v18399_v0 }
  0xa3   : > { %4256 = vst [vmem:[#allocation3 + $0xe0] sm:$0xff] %v18399_v0  ;;  %4257 = vst [vmem:[#allocation3 + $0xe8] sm:$0x3] %v18399_v0 }
  0xa4   : > { %4258 = vst [vmem:[#allocation3 + $0xf0] sm:$0xff] %v18399_v0  ;;  %4259 = vst [vmem:[#allocation3 + $0xf8] sm:$0xff] %v18399_v0 }
  0xa5   : > { %4260 = vst [vmem:[#allocation3 + $0x100] sm:$0x3] %v18399_v0  ;;  %4261 = vst [vmem:[#allocation3 + $0x108] sm:$0xff] %v18399_v0 }
  0xa6   : > { %4262 = vst [vmem:[#allocation3 + $0x110] sm:$0xff] %v18399_v0  ;;  %4263 = vst [vmem:[#allocation3 + $0x118] sm:$0x3] %v18399_v0 }
  0xa7   : > { %4264 = vst [vmem:[#allocation3 + $0x120] sm:$0xff] %v18399_v0  ;;  %4265 = vst [vmem:[#allocation3 + $0x128] sm:$0xff] %v18399_v0 }
  0xa8   : > { %4266 = vst [vmem:[#allocation3 + $0x130] sm:$0x3] %v18399_v0  ;;  %4267 = vst [vmem:[#allocation3 + $0x138] sm:$0xff] %v18399_v0 }
  0xa9   : > { %4268 = vst [vmem:[#allocation3 + $0x140] sm:$0xff] %v18399_v0  ;;  %4269 = vst [vmem:[#allocation3 + $0x148] sm:$0x3] %v18399_v0 }
  0xaa   : > { %4270 = vst [vmem:[#allocation3 + $0x150] sm:$0xff] %v18399_v0  ;;  %4271 = vst [vmem:[#allocation3 + $0x158] sm:$0xff] %v18399_v0 }
  0xab   : > { %4272 = vst [vmem:[#allocation3 + $0x160] sm:$0x3] %v18399_v0  ;;  %4273 = vst [vmem:[#allocation3 + $0x168] sm:$0xff] %v18399_v0 }
  0xac   : > { %4274 = vst [vmem:[#allocation3 + $0x170] sm:$0xff] %v18399_v0  ;;  %4275 = vst [vmem:[#allocation3 + $0x178] sm:$0x3] %v18399_v0 }
  0xad   : > { %4276 = vst [vmem:[#allocation3 + $0x180] sm:$0xff] %v18399_v0  ;;  %4277 = vst [vmem:[#allocation3 + $0x188] sm:$0xff] %v18399_v0 }
  0xae   : > { %4278 = vst [vmem:[#allocation3 + $0x190] sm:$0x3] %v18399_v0  ;;  %4279 = vst [vmem:[#allocation3 + $0x198] sm:$0xff] %v18399_v0 }
  0xaf   : > { %4280 = vst [vmem:[#allocation3 + $0x1a0] sm:$0xff] %v18399_v0  ;;  %4281 = vst [vmem:[#allocation3 + $0x1a8] sm:$0x3] %v18399_v0 }
  0xb0   : > { %594 = vst.msk [vmem:[#allocation2 + $0x10] sm:$0x3] %vm593_vm1, %v18399_v0  ;;  %597 = vst.msk [vmem:[#allocation2 + $0x28] sm:$0x3] %vm593_vm1, %v18399_v0 }
  0xb1   : > { %600 = vst.msk [vmem:[#allocation2 + $0x40] sm:$0x3] %vm593_vm1, %v18399_v0  ;;  %603 = vst.msk [vmem:[#allocation2 + $0x58] sm:$0x3] %vm593_vm1, %v18399_v0 }
  0xb2   : > { %606 = vst.msk [vmem:[#allocation2 + $0x70] sm:$0x3] %vm593_vm1, %v18399_v0  ;;  %609 = vst.msk [vmem:[#allocation2 + $0x88] sm:$0x3] %vm593_vm1, %v18399_v0 }
  0xb3   : > { %612 = vst.msk [vmem:[#allocation2 + $0xa0] sm:$0x3] %vm593_vm1, %v18399_v0  ;;  %615 = vst.msk [vmem:[#allocation2 + $0xb8] sm:$0x3] %vm593_vm1, %v18399_v0 }
  0xb4   : > { %618 = vst.msk [vmem:[#allocation2 + $0xd0] sm:$0x3] %vm593_vm1, %v18399_v0  ;;  %621 = vst.msk [vmem:[#allocation2 + $0xe8] sm:$0x3] %vm593_vm1, %v18399_v0 }
  0xb5   : > { %624 = vst.msk [vmem:[#allocation2 + $0x100] sm:$0x3] %vm593_vm1, %v18399_v0  ;;  %627 = vst.msk [vmem:[#allocation2 + $0x118] sm:$0x3] %vm593_vm1, %v18399_v0 }
  0xb6   : > { %630 = vst.msk [vmem:[#allocation2 + $0x130] sm:$0x3] %vm593_vm1, %v18399_v0  ;;  %633 = vst.msk [vmem:[#allocation2 + $0x148] sm:$0x3] %vm593_vm1, %v18399_v0 }
  0xb7   : > { %636 = vst.msk [vmem:[#allocation2 + $0x160] sm:$0x3] %vm593_vm1, %v18399_v0  ;;  %639 = vst.msk [vmem:[#allocation2 + $0x178] sm:$0x3] %vm593_vm1, %v18399_v0  ;;  %v748_v21 = vld [vmem:[#allocation2 + $0x9] sm:$0xff] }
  0xb8   : > { %642 = vst.msk [vmem:[#allocation2 + $0x190] sm:$0x3] %vm593_vm1, %v18399_v0  ;;  %645 = vst.msk [vmem:[#allocation2 + $0x1a8] sm:$0x3] %vm593_vm1, %v18399_v0  ;;  %14329 = vmatmul.mubr.msk.f32.vlgmr.msra.gmra.mrb[0].mxu0 %vm590_vm0, %v748_v21  ;;  %v1850_v21 = vld [vmem:[#allocation4 + $0x68] sm:$0xff] }
  0xb9   : > { %679 = vst.msk [vmem:[#allocation2 + $0x19] sm:$0xff] %vm590_vm0, %v646_v10  ;;  %680 = vst.msk [vmem:[#allocation2 + $0x21] sm:$0xff] %vm590_vm0, %v647_v11  ;;  %16275 = vmatpush3.bf16.msra.mxu0 %v16272_v17  ;;  %v712_v17 = vld [vmem:[#allocation2 + $0x8] sm:$0xff] }
  0xba   : > { %681 = vst.msk [vmem:[#allocation2 + $0x31] sm:$0xff] %vm590_vm0, %v648_v12  ;;  %682 = vst.msk [vmem:[#allocation2 + $0x39] sm:$0xff] %vm590_vm0, %v649_v13  ;;  %16277 = vmatprep.subr.bf16.mxu0 %v16276_v31 }
  0xbb   : > { %683 = vst.msk [vmem:[#allocation2 + $0x49] sm:$0xff] %vm590_vm0, %v650_v14  ;;  %684 = vst.msk [vmem:[#allocation2 + $0x51] sm:$0xff] %vm590_vm0, %v651_v15  ;;  %v711_v14 = vld [vmem:[#allocation2] sm:$0xff]  ;;  %v1461_v15 = vld [vmem:[#allocation4 + $0x50] sm:$0xff] }
  0xbc   : > { %685 = vst.msk [vmem:[#allocation2 + $0x61] sm:$0xff] %vm590_vm0, %v652_v16  ;;  %686 = vst.msk [vmem:[#allocation2 + $0x69] sm:$0xff] %vm590_vm0, %v653_v18  ;;  %v1462_v16 = vld [vmem:[#allocation4 + $0x58] sm:$0xff] }
  0xbd   : > { %687 = vst.msk [vmem:[#allocation2 + $0x79] sm:$0xff] %vm590_vm0, %v654_v19  ;;  %688 = vst.msk [vmem:[#allocation2 + $0x81] sm:$0xff] %vm590_vm0, %v655_v20  ;;  %16279 = vmatpush3.bf16.msra.mxu0 %v16276_v31  ;;  %v16284_v19 = vpack.c.bf16 %v1462_v16, %v1461_v15  ;;  %v1849_v20 = vld [vmem:[#allocation4 + $0x60] sm:$0xff]  ;;  %v676_v15 = vld [vmem:[%s18787_s16 + $0xf0] sm:$0xff] }
  0xbe   : > { %689 = vst.msk [vmem:[#allocation2 + $0x91] sm:$0xff] %vm590_vm0, %v656_v22  ;;  %690 = vst.msk [vmem:[#allocation2 + $0x99] sm:$0xff] %vm590_vm0, %v657_v23  ;;  %16281 = vmatprep.subr.bf16.mxu0 %v16280_v54  ;;  %v677_v16 = vld [vmem:[%s18787_s16 + $0xf8] sm:$0xff] }
  0xbf   : > { %691 = vst.msk [vmem:[#allocation2 + $0xa9] sm:$0xff] %vm590_vm0, %v658_v24  ;;  %692 = vst.msk [vmem:[#allocation2 + $0xb1] sm:$0xff] %vm590_vm0, %v659_v25  ;;  %v18981_v24 = vpack.c.bf16 %v1850_v21, %v1849_v20  ;;  %v1426_v21 = vld [vmem:[#allocation2 + $0x2] sm:$0xff] }
  0xc0   : > { %693 = vst.msk [vmem:[#allocation2 + $0xc1] sm:$0xff] %vm590_vm0, %v660_v26  ;;  %694 = vst.msk [vmem:[#allocation2 + $0xc9] sm:$0xff] %vm590_vm0, %v661_v27  ;;  %v18827_v35 = vld [vmem:[#allocation2 + $0x19] sm:$0xff]  ;;  %v18839_v38 = vld [vmem:[#allocation2 + $0x21] sm:$0xff] }
  0xc1   : > { %695 = vst.msk [vmem:[#allocation2 + $0xd9] sm:$0xff] %vm590_vm0, %v662_v30  ;;  %696 = vst.msk [vmem:[#allocation2 + $0xe1] sm:$0xff] %vm590_vm0, %v663_v32  ;;  %14331 = vmatprep.mubr.msk.f32.mxu0 %vm590_vm0, %v18827_v35  ;;  %v18841_v39 = vld [vmem:[#allocation2 + $0x31] sm:$0xff]  ;;  %v18847_v40 = vld [vmem:[#allocation2 + $0x39] sm:$0xff] }
  0xc2   : > { %697 = vst.msk [vmem:[#allocation2 + $0xf1] sm:$0xff] %vm590_vm0, %v664_v33  ;;  %698 = vst.msk [vmem:[#allocation2 + $0xf9] sm:$0xff] %vm590_vm0, %v665_v34  ;;  %14332 = vmatmul.mubr.msk.f32.gmra.mrb[2].mxu0 %vm590_vm0, %v18839_v38  ;;  %v18851_v43 = vld [vmem:[#allocation2 + $0x49] sm:$0xff]  ;;  %v18864_v48 = vld [vmem:[#allocation2 + $0x51] sm:$0xff] }
  0xc3   : > { %699 = vst.msk [vmem:[#allocation2 + $0x109] sm:$0xff] %vm590_vm0, %v666_v36  ;;  %700 = vst.msk [vmem:[#allocation2 + $0x111] sm:$0xff] %vm590_vm0, %v667_v37  ;;  %14334 = vmatprep.mubr.msk.f32.mxu0 %vm590_vm0, %v18841_v39  ;;  %v18871_v51 = vld [vmem:[#allocation2 + $0x61] sm:$0xff]  ;;  %v18879_v55 = vld [vmem:[#allocation2 + $0x69] sm:$0xff] }
  0xc4   : > { %701 = vst.msk [vmem:[#allocation2 + $0x121] sm:$0xff] %vm590_vm0, %v668_v41  ;;  %702 = vst.msk [vmem:[#allocation2 + $0x129] sm:$0xff] %vm590_vm0, %v669_v42  ;;  %v18881_v56 = vld [vmem:[#allocation2 + $0x79] sm:$0xff]  ;;  %v18887_v57 = vld [vmem:[#allocation2 + $0x81] sm:$0xff] }
  0xc5   : > { %703 = vst.msk [vmem:[#allocation2 + $0x139] sm:$0xff] %vm590_vm0, %v670_v44  ;;  %704 = vst.msk [vmem:[#allocation2 + $0x141] sm:$0xff] %vm590_vm0, %v671_v45  ;;  %v18889_v58 = vld [vmem:[#allocation2 + $0x91] sm:$0xff]  ;;  %v18895_v59 = vld [vmem:[#allocation2 + $0x99] sm:$0xff] }
  0xc6   : > { %14335 = vmatmul.mubr.msk.f32.gmra.mrb[4].mxu0 %vm590_vm0, %v18847_v40  ;;  %705 = vst.msk [vmem:[#allocation2 + $0x151] sm:$0xff] %vm590_vm0, %v672_v46  ;;  %706 = vst.msk [vmem:[#allocation2 + $0x159] sm:$0xff] %vm590_vm0, %v673_v47  ;;  %v18897_v60 = vld [vmem:[#allocation2 + $0xa9] sm:$0xff]  ;;  %v18903_v61 = vld [vmem:[#allocation2 + $0xb1] sm:$0xff] }
  0xc7   : > { %14337 = vmatprep.mubr.msk.f32.mxu0 %vm590_vm0, %v18851_v43  ;;  %707 = vst.msk [vmem:[#allocation2 + $0x169] sm:$0xff] %vm590_vm0, %v674_v49  ;;  %708 = vst.msk [vmem:[#allocation2 + $0x171] sm:$0xff] %vm590_vm0, %v675_v50  ;;  %v18905_v62 = vld [vmem:[#allocation2 + $0xc1] sm:$0xff]  ;;  %v18911_v63 = vld [vmem:[#allocation2 + $0xc9] sm:$0xff] }
  0xc8   : > { %v18913_v0 = vld [vmem:[#allocation2 + $0xd9] sm:$0xff]  ;;  %v18919_v1 = vld [vmem:[#allocation2 + $0xe1] sm:$0xff]  ;;  %v18979_v23 = vld [vmem:[#allocation2 + $0x30] sm:$0xff]  ;;  %709 = vst.msk [vmem:[#allocation2 + $0x181] sm:$0xff] %vm590_vm0, %v676_v15 }
  0xc9   : > { %v18921_v2 = vld [vmem:[#allocation2 + $0xf1] sm:$0xff]  ;;  %v18927_v3 = vld [vmem:[#allocation2 + $0xf9] sm:$0xff]  ;;  %v18989_v26 = vld [vmem:[#allocation2 + $0x48] sm:$0xff]  ;;  %710 = vst.msk [vmem:[#allocation2 + $0x189] sm:$0xff] %vm590_vm0, %v677_v16 }
  0xca   : > { %14338 = vmatmul.mubr.msk.f32.gmra.mrb[6].mxu0 %vm590_vm0, %v18864_v48  ;;  %v18929_v4 = vld [vmem:[#allocation2 + $0x109] sm:$0xff]  ;;  %v18935_v5 = vld [vmem:[#allocation2 + $0x111] sm:$0xff]  ;;  %v18977_v22 = vld [vmem:[#allocation2 + $0x20] sm:$0xff] }
  0xcb   : > { %14340 = vmatprep.mubr.msk.f32.mxu0 %vm590_vm0, %v18871_v51  ;;  %v18937_v6 = vld [vmem:[#allocation2 + $0x121] sm:$0xff]  ;;  %v18943_v7 = vld [vmem:[#allocation2 + $0x129] sm:$0xff]  ;;  %v18972_v18 = vld [vmem:[#allocation2 + $0x18] sm:$0xff] }
  0xcc   : > { %23706 = vst [vmem:[#allocation15_spill] sm:$0xff] %v18937_v6  ;;  %23707 = vst [vmem:[#allocation16_spill] sm:$0xff] %v18943_v7  ;;  %v18945_v8 = vld [vmem:[#allocation2 + $0x139] sm:$0xff]  ;;  %v18951_v9 = vld [vmem:[#allocation2 + $0x141] sm:$0xff] }
  0xcd   : > { %23708 = vst [vmem:[#allocation17_spill] sm:$0xff] %v18945_v8  ;;  %23709 = vst [vmem:[#allocation18_spill] sm:$0xff] %v18951_v9  ;;  %v18953_v10 = vld [vmem:[#allocation2 + $0x151] sm:$0xff]  ;;  %v18959_v11 = vld [vmem:[#allocation2 + $0x159] sm:$0xff] }
  0xce   : > { %14341 = vmatmul.mubr.msk.f32.gmra.mrb[8].mxu0 %vm590_vm0, %v18879_v55  ;;  %23710 = vst [vmem:[#allocation19_spill] sm:$0xff] %v18953_v10  ;;  %23711 = vst [vmem:[#allocation20_spill] sm:$0xff] %v18959_v11  ;;  %v18961_v12 = vld [vmem:[#allocation2 + $0x169] sm:$0xff]  ;;  %v18967_v13 = vld [vmem:[#allocation2 + $0x171] sm:$0xff] }
  0xcf   : > { %14343 = vmatprep.mubr.msk.f32.mxu0 %vm590_vm0, %v18881_v56  ;;  %23712 = vst [vmem:[#allocation21_spill] sm:$0xff] %v18961_v12  ;;  %23713 = vst [vmem:[#allocation22_spill] sm:$0xff] %v18967_v13  ;;  %v18987_v25 = vld [vmem:[#allocation2 + $0x38] sm:$0xff]  ;;  %v18996_v27 = vld [vmem:[#allocation2 + $0x50] sm:$0xff] }
  0xd0   : > { %v18998_v28 = vld [vmem:[#allocation2 + $0x60] sm:$0xff]  ;;  %v19004_v29 = vld [vmem:[#allocation2 + $0x68] sm:$0xff]  ;;  %v19006_v30 = vld [vmem:[#allocation2 + $0x78] sm:$0xff] }
  0xd1   : > { %v19012_v31 = vld [vmem:[#allocation2 + $0x80] sm:$0xff]  ;;  %v19014_v32 = vld [vmem:[#allocation2 + $0x90] sm:$0xff]  ;;  %v19020_v33 = vld [vmem:[#allocation2 + $0x98] sm:$0xff] }
  0xd2   : > { %14344 = vmatmul.mubr.msk.f32.gmra.mrb[10].mxu0 %vm590_vm0, %v18887_v57  ;;  %v19022_v34 = vld [vmem:[#allocation2 + $0xa8] sm:$0xff]  ;;  %v19028_v36 = vld [vmem:[#allocation2 + $0xb0] sm:$0xff]  ;;  %v19030_v37 = vld [vmem:[#allocation2 + $0xc0] sm:$0xff] }
  0xd3   : > { %14346 = vmatprep.mubr.msk.f32.mxu0 %vm590_vm0, %v18889_v58  ;;  %v19036_v41 = vld [vmem:[#allocation2 + $0xc8] sm:$0xff]  ;;  %v19038_v42 = vld [vmem:[#allocation2 + $0xd8] sm:$0xff]  ;;  %v19044_v44 = vld [vmem:[#allocation2 + $0xe0] sm:$0xff] }
  0xd4   : > { %v19046_v45 = vld [vmem:[#allocation2 + $0xf0] sm:$0xff]  ;;  %v19052_v46 = vld [vmem:[#allocation2 + $0xf8] sm:$0xff]  ;;  %v19054_v47 = vld [vmem:[#allocation2 + $0x108] sm:$0xff] }
  0xd5   : > { %v19060_v49 = vld [vmem:[#allocation2 + $0x110] sm:$0xff]  ;;  %v19062_v50 = vld [vmem:[#allocation2 + $0x120] sm:$0xff]  ;;  %v19068_v52 = vld [vmem:[#allocation2 + $0x128] sm:$0xff] }
  0xd6   : > { %14347 = vmatmul.mubr.msk.f32.gmra.mrb[12].mxu0 %vm590_vm0, %v18895_v59  ;;  %v19070_v53 = vld [vmem:[#allocation2 + $0x138] sm:$0xff]  ;;  %v19096_v20 = vld [vmem:[#allocation2 + $0x170] sm:$0xff] }
  0xd7   : > { %14349 = vmatprep.mubr.msk.f32.mxu0 %vm590_vm0, %v18897_v60  ;;  %v1851_v15 = vld [vmem:[#allocation4 + $0x70] sm:$0xff] }
  0xd8   : > { %v1427_v16 = vld [vmem:[#allocation2 + $0xa] sm:$0xff] }
  0xda   : > { %14350 = vmatmul.mubr.msk.f32.gmra.mrb[14].mxu0 %vm590_vm0, %v18903_v61 }
  0xdb   : > { %14352 = vmatprep.mubr.msk.f32.mxu0 %vm590_vm0, %v18905_v62 }
  0xde   : > { %14353 = vmatmul.mubr.msk.f32.gmra.mrb[16].mxu0 %vm590_vm0, %v18911_v63 }
  0xdf   : > { %14355 = vmatprep.mubr.msk.f32.mxu0 %vm590_vm0, %v18913_v0 }
  0xe2   : > { %14356 = vmatmul.mubr.msk.f32.gmra.mrb[18].mxu0 %vm590_vm0, %v18919_v1 }
  0xe3   : > { %14358 = vmatprep.mubr.msk.f32.mxu0 %vm590_vm0, %v18921_v2 }
  0xe6   : > { %14359 = vmatmul.mubr.msk.f32.gmra.mrb[20].mxu0 %vm590_vm0, %v18927_v3 }
  0xe7   : > { %14361 = vmatprep.mubr.msk.f32.mxu0 %vm590_vm0, %v18929_v4 }
  0xea   : > { %14362 = vmatmul.mubr.msk.f32.gmra.mrb[22].mxu0 %vm590_vm0, %v18935_v5 }
  0xeb   : > { %14364 = vmatprep.mubr.msk.f32.mxu0 %vm590_vm0, %v18937_v6 }
  0xee   : > { %14365 = vmatmul.mubr.msk.f32.gmra.mrb[24].mxu0 %vm590_vm0, %v18943_v7  ;;  %v19109_v7 = vld [vmem:[#allocation2 + $0x32] sm:$0xff] }
  0xef   : > { %14367 = vmatprep.mubr.msk.f32.mxu0 %vm590_vm0, %v18945_v8  ;;  %v19107_v8 = vld [vmem:[#allocation2 + $0x22] sm:$0xff] }
  0xf2   : > { %14368 = vmatmul.mubr.msk.f32.gmra.mrb[26].mxu0 %vm590_vm0, %v18951_v9  ;;  %v2240_v9 = vld [vmem:[#allocation4 + $0x88] sm:$0xff] }
  0xf3   : > { %14370 = vmatprep.mubr.msk.f32.mxu0 %vm590_vm0, %v18953_v10  ;;  %v2239_v10 = vld [vmem:[#allocation4 + $0x80] sm:$0xff] }
  0xf4   : > { %v19111_v6 = vpack.c.bf16 %v2240_v9, %v2239_v10  ;;  %v19126_v9 = vld [vmem:[#allocation2 + $0x52] sm:$0xff]  ;;  %v19128_v10 = vld [vmem:[#allocation2 + $0x62] sm:$0xff] }
  0xf5   : > { %23716 = vst [vmem:[#allocation25_spill] sm:$0xff] %v19126_v9  ;;  %23717 = vst [vmem:[#allocation26_spill] sm:$0xff] %v19128_v10 }
  0xf6   : > { %14371 = vmatmul.mubr.msk.f32.gmra.mrb[28].mxu0 %vm590_vm0, %v18959_v11 }
  0xf7   : > { %14373 = vmatprep.mubr.msk.f32.mxu0 %vm590_vm0, %v18961_v12  ;;  %v19101_v12 = vld [vmem:[#allocation2 + $0x1a] sm:$0xff] }
  0xfa   : > { %14374 = vmatmul.mubr.msk.f32.gmra.mrb[30].mxu0 %vm590_vm0, %v18967_v13  ;;  %v1852_v13 = vld [vmem:[#allocation4 + $0x78] sm:$0xff] }
  0xfb   : > { %14384 = vmatprep.mubr.msk.f32.mxu0 %vm590_vm0, %v711_v14  ;;  %v19078_v14 = vld [vmem:[#allocation2 + $0x150] sm:$0xff]  ;;  %v16292_v11 = vpack.c.bf16 %v1852_v13, %v1851_v15  ;;  %v19117_v13 = vld [vmem:[#allocation2 + $0x3a] sm:$0xff]  ;;  %v19142_v15 = vld [vmem:[#allocation2 + $0x82] sm:$0xff] }
  0xfc   : > { %23714 = vst [vmem:[#allocation23_spill] sm:$0xff] %v19117_v13  ;;  %23720 = vst [vmem:[#allocation29_spill] sm:$0xff] %v19142_v15 }
  0xfe   : > { %14385 = vmatmul.mubr.msk.f32.vlgmr.msra.gmra.mrb[0].mxu0 %vm590_vm0, %v712_v17  ;;  %v19088_v17 = vld [vmem:[#allocation2 + $0x158] sm:$0xff] }
  0xff   : > { %16283 = vmatpush3.bf16.msra.mxu0 %v16280_v54  ;;  %14387 = vmatprep.mubr.msk.f32.mxu0 %vm590_vm0, %v18972_v18  ;;  %v19076_v54 = vld [vmem:[#allocation2 + $0x140] sm:$0xff] }
 0x100   : > { %16285 = vmatprep.subr.bf16.mxu0 %v16284_v19 }
 0x102   : > { %14388 = vmatmul.mubr.msk.f32.gmra.mrb[2].mxu0 %vm590_vm0, %v18977_v22 }
 0x103   : > { %14390 = vmatprep.mubr.msk.f32.mxu0 %vm590_vm0, %v18979_v23  ;;  %16287 = vmatpush3.bf16.msra.mxu0 %v16284_v19  ;;  %v19090_v19 = vld [vmem:[#allocation2 + $0x168] sm:$0xff] }
 0x104   : > { %16289 = vmatprep.subr.bf16.mxu0 %v18981_v24 }
 0x106   : > { %14391 = vmatmul.mubr.msk.f32.gmra.mrb[4].mxu0 %vm590_vm0, %v18987_v25 }
 0x107   : > { %14393 = vmatprep.mubr.msk.f32.mxu0 %vm590_vm0, %v18989_v26 }
 0x10a   : > { %14394 = vmatmul.mubr.msk.f32.gmra.mrb[6].mxu0 %vm590_vm0, %v18996_v27 }
 0x10b   : > { %14396 = vmatprep.mubr.msk.f32.mxu0 %vm590_vm0, %v18998_v28 }
 0x10e   : > { %14397 = vmatmul.mubr.msk.f32.gmra.mrb[8].mxu0 %vm590_vm0, %v19004_v29 }
 0x10f   : > { %14399 = vmatprep.mubr.msk.f32.mxu0 %vm590_vm0, %v19006_v30 }
 0x112   : > { %14400 = vmatmul.mubr.msk.f32.gmra.mrb[10].mxu0 %vm590_vm0, %v19012_v31 }
 0x113   : > { %14402 = vmatprep.mubr.msk.f32.mxu0 %vm590_vm0, %v19014_v32 }
 0x116   : > { %14403 = vmatmul.mubr.msk.f32.gmra.mrb[12].mxu0 %vm590_vm0, %v19020_v33 }
 0x117   : > { %14405 = vmatprep.mubr.msk.f32.mxu0 %vm590_vm0, %v19022_v34 }
 0x11a   : > { %14406 = vmatmul.mubr.msk.f32.gmra.mrb[14].mxu0 %vm590_vm0, %v19028_v36 }
 0x11b   : > { %14408 = vmatprep.mubr.msk.f32.mxu0 %vm590_vm0, %v19030_v37 }
 0x11e   : > { %14409 = vmatmul.mubr.msk.f32.gmra.mrb[16].mxu0 %vm590_vm0, %v19036_v41 }
 0x11f   : > { %14411 = vmatprep.mubr.msk.f32.mxu0 %vm590_vm0, %v19038_v42 }
 0x122   : > { %14412 = vmatmul.mubr.msk.f32.gmra.mrb[18].mxu0 %vm590_vm0, %v19044_v44 }
 0x123   : > { %14414 = vmatprep.mubr.msk.f32.mxu0 %vm590_vm0, %v19046_v45 }
 0x126   : > { %14415 = vmatmul.mubr.msk.f32.gmra.mrb[20].mxu0 %vm590_vm0, %v19052_v46 }
 0x127   : > { %14417 = vmatprep.mubr.msk.f32.mxu0 %vm590_vm0, %v19054_v47 }
 0x12a   : > { %14418 = vmatmul.mubr.msk.f32.gmra.mrb[22].mxu0 %vm590_vm0, %v19060_v49 }
 0x12b   : > { %14420 = vmatprep.mubr.msk.f32.mxu0 %vm590_vm0, %v19062_v50 }
 0x12e   : > { %14421 = vmatmul.mubr.msk.f32.gmra.mrb[24].mxu0 %vm590_vm0, %v19068_v52 }
 0x12f   : > { %14423 = vmatprep.mubr.msk.f32.mxu0 %vm590_vm0, %v19070_v53 }
 0x132   : > { %14424 = vmatmul.mubr.msk.f32.gmra.mrb[26].mxu0 %vm590_vm0, %v19076_v54 }
 0x133   : > { %14426 = vmatprep.mubr.msk.f32.mxu0 %vm590_vm0, %v19078_v14 }
 0x136   : > { %14427 = vmatmul.mubr.msk.f32.gmra.mrb[28].mxu0 %vm590_vm0, %v19088_v17 }
 0x137   : > { %14429 = vmatprep.mubr.msk.f32.mxu0 %vm590_vm0, %v19090_v19 }
 0x13a   : > { %14430 = vmatmul.mubr.msk.f32.gmra.mrb[30].mxu0 %vm590_vm0, %v19096_v20 }
 0x13b   : > { %14440 = vmatprep.mubr.msk.f32.mxu0 %vm590_vm0, %v1426_v21  ;;  %v19136_v21 = vld [vmem:[#allocation2 + $0x7a] sm:$0xff] }
 0x13c   : > { %23719 = vst [vmem:[#allocation28_spill] sm:$0xff] %v19136_v21 }
 0x13e   : > { %14441 = vmatmul.mubr.msk.f32.vlgmr.msra.gmra.mrb[0].mxu0 %vm590_vm0, %v1427_v16  ;;  %v19144_v16 = vld [vmem:[#allocation2 + $0x92] sm:$0xff] }
 0x13f   : > { %16291 = vmatpush3.bf16.msra.mxu0 %v18981_v24  ;;  %14443 = vmatprep.mubr.msk.f32.mxu0 %vm590_vm0, %v19101_v12  ;;  %v19119_v24 = vld [vmem:[#allocation2 + $0x4a] sm:$0xff]  ;;  %23721 = vst [vmem:[#allocation30_spill] sm:$0xff] %v19144_v16 }
 0x140   : > { %16293 = vmatprep.subr.bf16.mxu0 %v16292_v11  ;;  %23715 = vst [vmem:[#allocation24_spill] sm:$0xff] %v19119_v24 }
 0x142   : > { %14444 = vmatmul.mubr.msk.f32.gmra.mrb[2].mxu0 %vm590_vm0, %v19107_v8 }
 0x143   : > { %14446 = vmatprep.mubr.msk.f32.mxu0 %vm590_vm0, %v19109_v7  ;;  %16295 = vmatpush3.bf16.msra.mxu0 %v16292_v11  ;;  %v19134_v11 = vld [vmem:[#allocation2 + $0x6a] sm:$0xff] }
 0x144   : > { %16297 = vmatprep.subr.bf16.mxu0 %v19111_v6  ;;  %23718 = vst [vmem:[#allocation27_spill] sm:$0xff] %v19134_v11 }
 0x146   : > { %14447 = vmatmul.mubr.msk.f32.gmra.mrb[4].mxu0 %vm590_vm0, %v19117_v13  ;;  %v2630_v13 = vld [vmem:[#allocation4 + $0xa8] sm:$0xff] }
 0x147   : > { %14449 = vmatprep.mubr.msk.f32.mxu0 %vm590_vm0, %v19119_v24  ;;  %v2242_v24 = vld [vmem:[#allocation4 + $0x98] sm:$0xff] }
 0x14a   : > { %14450 = vmatmul.mubr.msk.f32.gmra.mrb[6].mxu0 %vm590_vm0, %v19126_v9  ;;  %v19152_v9 = vld [vmem:[#allocation2 + $0xaa] sm:$0xff] }
 0x14b   : > { %14452 = vmatprep.mubr.msk.f32.mxu0 %vm590_vm0, %v19128_v10  ;;  %v19150_v10 = vld [vmem:[#allocation2 + $0x9a] sm:$0xff]  ;;  %23723 = vst [vmem:[#allocation32_spill] sm:$0xff] %v19152_v9 }
 0x14c   : > { %23722 = vst [vmem:[#allocation31_spill] sm:$0xff] %v19150_v10 }
 0x14e   : > { %14453 = vmatmul.mubr.msk.f32.gmra.mrb[8].mxu0 %vm590_vm0, %v19134_v11  ;;  %v19160_v11 = vld [vmem:[#allocation2 + $0xc2] sm:$0xff] }
 0x14f   : > { %14455 = vmatprep.mubr.msk.f32.mxu0 %vm590_vm0, %v19136_v21  ;;  %v19158_v21 = vld [vmem:[#allocation2 + $0xb2] sm:$0xff]  ;;  %23725 = vst [vmem:[#allocation34_spill] sm:$0xff] %v19160_v11 }
 0x150   : > { %23724 = vst [vmem:[#allocation33_spill] sm:$0xff] %v19158_v21 }
 0x152   : > { %14456 = vmatmul.mubr.msk.f32.gmra.mrb[10].mxu0 %vm590_vm0, %v19142_v15  ;;  %v19168_v15 = vld [vmem:[#allocation2 + $0xda] sm:$0xff] }
 0x153   : > { %14458 = vmatprep.mubr.msk.f32.mxu0 %vm590_vm0, %v19144_v16  ;;  %v19166_v16 = vld [vmem:[#allocation2 + $0xca] sm:$0xff]  ;;  %23727 = vst [vmem:[#allocation36_spill] sm:$0xff] %v19168_v15 }
 0x154   : > { %23726 = vst [vmem:[#allocation35_spill] sm:$0xff] %v19166_v16 }
 0x156   : > { %14459 = vmatmul.mubr.msk.f32.gmra.mrb[12].mxu0 %vm590_vm0, %v19150_v10  ;;  %v19176_v10 = vld [vmem:[#allocation2 + $0xf2] sm:$0xff] }
 0x157   : > { %14461 = vmatprep.mubr.msk.f32.mxu0 %vm590_vm0, %v19152_v9  ;;  %v19174_v9 = vld [vmem:[#allocation2 + $0xe2] sm:$0xff]  ;;  %23729 = vst [vmem:[#allocation38_spill] sm:$0xff] %v19176_v10 }
 0x158   : > { %23728 = vst [vmem:[#allocation37_spill] sm:$0xff] %v19174_v9 }
 0x15a   : > { %14462 = vmatmul.mubr.msk.f32.gmra.mrb[14].mxu0 %vm590_vm0, %v19158_v21  ;;  %v19184_v21 = vld [vmem:[#allocation2 + $0x10a] sm:$0xff] }
 0x15b   : > { %14464 = vmatprep.mubr.msk.f32.mxu0 %vm590_vm0, %v19160_v11  ;;  %v19182_v11 = vld [vmem:[#allocation2 + $0xfa] sm:$0xff]  ;;  %23731 = vst [vmem:[#allocation40_spill] sm:$0xff] %v19184_v21 }
 0x15c   : > { %23730 = vst [vmem:[#allocation39_spill] sm:$0xff] %v19182_v11 }
 0x15e   : > { %14465 = vmatmul.mubr.msk.f32.gmra.mrb[16].mxu0 %vm590_vm0, %v19166_v16  ;;  %v19192_v16 = vld [vmem:[#allocation2 + $0x122] sm:$0xff] }
 0x15f   : > { %14467 = vmatprep.mubr.msk.f32.mxu0 %vm590_vm0, %v19168_v15  ;;  %v19190_v15 = vld [vmem:[#allocation2 + $0x112] sm:$0xff]  ;;  %23733 = vst [vmem:[#allocation42_spill] sm:$0xff] %v19192_v16 }
 0x160   : > { %23732 = vst [vmem:[#allocation41_spill] sm:$0xff] %v19190_v15 }
 0x162   : > { %14468 = vmatmul.mubr.msk.f32.gmra.mrb[18].mxu0 %vm590_vm0, %v19174_v9  ;;  %v19200_v9 = vld [vmem:[#allocation2 + $0x13a] sm:$0xff] }
 0x163   : > { %14470 = vmatprep.mubr.msk.f32.mxu0 %vm590_vm0, %v19176_v10  ;;  %v19198_v10 = vld [vmem:[#allocation2 + $0x12a] sm:$0xff]  ;;  %23735 = vst [vmem:[#allocation44_spill] sm:$0xff] %v19200_v9 }
 0x164   : > { %23734 = vst [vmem:[#allocation43_spill] sm:$0xff] %v19198_v10 }
 0x166   : > { %14471 = vmatmul.mubr.msk.f32.gmra.mrb[20].mxu0 %vm590_vm0, %v19182_v11  ;;  %v19208_v11 = vld [vmem:[#allocation2 + $0x152] sm:$0xff] }
 0x167   : > { %14473 = vmatprep.mubr.msk.f32.mxu0 %vm590_vm0, %v19184_v21  ;;  %v19206_v21 = vld [vmem:[#allocation2 + $0x142] sm:$0xff]  ;;  %23737 = vst [vmem:[#allocation46_spill] sm:$0xff] %v19208_v11 }
 0x168   : > { %23736 = vst [vmem:[#allocation45_spill] sm:$0xff] %v19206_v21 }
 0x16a   : > { %14474 = vmatmul.mubr.msk.f32.gmra.mrb[22].mxu0 %vm590_vm0, %v19190_v15  ;;  %v19216_v15 = vld [vmem:[#allocation2 + $0x16a] sm:$0xff] }
 0x16b   : > { %14476 = vmatprep.mubr.msk.f32.mxu0 %vm590_vm0, %v19192_v16  ;;  %v19214_v16 = vld [vmem:[#allocation2 + $0x15a] sm:$0xff]  ;;  %23739 = vst [vmem:[#allocation48_spill] sm:$0xff] %v19216_v15 }
 0x16c   : > { %23738 = vst [vmem:[#allocation47_spill] sm:$0xff] %v19214_v16 }
 0x16e   : > { %14477 = vmatmul.mubr.msk.f32.gmra.mrb[24].mxu0 %vm590_vm0, %v19198_v10  ;;  %v2241_v10 = vld [vmem:[#allocation4 + $0x90] sm:$0xff] }
 0x16f   : > { %14479 = vmatprep.mubr.msk.f32.mxu0 %vm590_vm0, %v19200_v9  ;;  %v19222_v9 = vld [vmem:[#allocation2 + $0x172] sm:$0xff] }
 0x172   : > { %14480 = vmatmul.mubr.msk.f32.gmra.mrb[26].mxu0 %vm590_vm0, %v19206_v21  ;;  %v2629_v21 = vld [vmem:[#allocation4 + $0xa0] sm:$0xff] }
 0x173   : > { %14482 = vmatprep.mubr.msk.f32.mxu0 %vm590_vm0, %v19208_v11  ;;  %v16300_v11 = vpack.c.bf16 %v2242_v24, %v2241_v10  ;;  %v3020_v10 = vld [vmem:[#allocation4 + $0xc0] sm:$0xff] }
 0x176   : > { %14483 = vmatmul.mubr.msk.f32.gmra.mrb[28].mxu0 %vm590_vm0, %v19214_v16 }
 0x177   : > { %14485 = vmatprep.mubr.msk.f32.mxu0 %vm590_vm0, %v19216_v15  ;;  %v16304_v15 = vpack.c.bf16 %v2630_v13, %v2629_v21  ;;  %v2632_v13 = vld [vmem:[#allocation4 + $0xb8] sm:$0xff] }
 0x17a   : > { %14486 = vmatmul.mubr.msk.f32.gmra.mrb[30].mxu0 %vm590_vm0, %v19222_v9 }
 0x17b   : > { %14496 = vmatprep.mubr.msk.f32.mxu0 %vm590_vm0, %v18972_v18  ;;  %v19291_v18 = vld [vmem:[#allocation2 + $0x188] sm:$0xff] }
 0x17e   : > { %14497 = vmatmul.mubr.msk.f32.vlgmr.msra.gmra.mrb[0].mxu0 %vm590_vm0, %v18977_v22  ;;  %v2631_v22 = vld [vmem:[#allocation4 + $0xb0] sm:$0xff] }
 0x17f   : > { %16299 = vmatpush3.bf16.msra.mxu0 %v19111_v6  ;;  %14499 = vmatprep.mubr.msk.f32.mxu0 %vm590_vm0, %v18979_v23  ;;  %v19285_v6 = vld [vmem:[#allocation2 + $0x180] sm:$0xff]  ;;  %v16308_v24 = vpack.c.bf16 %v2632_v13, %v2631_v22  ;;  %v23757_v22 = vld [vmem:[#allocation32_spill] sm:$0xff]  ;;  %v23758_v13 = vld [vmem:[#allocation33_spill] sm:$0xff] }
 0x180   : > { %16301 = vmatprep.subr.bf16.mxu0 %v16300_v11 }
 0x182   : > { %14500 = vmatmul.mubr.msk.f32.gmra.mrb[2].mxu0 %vm590_vm0, %v18987_v25 }
 0x183   : > { %14502 = vmatprep.mubr.msk.f32.mxu0 %vm590_vm0, %v18989_v26  ;;  %16303 = vmatpush3.bf16.msra.mxu0 %v16300_v11  ;;  %v3021_v11 = vld [vmem:[#allocation4 + $0xc8] sm:$0xff] }
 0x184   : > { %16305 = vmatprep.subr.bf16.mxu0 %v16304_v15  ;;  %v16312_v21 = vpack.c.bf16 %v3021_v11, %v3020_v10  ;;  %v23760_v10 = vld [vmem:[#allocation35_spill] sm:$0xff]  ;;  %v23761_v11 = vld [vmem:[#allocation36_spill] sm:$0xff] }
 0x186   : > { %14503 = vmatmul.mubr.msk.f32.gmra.mrb[4].mxu0 %vm590_vm0, %v18996_v27 }
 0x187   : > { %14505 = vmatprep.mubr.msk.f32.mxu0 %vm590_vm0, %v18998_v28 }
 0x18a   : > { %14506 = vmatmul.mubr.msk.f32.gmra.mrb[6].mxu0 %vm590_vm0, %v19004_v29 }
 0x18b   : > { %14508 = vmatprep.mubr.msk.f32.mxu0 %vm590_vm0, %v19006_v30 }
 0x18e   : > { %14509 = vmatmul.mubr.msk.f32.gmra.mrb[8].mxu0 %vm590_vm0, %v19012_v31 }
 0x18f   : > { %14511 = vmatprep.mubr.msk.f32.mxu0 %vm590_vm0, %v19014_v32 }
 0x192   : > { %14512 = vmatmul.mubr.msk.f32.gmra.mrb[10].mxu0 %vm590_vm0, %v19020_v33 }
 0x193   : > { %14514 = vmatprep.mubr.msk.f32.mxu0 %vm590_vm0, %v19022_v34 }
 0x196   : > { %14515 = vmatmul.mubr.msk.f32.gmra.mrb[12].mxu0 %vm590_vm0, %v19028_v36 }
 0x197   : > { %14517 = vmatprep.mubr.msk.f32.mxu0 %vm590_vm0, %v19030_v37 }
 0x19a   : > { %14518 = vmatmul.mubr.msk.f32.gmra.mrb[14].mxu0 %vm590_vm0, %v19036_v41 }
 0x19b   : > { %14520 = vmatprep.mubr.msk.f32.mxu0 %vm590_vm0, %v19038_v42 }
 0x19e   : > { %14521 = vmatmul.mubr.msk.f32.gmra.mrb[16].mxu0 %vm590_vm0, %v19044_v44 }
 0x19f   : > { %14523 = vmatprep.mubr.msk.f32.mxu0 %vm590_vm0, %v19046_v45 }
 0x1a2   : > { %14524 = vmatmul.mubr.msk.f32.gmra.mrb[18].mxu0 %vm590_vm0, %v19052_v46 }
 0x1a3   : > { %14526 = vmatprep.mubr.msk.f32.mxu0 %vm590_vm0, %v19054_v47 }
 0x1a6   : > { %14527 = vmatmul.mubr.msk.f32.gmra.mrb[20].mxu0 %vm590_vm0, %v19060_v49 }
 0x1a7   : > { %14529 = vmatprep.mubr.msk.f32.mxu0 %vm590_vm0, %v19062_v50 }
 0x1aa   : > { %14530 = vmatmul.mubr.msk.f32.gmra.mrb[22].mxu0 %vm590_vm0, %v19068_v52 }
 0x1ab   : > { %14532 = vmatprep.mubr.msk.f32.mxu0 %vm590_vm0, %v19070_v53 }
 0x1ae   : > { %14533 = vmatmul.mubr.msk.f32.gmra.mrb[24].mxu0 %vm590_vm0, %v19076_v54 }
 0x1af   : > { %14535 = vmatprep.mubr.msk.f32.mxu0 %vm590_vm0, %v19078_v14 }
 0x1b2   : > { %14536 = vmatmul.mubr.msk.f32.gmra.mrb[26].mxu0 %vm590_vm0, %v19088_v17 }
 0x1b3   : > { %14538 = vmatprep.mubr.msk.f32.mxu0 %vm590_vm0, %v19090_v19 }
 0x1b6   : > { %14539 = vmatmul.mubr.msk.f32.gmra.mrb[28].mxu0 %vm590_vm0, %v19096_v20 }
 0x1b7   : > { %14541 = vmatprep.mubr.msk.f32.mxu0 %vm590_vm0, %v19285_v6 }
 0x1ba   : > { %14542 = vmatmul.mubr.msk.f32.gmra.mrb[30].mxu0 %vm590_vm0, %v19291_v18 }
 0x1bb   : > { %14552 = vmatprep.mubr.msk.f32.mxu0 %vm590_vm0, %v18827_v35  ;;  %v23740_v35 = vld [vmem:[#allocation15_spill] sm:$0xff] }
 0x1be   : > { %14553 = vmatmul.mubr.msk.f32.vlgmr.msra.gmra.mrb[0].mxu0 %vm590_vm0, %v18839_v38  ;;  %v23741_v38 = vld [vmem:[#allocation16_spill] sm:$0xff] }
 0x1bf   : > { %16307 = vmatpush3.bf16.msra.mxu0 %v16304_v15  ;;  %14555 = vmatprep.mubr.msk.f32.mxu0 %vm590_vm0, %v18841_v39  ;;  %v23742_v39 = vld [vmem:[#allocation17_spill] sm:$0xff]  ;;  %v23756_v15 = vld [vmem:[#allocation31_spill] sm:$0xff] }
 0x1c0   : > { %16309 = vmatprep.subr.bf16.mxu0 %v16308_v24 }
 0x1c2   : > { %14556 = vmatmul.mubr.msk.f32.gmra.mrb[2].mxu0 %vm590_vm0, %v18847_v40  ;;  %v23743_v40 = vld [vmem:[#allocation18_spill] sm:$0xff] }
 0x1c3   : > { %14558 = vmatprep.mubr.msk.f32.mxu0 %vm590_vm0, %v18851_v43  ;;  %16311 = vmatpush3.bf16.msra.mxu0 %v16308_v24  ;;  %v23744_v43 = vld [vmem:[#allocation19_spill] sm:$0xff]  ;;  %v23759_v24 = vld [vmem:[#allocation34_spill] sm:$0xff] }
 0x1c4   : > { %16313 = vmatprep.subr.bf16.mxu0 %v16312_v21 }
 0x1c6   : > { %14559 = vmatmul.mubr.msk.f32.gmra.mrb[4].mxu0 %vm590_vm0, %v18864_v48  ;;  %v23745_v48 = vld [vmem:[#allocation20_spill] sm:$0xff] }
 0x1c7   : > { %14561 = vmatprep.mubr.msk.f32.mxu0 %vm590_vm0, %v18871_v51  ;;  %v23746_v51 = vld [vmem:[#allocation21_spill] sm:$0xff] }
 0x1ca   : > { %14562 = vmatmul.mubr.msk.f32.gmra.mrb[6].mxu0 %vm590_vm0, %v18879_v55  ;;  %v19353_v55 = vld [vmem:[#allocation2 + $0x181] sm:$0xff] }
 0x1cb   : > { %14564 = vmatprep.mubr.msk.f32.mxu0 %vm590_vm0, %v18881_v56  ;;  %v23747_v56 = vld [vmem:[#allocation22_spill] sm:$0xff] }
 0x1ce   : > { %14565 = vmatmul.mubr.msk.f32.gmra.mrb[8].mxu0 %vm590_vm0, %v18887_v57  ;;  %v19359_v57 = vld [vmem:[#allocation2 + $0x189] sm:$0xff] }
 0x1cf   : > { %14567 = vmatprep.mubr.msk.f32.mxu0 %vm590_vm0, %v18889_v58  ;;  %v3022_v58 = vld [vmem:[#allocation4 + $0xd0] sm:$0xff] }
 0x1d2   : > { %14568 = vmatmul.mubr.msk.f32.gmra.mrb[10].mxu0 %vm590_vm0, %v18895_v59  ;;  %v3023_v59 = vld [vmem:[#allocation4 + $0xd8] sm:$0xff] }
 0x1d3   : > { %14570 = vmatprep.mubr.msk.f32.mxu0 %vm590_vm0, %v18897_v60  ;;  %v16316_v60 = vpack.c.bf16 %v3023_v59, %v3022_v58  ;;  %v23771_v58 = vld [vmem:[#allocation46_spill] sm:$0xff]  ;;  %v23772_v59 = vld [vmem:[#allocation48_spill] sm:$0xff] }
 0x1d6   : > { %14571 = vmatmul.mubr.msk.f32.gmra.mrb[12].mxu0 %vm590_vm0, %v18903_v61  ;;  %v3410_v61 = vld [vmem:[#allocation4 + $0xe0] sm:$0xff] }
 0x1d7   : > { %14573 = vmatprep.mubr.msk.f32.mxu0 %vm590_vm0, %v18905_v62  ;;  %v3411_v62 = vld [vmem:[#allocation4 + $0xe8] sm:$0xff] }
 0x1da   : > { %14574 = vmatmul.mubr.msk.f32.gmra.mrb[14].mxu0 %vm590_vm0, %v18911_v63  ;;  %v16320_v63 = vpack.c.bf16 %v3411_v62, %v3410_v61  ;;  %v19427_v61 = vld [vmem:[#allocation2 + $0x18a] sm:$0xff] }
 0x1db   : > { %14576 = vmatprep.mubr.msk.f32.mxu0 %vm590_vm0, %v18913_v0  ;;  %v23748_v0 = vld [vmem:[#allocation23_spill] sm:$0xff]  ;;  %v3412_v62 = vld [vmem:[#allocation4 + $0xf0] sm:$0xff] }
 0x1de   : > { %14577 = vmatmul.mubr.msk.f32.gmra.mrb[16].mxu0 %vm590_vm0, %v18919_v1  ;;  %v23749_v1 = vld [vmem:[#allocation24_spill] sm:$0xff] }
 0x1df   : > { %14579 = vmatprep.mubr.msk.f32.mxu0 %vm590_vm0, %v18921_v2  ;;  %v23750_v2 = vld [vmem:[#allocation25_spill] sm:$0xff] }
 0x1e2   : > { %14580 = vmatmul.mubr.msk.f32.gmra.mrb[18].mxu0 %vm590_vm0, %v18927_v3  ;;  %v23751_v3 = vld [vmem:[#allocation26_spill] sm:$0xff] }
 0x1e3   : > { %14582 = vmatprep.mubr.msk.f32.mxu0 %vm590_vm0, %v18929_v4  ;;  %v23752_v4 = vld [vmem:[#allocation27_spill] sm:$0xff] }
 0x1e6   : > { %14583 = vmatmul.mubr.msk.f32.gmra.mrb[20].mxu0 %vm590_vm0, %v18935_v5  ;;  %v23753_v5 = vld [vmem:[#allocation28_spill] sm:$0xff] }
 0x1e7   : > { %14585 = vmatprep.mubr.msk.f32.mxu0 %vm590_vm0, %v23740_v35  ;;  %v23763_v35 = vld [vmem:[#allocation38_spill] sm:$0xff] }
 0x1ea   : > { %14586 = vmatmul.mubr.msk.f32.gmra.mrb[22].mxu0 %vm590_vm0, %v23741_v38  ;;  %v23764_v38 = vld [vmem:[#allocation39_spill] sm:$0xff] }
 0x1eb   : > { %14588 = vmatprep.mubr.msk.f32.mxu0 %vm590_vm0, %v23742_v39  ;;  %v23765_v39 = vld [vmem:[#allocation40_spill] sm:$0xff] }
 0x1ee   : > { %14589 = vmatmul.mubr.msk.f32.gmra.mrb[24].mxu0 %vm590_vm0, %v23743_v40  ;;  %v23766_v40 = vld [vmem:[#allocation41_spill] sm:$0xff] }
 0x1ef   : > { %14591 = vmatprep.mubr.msk.f32.mxu0 %vm590_vm0, %v23744_v43  ;;  %v23767_v43 = vld [vmem:[#allocation42_spill] sm:$0xff] }
 0x1f2   : > { %14592 = vmatmul.mubr.msk.f32.gmra.mrb[26].mxu0 %vm590_vm0, %v23745_v48  ;;  %v23768_v48 = vld [vmem:[#allocation43_spill] sm:$0xff] }
 0x1f3   : > { %14594 = vmatprep.mubr.msk.f32.mxu0 %vm590_vm0, %v23746_v51  ;;  %v23769_v51 = vld [vmem:[#allocation44_spill] sm:$0xff] }
 0x1f6   : > { %14595 = vmatmul.mubr.msk.f32.gmra.mrb[28].mxu0 %vm590_vm0, %v23747_v56  ;;  %v23770_v56 = vld [vmem:[#allocation45_spill] sm:$0xff] }
 0x1f7   : > { %14597 = vmatprep.mubr.msk.f32.mxu0 %vm590_vm0, %v19353_v55 }
 0x1fa   : > { %14598 = vmatmul.mubr.msk.f32.gmra.mrb[30].mxu0 %vm590_vm0, %v19359_v57 }
 0x1fb   : > { %14608 = vmatprep.mubr.msk.f32.mxu0 %vm590_vm0, %v19101_v12  ;;  %v23755_v12 = vld [vmem:[#allocation30_spill] sm:$0xff] }
 0x1fe   : > { %14609 = vmatmul.mubr.msk.f32.vlgmr.msra.gmra.mrb[0].mxu0 %vm590_vm0, %v19107_v8  ;;  %v23754_v8 = vld [vmem:[#allocation29_spill] sm:$0xff] }
 0x1ff   : > { %16315 = vmatpush3.bf16.msra.mxu0 %v16312_v21  ;;  %14611 = vmatprep.mubr.msk.f32.mxu0 %vm590_vm0, %v19109_v7  ;;  %v23762_v21 = vld [vmem:[#allocation37_spill] sm:$0xff] }
 0x200   : > { %16317 = vmatprep.subr.bf16.mxu0 %v16316_v60 }
 0x202   : > { %14612 = vmatmul.mubr.msk.f32.gmra.mrb[2].mxu0 %vm590_vm0, %v23748_v0 }
 0x203   : > { %14614 = vmatprep.mubr.msk.f32.mxu0 %vm590_vm0, %v23749_v1  ;;  %16319 = vmatpush3.bf16.msra.mxu0 %v16316_v60  ;;  %v19421_v60 = vld [vmem:[#allocation2 + $0x182] sm:$0xff] }
 0x204   : > { %16321 = vmatprep.subr.bf16.mxu0 %v16320_v63  ;;  %23773 = vst [vmem:[#allocation15_spill] sm:$0xff] %v19421_v60 }
 0x206   : > { %14615 = vmatmul.mubr.msk.f32.gmra.mrb[4].mxu0 %vm590_vm0, %v23750_v2 }
 0x207   : > { %14617 = vmatprep.mubr.msk.f32.mxu0 %vm590_vm0, %v23751_v3 }
 0x20a   : > { %14618 = vmatmul.mubr.msk.f32.gmra.mrb[6].mxu0 %vm590_vm0, %v23752_v4 }
 0x20b   : > { %14620 = vmatprep.mubr.msk.f32.mxu0 %vm590_vm0, %v23753_v5 }
 0x20e   : > { %14621 = vmatmul.mubr.msk.f32.gmra.mrb[8].mxu0 %vm590_vm0, %v23754_v8 }
 0x20f   : > { %14623 = vmatprep.mubr.msk.f32.mxu0 %vm590_vm0, %v23755_v12 }
 0x212   : > { %14624 = vmatmul.mubr.msk.f32.gmra.mrb[10].mxu0 %vm590_vm0, %v23756_v15 }
 0x213   : > { %14626 = vmatprep.mubr.msk.f32.mxu0 %vm590_vm0, %v23757_v22 }
 0x216   : > { %14627 = vmatmul.mubr.msk.f32.gmra.mrb[12].mxu0 %vm590_vm0, %v23758_v13 }
 0x217   : > { %14629 = vmatprep.mubr.msk.f32.mxu0 %vm590_vm0, %v23759_v24 }
 0x21a   : > { %14630 = vmatmul.mubr.msk.f32.gmra.mrb[14].mxu0 %vm590_vm0, %v23760_v10 }
 0x21b   : > { %14632 = vmatprep.mubr.msk.f32.mxu0 %vm590_vm0, %v23761_v11 }
 0x21e   : > { %14633 = vmatmul.mubr.msk.f32.gmra.mrb[16].mxu0 %vm590_vm0, %v23762_v21 }
 0x21f   : > { %14635 = vmatprep.mubr.msk.f32.mxu0 %vm590_vm0, %v23763_v35 }
 0x222   : > { %14636 = vmatmul.mubr.msk.f32.gmra.mrb[18].mxu0 %vm590_vm0, %v23764_v38 }
 0x223   : > { %14638 = vmatprep.mubr.msk.f32.mxu0 %vm590_vm0, %v23765_v39 }
 0x226   : > { %14639 = vmatmul.mubr.msk.f32.gmra.mrb[20].mxu0 %vm590_vm0, %v23766_v40 }
 0x227   : > { %14641 = vmatprep.mubr.msk.f32.mxu0 %vm590_vm0, %v23767_v43 }
 0x22a   : > { %14642 = vmatmul.mubr.msk.f32.gmra.mrb[22].mxu0 %vm590_vm0, %v23768_v48 }
 0x22b   : > { %14644 = vmatprep.mubr.msk.f32.mxu0 %vm590_vm0, %v23769_v51 }
 0x22e   : > { %14645 = vmatmul.mubr.msk.f32.gmra.mrb[24].mxu0 %vm590_vm0, %v23770_v56  ;;  %v3413_v56 = vld [vmem:[#allocation4 + $0xf8] sm:$0xff] }
 0x22f   : > { %14647 = vmatprep.mubr.msk.f32.mxu0 %vm590_vm0, %v23771_v58  ;;  %v3801_v58 = vld [vmem:[#allocation4 + $0x108] sm:$0xff] }
 0x232   : > { %14648 = vmatmul.mubr.msk.f32.gmra.mrb[26].mxu0 %vm590_vm0, %v19214_v16  ;;  %v16324_v16 = vpack.c.bf16 %v3413_v56, %v3412_v62  ;;  %v3390_v62 = vld [vmem:[#allocation2 + $0xc9] sm:$0xff] }
 0x233   : > { %14650 = vmatprep.mubr.msk.f32.mxu0 %vm590_vm0, %v23772_v59  ;;  %v3800_v59 = vld [vmem:[#allocation4 + $0x100] sm:$0xff] }
 0x236   : > { %14651 = vmatmul.mubr.msk.f32.gmra.mrb[28].mxu0 %vm590_vm0, %v19222_v9 }
 0x237   : > { %14653 = vmatprep.mubr.msk.f32.mxu0 %vm590_vm0, %v19421_v60  ;;  %v16328_v60 = vpack.c.bf16 %v3801_v58, %v3800_v59  ;;  %v3387_v58 = vld [vmem:[#allocation2 + $0xa9] sm:$0xff]  ;;  %v3388_v59 = vld [vmem:[#allocation2 + $0xb1] sm:$0xff] }
 0x23a   : > { %14654 = vmatmul.mubr.msk.f32.gmra.mrb[30].mxu0 %vm590_vm0, %v19427_v61 }
 0x23b   : > { %14664 = vmatprep.mubr.msk.f32.mxu0 %vm590_vm0, %v18979_v23  ;;  %v3017_v23 = vld [vmem:[#allocation2 + $0x198] sm:$0xff] }
 0x23e   : > { %14665 = vmatmul.mubr.msk.f32.vlgmr.msra.gmra.mrb[0].mxu0 %vm590_vm0, %v18987_v25  ;;  %v3018_v25 = vld [vmem:[#allocation2 + $0x1a0] sm:$0xff] }
 0x23f   : > { %16323 = vmatpush3.bf16.msra.mxu0 %v16320_v63  ;;  %14667 = vmatprep.mubr.msk.f32.mxu0 %vm590_vm0, %v18989_v26  ;;  %v3377_v26 = vld [vmem:[#allocation2 + $0x31] sm:$0xff]  ;;  %v3386_v63 = vld [vmem:[#allocation2 + $0x99] sm:$0xff] }
 0x240   : > { %16325 = vmatprep.subr.bf16.mxu0 %v16324_v16 }
 0x242   : > { %14668 = vmatmul.mubr.msk.f32.gmra.mrb[2].mxu0 %vm590_vm0, %v18996_v27  ;;  %v3802_v27 = vld [vmem:[#allocation4 + $0x110] sm:$0xff] }
 0x243   : > { %14670 = vmatprep.mubr.msk.f32.mxu0 %vm590_vm0, %v18998_v28  ;;  %16327 = vmatpush3.bf16.msra.mxu0 %v16324_v16  ;;  %v3803_v28 = vld [vmem:[#allocation4 + $0x118] sm:$0xff] }
 0x244   : > { %16329 = vmatprep.subr.bf16.mxu0 %v16328_v60  ;;  %v3385_v16 = vld [vmem:[#allocation2 + $0x91] sm:$0xff] }
 0x246   : > { %14671 = vmatmul.mubr.msk.f32.gmra.mrb[4].mxu0 %vm590_vm0, %v19004_v29  ;;  %v12867_v29 = vld [vmem:[%s23502_s3 + $0x80] sm:$0xff] }
 0x247   : > { %14673 = vmatprep.mubr.msk.f32.mxu0 %vm590_vm0, %v19006_v30  ;;  %v12868_v30 = vld [vmem:[%s23502_s3 + $0x88] sm:$0xff] }
 0x24a   : > { %14674 = vmatmul.mubr.msk.f32.gmra.mrb[6].mxu0 %vm590_vm0, %v19012_v31  ;;  %v12869_v31 = vld [vmem:[%s23502_s3 + $0x90] sm:$0xff] }
 0x24b   : > { %14676 = vmatprep.mubr.msk.f32.mxu0 %vm590_vm0, %v19014_v32  ;;  %v3378_v32 = vld [vmem:[#allocation2 + $0x39] sm:$0xff] }
 0x24e   : > { %14677 = vmatmul.mubr.msk.f32.gmra.mrb[8].mxu0 %vm590_vm0, %v19020_v33  ;;  %v16336_v33 = vpack.c.bf16 %v12868_v30, %v12867_v29  ;;  %v3396_v29 = vld [vmem:[#allocation2 + $0x111] sm:$0xff]  ;;  %v3397_v30 = vld [vmem:[#allocation2 + $0x121] sm:$0xff] }
 0x24f   : > { %14679 = vmatprep.mubr.msk.f32.mxu0 %vm590_vm0, %v19022_v34  ;;  %v12870_v34 = vld [vmem:[%s23502_s3 + $0x98] sm:$0xff] }
 0x250   : > { %16337 = vmatprep.subr.bf16.mxu1 %v16336_v33 }
 0x251   : > { %16339 = vmatpush3.bf16.msra.mxu1 %v16336_v33  ;;  %v3400_v33 = vld [vmem:[#allocation2 + $0x141] sm:$0xff] }
 0x252   : > { %14680 = vmatmul.mubr.msk.f32.gmra.mrb[10].mxu0 %vm590_vm0, %v19028_v36  ;;  %v3379_v36 = vld [vmem:[#allocation2 + $0x49] sm:$0xff] }
 0x253   : > { %14682 = vmatprep.mubr.msk.f32.mxu0 %vm590_vm0, %v19030_v37  ;;  %v16332_v37 = vpack.c.bf16 %v3803_v28, %v3802_v27  ;;  %v3394_v27 = vld [vmem:[#allocation2 + $0xf9] sm:$0xff]  ;;  %v3395_v28 = vld [vmem:[#allocation2 + $0x109] sm:$0xff] }
 0x256   : > { %14683 = vmatmul.mubr.msk.f32.gmra.mrb[12].mxu0 %vm590_vm0, %v19036_v41  ;;  %v16340_v41 = vpack.c.bf16 %v12870_v34, %v12869_v31  ;;  %v3398_v31 = vld [vmem:[#allocation2 + $0x129] sm:$0xff]  ;;  %v3401_v34 = vld [vmem:[#allocation2 + $0x151] sm:$0xff] }
 0x257   : > { %14685 = vmatprep.mubr.msk.f32.mxu0 %vm590_vm0, %v19038_v42  ;;  %v12871_v42 = vld [vmem:[%s23502_s3 + $0xa0] sm:$0xff] }
 0x258   : > { %16341 = vmatprep.subr.bf16.mxu1 %v16340_v41 }
 0x259   : > { %16343 = vmatpush3.bf16.msra.mxu1 %v16340_v41  ;;  %v3404_v41 = vld [vmem:[#allocation2 + $0x171] sm:$0xff] }
 0x25a   : > { %14686 = vmatmul.mubr.msk.f32.gmra.mrb[14].mxu0 %vm590_vm0, %v19044_v44  ;;  %v12872_v44 = vld [vmem:[%s23502_s3 + $0xa8] sm:$0xff] }
 0x25b   : > { %14688 = vmatprep.mubr.msk.f32.mxu0 %vm590_vm0, %v19046_v45  ;;  %v3380_v45 = vld [vmem:[#allocation2 + $0x51] sm:$0xff] }
 0x25e   : > { %14689 = vmatmul.mubr.msk.f32.gmra.mrb[16].mxu0 %vm590_vm0, %v19052_v46  ;;  %v3381_v46 = vld [vmem:[#allocation2 + $0x61] sm:$0xff] }
 0x25f   : > { %14691 = vmatprep.mubr.msk.f32.mxu0 %vm590_vm0, %v19054_v47  ;;  %v16344_v47 = vpack.c.bf16 %v12872_v44, %v12871_v42  ;;  %v3407_v42 = vld [vmem:[#allocation2 + $0x199] sm:$0xff]  ;;  %v3408_v44 = vld [vmem:[#allocation2 + $0x1a1] sm:$0xff] }
 0x261   : > { %16345 = vmatprep.subr.bf16.mxu1 %v16344_v47 }
 0x262   : > { %14692 = vmatmul.mubr.msk.f32.gmra.mrb[18].mxu0 %vm590_vm0, %v19060_v49  ;;  %v12873_v49 = vld [vmem:[%s23502_s3 + $0xb0] sm:$0xff]  ;;  %16347 = vmatpush3.bf16.msra.mxu1 %v16344_v47 }
 0x263   : > { %14694 = vmatprep.mubr.msk.f32.mxu0 %vm590_vm0, %v19062_v50  ;;  %v12874_v50 = vld [vmem:[%s23502_s3 + $0xb8] sm:$0xff] }
 0x266   : > { %14695 = vmatmul.mubr.msk.f32.gmra.mrb[20].mxu0 %vm590_vm0, %v19068_v52  ;;  %v3382_v52 = vld [vmem:[#allocation2 + $0x69] sm:$0xff] }
 0x267   : > { %14697 = vmatprep.mubr.msk.f32.mxu0 %vm590_vm0, %v19070_v53  ;;  %v16348_v53 = vpack.c.bf16 %v12874_v50, %v12873_v49  ;;  %v4357_v49 = vld [vmem:[%s23502_s3 + $0x50] sm:$0xff]  ;;  %v4358_v50 = vld [vmem:[%s23502_s3 + $0x58] sm:$0xff] }
 0x269   : > { %16349 = vmatprep.subr.bf16.mxu1 %v16348_v53 }
 0x26a   : > { %14698 = vmatmul.mubr.msk.f32.gmra.mrb[22].mxu0 %vm590_vm0, %v19076_v54  ;;  %v3383_v54 = vld [vmem:[#allocation2 + $0x79] sm:$0xff]  ;;  %16351 = vmatpush3.bf16.msra.mxu1 %v16348_v53 }
 0x26b   : > { %14700 = vmatprep.mubr.msk.f32.mxu0 %vm590_vm0, %v19078_v14  ;;  %v12875_v14 = vld [vmem:[%s23502_s3 + $0xc0] sm:$0xff] }
 0x26c   : > { %v4359_v53 = vld [vmem:[%s23502_s3 + $0x60] sm:$0xff] }
 0x26e   : > { %14701 = vmatmul.mubr.msk.f32.gmra.mrb[24].mxu0 %vm590_vm0, %v19088_v17  ;;  %v12876_v17 = vld [vmem:[%s23502_s3 + $0xc8] sm:$0xff] }
 0x26f   : > { %14703 = vmatprep.mubr.msk.f32.mxu0 %vm590_vm0, %v19090_v19  ;;  %v3384_v19 = vld [vmem:[#allocation2 + $0x81] sm:$0xff] }
 0x272   : > { %14704 = vmatmul.mubr.msk.f32.gmra.mrb[26].mxu0 %vm590_vm0, %v19096_v20  ;;  %v16352_v20 = vpack.c.bf16 %v12876_v17, %v12875_v14  ;;  %v4361_v17 = vld [vmem:[%s23502_s3 + $0x70] sm:$0xff] }
 0x273   : > { %14706 = vmatprep.mubr.msk.f32.mxu0 %vm590_vm0, %v19285_v6  ;;  %v12877_v6 = vld [vmem:[%s23502_s3 + $0xd0] sm:$0xff] }
 0x274   : > { %16353 = vmatprep.subr.bf16.mxu1 %v16352_v20 }
 0x275   : > { %16355 = vmatpush3.bf16.msra.mxu1 %v16352_v20 }
 0x276   : > { %14707 = vmatmul.mubr.msk.f32.gmra.mrb[28].mxu0 %vm590_vm0, %v19291_v18  ;;  %v12878_v18 = vld [vmem:[%s23502_s3 + $0xd8] sm:$0xff] }
 0x277   : > { %14709 = vmatprep.mubr.msk.f32.mxu0 %vm590_vm0, %v3017_v23  ;;  %v16356_v56 = vpack.c.bf16 %v12878_v18, %v12877_v6  ;;  %v3391_v23 = vld [vmem:[#allocation2 + $0xd9] sm:$0xff]  ;;  %v12884_v6 = vld [vmem:[%s23502_s3 + $0x108] sm:$0xff] }
 0x279   : > { %16357 = vmatprep.subr.bf16.mxu1 %v16356_v56 }
 0x27a   : > { %14710 = vmatmul.mubr.msk.f32.gmra.mrb[30].mxu0 %vm590_vm0, %v3018_v25  ;;  %16359 = vmatpush3.bf16.msra.mxu1 %v16356_v56  ;;  %v3392_v25 = vld [vmem:[#allocation2 + $0xe1] sm:$0xff] }
 0x27b   : > { %14720 = vmatprep.mubr.msk.f32.mxu0 %vm590_vm0, %v3377_v26  ;;  %v3393_v26 = vld [vmem:[#allocation2 + $0xf1] sm:$0xff] }
 0x27e   : > { %14721 = vmatmul.mubr.msk.f32.vlgmr.msra.gmra.mrb[0].mxu0 %vm590_vm0, %v3378_v32  ;;  %v3399_v32 = vld [vmem:[#allocation2 + $0x139] sm:$0xff] }
 0x27f   : > { %16331 = vmatpush3.bf16.msra.mxu0 %v16328_v60  ;;  %14723 = vmatprep.mubr.msk.f32.mxu0 %vm590_vm0, %v3379_v36  ;;  %v3389_v60 = vld [vmem:[#allocation2 + $0xc1] sm:$0xff]  ;;  %v3402_v36 = vld [vmem:[#allocation2 + $0x159] sm:$0xff] }
 0x280   : > { %16333 = vmatprep.subr.bf16.mxu0 %v16332_v37 }
 0x282   : > { %14724 = vmatmul.mubr.msk.f32.gmra.mrb[2].mxu0 %vm590_vm0, %v3380_v45  ;;  %v4355_v45 = vld [vmem:[%s23502_s3 + $0x40] sm:$0xff] }
 0x283   : > { %14726 = vmatprep.mubr.msk.f32.mxu0 %vm590_vm0, %v3381_v46  ;;  %16335 = vmatpush3.bf16.msra.mxu0 %v16332_v37  ;;  %v3403_v37 = vld [vmem:[#allocation2 + $0x169] sm:$0xff] }
 0x284   : > { %v4356_v46 = vld [vmem:[%s23502_s3 + $0x48] sm:$0xff] }
 0x285   : > { %v16384_v47 = vpack.c.bf16 %v4356_v46, %v4355_v45 }
 0x286   : > { %14727 = vmatmul.mubr.msk.f32.gmra.mrb[4].mxu0 %vm590_vm0, %v3382_v52  ;;  %v16388_v52 = vpack.c.bf16 %v4358_v50, %v4357_v49 }
 0x287   : > { %14729 = vmatprep.mubr.msk.f32.mxu0 %vm590_vm0, %v3383_v54  ;;  %v4360_v54 = vld [vmem:[%s23502_s3 + $0x68] sm:$0xff] }
 0x288   : > { %v16392_v14 = vpack.c.bf16 %v4360_v54, %v4359_v53 }
 0x28a   : > { %14730 = vmatmul.mubr.msk.f32.gmra.mrb[6].mxu0 %vm590_vm0, %v3384_v19  ;;  %v4362_v19 = vld [vmem:[%s23502_s3 + $0x78] sm:$0xff] }
 0x28b   : > { %14732 = vmatprep.mubr.msk.f32.mxu0 %vm590_vm0, %v3385_v16  ;;  %v16396_v20 = vpack.c.bf16 %v4362_v19, %v4361_v17  ;;  %v12883_v16 = vld [vmem:[%s23502_s3 + $0x100] sm:$0xff] }
 0x28c   : > { %v19691_v18 = vpack.c.bf16 %v12884_v6, %v12883_v16 }
 0x28e   : > { %14733 = vmatmul.mubr.msk.f32.gmra.mrb[8].mxu0 %vm590_vm0, %v3386_v63  ;;  %v19697_v63 = vld [vmem:[%s23501_s2] ss:$0 sm:$0xff] }
 0x28f   : > { %14735 = vmatprep.mubr.msk.f32.mxu0 %vm590_vm0, %v3387_v58 }
 0x292   : > { %14736 = vmatmul.mubr.msk.f32.gmra.mrb[10].mxu0 %vm590_vm0, %v3388_v59 }
 0x293   : > { %14738 = vmatprep.mubr.msk.f32.mxu0 %vm590_vm0, %v3389_v60 }
 0x296   : > { %14739 = vmatmul.mubr.msk.f32.gmra.mrb[12].mxu0 %vm590_vm0, %v3390_v62 }
 0x297   : > { %14741 = vmatprep.mubr.msk.f32.mxu0 %vm590_vm0, %v3391_v23 }
 0x29a   : > { %14742 = vmatmul.mubr.msk.f32.gmra.mrb[14].mxu0 %vm590_vm0, %v3392_v25 }
 0x29b   : > { %14744 = vmatprep.mubr.msk.f32.mxu0 %vm590_vm0, %v3393_v26 }
 0x29e   : > { %14745 = vmatmul.mubr.msk.f32.gmra.mrb[16].mxu0 %vm590_vm0, %v3394_v27 }
 0x29f   : > { %14747 = vmatprep.mubr.msk.f32.mxu0 %vm590_vm0, %v3395_v28 }
 0x2a2   : > { %14748 = vmatmul.mubr.msk.f32.gmra.mrb[18].mxu0 %vm590_vm0, %v3396_v29 }
 0x2a3   : > { %14750 = vmatprep.mubr.msk.f32.mxu0 %vm590_vm0, %v3397_v30 }
 0x2a6   : > { %14751 = vmatmul.mubr.msk.f32.gmra.mrb[20].mxu0 %vm590_vm0, %v3398_v31 }
 0x2a7   : > { %14753 = vmatprep.mubr.msk.f32.mxu0 %vm590_vm0, %v3399_v32 }
 0x2aa   : > { %14754 = vmatmul.mubr.msk.f32.gmra.mrb[22].mxu0 %vm590_vm0, %v3400_v33 }
 0x2ab   : > { %14756 = vmatprep.mubr.msk.f32.mxu0 %vm590_vm0, %v3401_v34 }
 0x2ae   : > { %14757 = vmatmul.mubr.msk.f32.gmra.mrb[24].mxu0 %vm590_vm0, %v3402_v36 }
 0x2af   : > { %14759 = vmatprep.mubr.msk.f32.mxu0 %vm590_vm0, %v3403_v37 }
 0x2b2   : > { %14760 = vmatmul.mubr.msk.f32.gmra.mrb[26].mxu0 %vm590_vm0, %v3404_v41 }
 0x2b3   : > { %14762 = vmatprep.mubr.msk.f32.mxu0 %vm590_vm0, %v19353_v55  ;;  %v23775_v55 = vld [vmem:[#allocation46_spill] sm:$0xff] }
 0x2b6   : > { %14763 = vmatmul.mubr.msk.f32.gmra.mrb[28].mxu0 %vm590_vm0, %v19359_v57  ;;  %v23776_v57 = vld [vmem:[#allocation47_spill] sm:$0xff] }
 0x2b7   : > { %14765 = vmatprep.mubr.msk.f32.mxu0 %vm590_vm0, %v3407_v42 }
 0x2ba   : > { %14766 = vmatmul.mubr.msk.f32.gmra.mrb[30].mxu0 %vm590_vm0, %v3408_v44 }
 0x2bb   : > { %14776 = vmatprep.mubr.msk.f32.mxu0 %vm590_vm0, %v19109_v7  ;;  %v23774_v7 = vld [vmem:[#allocation45_spill] sm:$0xff] }
 0x2be   : > { %14777 = vmatmul.mubr.msk.f32.vlgmr.msra.gmra.mrb[0].mxu0 %vm590_vm0, %v23748_v0  ;;  %v23777_v0 = vld [vmem:[#allocation48_spill] sm:$0xff] }
 0x2bf   : > { %14779 = vmatprep.mubr.msk.f32.mxu0 %vm590_vm0, %v23749_v1  ;;  %v23778_v1 = vld [vmem:[#allocation15_spill] sm:$0xff] }
 0x2c2   : > { %14780 = vmatmul.mubr.msk.f32.gmra.mrb[2].mxu0 %vm590_vm0, %v23750_v2  ;;  %v3797_v2 = vld [vmem:[#allocation2 + $0x19a] sm:$0xff] }
 0x2c3   : > { %14782 = vmatprep.mubr.msk.f32.mxu0 %vm590_vm0, %v23751_v3  ;;  %v3798_v3 = vld [vmem:[#allocation2 + $0x1a2] sm:$0xff] }
 0x2c6   : > { %14783 = vmatmul.mubr.msk.f32.gmra.mrb[4].mxu0 %vm590_vm0, %v23752_v4  ;;  %v12879_v4 = vld [vmem:[%s23502_s3 + $0xe0] sm:$0xff] }
 0x2c7   : > { %14785 = vmatprep.mubr.msk.f32.mxu0 %vm590_vm0, %v23753_v5 }
 0x2ca   : > { %14786 = vmatmul.mubr.msk.f32.gmra.mrb[6].mxu0 %vm590_vm0, %v23754_v8  ;;  %v12881_v8 = vld [vmem:[%s23502_s3 + $0xf0] sm:$0xff] }
 0x2cb   : > { %14788 = vmatprep.mubr.msk.f32.mxu0 %vm590_vm0, %v23755_v12  ;;  %v12882_v12 = vld [vmem:[%s23502_s3 + $0xf8] sm:$0xff] }
 0x2ce   : > { %14789 = vmatmul.mubr.msk.f32.gmra.mrb[8].mxu0 %vm590_vm0, %v23756_v15  ;;  %v16364_v15 = vpack.c.bf16 %v12882_v12, %v12881_v8 }
 0x2cf   : > { %14791 = vmatprep.mubr.msk.f32.mxu0 %vm590_vm0, %v23757_v22  ;;  %v4363_v22 = vld [vmem:[#allocation3 + $0x1] sm:$0xff] }
 0x2d0   : > { %14856 = vmatprep.mubr.f32.mxu1 %v4363_v22 }
 0x2d2   : > { %14792 = vmatmul.mubr.msk.f32.gmra.mrb[10].mxu0 %vm590_vm0, %v23758_v13  ;;  %v4364_v13 = vld [vmem:[#allocation3 + $0x9] sm:$0xff] }
 0x2d3   : > { %14794 = vmatprep.mubr.msk.f32.mxu0 %vm590_vm0, %v23759_v24  ;;  %v4347_v24 = vld [vmem:[%s23502_s3] sm:$0xff] }
 0x2d6   : > { %14795 = vmatmul.mubr.msk.f32.gmra.mrb[12].mxu0 %vm590_vm0, %v23760_v10  ;;  %v4348_v10 = vld [vmem:[%s23502_s3 + $0x8] sm:$0xff] }
 0x2d7   : > { %14797 = vmatprep.mubr.msk.f32.mxu0 %vm590_vm0, %v23761_v11  ;;  %v16368_v11 = vpack.c.bf16 %v4348_v10, %v4347_v24 }
 0x2da   : > { %14798 = vmatmul.mubr.msk.f32.gmra.mrb[14].mxu0 %vm590_vm0, %v23762_v21  ;;  %v4349_v21 = vld [vmem:[%s23502_s3 + $0x10] sm:$0xff] }
 0x2db   : > { %14800 = vmatprep.mubr.msk.f32.mxu0 %vm590_vm0, %v23763_v35  ;;  %v4350_v35 = vld [vmem:[%s23502_s3 + $0x18] sm:$0xff] }
 0x2de   : > { %14801 = vmatmul.mubr.msk.f32.gmra.mrb[16].mxu0 %vm590_vm0, %v23764_v38  ;;  %v16372_v38 = vpack.c.bf16 %v4350_v35, %v4349_v21 }
 0x2df   : > { %14803 = vmatprep.mubr.msk.f32.mxu0 %vm590_vm0, %v23765_v39  ;;  %v4351_v39 = vld [vmem:[%s23502_s3 + $0x20] sm:$0xff] }
 0x2e2   : > { %14804 = vmatmul.mubr.msk.f32.gmra.mrb[18].mxu0 %vm590_vm0, %v23766_v40  ;;  %v4352_v40 = vld [vmem:[%s23502_s3 + $0x28] sm:$0xff] }
 0x2e3   : > { %14806 = vmatprep.mubr.msk.f32.mxu0 %vm590_vm0, %v23767_v43  ;;  %v16376_v43 = vpack.c.bf16 %v4352_v40, %v4351_v39 }
 0x2e6   : > { %14807 = vmatmul.mubr.msk.f32.gmra.mrb[20].mxu0 %vm590_vm0, %v23768_v48  ;;  %v4353_v48 = vld [vmem:[%s23502_s3 + $0x30] sm:$0xff] }
 0x2e7   : > { %14809 = vmatprep.mubr.msk.f32.mxu0 %vm590_vm0, %v23769_v51  ;;  %v4354_v51 = vld [vmem:[%s23502_s3 + $0x38] sm:$0xff] }
 0x2ea   : > { %14810 = vmatmul.mubr.msk.f32.gmra.mrb[22].mxu0 %vm590_vm0, %v23774_v7 }
 0x2eb   : > { %14812 = vmatprep.mubr.msk.f32.mxu0 %vm590_vm0, %v23775_v55 }
 0x2ee   : > { %14813 = vmatmul.mubr.msk.f32.gmra.mrb[24].mxu0 %vm590_vm0, %v23776_v57 }
 0x2ef   : > { %14815 = vmatprep.mubr.msk.f32.mxu0 %vm590_vm0, %v23777_v0 }
 0x2f2   : > { %14816 = vmatmul.mubr.msk.f32.gmra.mrb[26].mxu0 %vm590_vm0, %v19222_v9  ;;  %v12880_v9 = vld [vmem:[%s23502_s3 + $0xe8] sm:$0xff] }
 0x2f3   : > { %14818 = vmatprep.mubr.msk.f32.mxu0 %vm590_vm0, %v23778_v1  ;;  %v16360_v5 = vpack.c.bf16 %v12880_v9, %v12879_v4 }
 0x2f5   : > { %16361 = vmatprep.subr.bf16.mxu1 %v16360_v5 }
 0x2f6   : > { %14819 = vmatmul.mubr.msk.f32.gmra.mrb[28].mxu0 %vm590_vm0, %v19427_v61  ;;  %16363 = vmatpush3.bf16.msra.mxu1 %v16360_v5  ;;  %v16380_v61 = vpack.c.bf16 %v4354_v51, %v4353_v48 }
 0x2f7   : > { %14821 = vmatprep.mubr.msk.f32.mxu0 %vm590_vm0, %v3797_v2  ;;  %16365 = vmatprep.subr.bf16.mxu1 %v16364_v15 }
 0x2fa   : > { %14822 = vmatmul.mubr.msk.f32.gmra.mrb[30].mxu0 %vm590_vm0, %v3798_v3  ;;  %16367 = vmatpush3.bf16.msra.mxu1 %v16364_v15 }
 0x2fb   : > { %16369 = vmatprep.subr.bf16.mxu1 %v16368_v11 }
 0x2fd   : > { %14857 = vmatmul.mubr.f32.vlgmr.msra.gmra.mrb[0].mxu1 %v4364_v13 }
 0x2fe   : > { %16371 = vmatpush3.bf16.msra.mxu1 %v16368_v11 }
 0x2ff   : > { %16373 = vmatprep.subr.bf16.mxu1 %v16372_v38 }
 0x302   : > { %16375 = vmatpush3.bf16.msra.mxu1 %v16372_v38 }
 0x303   : > { %16377 = vmatprep.subr.bf16.mxu1 %v16376_v43 }
 0x306   : > { %16379 = vmatpush3.bf16.msra.mxu1 %v16376_v43 }
 0x307   : > { %16381 = vmatprep.subr.bf16.mxu1 %v16380_v61 }
 0x30a   : > { %16383 = vmatpush3.bf16.msra.mxu1 %v16380_v61 }
 0x30b   : > { %16385 = vmatprep.subr.bf16.mxu1 %v16384_v47 }
 0x30e   : > { %16387 = vmatpush3.bf16.msra.mxu1 %v16384_v47 }
 0x30f   : > { %16389 = vmatprep.subr.bf16.mxu1 %v16388_v52 }
 0x312   : > { %16391 = vmatpush3.bf16.msra.mxu1 %v16388_v52 }
 0x313   : > { %16393 = vmatprep.subr.bf16.mxu1 %v16392_v14 }
 0x316   : > { %16395 = vmatpush3.bf16.msra.mxu1 %v16392_v14 }
 0x317   : > { %16397 = vmatprep.subr.bf16.mxu1 %v16396_v20 }
 0x31a   : > { %16399 = vmatpush3.bf16.msra.mxu1 %v16396_v20 }
 0x31b   : > { %16401 = vmatprep.subr.bf16.mxu1 %v19691_v18 }
 0x391   : > { %v14778_v56 = vpop.f32.mrb[0].mxu0 }
 0x392   : > { %v4165_v58 = vadd.f32 %v14778_v56, %v19697_v63  ;;  %v3966_v59 = vpop.f32.mrb[1].mxu0 }
 0x393   : > { %v4164_v60 = vadd.f32 %v19697_v63, %v3966_v59 }
 0x394   : > { %v4197_v62 = vmax.f32 %v4165_v58, 0.0 }
 0x395   : > { %v4196_v23 = vmax.f32 %v4164_v60, 0.0  ;;  %v14781_v25 = vpop.f32.mrb[2].mxu0 }
 0x396   : > { %4284 = vst [vmem:[#allocation3 + $0x21] sm:$0xff] %v4197_v62  ;;  %v4167_v26 = vadd.f32 %v14781_v25, %v19697_v63  ;;  %v3976_v27 = vpop.f32.mrb[3].mxu0 }
 0x397   : > { %4283 = vst [vmem:[#allocation3 + $0x19] sm:$0xff] %v4196_v23  ;;  %v4166_v28 = vadd.f32 %v19697_v63, %v3976_v27  ;;  %14859 = vmatprep.mubr.f32.mxu1 %v4196_v23 }
 0x398   : > { %v4199_v29 = vmax.f32 %v4167_v26, 0.0  ;;  %14860 = vmatmul.mubr.f32.gmra.mrb[2].mxu1 %v4197_v62 }
 0x399   : > { %v4198_v30 = vmax.f32 %v4166_v28, 0.0  ;;  %v14784_v31 = vpop.f32.mrb[4].mxu0 }
 0x39a   : > { %4286 = vst [vmem:[#allocation3 + $0x39] sm:$0xff] %v4199_v29  ;;  %v4169_v32 = vadd.f32 %v14784_v31, %v19697_v63  ;;  %v3986_v33 = vpop.f32.mrb[5].mxu0 }
 0x39b   : > { %4285 = vst [vmem:[#allocation3 + $0x31] sm:$0xff] %v4198_v30  ;;  %v4168_v34 = vadd.f32 %v19697_v63, %v3986_v33  ;;  %14862 = vmatprep.mubr.f32.mxu1 %v4198_v30 }
 0x39c   : > { %v4201_v36 = vmax.f32 %v4169_v32, 0.0  ;;  %14863 = vmatmul.mubr.f32.gmra.mrb[4].mxu1 %v4199_v29 }
 0x39d   : > { %v4200_v37 = vmax.f32 %v4168_v34, 0.0  ;;  %v14787_v41 = vpop.f32.mrb[6].mxu0 }
 0x39e   : > { %4288 = vst [vmem:[#allocation3 + $0x51] sm:$0xff] %v4201_v36  ;;  %v4171_v42 = vadd.f32 %v14787_v41, %v19697_v63  ;;  %v3996_v44 = vpop.f32.mrb[7].mxu0 }
 0x39f   : > { %4287 = vst [vmem:[#allocation3 + $0x49] sm:$0xff] %v4200_v37  ;;  %v4170_v7 = vadd.f32 %v19697_v63, %v3996_v44  ;;  %14865 = vmatprep.mubr.f32.mxu1 %v4200_v37 }
 0x3a0   : > { %v4203_v55 = vmax.f32 %v4171_v42, 0.0  ;;  %14866 = vmatmul.mubr.f32.gmra.mrb[6].mxu1 %v4201_v36 }
 0x3a1   : > { %v4202_v57 = vmax.f32 %v4170_v7, 0.0  ;;  %v14790_v0 = vpop.f32.mrb[8].mxu0 }
 0x3a2   : > { %4290 = vst [vmem:[#allocation3 + $0x69] sm:$0xff] %v4203_v55  ;;  %v4173_v1 = vadd.f32 %v14790_v0, %v19697_v63  ;;  %v4006_v2 = vpop.f32.mrb[9].mxu0 }
 0x3a3   : > { %4289 = vst [vmem:[#allocation3 + $0x61] sm:$0xff] %v4202_v57  ;;  %v4172_v3 = vadd.f32 %v19697_v63, %v4006_v2  ;;  %14868 = vmatprep.mubr.f32.mxu1 %v4202_v57 }
 0x3a4   : > { %v4205_v4 = vmax.f32 %v4173_v1, 0.0  ;;  %14869 = vmatmul.mubr.f32.gmra.mrb[8].mxu1 %v4203_v55 }
 0x3a5   : > { %v4204_v9 = vmax.f32 %v4172_v3, 0.0  ;;  %v14793_v5 = vpop.f32.mrb[10].mxu0 }
 0x3a6   : > { %4292 = vst [vmem:[#allocation3 + $0x81] sm:$0xff] %v4205_v4  ;;  %v4175_v8 = vadd.f32 %v14793_v5, %v19697_v63  ;;  %v4016_v12 = vpop.f32.mrb[11].mxu0 }
 0x3a7   : > { %4291 = vst [vmem:[#allocation3 + $0x79] sm:$0xff] %v4204_v9  ;;  %v4174_v15 = vadd.f32 %v19697_v63, %v4016_v12  ;;  %14871 = vmatprep.mubr.f32.mxu1 %v4204_v9  ;;  %v12885_v12 = vld [vmem:[%s23502_s3 + $0x110] sm:$0xff] }
 0x3a8   : > { %v4207_v22 = vmax.f32 %v4175_v8, 0.0  ;;  %14872 = vmatmul.mubr.f32.gmra.mrb[10].mxu1 %v4205_v4 }
 0x3a9   : > { %v19711_v13 = vmax.f32 %v4174_v15, 0.0  ;;  %v14796_v24 = vpop.f32.mrb[12].mxu0  ;;  %v12886_v15 = vld [vmem:[%s23502_s3 + $0x118] sm:$0xff] }
 0x3aa   : > { %4294 = vst [vmem:[#allocation3 + $0x99] sm:$0xff] %v4207_v22  ;;  %v4177_v10 = vadd.f32 %v14796_v24, %v19697_v63  ;;  %v4026_v11 = vpop.f32.mrb[13].mxu0 }
 0x3ab   : > { %4293 = vst [vmem:[#allocation3 + $0x91] sm:$0xff] %v19711_v13  ;;  %v4176_v21 = vadd.f32 %v19697_v63, %v4026_v11  ;;  %14874 = vmatprep.mubr.f32.mxu1 %v19711_v13  ;;  %v12887_v11 = vld [vmem:[%s23502_s3 + $0x120] sm:$0xff] }
 0x3ac   : > { %v19717_v35 = vmax.f32 %v4177_v10, 0.0  ;;  %14875 = vmatmul.mubr.f32.gmra.mrb[12].mxu1 %v4207_v22  ;;  %v19819_v10 = vld [vmem:[#allocation3] sm:$0xff] }
 0x3ad   : > { %v19719_v38 = vmax.f32 %v4176_v21, 0.0  ;;  %v14799_v39 = vpop.f32.mrb[14].mxu0  ;;  %23779 = vst [vmem:[#allocation16_spill] sm:$0xff] %v19819_v10  ;;  %v12888_v21 = vld [vmem:[%s23502_s3 + $0x128] sm:$0xff] }
 0x3ae   : > { %4296 = vst [vmem:[#allocation3 + $0xb1] sm:$0xff] %v19717_v35  ;;  %v4179_v40 = vadd.f32 %v14799_v39, %v19697_v63  ;;  %v4036_v43 = vpop.f32.mrb[15].mxu0  ;;  %v19833_v39 = vld [vmem:[#allocation3 + $0x18] sm:$0xff] }
 0x3af   : > { %4295 = vst [vmem:[#allocation3 + $0xa9] sm:$0xff] %v19719_v38  ;;  %v4178_v48 = vadd.f32 %v19697_v63, %v4036_v43  ;;  %14877 = vmatprep.mubr.f32.mxu1 %v19719_v38  ;;  %v19837_v43 = vld [vmem:[#allocation3 + $0x20] sm:$0xff] }
 0x3b0   : > { %v19726_v51 = vmax.f32 %v4179_v40, 0.0  ;;  %14878 = vmatmul.mubr.f32.gmra.mrb[14].mxu1 %v19717_v35  ;;  %v16408_v40 = vpack.c.bf16 %v12888_v21, %v12887_v11 }
 0x3b1   : > { %v19729_v61 = vmax.f32 %v4178_v48, 0.0  ;;  %v14802_v45 = vpop.f32.mrb[16].mxu0  ;;  %v12889_v48 = vld [vmem:[%s23502_s3 + $0x130] sm:$0xff] }
 0x3b2   : > { %4298 = vst [vmem:[#allocation3 + $0xc9] sm:$0xff] %v19726_v51  ;;  %v4181_v46 = vadd.f32 %v14802_v45, %v19697_v63  ;;  %v4046_v47 = vpop.f32.mrb[17].mxu0  ;;  %v12890_v45 = vld [vmem:[%s23502_s3 + $0x138] sm:$0xff] }
 0x3b3   : > { %4297 = vst [vmem:[#allocation3 + $0xc1] sm:$0xff] %v19729_v61  ;;  %v4180_v49 = vadd.f32 %v19697_v63, %v4046_v47  ;;  %14880 = vmatprep.mubr.f32.mxu1 %v19729_v61  ;;  %v19849_v47 = vld [vmem:[#allocation3 + $0x38] sm:$0xff] }
 0x3b4   : > { %v19736_v50 = vmax.f32 %v4181_v46, 0.0  ;;  %14881 = vmatmul.mubr.f32.gmra.mrb[16].mxu1 %v19726_v51  ;;  %v19846_v46 = vld [vmem:[#allocation3 + $0x30] sm:$0xff] }
 0x3b5   : > { %v19739_v52 = vmax.f32 %v4180_v49, 0.0  ;;  %v14805_v53 = vpop.f32.mrb[18].mxu0  ;;  %v12891_v49 = vld [vmem:[%s23502_s3 + $0x140] sm:$0xff] }
 0x3b6   : > { %4300 = vst [vmem:[#allocation3 + $0xe1] sm:$0xff] %v19736_v50  ;;  %v4183_v54 = vadd.f32 %v14805_v53, %v19697_v63  ;;  %v4056_v14 = vpop.f32.mrb[19].mxu0  ;;  %v12892_v53 = vld [vmem:[%s23502_s3 + $0x148] sm:$0xff] }
 0x3b7   : > { %4299 = vst [vmem:[#allocation3 + $0xd9] sm:$0xff] %v19739_v52  ;;  %v4182_v17 = vadd.f32 %v19697_v63, %v4056_v14  ;;  %14883 = vmatprep.mubr.f32.mxu1 %v19739_v52  ;;  %v16416_v14 = vpack.c.bf16 %v12892_v53, %v12891_v49 }
 0x3b8   : > { %v19746_v19 = vmax.f32 %v4183_v54, 0.0  ;;  %14884 = vmatmul.mubr.f32.gmra.mrb[18].mxu1 %v19736_v50  ;;  %v19858_v54 = vld [vmem:[#allocation3 + $0x48] sm:$0xff] }
 0x3b9   : > { %v19749_v20 = vmax.f32 %v4182_v17, 0.0  ;;  %v14808_v16 = vpop.f32.mrb[20].mxu0  ;;  %v19861_v17 = vld [vmem:[#allocation3 + $0x50] sm:$0xff] }
 0x3ba   : > { %4302 = vst [vmem:[#allocation3 + $0xf9] sm:$0xff] %v19746_v19  ;;  %v4185_v6 = vadd.f32 %v14808_v16, %v19697_v63  ;;  %v4066_v56 = vpop.f32.mrb[21].mxu0  ;;  %v12893_v16 = vld [vmem:[%s23502_s3 + $0x150] sm:$0xff] }
 0x3bb   : > { %4301 = vst [vmem:[#allocation3 + $0xf1] sm:$0xff] %v19749_v20  ;;  %v4184_v58 = vadd.f32 %v19697_v63, %v4066_v56  ;;  %14886 = vmatprep.mubr.f32.mxu1 %v19749_v20  ;;  %v19870_v56 = vld [vmem:[#allocation3 + $0x60] sm:$0xff] }
 0x3bc   : > { %v19756_v59 = vmax.f32 %v4185_v6, 0.0  ;;  %14887 = vmatmul.mubr.f32.gmra.mrb[20].mxu1 %v19746_v19  ;;  %v12894_v6 = vld [vmem:[%s23502_s3 + $0x158] sm:$0xff] }
 0x3bd   : > { %v19759_v60 = vmax.f32 %v4184_v58, 0.0  ;;  %v14811_v62 = vpop.f32.mrb[22].mxu0  ;;  %v16420_v58 = vpack.c.bf16 %v12894_v6, %v12893_v16  ;;  %v4862_v6 = vld [vmem:[#allocation3 + $0x2] sm:$0xff] }
 0x3be   : > { %4304 = vst [vmem:[#allocation3 + $0x111] sm:$0xff] %v19756_v59  ;;  %v4187_v23 = vadd.f32 %v14811_v62, %v19697_v63  ;;  %v4076_v25 = vpop.f32.mrb[23].mxu0  ;;  %v19873_v62 = vld [vmem:[#allocation3 + $0x68] sm:$0xff] }
 0x3bf   : > { %4303 = vst [vmem:[#allocation3 + $0x109] sm:$0xff] %v19759_v60  ;;  %v4186_v26 = vadd.f32 %v19697_v63, %v4076_v25  ;;  %14889 = vmatprep.mubr.f32.mxu1 %v19759_v60  ;;  %v12896_v25 = vld [vmem:[%s23502_s3 + $0x168] sm:$0xff] }
 0x3c0   : > { %v19766_v27 = vmax.f32 %v4187_v23, 0.0  ;;  %14890 = vmatmul.mubr.f32.gmra.mrb[22].mxu1 %v19756_v59  ;;  %v12895_v23 = vld [vmem:[%s23502_s3 + $0x160] sm:$0xff] }
 0x3c1   : > { %v19769_v28 = vmax.f32 %v4186_v26, 0.0  ;;  %v14814_v29 = vpop.f32.mrb[24].mxu0  ;;  %v19882_v26 = vld [vmem:[#allocation3 + $0x78] sm:$0xff] }
 0x3c2   : > { %4306 = vst [vmem:[#allocation3 + $0x129] sm:$0xff] %v19766_v27  ;;  %v4189_v30 = vadd.f32 %v14814_v29, %v19697_v63  ;;  %v4086_v31 = vpop.f32.mrb[25].mxu0  ;;  %v16424_v29 = vpack.c.bf16 %v12896_v25, %v12895_v23  ;;  %v19927_v11 = vld [vmem:[#allocation3 + $0xf8] sm:$0xff]  ;;  %v12901_v23 = vld [vmem:[%s23502_s3 + $0x190] sm:$0xff]  ;;  %v12902_v25 = vld [vmem:[%s23502_s3 + $0x198] sm:$0xff] }
 0x3c3   : > { %4305 = vst [vmem:[#allocation3 + $0x121] sm:$0xff] %v19769_v28  ;;  %v4188_v32 = vadd.f32 %v19697_v63, %v4086_v31  ;;  %14892 = vmatprep.mubr.f32.mxu1 %v19769_v28  ;;  %v12897_v31 = vld [vmem:[%s23502_s3 + $0x170] sm:$0xff] }
 0x3c4   : > { %v19776_v33 = vmax.f32 %v4189_v30, 0.0  ;;  %14893 = vmatmul.mubr.f32.gmra.mrb[24].mxu1 %v19766_v27  ;;  %v19885_v30 = vld [vmem:[#allocation3 + $0x80] sm:$0xff] }
 0x3c5   : > { %v19779_v34 = vmax.f32 %v4188_v32, 0.0  ;;  %v14817_v36 = vpop.f32.mrb[26].mxu0  ;;  %v12898_v32 = vld [vmem:[%s23502_s3 + $0x178] sm:$0xff] }
 0x3c6   : > { %4308 = vst [vmem:[#allocation3 + $0x141] sm:$0xff] %v19776_v33  ;;  %v4191_v37 = vadd.f32 %v14817_v36, %v19697_v63  ;;  %v4096_v41 = vpop.f32.mrb[27].mxu0  ;;  %v19894_v36 = vld [vmem:[#allocation3 + $0x90] sm:$0xff]  ;;  %v19930_v21 = vld [vmem:[#allocation3 + $0x108] sm:$0xff] }
 0x3c7   : > { %4307 = vst [vmem:[#allocation3 + $0x139] sm:$0xff] %v19779_v34  ;;  %v4190_v42 = vadd.f32 %v19697_v63, %v4096_v41  ;;  %14895 = vmatprep.mubr.f32.mxu1 %v19779_v34  ;;  %v19897_v41 = vld [vmem:[#allocation3 + $0x98] sm:$0xff] }
 0x3c8   : > { %v19786_v44 = vmax.f32 %v4191_v37, 0.0  ;;  %14896 = vmatmul.mubr.f32.gmra.mrb[26].mxu1 %v19776_v33  ;;  %v16428_v37 = vpack.c.bf16 %v12898_v32, %v12897_v31  ;;  %v16436_v31 = vpack.c.bf16 %v12902_v25, %v12901_v23  ;;  %v12903_v32 = vld [vmem:[%s23502_s3 + $0x1a0] sm:$0xff]  ;;  %v12906_v23 = vld [vmem:[%s23502_s3 + $0x1b8] sm:$0xff] }
 0x3c9   : > { %v19789_v7 = vmax.f32 %v4190_v42, 0.0  ;;  %v14820_v55 = vpop.f32.mrb[28].mxu0  ;;  %v12899_v42 = vld [vmem:[%s23502_s3 + $0x180] sm:$0xff] }
 0x3ca   : > { %4310 = vst [vmem:[#allocation3 + $0x159] sm:$0xff] %v19786_v44  ;;  %v4193_v57 = vadd.f32 %v14820_v55, %v19697_v63  ;;  %v4106_v0 = vpop.f32.mrb[29].mxu0  ;;  %v12900_v55 = vld [vmem:[%s23502_s3 + $0x188] sm:$0xff] }
 0x3cb   : > { %4309 = vst [vmem:[#allocation3 + $0x151] sm:$0xff] %v19789_v7  ;;  %v4192_v1 = vadd.f32 %v19697_v63, %v4106_v0  ;;  %14898 = vmatprep.mubr.f32.mxu1 %v19789_v7  ;;  %v16432_v0 = vpack.c.bf16 %v12900_v55, %v12899_v42  ;;  %v19972_v42 = vld [vmem:[#allocation3 + $0x1a] sm:$0xff]  ;;  %v19984_v25 = vld [vmem:[#allocation3 + $0x32] sm:$0xff] }
 0x3cc   : > { %v19796_v2 = vmax.f32 %v4193_v57, 0.0  ;;  %14899 = vmatmul.mubr.f32.gmra.mrb[28].mxu1 %v19786_v44  ;;  %v19906_v57 = vld [vmem:[#allocation3 + $0xa8] sm:$0xff] }
 0x3cd   : > { %v19799_v3 = vmax.f32 %v4192_v1, 0.0  ;;  %v14823_v4 = vpop.f32.mrb[30].mxu0  ;;  %v19909_v1 = vld [vmem:[#allocation3 + $0xb0] sm:$0xff] }
 0x3ce   : > { %4312 = vst [vmem:[#allocation3 + $0x171] sm:$0xff] %v19796_v2  ;;  %v19803_v9 = vadd.f32 %v14823_v4, %v19697_v63  ;;  %v4116_v5 = vpop.f32.mrb[31].mxu0  ;;  %v19912_v4 = vld [vmem:[#allocation3 + $0xc0] sm:$0xff] }
 0x3cf   : > { %4311 = vst [vmem:[#allocation3 + $0x169] sm:$0xff] %v19799_v3  ;;  %v19807_v8 = vadd.f32 %v19697_v63, %v4116_v5  ;;  %14901 = vmatprep.mubr.f32.mxu1 %v19799_v3  ;;  %v16404_v63 = vpack.c.bf16 %v12886_v15, %v12885_v12  ;;  %v19915_v5 = vld [vmem:[#allocation3 + $0xc8] sm:$0xff]  ;;  %v19918_v12 = vld [vmem:[#allocation3 + $0xd8] sm:$0xff]  ;;  %v19921_v15 = vld [vmem:[#allocation3 + $0xe0] sm:$0xff] }
 0x3d0   : > { %v23579_v22 = vmax.f32 %v19803_v9, 0.0  ;;  %14902 = vmatmul.mubr.f32.gmra.mrb[30].mxu1 %v19796_v2  ;;  %v19945_v49 = vld [vmem:[#allocation3 + $0x140] sm:$0xff] }
 0x3d1   : > { %v23580_v24 = vmax.f32 %v19807_v8, 0.0  ;;  %14936 = vmatprep.mubr.f32.mxu1 %v19819_v10 }
 0x3d2   : > { %4314 = vst [vmem:[#allocation3 + $0x189] sm:$0xff] %v23579_v22  ;;  %v19948_v53 = vld [vmem:[#allocation3 + $0x150] sm:$0xff]  ;;  %v19975_v22 = vld [vmem:[#allocation3 + $0x22] sm:$0xff] }
 0x3d3   : > { %4313 = vst [vmem:[#allocation3 + $0x181] sm:$0xff] %v23580_v24  ;;  %v19996_v24 = vld [vmem:[#allocation3 + $0x4a] sm:$0xff] }
 0x3d4   : > { %14937 = vmatmul.mubr.f32.vlgmr.msra.gmra.mrb[0].mxu1 %v19819_v10  ;;  %23783 = vst [vmem:[#allocation20_spill] sm:$0xff] %v19996_v24  ;;  %v12910_v10 = vld [vmem:[%s23502_s3 + $0x1d8] sm:$0xff] }
 0x3d5   : > { %14939 = vmatprep.mubr.f32.mxu1 %v19833_v39  ;;  %16403 = vmatpush3.bf16.msra.mxu1 %v19691_v18  ;;  %v16412_v18 = vpack.c.bf16 %v12890_v45, %v12889_v48  ;;  %v19936_v48 = vld [vmem:[#allocation3 + $0x120] sm:$0xff]  ;;  %v19939_v45 = vld [vmem:[#allocation3 + $0x128] sm:$0xff] }
 0x3d6   : > { %16405 = vmatprep.subr.bf16.mxu1 %v16404_v63  ;;  %v19954_v16 = vld [vmem:[#allocation3 + $0x168] sm:$0xff] }
 0x3d7   : > { %23780 = vst [vmem:[#allocation17_spill] sm:$0xff] %v19954_v16 }
 0x3d8   : > { %14940 = vmatmul.mubr.f32.gmra.mrb[2].mxu1 %v19837_v43 }
 0x3d9   : > { %14942 = vmatprep.mubr.f32.mxu1 %v19846_v46  ;;  %16407 = vmatpush3.bf16.msra.mxu1 %v16404_v63  ;;  %v19924_v63 = vld [vmem:[#allocation3 + $0xf0] sm:$0xff] }
 0x3da   : > { %16409 = vmatprep.subr.bf16.mxu1 %v16408_v40 }
 0x3dc   : > { %14943 = vmatmul.mubr.f32.gmra.mrb[4].mxu1 %v19849_v47 }
 0x3dd   : > { %14945 = vmatprep.mubr.f32.mxu1 %v19858_v54  ;;  %16411 = vmatpush3.bf16.msra.mxu1 %v16408_v40  ;;  %v19933_v40 = vld [vmem:[#allocation3 + $0x110] sm:$0xff] }
 0x3de   : > { %16413 = vmatprep.subr.bf16.mxu1 %v16412_v18 }
 0x3e0   : > { %14946 = vmatmul.mubr.f32.gmra.mrb[6].mxu1 %v19861_v17 }
 0x3e1   : > { %14948 = vmatprep.mubr.f32.mxu1 %v19870_v56  ;;  %16415 = vmatpush3.bf16.msra.mxu1 %v16412_v18  ;;  %v19942_v18 = vld [vmem:[#allocation3 + $0x138] sm:$0xff] }
 0x3e2   : > { %16417 = vmatprep.subr.bf16.mxu1 %v16416_v14 }
 0x3e4   : > { %14949 = vmatmul.mubr.f32.gmra.mrb[8].mxu1 %v19873_v62 }
 0x3e5   : > { %14951 = vmatprep.mubr.f32.mxu1 %v19882_v26  ;;  %16419 = vmatpush3.bf16.msra.mxu1 %v16416_v14  ;;  %v19951_v14 = vld [vmem:[#allocation3 + $0x158] sm:$0xff] }
 0x3e6   : > { %16421 = vmatprep.subr.bf16.mxu1 %v16420_v58 }
 0x3e8   : > { %14952 = vmatmul.mubr.f32.gmra.mrb[10].mxu1 %v19885_v30 }
 0x3e9   : > { %14954 = vmatprep.mubr.f32.mxu1 %v19894_v36  ;;  %16423 = vmatpush3.bf16.msra.mxu1 %v16420_v58  ;;  %v19957_v58 = vld [vmem:[#allocation3 + $0x170] sm:$0xff] }
 0x3ea   : > { %16425 = vmatprep.subr.bf16.mxu1 %v16424_v29  ;;  %23781 = vst [vmem:[#allocation18_spill] sm:$0xff] %v19957_v58 }
 0x3ec   : > { %14955 = vmatmul.mubr.f32.gmra.mrb[12].mxu1 %v19897_v41 }
 0x3ed   : > { %14957 = vmatprep.mubr.f32.mxu1 %v19906_v57  ;;  %16427 = vmatpush3.bf16.msra.mxu1 %v16424_v29  ;;  %v4863_v29 = vld [vmem:[#allocation3 + $0xa] sm:$0xff] }
 0x3ee   : > { %16429 = vmatprep.subr.bf16.mxu1 %v16428_v37 }
 0x3f0   : > { %14958 = vmatmul.mubr.f32.gmra.mrb[14].mxu1 %v19909_v1 }
 0x3f1   : > { %14960 = vmatprep.mubr.f32.mxu1 %v19912_v4  ;;  %16431 = vmatpush3.bf16.msra.mxu1 %v16428_v37  ;;  %v12904_v37 = vld [vmem:[%s23502_s3 + $0x1a8] sm:$0xff] }
 0x3f2   : > { %16433 = vmatprep.subr.bf16.mxu1 %v16432_v0  ;;  %v16440_v55 = vpack.c.bf16 %v12904_v37, %v12903_v32  ;;  %v12907_v32 = vld [vmem:[%s23502_s3 + $0x1c0] sm:$0xff]  ;;  %v12908_v37 = vld [vmem:[%s23502_s3 + $0x1c8] sm:$0xff] }
 0x3f4   : > { %14961 = vmatmul.mubr.f32.gmra.mrb[16].mxu1 %v19915_v5 }
 0x3f5   : > { %14963 = vmatprep.mubr.f32.mxu1 %v19918_v12 }
 0x3f8   : > { %14964 = vmatmul.mubr.f32.gmra.mrb[18].mxu1 %v19921_v15 }
 0x3f9   : > { %14966 = vmatprep.mubr.f32.mxu1 %v19924_v63 }
 0x3fc   : > { %14967 = vmatmul.mubr.f32.gmra.mrb[20].mxu1 %v19927_v11 }
 0x3fd   : > { %14969 = vmatprep.mubr.f32.mxu1 %v19930_v21 }
 0x400   : > { %14970 = vmatmul.mubr.f32.gmra.mrb[22].mxu1 %v19933_v40 }
 0x401   : > { %14972 = vmatprep.mubr.f32.mxu1 %v19936_v48 }
 0x404   : > { %14973 = vmatmul.mubr.f32.gmra.mrb[24].mxu1 %v19939_v45 }
 0x405   : > { %14975 = vmatprep.mubr.f32.mxu1 %v19942_v18 }
 0x408   : > { %14976 = vmatmul.mubr.f32.gmra.mrb[26].mxu1 %v19945_v49 }
 0x409   : > { %14978 = vmatprep.mubr.f32.mxu1 %v19948_v53 }
 0x40c   : > { %14979 = vmatmul.mubr.f32.gmra.mrb[28].mxu1 %v19951_v14 }
 0x40d   : > { %14981 = vmatprep.mubr.f32.mxu1 %v19954_v16 }
 0x410   : > { %14982 = vmatmul.mubr.f32.gmra.mrb[30].mxu1 %v19957_v58 }
 0x411   : > { %15016 = vmatprep.mubr.f32.mxu1 %v4862_v6  ;;  %v12905_v6 = vld [vmem:[%s23502_s3 + $0x1b0] sm:$0xff] }
 0x414   : > { %15017 = vmatmul.mubr.f32.vlgmr.msra.gmra.mrb[0].mxu1 %v4863_v29  ;;  %v19987_v29 = vld [vmem:[#allocation3 + $0x3a] sm:$0xff] }
 0x415   : > { %15019 = vmatprep.mubr.f32.mxu1 %v19972_v42  ;;  %16435 = vmatpush3.bf16.msra.mxu1 %v16432_v0  ;;  %v16444_v0 = vpack.c.bf16 %v12906_v23, %v12905_v6  ;;  %23782 = vst [vmem:[#allocation19_spill] sm:$0xff] %v19987_v29  ;;  %v19999_v6 = vld [vmem:[#allocation3 + $0x52] sm:$0xff]  ;;  %v12909_v23 = vld [vmem:[%s23502_s3 + $0x1d0] sm:$0xff] }
 0x416   : > { %16437 = vmatprep.subr.bf16.mxu1 %v16436_v31  ;;  %23784 = vst [vmem:[#allocation21_spill] sm:$0xff] %v19999_v6 }
 0x418   : > { %15020 = vmatmul.mubr.f32.gmra.mrb[2].mxu1 %v19975_v22 }
 0x419   : > { %15022 = vmatprep.mubr.f32.mxu1 %v19984_v25  ;;  %16439 = vmatpush3.bf16.msra.mxu1 %v16436_v31  ;;  %v16448_v31 = vpack.c.bf16 %v12908_v37, %v12907_v32  ;;  %v20011_v32 = vld [vmem:[#allocation3 + $0x6a] sm:$0xff] }
 0x41a   : > { %16441 = vmatprep.subr.bf16.mxu1 %v16440_v55  ;;  %23786 = vst [vmem:[#allocation23_spill] sm:$0xff] %v20011_v32  ;;  %v12911_v37 = vld [vmem:[%s23502_s3 + $0x1e0] sm:$0xff] }
 0x41c   : > { %15023 = vmatmul.mubr.f32.gmra.mrb[4].mxu1 %v19987_v29  ;;  %v20008_v29 = vld [vmem:[#allocation3 + $0x62] sm:$0xff] }
 0x41d   : > { %15025 = vmatprep.mubr.f32.mxu1 %v19996_v24  ;;  %16443 = vmatpush3.bf16.msra.mxu1 %v16440_v55  ;;  %23785 = vst [vmem:[#allocation22_spill] sm:$0xff] %v20008_v29  ;;  %v16452_v55 = vpack.c.bf16 %v12910_v10, %v12909_v23  ;;  %v12912_v24 = vld [vmem:[%s23502_s3 + $0x1e8] sm:$0xff]  ;;  %v20023_v10 = vld [vmem:[#allocation3 + $0x82] sm:$0xff] }
 0x41e   : > { %16445 = vmatprep.subr.bf16.mxu1 %v16444_v0  ;;  %23788 = vst [vmem:[#allocation25_spill] sm:$0xff] %v20023_v10  ;;  %v12913_v23 = vld [vmem:[%s23502_s3 + $0x1f0] sm:$0xff] }
 0x420   : > { %15026 = vmatmul.mubr.f32.gmra.mrb[6].mxu1 %v19999_v6  ;;  %v20020_v6 = vld [vmem:[#allocation3 + $0x7a] sm:$0xff] }
 0x421   : > { %15028 = vmatprep.mubr.f32.mxu1 %v20008_v29  ;;  %16447 = vmatpush3.bf16.msra.mxu1 %v16444_v0  ;;  %23787 = vst [vmem:[#allocation24_spill] sm:$0xff] %v20020_v6  ;;  %v16456_v0 = vpack.c.bf16 %v12912_v24, %v12911_v37  ;;  %v12914_v29 = vld [vmem:[%s23502_s3 + $0x1f8] sm:$0xff]  ;;  %v20035_v24 = vld [vmem:[#allocation3 + $0x9a] sm:$0xff]  ;;  %v12915_v37 = vld [vmem:[%s23502_s3 + $0x200] sm:$0xff] }
 0x422   : > { %16449 = vmatprep.subr.bf16.mxu1 %v16448_v31  ;;  %23790 = vst [vmem:[#allocation27_spill] sm:$0xff] %v20035_v24 }
 0x424   : > { %15029 = vmatmul.mubr.f32.gmra.mrb[8].mxu1 %v20011_v32  ;;  %v20032_v32 = vld [vmem:[#allocation3 + $0x92] sm:$0xff] }
 0x425   : > { %15031 = vmatprep.mubr.f32.mxu1 %v20020_v6  ;;  %16451 = vmatpush3.bf16.msra.mxu1 %v16448_v31  ;;  %23789 = vst [vmem:[#allocation26_spill] sm:$0xff] %v20032_v32  ;;  %v16460_v31 = vpack.c.bf16 %v12914_v29, %v12913_v23  ;;  %v12916_v6 = vld [vmem:[%s23502_s3 + $0x208] sm:$0xff]  ;;  %v20050_v23 = vld [vmem:[#allocation3 + $0xc2] sm:$0xff] }
 0x426   : > { %16453 = vmatprep.subr.bf16.mxu1 %v16452_v55  ;;  %v20047_v29 = vld [vmem:[#allocation3 + $0xb2] sm:$0xff]  ;;  %23791 = vst [vmem:[#allocation28_spill] sm:$0xff] %v20050_v23 }
 0x428   : > { %15032 = vmatmul.mubr.f32.gmra.mrb[10].mxu1 %v20023_v10  ;;  %v20044_v10 = vld [vmem:[#allocation3 + $0xaa] sm:$0xff] }
 0x429   : > { %15034 = vmatprep.mubr.f32.mxu1 %v20032_v32  ;;  %16455 = vmatpush3.bf16.msra.mxu1 %v16452_v55  ;;  %v16464_v55 = vpack.c.bf16 %v12916_v6, %v12915_v37  ;;  %v20053_v32 = vld [vmem:[#allocation3 + $0xca] sm:$0xff]  ;;  %v20062_v6 = vld [vmem:[#allocation3 + $0xf2] sm:$0xff]  ;;  %v20065_v37 = vld [vmem:[#allocation3 + $0xfa] sm:$0xff] }
 0x42a   : > { %16457 = vmatprep.subr.bf16.mxu1 %v16456_v0  ;;  %23792 = vst [vmem:[#allocation29_spill] sm:$0xff] %v20053_v32  ;;  %23795 = vst [vmem:[#allocation32_spill] sm:$0xff] %v20062_v6 }
 0x42b   : > { %23796 = vst [vmem:[#allocation33_spill] sm:$0xff] %v20065_v37 }
 0x42c   : > { %15035 = vmatmul.mubr.f32.gmra.mrb[12].mxu1 %v20035_v24  ;;  %v20056_v24 = vld [vmem:[#allocation3 + $0xda] sm:$0xff] }
 0x42d   : > { %15037 = vmatprep.mubr.f32.mxu1 %v20044_v10  ;;  %16459 = vmatpush3.bf16.msra.mxu1 %v16456_v0  ;;  %23793 = vst [vmem:[#allocation30_spill] sm:$0xff] %v20056_v24  ;;  %v20059_v0 = vld [vmem:[#allocation3 + $0xe2] sm:$0xff] }
 0x42e   : > { %16461 = vmatprep.subr.bf16.mxu1 %v16460_v31  ;;  %23794 = vst [vmem:[#allocation31_spill] sm:$0xff] %v20059_v0 }
 0x430   : > { %15038 = vmatmul.mubr.f32.gmra.mrb[14].mxu1 %v20047_v29 }
 0x431   : > { %15040 = vmatprep.mubr.f32.mxu1 %v20050_v23  ;;  %16463 = vmatpush3.bf16.msra.mxu1 %v16460_v31  ;;  %v20068_v31 = vld [vmem:[#allocation3 + $0x10a] sm:$0xff] }
 0x432   : > { %16465 = vmatprep.subr.bf16.mxu1 %v16464_v55  ;;  %23797 = vst [vmem:[#allocation34_spill] sm:$0xff] %v20068_v31 }
 0x434   : > { %15041 = vmatmul.mubr.f32.gmra.mrb[16].mxu1 %v20053_v32  ;;  %v20071_v32 = vld [vmem:[#allocation3 + $0x112] sm:$0xff] }
 0x435   : > { %15043 = vmatprep.mubr.f32.mxu1 %v20056_v24  ;;  %23798 = vst [vmem:[#allocation35_spill] sm:$0xff] %v20071_v32  ;;  %v20074_v24 = vld [vmem:[#allocation3 + $0x122] sm:$0xff] }
 0x436   : > { %23799 = vst [vmem:[#allocation36_spill] sm:$0xff] %v20074_v24 }
 0x438   : > { %15044 = vmatmul.mubr.f32.gmra.mrb[18].mxu1 %v20059_v0  ;;  %v20077_v0 = vld [vmem:[#allocation3 + $0x12a] sm:$0xff] }
 0x439   : > { %15046 = vmatprep.mubr.f32.mxu1 %v20062_v6  ;;  %23800 = vst [vmem:[#allocation37_spill] sm:$0xff] %v20077_v0  ;;  %v20080_v6 = vld [vmem:[#allocation3 + $0x13a] sm:$0xff] }
 0x43a   : > { %23801 = vst [vmem:[#allocation38_spill] sm:$0xff] %v20080_v6 }
 0x43c   : > { %15047 = vmatmul.mubr.f32.gmra.mrb[20].mxu1 %v20065_v37  ;;  %v20083_v37 = vld [vmem:[#allocation3 + $0x142] sm:$0xff] }
 0x43d   : > { %15049 = vmatprep.mubr.f32.mxu1 %v20068_v31  ;;  %23802 = vst [vmem:[#allocation39_spill] sm:$0xff] %v20083_v37  ;;  %v20086_v31 = vld [vmem:[#allocation3 + $0x152] sm:$0xff] }
 0x43e   : > { %23803 = vst [vmem:[#allocation40_spill] sm:$0xff] %v20086_v31 }
 0x440   : > { %15050 = vmatmul.mubr.f32.gmra.mrb[22].mxu1 %v20071_v32  ;;  %v20089_v32 = vld [vmem:[#allocation3 + $0x15a] sm:$0xff] }
 0x441   : > { %15052 = vmatprep.mubr.f32.mxu1 %v20074_v24  ;;  %23804 = vst [vmem:[#allocation41_spill] sm:$0xff] %v20089_v32  ;;  %v20092_v24 = vld [vmem:[#allocation3 + $0x16a] sm:$0xff] }
 0x442   : > { %23805 = vst [vmem:[#allocation42_spill] sm:$0xff] %v20092_v24 }
 0x444   : > { %15053 = vmatmul.mubr.f32.gmra.mrb[24].mxu1 %v20077_v0  ;;  %v20095_v0 = vld [vmem:[#allocation3 + $0x172] sm:$0xff] }
 0x445   : > { %15055 = vmatprep.mubr.f32.mxu1 %v20080_v6  ;;  %v12917_v6 = vld [vmem:[%s23502_s3 + $0x210] sm:$0xff] }
 0x448   : > { %15056 = vmatmul.mubr.f32.gmra.mrb[26].mxu1 %v20083_v37  ;;  %v12918_v37 = vld [vmem:[%s23502_s3 + $0x218] sm:$0xff] }
 0x449   : > { %15058 = vmatprep.mubr.f32.mxu1 %v20086_v31  ;;  %v16468_v31 = vpack.c.bf16 %v12918_v37, %v12917_v6  ;;  %v12922_v6 = vld [vmem:[%s23502_s3 + $0x238] sm:$0xff]  ;;  %v12925_v37 = vld [vmem:[%s23502_s3 + $0x250] sm:$0xff] }
 0x44c   : > { %15059 = vmatmul.mubr.f32.gmra.mrb[28].mxu1 %v20089_v32  ;;  %v12919_v32 = vld [vmem:[%s23502_s3 + $0x220] sm:$0xff] }
 0x44d   : > { %15061 = vmatprep.mubr.f32.mxu1 %v20092_v24  ;;  %v12920_v24 = vld [vmem:[%s23502_s3 + $0x228] sm:$0xff] }
 0x44e   : > { %v16472_v23 = vpack.c.bf16 %v12920_v24, %v12919_v32  ;;  %v12924_v32 = vld [vmem:[%s23502_s3 + $0x248] sm:$0xff] }
 0x450   : > { %15062 = vmatmul.mubr.f32.gmra.mrb[30].mxu1 %v20095_v0 }
 0x451   : > { %15096 = vmatprep.mubr.f32.mxu1 %v19833_v39  ;;  %v12921_v39 = vld [vmem:[%s23502_s3 + $0x230] sm:$0xff] }
 0x454   : > { %15097 = vmatmul.mubr.f32.vlgmr.msra.gmra.mrb[0].mxu1 %v19837_v43  ;;  %v16476_v43 = vpack.c.bf16 %v12922_v6, %v12921_v39  ;;  %v12928_v6 = vld [vmem:[%s23502_s3 + $0x268] sm:$0xff] }
 0x455   : > { %15099 = vmatprep.mubr.f32.mxu1 %v19846_v46  ;;  %16467 = vmatpush3.bf16.msra.mxu1 %v16464_v55  ;;  %v12923_v55 = vld [vmem:[%s23502_s3 + $0x240] sm:$0xff] }
 0x456   : > { %16469 = vmatprep.subr.bf16.mxu1 %v16468_v31  ;;  %v16480_v24 = vpack.c.bf16 %v12924_v32, %v12923_v55  ;;  %v12930_v32 = vld [vmem:[%s23502_s3 + $0x278] sm:$0xff] }
 0x458   : > { %15100 = vmatmul.mubr.f32.gmra.mrb[2].mxu1 %v19849_v47 }
 0x459   : > { %15102 = vmatprep.mubr.f32.mxu1 %v19858_v54  ;;  %16471 = vmatpush3.bf16.msra.mxu1 %v16468_v31  ;;  %v12926_v31 = vld [vmem:[%s23502_s3 + $0x258] sm:$0xff] }
 0x45a   : > { %16473 = vmatprep.subr.bf16.mxu1 %v16472_v23  ;;  %v16484_v39 = vpack.c.bf16 %v12926_v31, %v12925_v37  ;;  %v12932_v31 = vld [vmem:[%s23502_s3 + $0x288] sm:$0xff] }
 0x45c   : > { %15103 = vmatmul.mubr.f32.gmra.mrb[4].mxu1 %v19861_v17 }
 0x45d   : > { %15105 = vmatprep.mubr.f32.mxu1 %v19870_v56  ;;  %16475 = vmatpush3.bf16.msra.mxu1 %v16472_v23  ;;  %v12927_v23 = vld [vmem:[%s23502_s3 + $0x260] sm:$0xff] }
 0x45e   : > { %16477 = vmatprep.subr.bf16.mxu1 %v16476_v43  ;;  %v16488_v55 = vpack.c.bf16 %v12928_v6, %v12927_v23  ;;  %v20179_v6 = vld [vmem:[#allocation3 + $0x188] sm:$0xff] }
 0x45f   : > { %23807 = vst [vmem:[#allocation44_spill] sm:$0xff] %v20179_v6 }
 0x460   : > { %15106 = vmatmul.mubr.f32.gmra.mrb[6].mxu1 %v19873_v62 }
 0x461   : > { %15108 = vmatprep.mubr.f32.mxu1 %v19882_v26  ;;  %16479 = vmatpush3.bf16.msra.mxu1 %v16476_v43  ;;  %v12929_v43 = vld [vmem:[%s23502_s3 + $0x270] sm:$0xff] }
 0x462   : > { %16481 = vmatprep.subr.bf16.mxu1 %v16480_v24  ;;  %v16492_v37 = vpack.c.bf16 %v12930_v32, %v12929_v43  ;;  %v12934_v43 = vld [vmem:[%s23502_s3 + $0x298] sm:$0xff]  ;;  %v5474_v32 = vld [vmem:[#allocation3 + $0x19] sm:$0xff] }
 0x464   : > { %15109 = vmatmul.mubr.f32.gmra.mrb[8].mxu1 %v19885_v30 }
 0x465   : > { %15111 = vmatprep.mubr.f32.mxu1 %v19894_v36  ;;  %16483 = vmatpush3.bf16.msra.mxu1 %v16480_v24  ;;  %v12931_v24 = vld [vmem:[%s23502_s3 + $0x280] sm:$0xff] }
 0x466   : > { %16485 = vmatprep.subr.bf16.mxu1 %v16484_v39  ;;  %v16496_v23 = vpack.c.bf16 %v12932_v31, %v12931_v24  ;;  %v5475_v24 = vld [vmem:[#allocation3 + $0x21] sm:$0xff]  ;;  %v12935_v31 = vld [vmem:[%s23502_s3 + $0x2a0] sm:$0xff] }
 0x468   : > { %15112 = vmatmul.mubr.f32.gmra.mrb[10].mxu1 %v19897_v41 }
 0x469   : > { %15114 = vmatprep.mubr.f32.mxu1 %v19906_v57  ;;  %16487 = vmatpush3.bf16.msra.mxu1 %v16484_v39  ;;  %v20176_v39 = vld [vmem:[#allocation3 + $0x180] sm:$0xff] }
 0x46a   : > { %16489 = vmatprep.subr.bf16.mxu1 %v16488_v55  ;;  %23806 = vst [vmem:[#allocation43_spill] sm:$0xff] %v20176_v39 }
 0x46c   : > { %15115 = vmatmul.mubr.f32.gmra.mrb[12].mxu1 %v19909_v1 }
 0x46d   : > { %15117 = vmatprep.mubr.f32.mxu1 %v19912_v4  ;;  %16491 = vmatpush3.bf16.msra.mxu1 %v16488_v55  ;;  %v12933_v55 = vld [vmem:[%s23502_s3 + $0x290] sm:$0xff] }
 0x46e   : > { %16493 = vmatprep.subr.bf16.mxu1 %v16492_v37 }
 0x470   : > { %15118 = vmatmul.mubr.f32.gmra.mrb[14].mxu1 %v19915_v5 }
 0x471   : > { %15120 = vmatprep.mubr.f32.mxu1 %v19918_v12  ;;  %16495 = vmatpush3.bf16.msra.mxu1 %v16492_v37  ;;  %v16500_v37 = vpack.c.bf16 %v12934_v43, %v12933_v55  ;;  %v12937_v55 = vld [vmem:[%s23502_s3 + $0x2b0] sm:$0xff]  ;;  %v12938_v43 = vld [vmem:[%s23502_s3 + $0x2b8] sm:$0xff] }
 0x472   : > { %16497 = vmatprep.subr.bf16.mxu1 %v16496_v23 }
 0x474   : > { %15121 = vmatmul.mubr.f32.gmra.mrb[16].mxu1 %v19921_v15 }
 0x475   : > { %15123 = vmatprep.mubr.f32.mxu1 %v19924_v63 }
 0x478   : > { %15124 = vmatmul.mubr.f32.gmra.mrb[18].mxu1 %v19927_v11 }
 0x479   : > { %15126 = vmatprep.mubr.f32.mxu1 %v19930_v21 }
 0x47c   : > { %15127 = vmatmul.mubr.f32.gmra.mrb[20].mxu1 %v19933_v40 }
 0x47d   : > { %15129 = vmatprep.mubr.f32.mxu1 %v19936_v48 }
 0x480   : > { %15130 = vmatmul.mubr.f32.gmra.mrb[22].mxu1 %v19939_v45 }
 0x481   : > { %15132 = vmatprep.mubr.f32.mxu1 %v19942_v18 }
 0x484   : > { %15133 = vmatmul.mubr.f32.gmra.mrb[24].mxu1 %v19945_v49 }
 0x485   : > { %15135 = vmatprep.mubr.f32.mxu1 %v19948_v53 }
 0x488   : > { %15136 = vmatmul.mubr.f32.gmra.mrb[26].mxu1 %v19951_v14 }
 0x489   : > { %15138 = vmatprep.mubr.f32.mxu1 %v19954_v16  ;;  %v20197_v16 = vld [vmem:[#allocation3 + $0x39] sm:$0xff] }
 0x48a   : > { %23808 = vst [vmem:[#allocation45_spill] sm:$0xff] %v20197_v16 }
 0x48c   : > { %15139 = vmatmul.mubr.f32.gmra.mrb[28].mxu1 %v19957_v58  ;;  %v20194_v58 = vld [vmem:[#allocation3 + $0x31] sm:$0xff] }
 0x48d   : > { %15141 = vmatprep.mubr.f32.mxu1 %v20176_v39  ;;  %v12936_v39 = vld [vmem:[%s23502_s3 + $0x2a8] sm:$0xff] }
 0x490   : > { %15142 = vmatmul.mubr.f32.gmra.mrb[30].mxu1 %v20179_v6  ;;  %v16504_v6 = vpack.c.bf16 %v12936_v39, %v12935_v31  ;;  %v20209_v39 = vld [vmem:[#allocation3 + $0x51] sm:$0xff] }
 0x491   : > { %15176 = vmatprep.mubr.f32.mxu1 %v5474_v32  ;;  %v20206_v32 = vld [vmem:[#allocation3 + $0x49] sm:$0xff]  ;;  %23810 = vst [vmem:[#allocation47_spill] sm:$0xff] %v20209_v39  ;;  %v12940_v31 = vld [vmem:[%s23502_s3 + $0x2c8] sm:$0xff] }
 0x492   : > { %23809 = vst [vmem:[#allocation46_spill] sm:$0xff] %v20206_v32 }
 0x494   : > { %15177 = vmatmul.mubr.f32.vlgmr.msra.gmra.mrb[0].mxu1 %v5475_v24  ;;  %v12939_v24 = vld [vmem:[%s23502_s3 + $0x2c0] sm:$0xff] }
 0x495   : > { %15179 = vmatprep.mubr.f32.mxu1 %v20194_v58  ;;  %16499 = vmatpush3.bf16.msra.mxu1 %v16496_v23  ;;  %v16508_v23 = vpack.c.bf16 %v12938_v43, %v12937_v55  ;;  %v20221_v55 = vld [vmem:[#allocation3 + $0x69] sm:$0xff]  ;;  %v12941_v43 = vld [vmem:[%s23502_s3 + $0x2d0] sm:$0xff] }
 0x496   : > { %16501 = vmatprep.subr.bf16.mxu1 %v16500_v37 }
 0x498   : > { %15180 = vmatmul.mubr.f32.gmra.mrb[2].mxu1 %v20197_v16  ;;  %v20218_v16 = vld [vmem:[#allocation3 + $0x61] sm:$0xff] }
 0x499   : > { %15182 = vmatprep.mubr.f32.mxu1 %v20206_v32  ;;  %16503 = vmatpush3.bf16.msra.mxu1 %v16500_v37  ;;  %23811 = vst [vmem:[#allocation48_spill] sm:$0xff] %v20218_v16  ;;  %v16512_v37 = vpack.c.bf16 %v12940_v31, %v12939_v24  ;;  %v12942_v32 = vld [vmem:[%s23502_s3 + $0x2d8] sm:$0xff]  ;;  %v12943_v31 = vld [vmem:[%s23502_s3 + $0x2e0] sm:$0xff] }
 0x49a   : > { %16505 = vmatprep.subr.bf16.mxu1 %v16504_v6  ;;  %v20233_v24 = vld [vmem:[#allocation3 + $0x81] sm:$0xff] }
 0x49c   : > { %15183 = vmatmul.mubr.f32.gmra.mrb[4].mxu1 %v20209_v39  ;;  %v20230_v39 = vld [vmem:[#allocation3 + $0x79] sm:$0xff] }
 0x49d   : > { %15185 = vmatprep.mubr.f32.mxu1 %v20218_v16  ;;  %16507 = vmatpush3.bf16.msra.mxu1 %v16504_v6  ;;  %23812 = vst [vmem:[#allocation15_spill] sm:$0xff] %v20230_v39  ;;  %v16516_v6 = vpack.c.bf16 %v12942_v32, %v12941_v43  ;;  %v12944_v16 = vld [vmem:[%s23502_s3 + $0x2e8] sm:$0xff]  ;;  %v12945_v32 = vld [vmem:[%s23502_s3 + $0x2f0] sm:$0xff]  ;;  %v12946_v43 = vld [vmem:[%s23502_s3 + $0x2f8] sm:$0xff] }
 0x49e   : > { %16509 = vmatprep.subr.bf16.mxu1 %v16508_v23 }
 0x4a0   : > { %15186 = vmatmul.mubr.f32.gmra.mrb[6].mxu1 %v20221_v55 }
 0x4a1   : > { %15188 = vmatprep.mubr.f32.mxu1 %v20230_v39  ;;  %16511 = vmatpush3.bf16.msra.mxu1 %v16508_v23  ;;  %v16520_v39 = vpack.c.bf16 %v12944_v16, %v12943_v31  ;;  %v20243_v23 = vld [vmem:[#allocation3 + $0x99] sm:$0xff]  ;;  %v12947_v16 = vld [vmem:[%s23502_s3 + $0x300] sm:$0xff] }
 0x4a2   : > { %16513 = vmatprep.subr.bf16.mxu1 %v16512_v37 }
 0x4a4   : > { %15189 = vmatmul.mubr.f32.gmra.mrb[8].mxu1 %v20233_v24 }
 0x4a5   : > { %15191 = vmatprep.mubr.f32.mxu1 %v19711_v13  ;;  %16515 = vmatpush3.bf16.msra.mxu1 %v16512_v37  ;;  %v16524_v13 = vpack.c.bf16 %v12946_v43, %v12945_v32  ;;  %v12948_v37 = vld [vmem:[%s23502_s3 + $0x308] sm:$0xff]  ;;  %v23821_v32 = vld [vmem:[#allocation25_spill] sm:$0xff]  ;;  %v23822_v43 = vld [vmem:[#allocation26_spill] sm:$0xff] }
 0x4a6   : > { %16517 = vmatprep.subr.bf16.mxu1 %v16516_v6  ;;  %v16528_v31 = vpack.c.bf16 %v12948_v37, %v12947_v16  ;;  %v12961_v16 = vld [vmem:[%s23502_s3 + $0x370] sm:$0xff]  ;;  %v12962_v37 = vld [vmem:[%s23502_s3 + $0x378] sm:$0xff] }
 0x4a8   : > { %15192 = vmatmul.mubr.f32.gmra.mrb[10].mxu1 %v20243_v23 }
 0x4a9   : > { %15194 = vmatprep.mubr.f32.mxu1 %v19719_v38  ;;  %16519 = vmatpush3.bf16.msra.mxu1 %v16516_v6  ;;  %v12949_v38 = vld [vmem:[%s23502_s3 + $0x310] sm:$0xff]  ;;  %v12960_v6 = vld [vmem:[%s23502_s3 + $0x368] sm:$0xff] }
 0x4aa   : > { %16521 = vmatprep.subr.bf16.mxu1 %v16520_v39 }
 0x4ac   : > { %15195 = vmatmul.mubr.f32.gmra.mrb[12].mxu1 %v19717_v35  ;;  %v23813_v35 = vmax.f32 %v19807_v8, 0.0  ;;  %v12958_v8 = vld [vmem:[%s23502_s3 + $0x358] sm:$0xff] }
 0x4ad   : > { %15197 = vmatprep.mubr.f32.mxu1 %v19729_v61  ;;  %16523 = vmatpush3.bf16.msra.mxu1 %v16520_v39  ;;  %v23814_v61 = vmax.f32 %v19803_v9, 0.0  ;;  %v12957_v9 = vld [vmem:[%s23502_s3 + $0x350] sm:$0xff]  ;;  %v12959_v39 = vld [vmem:[%s23502_s3 + $0x360] sm:$0xff] }
 0x4ae   : > { %16525 = vmatprep.subr.bf16.mxu1 %v16524_v13 }
 0x4b0   : > { %15198 = vmatmul.mubr.f32.gmra.mrb[14].mxu1 %v19726_v51  ;;  %v12950_v51 = vld [vmem:[%s23502_s3 + $0x318] sm:$0xff] }
 0x4b1   : > { %15200 = vmatprep.mubr.f32.mxu1 %v19739_v52  ;;  %16527 = vmatpush3.bf16.msra.mxu1 %v16524_v13  ;;  %v12951_v52 = vld [vmem:[%s23502_s3 + $0x320] sm:$0xff]  ;;  %v16552_v13 = vpack.c.bf16 %v12960_v6, %v12959_v39  ;;  %v12970_v6 = vld [vmem:[%s23502_s3 + $0x3b8] sm:$0xff] }
 0x4b2   : > { %16529 = vmatprep.subr.bf16.mxu1 %v16528_v31 }
 0x4b4   : > { %15201 = vmatmul.mubr.f32.gmra.mrb[16].mxu1 %v19736_v50  ;;  %v16532_v50 = vpack.c.bf16 %v12950_v51, %v12949_v38  ;;  %v12963_v38 = vld [vmem:[%s23502_s3 + $0x380] sm:$0xff]  ;;  %v12964_v51 = vld [vmem:[%s23502_s3 + $0x388] sm:$0xff] }
 0x4b5   : > { %15203 = vmatprep.mubr.f32.mxu1 %v19749_v20 }
 0x4b8   : > { %15204 = vmatmul.mubr.f32.gmra.mrb[18].mxu1 %v19746_v19  ;;  %v12952_v19 = vld [vmem:[%s23502_s3 + $0x328] sm:$0xff] }
 0x4b9   : > { %15206 = vmatprep.mubr.f32.mxu1 %v19759_v60  ;;  %v16536_v20 = vpack.c.bf16 %v12952_v19, %v12951_v52  ;;  %v12954_v60 = vld [vmem:[%s23502_s3 + $0x338] sm:$0xff]  ;;  %v23827_v19 = vld [vmem:[#allocation31_spill] sm:$0xff] }
 0x4ba   : > { %v23825_v52 = vld [vmem:[#allocation29_spill] sm:$0xff] }
 0x4bc   : > { %15207 = vmatmul.mubr.f32.gmra.mrb[20].mxu1 %v19756_v59  ;;  %v12953_v59 = vld [vmem:[%s23502_s3 + $0x330] sm:$0xff] }
 0x4bd   : > { %15209 = vmatprep.mubr.f32.mxu1 %v19769_v28  ;;  %v23816_v28 = vld [vmem:[#allocation20_spill] sm:$0xff] }
 0x4c0   : > { %15210 = vmatmul.mubr.f32.gmra.mrb[22].mxu1 %v19766_v27  ;;  %v23815_v27 = vld [vmem:[#allocation19_spill] sm:$0xff] }
 0x4c1   : > { %15212 = vmatprep.mubr.f32.mxu1 %v19779_v34  ;;  %v12955_v34 = vld [vmem:[%s23502_s3 + $0x340] sm:$0xff] }
 0x4c4   : > { %15213 = vmatmul.mubr.f32.gmra.mrb[24].mxu1 %v19776_v33  ;;  %v16540_v33 = vpack.c.bf16 %v12954_v60, %v12953_v59  ;;  %v23829_v59 = vld [vmem:[#allocation33_spill] sm:$0xff]  ;;  %v23830_v60 = vld [vmem:[#allocation34_spill] sm:$0xff] }
 0x4c5   : > { %15215 = vmatprep.mubr.f32.mxu1 %v19789_v7  ;;  %v23817_v7 = vld [vmem:[#allocation21_spill] sm:$0xff] }
 0x4c8   : > { %15216 = vmatmul.mubr.f32.gmra.mrb[26].mxu1 %v19786_v44  ;;  %v12956_v44 = vld [vmem:[%s23502_s3 + $0x348] sm:$0xff] }
 0x4c9   : > { %15218 = vmatprep.mubr.f32.mxu1 %v19799_v3  ;;  %v16544_v3 = vpack.c.bf16 %v12956_v44, %v12955_v34  ;;  %v23835_v34 = vld [vmem:[#allocation39_spill] sm:$0xff]  ;;  %v23836_v44 = vld [vmem:[#allocation40_spill] sm:$0xff] }
 0x4cc   : > { %15219 = vmatmul.mubr.f32.gmra.mrb[28].mxu1 %v19796_v2  ;;  %v23818_v2 = vld [vmem:[#allocation22_spill] sm:$0xff] }
 0x4cd   : > { %15221 = vmatprep.mubr.f32.mxu1 %v23813_v35  ;;  %v16556_v35 = vpack.c.bf16 %v12962_v37, %v12961_v16  ;;  %v12978_v16 = vld [vmem:[%s23502_s3 + $0x3f8] sm:$0xff]  ;;  %v12980_v37 = vld [vmem:[%s23502_s3 + $0x408] sm:$0xff] }
 0x4d0   : > { %15222 = vmatmul.mubr.f32.gmra.mrb[30].mxu1 %v23814_v61  ;;  %v23824_v61 = vld [vmem:[#allocation28_spill] sm:$0xff] }
 0x4d1   : > { %15256 = vmatprep.mubr.f32.mxu1 %v19972_v42  ;;  %v23820_v42 = vld [vmem:[#allocation24_spill] sm:$0xff] }
 0x4d4   : > { %15257 = vmatmul.mubr.f32.vlgmr.msra.gmra.mrb[0].mxu1 %v19975_v22  ;;  %v23819_v22 = vld [vmem:[#allocation23_spill] sm:$0xff] }
 0x4d5   : > { %15259 = vmatprep.mubr.f32.mxu1 %v19984_v25  ;;  %16531 = vmatpush3.bf16.msra.mxu1 %v16528_v31  ;;  %v16548_v25 = vpack.c.bf16 %v12958_v8, %v12957_v9  ;;  %v23823_v31 = vld [vmem:[#allocation27_spill] sm:$0xff]  ;;  %v20361_v9 = vld [vmem:[#allocation3 + $0x18a] sm:$0xff]  ;;  %v12965_v8 = vld [vmem:[%s23502_s3 + $0x390] sm:$0xff] }
 0x4d6   : > { %16533 = vmatprep.subr.bf16.mxu1 %v16532_v50 }
 0x4d8   : > { %15260 = vmatmul.mubr.f32.gmra.mrb[2].mxu1 %v23815_v27  ;;  %v23832_v27 = vld [vmem:[#allocation36_spill] sm:$0xff] }
 0x4d9   : > { %15262 = vmatprep.mubr.f32.mxu1 %v23816_v28  ;;  %16535 = vmatpush3.bf16.msra.mxu1 %v16532_v50  ;;  %v16560_v50 = vpack.c.bf16 %v12964_v51, %v12963_v38  ;;  %v23833_v28 = vld [vmem:[#allocation37_spill] sm:$0xff]  ;;  %v13001_v38 = vld [vmem:[%s23504_s5 + $0xa8] sm:$0xff] }
 0x4da   : > { %16537 = vmatprep.subr.bf16.mxu1 %v16536_v20  ;;  %v23844_v51 = vld [vmem:[#allocation45_spill] sm:$0xff] }
 0x4dc   : > { %15263 = vmatmul.mubr.f32.gmra.mrb[4].mxu1 %v23817_v7  ;;  %v23837_v7 = vld [vmem:[#allocation41_spill] sm:$0xff] }
 0x4dd   : > { %15265 = vmatprep.mubr.f32.mxu1 %v23818_v2  ;;  %16539 = vmatpush3.bf16.msra.mxu1 %v16536_v20  ;;  %v23828_v20 = vld [vmem:[#allocation32_spill] sm:$0xff]  ;;  %v23838_v2 = vld [vmem:[#allocation42_spill] sm:$0xff] }
 0x4de   : > { %16541 = vmatprep.subr.bf16.mxu1 %v16540_v33 }
 0x4e0   : > { %15266 = vmatmul.mubr.f32.gmra.mrb[6].mxu1 %v23819_v22  ;;  %v12966_v22 = vld [vmem:[%s23502_s3 + $0x398] sm:$0xff] }
 0x4e1   : > { %15268 = vmatprep.mubr.f32.mxu1 %v23820_v42  ;;  %16543 = vmatpush3.bf16.msra.mxu1 %v16540_v33  ;;  %v23834_v33 = vld [vmem:[#allocation38_spill] sm:$0xff]  ;;  %v16564_v42 = vpack.c.bf16 %v12966_v22, %v12965_v8  ;;  %v12989_v22 = vld [vmem:[%s23502_s3 + $0x450] sm:$0xff] }
 0x4e2   : > { %16545 = vmatprep.subr.bf16.mxu1 %v16544_v3 }
 0x4e4   : > { %15269 = vmatmul.mubr.f32.gmra.mrb[8].mxu1 %v23821_v32  ;;  %v12972_v32 = vld [vmem:[%s23502_s3 + $0x3c8] sm:$0xff] }
 0x4e5   : > { %15271 = vmatprep.mubr.f32.mxu1 %v23822_v43  ;;  %16547 = vmatpush3.bf16.msra.mxu1 %v16544_v3  ;;  %v20358_v3 = vld [vmem:[#allocation3 + $0x182] sm:$0xff] }
 0x4e6   : > { %16549 = vmatprep.subr.bf16.mxu1 %v16548_v25  ;;  %v12974_v43 = vld [vmem:[%s23502_s3 + $0x3d8] sm:$0xff] }
 0x4e8   : > { %15272 = vmatmul.mubr.f32.gmra.mrb[10].mxu1 %v23823_v31 }
 0x4e9   : > { %15274 = vmatprep.mubr.f32.mxu1 %v20044_v10  ;;  %16551 = vmatpush3.bf16.msra.mxu1 %v16548_v25  ;;  %v23826_v10 = vld [vmem:[#allocation30_spill] sm:$0xff]  ;;  %v12968_v25 = vld [vmem:[%s23502_s3 + $0x3a8] sm:$0xff] }
 0x4ea   : > { %16553 = vmatprep.subr.bf16.mxu1 %v16552_v13 }
 0x4ec   : > { %15275 = vmatmul.mubr.f32.gmra.mrb[12].mxu1 %v20047_v29  ;;  %v23831_v29 = vld [vmem:[#allocation35_spill] sm:$0xff] }
 0x4ed   : > { %15277 = vmatprep.mubr.f32.mxu1 %v23824_v61  ;;  %16555 = vmatpush3.bf16.msra.mxu1 %v16552_v13  ;;  %v12976_v13 = vld [vmem:[%s23502_s3 + $0x3e8] sm:$0xff]  ;;  %v23845_v61 = vld [vmem:[#allocation46_spill] sm:$0xff] }
 0x4ee   : > { %16557 = vmatprep.subr.bf16.mxu1 %v16556_v35 }
 0x4f0   : > { %15278 = vmatmul.mubr.f32.gmra.mrb[14].mxu1 %v23825_v52  ;;  %v12985_v52 = vld [vmem:[%s23502_s3 + $0x430] sm:$0xff] }
 0x4f1   : > { %15280 = vmatprep.mubr.f32.mxu1 %v23826_v10  ;;  %16559 = vmatpush3.bf16.msra.mxu1 %v16556_v35  ;;  %v12984_v35 = vld [vmem:[%s23502_s3 + $0x428] sm:$0xff] }
 0x4f2   : > { %16561 = vmatprep.subr.bf16.mxu1 %v16560_v50 }
 0x4f4   : > { %15281 = vmatmul.mubr.f32.gmra.mrb[16].mxu1 %v23827_v19  ;;  %v12986_v19 = vld [vmem:[%s23502_s3 + $0x438] sm:$0xff] }
 0x4f5   : > { %15283 = vmatprep.mubr.f32.mxu1 %v23828_v20  ;;  %v13002_v20 = vld [vmem:[%s23504_s5 + $0xb0] sm:$0xff] }
 0x4f8   : > { %15284 = vmatmul.mubr.f32.gmra.mrb[18].mxu1 %v23829_v59  ;;  %v13003_v59 = vld [vmem:[%s23504_s5 + $0xb8] sm:$0xff] }
 0x4f9   : > { %15286 = vmatprep.mubr.f32.mxu1 %v23830_v60  ;;  %v23846_v60 = vld [vmem:[#allocation47_spill] sm:$0xff] }
 0x4fc   : > { %15287 = vmatmul.mubr.f32.gmra.mrb[20].mxu1 %v23831_v29  ;;  %v23847_v29 = vld [vmem:[#allocation48_spill] sm:$0xff] }
 0x4fd   : > { %15289 = vmatprep.mubr.f32.mxu1 %v23832_v27  ;;  %v16604_v27 = vpack.c.bf16 %v12986_v19, %v12985_v52  ;;  %v6707_v52 = vld [vmem:[#allocation3 + $0x92] sm:$0xff]  ;;  %v6709_v19 = vld [vmem:[#allocation3 + $0xaa] sm:$0xff] }
 0x500   : > { %15290 = vmatmul.mubr.f32.gmra.mrb[22].mxu1 %v23833_v28  ;;  %v12987_v28 = vld [vmem:[%s23502_s3 + $0x440] sm:$0xff] }
 0x501   : > { %15292 = vmatprep.mubr.f32.mxu1 %v23834_v33  ;;  %v16636_v33 = vpack.c.bf16 %v13003_v59, %v13002_v20  ;;  %v6710_v20 = vld [vmem:[#allocation3 + $0xb2] sm:$0xff]  ;;  %v6711_v59 = vld [vmem:[#allocation3 + $0xc2] sm:$0xff] }
 0x504   : > { %15293 = vmatmul.mubr.f32.gmra.mrb[24].mxu1 %v23835_v34  ;;  %v12988_v34 = vld [vmem:[%s23502_s3 + $0x448] sm:$0xff] }
 0x505   : > { %15295 = vmatprep.mubr.f32.mxu1 %v23836_v44  ;;  %v13004_v44 = vld [vmem:[%s23504_s5 + $0xc0] sm:$0xff]  ;;  %v16608_v8 = vpack.c.bf16 %v12988_v34, %v12987_v28 }
 0x506   : > { %v6715_v28 = vld [vmem:[#allocation3 + $0xf2] sm:$0xff]  ;;  %v6717_v34 = vld [vmem:[#allocation3 + $0x10a] sm:$0xff] }
 0x508   : > { %15296 = vmatmul.mubr.f32.gmra.mrb[26].mxu1 %v23837_v7  ;;  %v13005_v7 = vld [vmem:[%s23504_s5 + $0xc8] sm:$0xff] }
 0x509   : > { %15298 = vmatprep.mubr.f32.mxu1 %v23838_v2  ;;  %v23848_v2 = vld [vmem:[#allocation15_spill] sm:$0xff] }
 0x50c   : > { %15299 = vmatmul.mubr.f32.gmra.mrb[28].mxu1 %v20095_v0  ;;  %v12967_v0 = vld [vmem:[%s23502_s3 + $0x3a0] sm:$0xff] }
 0x50d   : > { %15301 = vmatprep.mubr.f32.mxu1 %v20358_v3  ;;  %v16568_v39 = vpack.c.bf16 %v12968_v25, %v12967_v0  ;;  %v12990_v0 = vld [vmem:[%s23502_s3 + $0x458] sm:$0xff] }
 0x50e   : > { %v13007_v25 = vld [vmem:[%s23504_s5 + $0xd8] sm:$0xff] }
 0x510   : > { %15302 = vmatmul.mubr.f32.gmra.mrb[30].mxu1 %v20361_v9 }
 0x511   : > { %15336 = vmatprep.mubr.f32.mxu1 %v19846_v46  ;;  %v12969_v46 = vld [vmem:[%s23502_s3 + $0x3b0] sm:$0xff] }
 0x514   : > { %15337 = vmatmul.mubr.f32.vlgmr.msra.gmra.mrb[0].mxu1 %v19849_v47  ;;  %v16572_v47 = vpack.c.bf16 %v12970_v6, %v12969_v46  ;;  %v16612_v46 = vpack.c.bf16 %v12990_v0, %v12989_v22  ;;  %v12991_v6 = vld [vmem:[%s23502_s3 + $0x460] sm:$0xff]  ;;  %v6722_v22 = vld [vmem:[#allocation3 + $0x142] sm:$0xff]  ;;  %v6724_v0 = vld [vmem:[#allocation3 + $0x15a] sm:$0xff] }
 0x515   : > { %15339 = vmatprep.mubr.f32.mxu1 %v19858_v54  ;;  %16563 = vmatpush3.bf16.msra.mxu1 %v16560_v50  ;;  %v12971_v54 = vld [vmem:[%s23502_s3 + $0x3c0] sm:$0xff] }
 0x516   : > { %16565 = vmatprep.subr.bf16.mxu1 %v16564_v42 }
 0x518   : > { %15340 = vmatmul.mubr.f32.gmra.mrb[2].mxu1 %v19861_v17  ;;  %v16576_v17 = vpack.c.bf16 %v12972_v32, %v12971_v54  ;;  %v12992_v54 = vld [vmem:[%s23502_s3 + $0x468] sm:$0xff] }
 0x519   : > { %15342 = vmatprep.mubr.f32.mxu1 %v19870_v56  ;;  %16567 = vmatpush3.bf16.msra.mxu1 %v16564_v42  ;;  %v12973_v56 = vld [vmem:[%s23502_s3 + $0x3d0] sm:$0xff]  ;;  %v16640_v42 = vpack.c.bf16 %v13005_v7, %v13004_v44  ;;  %v13009_v32 = vld [vmem:[%s23504_s5 + $0xe8] sm:$0xff] }
 0x51a   : > { %16569 = vmatprep.subr.bf16.mxu1 %v16568_v39  ;;  %v6718_v44 = vld [vmem:[#allocation3 + $0x112] sm:$0xff]  ;;  %v6719_v7 = vld [vmem:[#allocation3 + $0x122] sm:$0xff] }
 0x51c   : > { %15343 = vmatmul.mubr.f32.gmra.mrb[4].mxu1 %v19873_v62  ;;  %v16580_v62 = vpack.c.bf16 %v12974_v43, %v12973_v56  ;;  %v16616_v56 = vpack.c.bf16 %v12992_v54, %v12991_v6  ;;  %v20539_v6 = vld [vmem:[#allocation3] sm:$0xff]  ;;  %v13011_v54 = vld [vmem:[%s23504_s5 + $0xf8] sm:$0xff] }
 0x51d   : > { %15345 = vmatprep.mubr.f32.mxu1 %v19882_v26  ;;  %16571 = vmatpush3.bf16.msra.mxu1 %v16568_v39  ;;  %v12975_v26 = vld [vmem:[%s23502_s3 + $0x3e0] sm:$0xff] }
 0x51e   : > { %16573 = vmatprep.subr.bf16.mxu1 %v16572_v47  ;;  %v6401_v39 = vld [vmem:[#allocation3 + $0x91] sm:$0xff] }
 0x520   : > { %15346 = vmatmul.mubr.f32.gmra.mrb[6].mxu1 %v19885_v30  ;;  %v16584_v30 = vpack.c.bf16 %v12976_v13, %v12975_v26  ;;  %v12993_v26 = vld [vmem:[%s23502_s3 + $0x470] sm:$0xff]  ;;  %v12994_v13 = vld [vmem:[%s23502_s3 + $0x478] sm:$0xff] }
 0x521   : > { %15348 = vmatprep.mubr.f32.mxu1 %v19894_v36  ;;  %16575 = vmatpush3.bf16.msra.mxu1 %v16572_v47  ;;  %v12977_v36 = vld [vmem:[%s23502_s3 + $0x3f0] sm:$0xff] }
 0x522   : > { %16577 = vmatprep.subr.bf16.mxu1 %v16576_v17 }
 0x524   : > { %15349 = vmatmul.mubr.f32.gmra.mrb[8].mxu1 %v19897_v41  ;;  %v16588_v41 = vpack.c.bf16 %v12978_v16, %v12977_v36  ;;  %v6406_v36 = vld [vmem:[#allocation3 + $0xc9] sm:$0xff]  ;;  %v6407_v16 = vld [vmem:[#allocation3 + $0xd9] sm:$0xff] }
 0x525   : > { %15351 = vmatprep.mubr.f32.mxu1 %v19906_v57  ;;  %16579 = vmatpush3.bf16.msra.mxu1 %v16576_v17  ;;  %v12979_v57 = vld [vmem:[%s23502_s3 + $0x400] sm:$0xff] }
 0x526   : > { %16581 = vmatprep.subr.bf16.mxu1 %v16580_v62  ;;  %v6403_v17 = vld [vmem:[#allocation3 + $0xa9] sm:$0xff] }
 0x528   : > { %15352 = vmatmul.mubr.f32.gmra.mrb[10].mxu1 %v19909_v1  ;;  %v16592_v1 = vpack.c.bf16 %v12980_v37, %v12979_v57  ;;  %v6409_v57 = vld [vmem:[#allocation3 + $0xf1] sm:$0xff]  ;;  %v6410_v37 = vld [vmem:[#allocation3 + $0xf9] sm:$0xff] }
 0x529   : > { %15354 = vmatprep.mubr.f32.mxu1 %v19912_v4  ;;  %16583 = vmatpush3.bf16.msra.mxu1 %v16580_v62  ;;  %v23839_v4 = vld [vmem:[#allocation17_spill] sm:$0xff]  ;;  %v6404_v62 = vld [vmem:[#allocation3 + $0xb1] sm:$0xff] }
 0x52a   : > { %16585 = vmatprep.subr.bf16.mxu1 %v16584_v30 }
 0x52c   : > { %15355 = vmatmul.mubr.f32.gmra.mrb[12].mxu1 %v19915_v5  ;;  %v23840_v5 = vld [vmem:[#allocation18_spill] sm:$0xff] }
 0x52d   : > { %15357 = vmatprep.mubr.f32.mxu1 %v19918_v12  ;;  %16587 = vmatpush3.bf16.msra.mxu1 %v16584_v30  ;;  %v23841_v12 = vld [vmem:[#allocation43_spill] sm:$0xff]  ;;  %v6405_v30 = vld [vmem:[#allocation3 + $0xc1] sm:$0xff] }
 0x52e   : > { %16589 = vmatprep.subr.bf16.mxu1 %v16588_v41 }
 0x530   : > { %15358 = vmatmul.mubr.f32.gmra.mrb[14].mxu1 %v19921_v15  ;;  %v23842_v15 = vld [vmem:[#allocation44_spill] sm:$0xff] }
 0x531   : > { %15360 = vmatprep.mubr.f32.mxu1 %v19924_v63  ;;  %16591 = vmatpush3.bf16.msra.mxu1 %v16588_v41  ;;  %v23843_v63 = vld [vmem:[#allocation16_spill] sm:$0xff] }
 0x532   : > { %16593 = vmatprep.subr.bf16.mxu1 %v16592_v1  ;;  %v6408_v41 = vld [vmem:[#allocation3 + $0xe1] sm:$0xff] }
 0x534   : > { %15361 = vmatmul.mubr.f32.gmra.mrb[16].mxu1 %v19927_v11  ;;  %v12981_v11 = vld [vmem:[%s23502_s3 + $0x410] sm:$0xff] }
 0x535   : > { %15363 = vmatprep.mubr.f32.mxu1 %v19930_v21  ;;  %v12982_v21 = vld [vmem:[%s23502_s3 + $0x418] sm:$0xff] }
 0x538   : > { %15364 = vmatmul.mubr.f32.gmra.mrb[18].mxu1 %v19933_v40  ;;  %v12996_v40 = vld [vmem:[%s23504_s5 + $0x80] sm:$0xff] }
 0x539   : > { %15366 = vmatprep.mubr.f32.mxu1 %v19936_v48  ;;  %v12997_v48 = vld [vmem:[%s23504_s5 + $0x88] sm:$0xff] }
 0x53c   : > { %15367 = vmatmul.mubr.f32.gmra.mrb[20].mxu1 %v19939_v45  ;;  %v12998_v45 = vld [vmem:[%s23504_s5 + $0x90] sm:$0xff] }
 0x53d   : > { %15369 = vmatprep.mubr.f32.mxu1 %v19942_v18  ;;  %v16624_v18 = vpack.c.bf16 %v12997_v48, %v12996_v40  ;;  %v6419_v40 = vld [vmem:[#allocation3 + $0x169] sm:$0xff]  ;;  %v6420_v48 = vld [vmem:[#allocation3 + $0x171] sm:$0xff] }
 0x53f   : > { %16625 = vmatprep.subr.bf16.mxu0 %v16624_v18 }
 0x540   : > { %15370 = vmatmul.mubr.f32.gmra.mrb[22].mxu1 %v19945_v49  ;;  %v12999_v49 = vld [vmem:[%s23504_s5 + $0x98] sm:$0xff]  ;;  %16627 = vmatpush3.bf16.msra.mxu0 %v16624_v18  ;;  %v6423_v18 = vld [vmem:[#allocation3 + $0x199] sm:$0xff] }
 0x541   : > { %15372 = vmatprep.mubr.f32.mxu1 %v19948_v53  ;;  %v16596_v53 = vpack.c.bf16 %v12982_v21, %v12981_v11  ;;  %v16628_v31 = vpack.c.bf16 %v12999_v49, %v12998_v45  ;;  %v6417_v11 = vld [vmem:[#allocation3 + $0x151] sm:$0xff]  ;;  %v6418_v21 = vld [vmem:[#allocation3 + $0x159] sm:$0xff]  ;;  %v6421_v45 = vld [vmem:[#allocation3 + $0x181] sm:$0xff] }
 0x542   : > { %v6422_v49 = vld [vmem:[#allocation3 + $0x189] sm:$0xff] }
 0x543   : > { %16629 = vmatprep.subr.bf16.mxu0 %v16628_v31 }
 0x544   : > { %15373 = vmatmul.mubr.f32.gmra.mrb[24].mxu1 %v19951_v14  ;;  %v12983_v14 = vld [vmem:[%s23502_s3 + $0x420] sm:$0xff]  ;;  %16631 = vmatpush3.bf16.msra.mxu0 %v16628_v31  ;;  %v6700_v31 = vld [vmem:[#allocation3 + $0x3a] sm:$0xff] }
 0x545   : > { %15375 = vmatprep.mubr.f32.mxu1 %v23839_v4  ;;  %v16600_v50 = vpack.c.bf16 %v12984_v35, %v12983_v14  ;;  %v6412_v4 = vld [vmem:[#allocation3 + $0x111] sm:$0xff] }
 0x546   : > { %v6699_v14 = vld [vmem:[#allocation3 + $0x32] sm:$0xff]  ;;  %v6701_v35 = vld [vmem:[#allocation3 + $0x4a] sm:$0xff] }
 0x548   : > { %15376 = vmatmul.mubr.f32.gmra.mrb[26].mxu1 %v23840_v5  ;;  %v6413_v5 = vld [vmem:[#allocation3 + $0x121] sm:$0xff] }
 0x549   : > { %15378 = vmatprep.mubr.f32.mxu1 %v23841_v12  ;;  %v6414_v12 = vld [vmem:[#allocation3 + $0x129] sm:$0xff] }
 0x54c   : > { %15379 = vmatmul.mubr.f32.gmra.mrb[28].mxu1 %v23842_v15  ;;  %v6415_v15 = vld [vmem:[#allocation3 + $0x139] sm:$0xff] }
 0x54d   : > { %15381 = vmatprep.mubr.f32.mxu1 %v23843_v63 }
 0x550   : > { %15382 = vmatmul.mubr.f32.gmra.mrb[30].mxu1 %v23843_v63  ;;  %v6416_v63 = vld [vmem:[#allocation3 + $0x141] sm:$0xff] }
 0x551   : > { %15416 = vmatprep.mubr.f32.mxu1 %v20194_v58  ;;  %v13000_v58 = vld [vmem:[%s23504_s5 + $0xa0] sm:$0xff] }
 0x552   : > { %v16632_v10 = vpack.c.bf16 %v13001_v38, %v13000_v58  ;;  %v6702_v58 = vld [vmem:[#allocation3 + $0x52] sm:$0xff]  ;;  %v6703_v38 = vld [vmem:[#allocation3 + $0x62] sm:$0xff] }
 0x554   : > { %15417 = vmatmul.mubr.f32.vlgmr.msra.gmra.mrb[0].mxu1 %v23844_v51  ;;  %16633 = vmatprep.subr.bf16.mxu0 %v16632_v10  ;;  %v6704_v51 = vld [vmem:[#allocation3 + $0x6a] sm:$0xff] }
 0x555   : > { %15419 = vmatprep.mubr.f32.mxu1 %v23845_v61  ;;  %16595 = vmatpush3.bf16.msra.mxu1 %v16592_v1  ;;  %v6411_v1 = vld [vmem:[#allocation3 + $0x109] sm:$0xff]  ;;  %v6705_v61 = vld [vmem:[#allocation3 + $0x7a] sm:$0xff] }
 0x556   : > { %16597 = vmatprep.subr.bf16.mxu1 %v16596_v53  ;;  %16635 = vmatpush3.bf16.msra.mxu0 %v16632_v10  ;;  %v6708_v10 = vld [vmem:[#allocation3 + $0x9a] sm:$0xff] }
 0x557   : > { %16637 = vmatprep.subr.bf16.mxu0 %v16636_v33 }
 0x558   : > { %15420 = vmatmul.mubr.f32.gmra.mrb[2].mxu1 %v23846_v60  ;;  %v6712_v60 = vld [vmem:[#allocation3 + $0xca] sm:$0xff] }
 0x559   : > { %15422 = vmatprep.mubr.f32.mxu1 %v23847_v29  ;;  %16599 = vmatpush3.bf16.msra.mxu1 %v16596_v53  ;;  %v6424_v53 = vld [vmem:[#allocation3 + $0x1a1] sm:$0xff] }
 0x55a   : > { %16601 = vmatprep.subr.bf16.mxu1 %v16600_v50  ;;  %16639 = vmatpush3.bf16.msra.mxu0 %v16636_v33  ;;  %v6713_v29 = vld [vmem:[#allocation3 + $0xda] sm:$0xff] }
 0x55b   : > { %16641 = vmatprep.subr.bf16.mxu0 %v16640_v42  ;;  %v6716_v33 = vld [vmem:[#allocation3 + $0xfa] sm:$0xff] }
 0x55c   : > { %15423 = vmatmul.mubr.f32.gmra.mrb[4].mxu1 %v20221_v55  ;;  %v13006_v55 = vld [vmem:[%s23504_s5 + $0xd0] sm:$0xff] }
 0x55d   : > { %15425 = vmatprep.mubr.f32.mxu1 %v23848_v2  ;;  %16603 = vmatpush3.bf16.msra.mxu1 %v16600_v50  ;;  %v16644_v47 = vpack.c.bf16 %v13007_v25, %v13006_v55  ;;  %v6706_v50 = vld [vmem:[#allocation3 + $0x82] sm:$0xff]  ;;  %v6720_v2 = vld [vmem:[#allocation3 + $0x12a] sm:$0xff]  ;;  %v6726_v25 = vld [vmem:[#allocation3 + $0x172] sm:$0xff] }
 0x55e   : > { %16605 = vmatprep.subr.bf16.mxu1 %v16604_v27  ;;  %16643 = vmatpush3.bf16.msra.mxu0 %v16640_v42  ;;  %v6723_v42 = vld [vmem:[#allocation3 + $0x152] sm:$0xff]  ;;  %v6725_v55 = vld [vmem:[#allocation3 + $0x16a] sm:$0xff] }
 0x55f   : > { %16645 = vmatprep.subr.bf16.mxu0 %v16644_v47 }
 0x560   : > { %15426 = vmatmul.mubr.f32.gmra.mrb[6].mxu1 %v20233_v24  ;;  %v13008_v24 = vld [vmem:[%s23504_s5 + $0xe0] sm:$0xff] }
 0x561   : > { %15428 = vmatprep.mubr.f32.mxu1 %v6401_v39  ;;  %16607 = vmatpush3.bf16.msra.mxu1 %v16604_v27  ;;  %v16648_v43 = vpack.c.bf16 %v13009_v32, %v13008_v24  ;;  %v6714_v27 = vld [vmem:[#allocation3 + $0xe2] sm:$0xff]  ;;  %v6729_v39 = vld [vmem:[#allocation3 + $0x19a] sm:$0xff]  ;;  %v7140_v32 = vld [vmem:[%s23504_s5] sm:$0xff] }
 0x562   : > { %16609 = vmatprep.subr.bf16.mxu1 %v16608_v8  ;;  %16647 = vmatpush3.bf16.msra.mxu0 %v16644_v47  ;;  %v13010_v47 = vld [vmem:[%s23504_s5 + $0xf0] sm:$0xff] }
 0x563   : > { %16649 = vmatprep.subr.bf16.mxu0 %v16648_v43  ;;  %v16652_v24 = vpack.c.bf16 %v13011_v54, %v13010_v47 }
 0x564   : > { %15429 = vmatmul.mubr.f32.gmra.mrb[8].mxu1 %v20243_v23  ;;  %v16620_v23 = vpack.c.bf16 %v12994_v13, %v12993_v26  ;;  %v7144_v13 = vld [vmem:[%s23504_s5 + $0x20] sm:$0xff] }
 0x565   : > { %15431 = vmatprep.mubr.f32.mxu1 %v6403_v17  ;;  %16611 = vmatpush3.bf16.msra.mxu1 %v16608_v8  ;;  %v6721_v8 = vld [vmem:[#allocation3 + $0x13a] sm:$0xff] }
 0x566   : > { %16613 = vmatprep.subr.bf16.mxu1 %v16612_v46  ;;  %16651 = vmatpush3.bf16.msra.mxu0 %v16648_v43  ;;  %v7141_v17 = vld [vmem:[%s23504_s5 + $0x8] sm:$0xff]  ;;  %v7142_v43 = vld [vmem:[%s23504_s5 + $0x10] sm:$0xff] }
 0x567   : > { %16653 = vmatprep.subr.bf16.mxu0 %v16652_v24 }
 0x568   : > { %15432 = vmatmul.mubr.f32.gmra.mrb[10].mxu1 %v6404_v62  ;;  %v7143_v62 = vld [vmem:[%s23504_s5 + $0x18] sm:$0xff] }
 0x569   : > { %15434 = vmatprep.mubr.f32.mxu1 %v6405_v30  ;;  %16615 = vmatpush3.bf16.msra.mxu1 %v16612_v46  ;;  %v6730_v46 = vld [vmem:[#allocation3 + $0x1a2] sm:$0xff]  ;;  %v16660_v26 = vpack.c.bf16 %v7143_v62, %v7142_v43  ;;  %v7145_v30 = vld [vmem:[%s23504_s5 + $0x28] sm:$0xff] }
 0x56a   : > { %16617 = vmatprep.subr.bf16.mxu1 %v16616_v56  ;;  %16655 = vmatpush3.bf16.msra.mxu0 %v16652_v24 }
 0x56c   : > { %15435 = vmatmul.mubr.f32.gmra.mrb[12].mxu1 %v6406_v36  ;;  %v7146_v36 = vld [vmem:[%s23504_s5 + $0x30] sm:$0xff] }
 0x56d   : > { %15437 = vmatprep.mubr.f32.mxu1 %v6407_v16  ;;  %16619 = vmatpush3.bf16.msra.mxu1 %v16616_v56  ;;  %v16656_v56 = vpack.c.bf16 %v7141_v17, %v7140_v32  ;;  %v7147_v16 = vld [vmem:[%s23504_s5 + $0x38] sm:$0xff] }
 0x56e   : > { %16621 = vmatprep.subr.bf16.mxu1 %v16620_v23 }
 0x56f   : > { %16657 = vmatprep.subr.bf16.mxu0 %v16656_v56 }
 0x570   : > { %15438 = vmatmul.mubr.f32.gmra.mrb[14].mxu1 %v6408_v41  ;;  %v16668_v41 = vpack.c.bf16 %v7147_v16, %v7146_v36 }
 0x571   : > { %15440 = vmatprep.mubr.f32.mxu1 %v6409_v57  ;;  %16623 = vmatpush3.bf16.msra.mxu1 %v16620_v23  ;;  %v16664_v23 = vpack.c.bf16 %v7145_v30, %v7144_v13  ;;  %v7148_v57 = vld [vmem:[%s23504_s5 + $0x40] sm:$0xff] }
 0x574   : > { %15441 = vmatmul.mubr.f32.gmra.mrb[16].mxu1 %v6410_v37  ;;  %v7149_v37 = vld [vmem:[%s23504_s5 + $0x48] sm:$0xff] }
 0x575   : > { %15443 = vmatprep.mubr.f32.mxu1 %v6411_v1  ;;  %v16672_v1 = vpack.c.bf16 %v7149_v37, %v7148_v57 }
 0x578   : > { %15444 = vmatmul.mubr.f32.gmra.mrb[18].mxu1 %v6412_v4  ;;  %v7150_v4 = vld [vmem:[%s23504_s5 + $0x50] sm:$0xff] }
 0x579   : > { %15446 = vmatprep.mubr.f32.mxu1 %v6413_v5  ;;  %v7151_v5 = vld [vmem:[%s23504_s5 + $0x58] sm:$0xff] }
 0x57c   : > { %15447 = vmatmul.mubr.f32.gmra.mrb[20].mxu1 %v6414_v12  ;;  %v16676_v12 = vpack.c.bf16 %v7151_v5, %v7150_v4 }
 0x57d   : > { %15449 = vmatprep.mubr.f32.mxu1 %v6415_v15  ;;  %v7152_v15 = vld [vmem:[%s23504_s5 + $0x60] sm:$0xff] }
 0x580   : > { %15450 = vmatmul.mubr.f32.gmra.mrb[22].mxu1 %v6416_v63  ;;  %v7153_v63 = vld [vmem:[%s23504_s5 + $0x68] sm:$0xff] }
 0x581   : > { %15452 = vmatprep.mubr.f32.mxu1 %v6417_v11  ;;  %v16680_v11 = vpack.c.bf16 %v7153_v63, %v7152_v15 }
 0x584   : > { %15453 = vmatmul.mubr.f32.gmra.mrb[24].mxu1 %v6418_v21  ;;  %v7154_v21 = vld [vmem:[%s23504_s5 + $0x70] sm:$0xff] }
 0x585   : > { %15455 = vmatprep.mubr.f32.mxu1 %v6419_v40  ;;  %v7155_v40 = vld [vmem:[%s23504_s5 + $0x78] sm:$0xff] }
 0x588   : > { %15456 = vmatmul.mubr.f32.gmra.mrb[26].mxu1 %v6420_v48  ;;  %v16684_v48 = vpack.c.bf16 %v7155_v40, %v7154_v21 }
 0x589   : > { %15458 = vmatprep.mubr.f32.mxu1 %v6421_v45  ;;  %v13012_v45 = vld [vmem:[%s23504_s5 + $0x100] sm:$0xff] }
 0x58c   : > { %15459 = vmatmul.mubr.f32.gmra.mrb[28].mxu1 %v6422_v49 }
 0x58d   : > { %15461 = vmatprep.mubr.f32.mxu1 %v6423_v18  ;;  %v13013_v18 = vld [vmem:[%s23504_s5 + $0x108] sm:$0xff] }
 0x58e   : > { %v20602_v49 = vpack.c.bf16 %v13013_v18, %v13012_v45 }
 0x590   : > { %15462 = vmatmul.mubr.f32.gmra.mrb[30].mxu1 %v6424_v53  ;;  %v20608_v53 = vld [vmem:[%s23503_s4] ss:$0 sm:$0xff] }
 0x591   : > { %15496 = vmatprep.mubr.f32.mxu1 %v6699_v14 }
 0x594   : > { %15497 = vmatmul.mubr.f32.vlgmr.msra.gmra.mrb[0].mxu1 %v6700_v31 }
 0x595   : > { %15499 = vmatprep.mubr.f32.mxu1 %v6701_v35 }
 0x598   : > { %15500 = vmatmul.mubr.f32.gmra.mrb[2].mxu1 %v6702_v58 }
 0x599   : > { %15502 = vmatprep.mubr.f32.mxu1 %v6703_v38 }
 0x59c   : > { %15503 = vmatmul.mubr.f32.gmra.mrb[4].mxu1 %v6704_v51 }
 0x59d   : > { %15505 = vmatprep.mubr.f32.mxu1 %v6705_v61 }
 0x5a0   : > { %15506 = vmatmul.mubr.f32.gmra.mrb[6].mxu1 %v6706_v50 }
 0x5a1   : > { %15508 = vmatprep.mubr.f32.mxu1 %v6707_v52 }
 0x5a4   : > { %15509 = vmatmul.mubr.f32.gmra.mrb[8].mxu1 %v6708_v10 }
 0x5a5   : > { %15511 = vmatprep.mubr.f32.mxu1 %v6709_v19 }
 0x5a8   : > { %15512 = vmatmul.mubr.f32.gmra.mrb[10].mxu1 %v6710_v20 }
 0x5a9   : > { %15514 = vmatprep.mubr.f32.mxu1 %v6711_v59 }
 0x5ac   : > { %15515 = vmatmul.mubr.f32.gmra.mrb[12].mxu1 %v6712_v60 }
 0x5ad   : > { %15517 = vmatprep.mubr.f32.mxu1 %v6713_v29 }
 0x5b0   : > { %15518 = vmatmul.mubr.f32.gmra.mrb[14].mxu1 %v6714_v27 }
 0x5b1   : > { %15520 = vmatprep.mubr.f32.mxu1 %v6715_v28 }
 0x5b4   : > { %15521 = vmatmul.mubr.f32.gmra.mrb[16].mxu1 %v6716_v33 }
 0x5b5   : > { %15523 = vmatprep.mubr.f32.mxu1 %v6717_v34 }
 0x5b8   : > { %15524 = vmatmul.mubr.f32.gmra.mrb[18].mxu1 %v6718_v44 }
 0x5b9   : > { %15526 = vmatprep.mubr.f32.mxu1 %v6719_v7 }
 0x5bc   : > { %15527 = vmatmul.mubr.f32.gmra.mrb[20].mxu1 %v6720_v2 }
 0x5bd   : > { %15529 = vmatprep.mubr.f32.mxu1 %v6721_v8 }
 0x5c0   : > { %15530 = vmatmul.mubr.f32.gmra.mrb[22].mxu1 %v6722_v22 }
 0x5c1   : > { %15532 = vmatprep.mubr.f32.mxu1 %v6723_v42 }
 0x5c4   : > { %15533 = vmatmul.mubr.f32.gmra.mrb[24].mxu1 %v6724_v0 }
 0x5c5   : > { %15535 = vmatprep.mubr.f32.mxu1 %v6725_v55 }
 0x5c8   : > { %15536 = vmatmul.mubr.f32.gmra.mrb[26].mxu1 %v6726_v25 }
 0x5c9   : > { %15538 = vmatprep.mubr.f32.mxu1 %v20358_v3  ;;  %v7156_v3 = vld [vmem:[#allocation3 + $0x1] sm:$0xff] }
 0x5ca   : > { %15576 = vmatprep.mubr.f32.mxu0 %v7156_v3 }
 0x5cc   : > { %15539 = vmatmul.mubr.f32.gmra.mrb[28].mxu1 %v20361_v9  ;;  %v7157_v9 = vld [vmem:[#allocation3 + $0x9] sm:$0xff] }
 0x5cd   : > { %15541 = vmatprep.mubr.f32.mxu1 %v6729_v39  ;;  %15577 = vmatmul.mubr.f32.vlgmr.msra.gmra.mrb[32].mxu0 %v7157_v9 }
 0x5ce   : > { %16659 = vmatpush3.bf16.msra.mxu0 %v16656_v56 }
 0x5cf   : > { %16661 = vmatprep.subr.bf16.mxu0 %v16660_v26 }
 0x5d0   : > { %15542 = vmatmul.mubr.f32.gmra.mrb[30].mxu1 %v6730_v46 }
 0x5d1   : > { %10018 = vmatprep.mubr.f32.mxu1 %v20539_v6 }
 0x5d2   : > { %16663 = vmatpush3.bf16.msra.mxu0 %v16660_v26 }
 0x5d3   : > { %16665 = vmatprep.subr.bf16.mxu0 %v16664_v23 }
 0x5d6   : > { %16667 = vmatpush3.bf16.msra.mxu0 %v16664_v23 }
 0x5d7   : > { %16669 = vmatprep.subr.bf16.mxu0 %v16668_v41 }
 0x5da   : > { %16671 = vmatpush3.bf16.msra.mxu0 %v16668_v41 }
 0x5db   : > { %16673 = vmatprep.subr.bf16.mxu0 %v16672_v1 }
 0x5de   : > { %16675 = vmatpush3.bf16.msra.mxu0 %v16672_v1 }
 0x5df   : > { %16677 = vmatprep.subr.bf16.mxu0 %v16676_v12 }
 0x5e2   : > { %16679 = vmatpush3.bf16.msra.mxu0 %v16676_v12 }
 0x5e3   : > { %16681 = vmatprep.subr.bf16.mxu0 %v16680_v11 }
 0x5e6   : > { %16683 = vmatpush3.bf16.msra.mxu0 %v16680_v11 }
 0x5e7   : > { %16685 = vmatprep.subr.bf16.mxu0 %v16684_v48 }
 0x5ea   : > { %16687 = vmatpush3.bf16.msra.mxu0 %v16684_v48 }
 0x5eb   : > { %16689 = vmatprep.subr.bf16.mxu0 %v20602_v49 }
 0x667   : > { %v15498_v14 = vpop.f32.mrb[0].mxu1 }
 0x668   : > { %v7013_v31 = vadd.f32 %v15498_v14, %v20608_v53  ;;  %v6814_v35 = vpop.f32.mrb[1].mxu1 }
 0x669   : > { %v7012_v58 = vadd.f32 %v20608_v53, %v6814_v35 }
 0x66a   : > { %v7045_v38 = vmax.f32 %v7013_v31, 0.0 }
 0x66b   : > { %v7044_v51 = vmax.f32 %v7012_v58, 0.0  ;;  %v15501_v61 = vpop.f32.mrb[2].mxu1 }
 0x66c   : > { %7077 = vst [vmem:[#allocation3 + $0x21] sm:$0xff] %v7045_v38  ;;  %v7015_v50 = vadd.f32 %v15501_v61, %v20608_v53  ;;  %v6824_v52 = vpop.f32.mrb[3].mxu1 }
 0x66d   : > { %7076 = vst [vmem:[#allocation3 + $0x19] sm:$0xff] %v7044_v51  ;;  %v7014_v10 = vadd.f32 %v20608_v53, %v6824_v52  ;;  %15579 = vmatprep.mubr.f32.mxu0 %v7044_v51 }
 0x66e   : > { %v7047_v19 = vmax.f32 %v7015_v50, 0.0  ;;  %15580 = vmatmul.mubr.f32.gmra.mrb[34].mxu0 %v7045_v38 }
 0x66f   : > { %v7046_v20 = vmax.f32 %v7014_v10, 0.0  ;;  %v15504_v59 = vpop.f32.mrb[4].mxu1 }
 0x670   : > { %7079 = vst [vmem:[#allocation3 + $0x39] sm:$0xff] %v7047_v19  ;;  %v7017_v60 = vadd.f32 %v15504_v59, %v20608_v53  ;;  %v6834_v29 = vpop.f32.mrb[5].mxu1 }
 0x671   : > { %7078 = vst [vmem:[#allocation3 + $0x31] sm:$0xff] %v7046_v20  ;;  %v7016_v27 = vadd.f32 %v20608_v53, %v6834_v29  ;;  %15582 = vmatprep.mubr.f32.mxu0 %v7046_v20 }
 0x672   : > { %v7049_v28 = vmax.f32 %v7017_v60, 0.0  ;;  %15583 = vmatmul.mubr.f32.gmra.mrb[36].mxu0 %v7047_v19 }
 0x673   : > { %v7048_v33 = vmax.f32 %v7016_v27, 0.0  ;;  %v15507_v34 = vpop.f32.mrb[6].mxu1 }
 0x674   : > { %7081 = vst [vmem:[#allocation3 + $0x51] sm:$0xff] %v7049_v28  ;;  %v7019_v44 = vadd.f32 %v15507_v34, %v20608_v53  ;;  %v6844_v7 = vpop.f32.mrb[7].mxu1 }
 0x675   : > { %7080 = vst [vmem:[#allocation3 + $0x49] sm:$0xff] %v7048_v33  ;;  %v7018_v2 = vadd.f32 %v20608_v53, %v6844_v7  ;;  %15585 = vmatprep.mubr.f32.mxu0 %v7048_v33 }
 0x676   : > { %v7051_v8 = vmax.f32 %v7019_v44, 0.0  ;;  %15586 = vmatmul.mubr.f32.gmra.mrb[38].mxu0 %v7049_v28 }
 0x677   : > { %v7050_v22 = vmax.f32 %v7018_v2, 0.0  ;;  %v15510_v42 = vpop.f32.mrb[8].mxu1 }
 0x678   : > { %7083 = vst [vmem:[#allocation3 + $0x69] sm:$0xff] %v7051_v8  ;;  %v7021_v0 = vadd.f32 %v15510_v42, %v20608_v53  ;;  %v6854_v55 = vpop.f32.mrb[9].mxu1 }
 0x679   : > { %7082 = vst [vmem:[#allocation3 + $0x61] sm:$0xff] %v7050_v22  ;;  %v7020_v25 = vadd.f32 %v20608_v53, %v6854_v55  ;;  %15588 = vmatprep.mubr.f32.mxu0 %v7050_v22 }
 0x67a   : > { %v7053_v39 = vmax.f32 %v7021_v0, 0.0  ;;  %15589 = vmatmul.mubr.f32.gmra.mrb[40].mxu0 %v7051_v8 }
 0x67b   : > { %v7052_v46 = vmax.f32 %v7020_v25, 0.0  ;;  %v15513_v47 = vpop.f32.mrb[10].mxu1 }
 0x67c   : > { %7085 = vst [vmem:[#allocation3 + $0x81] sm:$0xff] %v7053_v39  ;;  %v7023_v54 = vadd.f32 %v15513_v47, %v20608_v53  ;;  %v6864_v24 = vpop.f32.mrb[11].mxu1 }
 0x67d   : > { %7084 = vst [vmem:[#allocation3 + $0x79] sm:$0xff] %v7052_v46  ;;  %v7022_v3 = vadd.f32 %v20608_v53, %v6864_v24  ;;  %15591 = vmatprep.mubr.f32.mxu0 %v7052_v46 }
 0x67e   : > { %v7055_v9 = vmax.f32 %v7023_v54, 0.0  ;;  %15592 = vmatmul.mubr.f32.gmra.mrb[42].mxu0 %v7053_v39 }
 0x67f   : > { %v20622_v32 = vmax.f32 %v7022_v3, 0.0  ;;  %v15516_v17 = vpop.f32.mrb[12].mxu1  ;;  %v13014_v3 = vld [vmem:[%s23504_s5 + $0x110] sm:$0xff] }
 0x680   : > { %7087 = vst [vmem:[#allocation3 + $0x99] sm:$0xff] %v7055_v9  ;;  %v7025_v56 = vadd.f32 %v15516_v17, %v20608_v53  ;;  %v6874_v43 = vpop.f32.mrb[13].mxu1 }
 0x681   : > { %7086 = vst [vmem:[#allocation3 + $0x91] sm:$0xff] %v20622_v32  ;;  %v7024_v62 = vadd.f32 %v20608_v53, %v6874_v43  ;;  %15594 = vmatprep.mubr.f32.mxu0 %v20622_v32  ;;  %v13016_v43 = vld [vmem:[%s23504_s5 + $0x120] sm:$0xff] }
 0x682   : > { %v20628_v26 = vmax.f32 %v7025_v56, 0.0  ;;  %15595 = vmatmul.mubr.f32.gmra.mrb[44].mxu0 %v7055_v9  ;;  %v13015_v9 = vld [vmem:[%s23504_s5 + $0x118] sm:$0xff] }
 0x683   : > { %v20630_v13 = vmax.f32 %v7024_v62, 0.0  ;;  %v15519_v30 = vpop.f32.mrb[14].mxu1  ;;  %v13017_v62 = vld [vmem:[%s23504_s5 + $0x128] sm:$0xff] }
 0x684   : > { %7089 = vst [vmem:[#allocation3 + $0xb1] sm:$0xff] %v20628_v26  ;;  %v7027_v23 = vadd.f32 %v15519_v30, %v20608_v53  ;;  %v6884_v36 = vpop.f32.mrb[15].mxu1  ;;  %v20742_v30 = vld [vmem:[#allocation3 + $0x18] sm:$0xff] }
 0x685   : > { %7088 = vst [vmem:[#allocation3 + $0xa9] sm:$0xff] %v20630_v13  ;;  %v7026_v16 = vadd.f32 %v20608_v53, %v6884_v36  ;;  %15597 = vmatprep.mubr.f32.mxu0 %v20630_v13  ;;  %v20746_v36 = vld [vmem:[#allocation3 + $0x20] sm:$0xff] }
 0x686   : > { %v20637_v41 = vmax.f32 %v7027_v23, 0.0  ;;  %15598 = vmatmul.mubr.f32.gmra.mrb[46].mxu0 %v20628_v26  ;;  %v16696_v23 = vpack.c.bf16 %v13017_v62, %v13016_v43 }
 0x687   : > { %v20640_v57 = vmax.f32 %v7026_v16, 0.0  ;;  %v15522_v37 = vpop.f32.mrb[16].mxu1  ;;  %v13018_v16 = vld [vmem:[%s23504_s5 + $0x130] sm:$0xff] }
 0x688   : > { %7091 = vst [vmem:[#allocation3 + $0xc9] sm:$0xff] %v20637_v41  ;;  %v7029_v1 = vadd.f32 %v15522_v37, %v20608_v53  ;;  %v6894_v4 = vpop.f32.mrb[17].mxu1  ;;  %v13019_v37 = vld [vmem:[%s23504_s5 + $0x138] sm:$0xff] }
 0x689   : > { %7090 = vst [vmem:[#allocation3 + $0xc1] sm:$0xff] %v20640_v57  ;;  %v7028_v5 = vadd.f32 %v20608_v53, %v6894_v4  ;;  %15600 = vmatprep.mubr.f32.mxu0 %v20640_v57  ;;  %v13020_v4 = vld [vmem:[%s23504_s5 + $0x140] sm:$0xff] }
 0x68a   : > { %v20647_v12 = vmax.f32 %v7029_v1, 0.0  ;;  %15601 = vmatmul.mubr.f32.gmra.mrb[48].mxu0 %v20637_v41  ;;  %v20758_v1 = vld [vmem:[#allocation3 + $0x38] sm:$0xff] }
 0x68b   : > { %v20650_v15 = vmax.f32 %v7028_v5, 0.0  ;;  %v15525_v63 = vpop.f32.mrb[18].mxu1  ;;  %v13021_v5 = vld [vmem:[%s23504_s5 + $0x148] sm:$0xff] }
 0x68c   : > { %7093 = vst [vmem:[#allocation3 + $0xe1] sm:$0xff] %v20647_v12  ;;  %v7031_v11 = vadd.f32 %v15525_v63, %v20608_v53  ;;  %v6904_v21 = vpop.f32.mrb[19].mxu1  ;;  %v20767_v63 = vld [vmem:[#allocation3 + $0x48] sm:$0xff] }
 0x68d   : > { %7092 = vst [vmem:[#allocation3 + $0xd9] sm:$0xff] %v20650_v15  ;;  %v7030_v40 = vadd.f32 %v20608_v53, %v6904_v21  ;;  %15603 = vmatprep.mubr.f32.mxu0 %v20650_v15  ;;  %v20770_v21 = vld [vmem:[#allocation3 + $0x50] sm:$0xff] }
 0x68e   : > { %v20657_v48 = vmax.f32 %v7031_v11, 0.0  ;;  %15604 = vmatmul.mubr.f32.gmra.mrb[50].mxu0 %v20647_v12  ;;  %v16704_v11 = vpack.c.bf16 %v13021_v5, %v13020_v4 }
 0x68f   : > { %v20660_v45 = vmax.f32 %v7030_v40, 0.0  ;;  %v15528_v18 = vpop.f32.mrb[20].mxu1  ;;  %v13022_v40 = vld [vmem:[%s23504_s5 + $0x150] sm:$0xff] }
 0x690   : > { %7095 = vst [vmem:[#allocation3 + $0xf9] sm:$0xff] %v20657_v48  ;;  %v7033_v14 = vadd.f32 %v15528_v18, %v20608_v53  ;;  %v6914_v31 = vpop.f32.mrb[21].mxu1  ;;  %v13023_v18 = vld [vmem:[%s23504_s5 + $0x158] sm:$0xff] }
 0x691   : > { %7094 = vst [vmem:[#allocation3 + $0xf1] sm:$0xff] %v20660_v45  ;;  %v7032_v35 = vadd.f32 %v20608_v53, %v6914_v31  ;;  %15606 = vmatprep.mubr.f32.mxu0 %v20660_v45  ;;  %v16708_v31 = vpack.c.bf16 %v13023_v18, %v13022_v40  ;;  %v7655_v40 = vld [vmem:[#allocation3 + $0x2] sm:$0xff] }
 0x692   : > { %v20667_v58 = vmax.f32 %v7033_v14, 0.0  ;;  %15607 = vmatmul.mubr.f32.gmra.mrb[52].mxu0 %v20657_v48  ;;  %v20779_v14 = vld [vmem:[#allocation3 + $0x60] sm:$0xff] }
 0x693   : > { %v20670_v38 = vmax.f32 %v7032_v35, 0.0  ;;  %v15531_v51 = vpop.f32.mrb[22].mxu1  ;;  %v20782_v35 = vld [vmem:[#allocation3 + $0x68] sm:$0xff] }
 0x694   : > { %7097 = vst [vmem:[#allocation3 + $0x111] sm:$0xff] %v20667_v58  ;;  %v7035_v61 = vadd.f32 %v15531_v51, %v20608_v53  ;;  %v6924_v50 = vpop.f32.mrb[23].mxu1  ;;  %v13024_v51 = vld [vmem:[%s23504_s5 + $0x160] sm:$0xff] }
 0x695   : > { %7096 = vst [vmem:[#allocation3 + $0x109] sm:$0xff] %v20670_v38  ;;  %v7034_v52 = vadd.f32 %v20608_v53, %v6924_v50  ;;  %15609 = vmatprep.mubr.f32.mxu0 %v20670_v38  ;;  %v20791_v50 = vld [vmem:[#allocation3 + $0x78] sm:$0xff] }
 0x696   : > { %v20677_v10 = vmax.f32 %v7035_v61, 0.0  ;;  %15610 = vmatmul.mubr.f32.gmra.mrb[54].mxu0 %v20667_v58  ;;  %v13025_v61 = vld [vmem:[%s23504_s5 + $0x168] sm:$0xff] }
 0x697   : > { %v20680_v19 = vmax.f32 %v7034_v52, 0.0  ;;  %v15534_v20 = vpop.f32.mrb[24].mxu1  ;;  %v16712_v52 = vpack.c.bf16 %v13025_v61, %v13024_v51  ;;  %v13031_v51 = vld [vmem:[%s23504_s5 + $0x198] sm:$0xff] }
 0x698   : > { %7099 = vst [vmem:[#allocation3 + $0x129] sm:$0xff] %v20677_v10  ;;  %v7037_v59 = vadd.f32 %v15534_v20, %v20608_v53  ;;  %v6934_v60 = vpop.f32.mrb[25].mxu1  ;;  %v20794_v20 = vld [vmem:[#allocation3 + $0x80] sm:$0xff]  ;;  %v7656_v61 = vld [vmem:[#allocation3 + $0xa] sm:$0xff] }
 0x699   : > { %7098 = vst [vmem:[#allocation3 + $0x121] sm:$0xff] %v20680_v19  ;;  %v7036_v29 = vadd.f32 %v20608_v53, %v6934_v60  ;;  %15612 = vmatprep.mubr.f32.mxu0 %v20680_v19  ;;  %v13027_v60 = vld [vmem:[%s23504_s5 + $0x178] sm:$0xff] }
 0x69a   : > { %v20687_v27 = vmax.f32 %v7037_v59, 0.0  ;;  %15613 = vmatmul.mubr.f32.gmra.mrb[56].mxu0 %v20677_v10  ;;  %v13026_v59 = vld [vmem:[%s23504_s5 + $0x170] sm:$0xff] }
 0x69b   : > { %v20690_v28 = vmax.f32 %v7036_v29, 0.0  ;;  %v15537_v33 = vpop.f32.mrb[26].mxu1  ;;  %v20803_v29 = vld [vmem:[#allocation3 + $0x90] sm:$0xff] }
 0x69c   : > { %7101 = vst [vmem:[#allocation3 + $0x141] sm:$0xff] %v20687_v27  ;;  %v7039_v34 = vadd.f32 %v15537_v33, %v20608_v53  ;;  %v6944_v44 = vpop.f32.mrb[27].mxu1  ;;  %v16716_v33 = vpack.c.bf16 %v13027_v60, %v13026_v59  ;;  %v20839_v43 = vld [vmem:[#allocation3 + $0x108] sm:$0xff]  ;;  %v20842_v62 = vld [vmem:[#allocation3 + $0x110] sm:$0xff]  ;;  %v13033_v60 = vld [vmem:[%s23504_s5 + $0x1a8] sm:$0xff] }
 0x69d   : > { %7100 = vst [vmem:[#allocation3 + $0x139] sm:$0xff] %v20690_v28  ;;  %v7038_v7 = vadd.f32 %v20608_v53, %v6944_v44  ;;  %15615 = vmatprep.mubr.f32.mxu0 %v20690_v28  ;;  %v13028_v44 = vld [vmem:[%s23504_s5 + $0x180] sm:$0xff] }
 0x69e   : > { %v20697_v2 = vmax.f32 %v7039_v34, 0.0  ;;  %15616 = vmatmul.mubr.f32.gmra.mrb[58].mxu0 %v20687_v27  ;;  %v20806_v34 = vld [vmem:[#allocation3 + $0x98] sm:$0xff]  ;;  %v13032_v59 = vld [vmem:[%s23504_s5 + $0x1a0] sm:$0xff] }
 0x69f   : > { %v20700_v8 = vmax.f32 %v7038_v7, 0.0  ;;  %v15540_v22 = vpop.f32.mrb[28].mxu1  ;;  %v13029_v7 = vld [vmem:[%s23504_s5 + $0x188] sm:$0xff] }
 0x6a0   : > { %7103 = vst [vmem:[#allocation3 + $0x159] sm:$0xff] %v20697_v2  ;;  %v7041_v42 = vadd.f32 %v15540_v22, %v20608_v53  ;;  %v6954_v0 = vpop.f32.mrb[29].mxu1  ;;  %v20815_v22 = vld [vmem:[#allocation3 + $0xa8] sm:$0xff] }
 0x6a1   : > { %7102 = vst [vmem:[#allocation3 + $0x151] sm:$0xff] %v20700_v8  ;;  %v7040_v55 = vadd.f32 %v20608_v53, %v6954_v0  ;;  %15618 = vmatprep.mubr.f32.mxu0 %v20700_v8  ;;  %v20818_v0 = vld [vmem:[#allocation3 + $0xb0] sm:$0xff] }
 0x6a2   : > { %v20707_v25 = vmax.f32 %v7041_v42, 0.0  ;;  %15619 = vmatmul.mubr.f32.gmra.mrb[60].mxu0 %v20697_v2  ;;  %v16720_v42 = vpack.c.bf16 %v13029_v7, %v13028_v44  ;;  %v16728_v44 = vpack.c.bf16 %v13033_v60, %v13032_v59  ;;  %v20884_v7 = vld [vmem:[#allocation3 + $0x22] sm:$0xff]  ;;  %v13036_v59 = vld [vmem:[%s23504_s5 + $0x1c0] sm:$0xff]  ;;  %v13037_v60 = vld [vmem:[%s23504_s5 + $0x1c8] sm:$0xff] }
 0x6a3   : > { %v20710_v39 = vmax.f32 %v7040_v55, 0.0  ;;  %v15543_v46 = vpop.f32.mrb[30].mxu1  ;;  %v20821_v55 = vld [vmem:[#allocation3 + $0xc0] sm:$0xff] }
 0x6a4   : > { %7105 = vst [vmem:[#allocation3 + $0x171] sm:$0xff] %v20707_v25  ;;  %v20714_v47 = vadd.f32 %v15543_v46, %v20608_v53  ;;  %v6964_v54 = vpop.f32.mrb[31].mxu1  ;;  %v20824_v46 = vld [vmem:[#allocation3 + $0xc8] sm:$0xff] }
 0x6a5   : > { %7104 = vst [vmem:[#allocation3 + $0x169] sm:$0xff] %v20710_v39  ;;  %v20718_v24 = vadd.f32 %v20608_v53, %v6964_v54  ;;  %15621 = vmatprep.mubr.f32.mxu0 %v20710_v39  ;;  %v16692_v53 = vpack.c.bf16 %v13015_v9, %v13014_v3  ;;  %v20827_v54 = vld [vmem:[#allocation3 + $0xd8] sm:$0xff]  ;;  %v20830_v3 = vld [vmem:[#allocation3 + $0xe0] sm:$0xff]  ;;  %v20833_v9 = vld [vmem:[#allocation3 + $0xf0] sm:$0xff] }
 0x6a6   : > { %v23616_v17 = vmax.f32 %v20714_v47, 0.0  ;;  %15622 = vmatmul.mubr.f32.gmra.mrb[62].mxu0 %v20707_v25 }
 0x6a7   : > { %v23617_v56 = vmax.f32 %v20718_v24, 0.0  ;;  %15656 = vmatprep.mubr.f32.mxu0 %v20539_v6 }
 0x6a8   : > { %7107 = vst [vmem:[#allocation3 + $0x189] sm:$0xff] %v23616_v17  ;;  %v20857_v4 = vld [vmem:[#allocation3 + $0x150] sm:$0xff]  ;;  %v20860_v5 = vld [vmem:[#allocation3 + $0x158] sm:$0xff] }
 0x6a9   : > { %7106 = vst [vmem:[#allocation3 + $0x181] sm:$0xff] %v23617_v56  ;;  %v20905_v17 = vld [vmem:[#allocation3 + $0x4a] sm:$0xff] }
 0x6aa   : > { %15657 = vmatmul.mubr.f32.vlgmr.msra.gmra.mrb[32].mxu0 %v20539_v6  ;;  %v20755_v6 = vld [vmem:[#allocation3 + $0x30] sm:$0xff]  ;;  %23852 = vst [vmem:[#allocation22_spill] sm:$0xff] %v20905_v17  ;;  %v13039_v56 = vld [vmem:[%s23504_s5 + $0x1d8] sm:$0xff] }
 0x6ab   : > { %15659 = vmatprep.mubr.f32.mxu0 %v20742_v30  ;;  %16691 = vmatpush3.bf16.msra.mxu0 %v20602_v49  ;;  %v16700_v49 = vpack.c.bf16 %v13019_v37, %v13018_v16  ;;  %v20848_v16 = vld [vmem:[#allocation3 + $0x128] sm:$0xff]  ;;  %v20851_v37 = vld [vmem:[#allocation3 + $0x138] sm:$0xff] }
 0x6ac   : > { %16693 = vmatprep.subr.bf16.mxu0 %v16692_v53  ;;  %v20866_v18 = vld [vmem:[#allocation3 + $0x170] sm:$0xff] }
 0x6ad   : > { %23850 = vst [vmem:[#allocation20_spill] sm:$0xff] %v20866_v18 }
 0x6ae   : > { %15660 = vmatmul.mubr.f32.gmra.mrb[34].mxu0 %v20746_v36 }
 0x6af   : > { %15662 = vmatprep.mubr.f32.mxu0 %v20755_v6  ;;  %16695 = vmatpush3.bf16.msra.mxu0 %v16692_v53  ;;  %v20836_v53 = vld [vmem:[#allocation3 + $0xf8] sm:$0xff] }
 0x6b0   : > { %16697 = vmatprep.subr.bf16.mxu0 %v16696_v23 }
 0x6b2   : > { %15663 = vmatmul.mubr.f32.gmra.mrb[36].mxu0 %v20758_v1 }
 0x6b3   : > { %15665 = vmatprep.mubr.f32.mxu0 %v20767_v63  ;;  %16699 = vmatpush3.bf16.msra.mxu0 %v16696_v23  ;;  %v20845_v23 = vld [vmem:[#allocation3 + $0x120] sm:$0xff] }
 0x6b4   : > { %16701 = vmatprep.subr.bf16.mxu0 %v16700_v49 }
 0x6b6   : > { %15666 = vmatmul.mubr.f32.gmra.mrb[38].mxu0 %v20770_v21 }
 0x6b7   : > { %15668 = vmatprep.mubr.f32.mxu0 %v20779_v14  ;;  %16703 = vmatpush3.bf16.msra.mxu0 %v16700_v49  ;;  %v20854_v49 = vld [vmem:[#allocation3 + $0x140] sm:$0xff] }
 0x6b8   : > { %16705 = vmatprep.subr.bf16.mxu0 %v16704_v11 }
 0x6ba   : > { %15669 = vmatmul.mubr.f32.gmra.mrb[40].mxu0 %v20782_v35 }
 0x6bb   : > { %15671 = vmatprep.mubr.f32.mxu0 %v20791_v50  ;;  %16707 = vmatpush3.bf16.msra.mxu0 %v16704_v11  ;;  %v20863_v11 = vld [vmem:[#allocation3 + $0x168] sm:$0xff] }
 0x6bc   : > { %16709 = vmatprep.subr.bf16.mxu0 %v16708_v31  ;;  %23849 = vst [vmem:[#allocation19_spill] sm:$0xff] %v20863_v11 }
 0x6be   : > { %15672 = vmatmul.mubr.f32.gmra.mrb[42].mxu0 %v20794_v20 }
 0x6bf   : > { %15674 = vmatprep.mubr.f32.mxu0 %v20803_v29  ;;  %16711 = vmatpush3.bf16.msra.mxu0 %v16708_v31  ;;  %v13030_v31 = vld [vmem:[%s23504_s5 + $0x190] sm:$0xff] }
 0x6c0   : > { %16713 = vmatprep.subr.bf16.mxu0 %v16712_v52 }
 0x6c2   : > { %15675 = vmatmul.mubr.f32.gmra.mrb[44].mxu0 %v20806_v34 }
 0x6c3   : > { %15677 = vmatprep.mubr.f32.mxu0 %v20815_v22  ;;  %16715 = vmatpush3.bf16.msra.mxu0 %v16712_v52  ;;  %v16724_v52 = vpack.c.bf16 %v13031_v51, %v13030_v31  ;;  %v13035_v31 = vld [vmem:[%s23504_s5 + $0x1b8] sm:$0xff]  ;;  %v20893_v51 = vld [vmem:[#allocation3 + $0x32] sm:$0xff] }
 0x6c4   : > { %16717 = vmatprep.subr.bf16.mxu0 %v16716_v33 }
 0x6c6   : > { %15678 = vmatmul.mubr.f32.gmra.mrb[46].mxu0 %v20818_v0 }
 0x6c7   : > { %15680 = vmatprep.mubr.f32.mxu0 %v20821_v55  ;;  %16719 = vmatpush3.bf16.msra.mxu0 %v16716_v33  ;;  %v20881_v33 = vld [vmem:[#allocation3 + $0x1a] sm:$0xff] }
 0x6c8   : > { %16721 = vmatprep.subr.bf16.mxu0 %v16720_v42 }
 0x6ca   : > { %15681 = vmatmul.mubr.f32.gmra.mrb[48].mxu0 %v20824_v46 }
 0x6cb   : > { %15683 = vmatprep.mubr.f32.mxu0 %v20827_v54 }
 0x6ce   : > { %15684 = vmatmul.mubr.f32.gmra.mrb[50].mxu0 %v20830_v3 }
 0x6cf   : > { %15686 = vmatprep.mubr.f32.mxu0 %v20833_v9 }
 0x6d2   : > { %15687 = vmatmul.mubr.f32.gmra.mrb[52].mxu0 %v20836_v53 }
 0x6d3   : > { %15689 = vmatprep.mubr.f32.mxu0 %v20839_v43 }
 0x6d6   : > { %15690 = vmatmul.mubr.f32.gmra.mrb[54].mxu0 %v20842_v62 }
 0x6d7   : > { %15692 = vmatprep.mubr.f32.mxu0 %v20845_v23 }
 0x6da   : > { %15693 = vmatmul.mubr.f32.gmra.mrb[56].mxu0 %v20848_v16 }
 0x6db   : > { %15695 = vmatprep.mubr.f32.mxu0 %v20851_v37 }
 0x6de   : > { %15696 = vmatmul.mubr.f32.gmra.mrb[58].mxu0 %v20854_v49 }
 0x6df   : > { %15698 = vmatprep.mubr.f32.mxu0 %v20857_v4 }
 0x6e2   : > { %15699 = vmatmul.mubr.f32.gmra.mrb[60].mxu0 %v20860_v5 }
 0x6e3   : > { %15701 = vmatprep.mubr.f32.mxu0 %v20863_v11 }
 0x6e6   : > { %15702 = vmatmul.mubr.f32.gmra.mrb[62].mxu0 %v20866_v18 }
 0x6e7   : > { %15736 = vmatprep.mubr.f32.mxu0 %v7655_v40  ;;  %v13034_v40 = vld [vmem:[%s23504_s5 + $0x1b0] sm:$0xff] }
 0x6ea   : > { %15737 = vmatmul.mubr.f32.vlgmr.msra.gmra.mrb[32].mxu0 %v7656_v61  ;;  %v20896_v61 = vld [vmem:[#allocation3 + $0x3a] sm:$0xff] }
 0x6eb   : > { %15739 = vmatprep.mubr.f32.mxu0 %v20881_v33  ;;  %16723 = vmatpush3.bf16.msra.mxu0 %v16720_v42  ;;  %v16732_v42 = vpack.c.bf16 %v13035_v31, %v13034_v40  ;;  %23851 = vst [vmem:[#allocation21_spill] sm:$0xff] %v20896_v61  ;;  %v20908_v40 = vld [vmem:[#allocation3 + $0x52] sm:$0xff]  ;;  %v13038_v31 = vld [vmem:[%s23504_s5 + $0x1d0] sm:$0xff] }
 0x6ec   : > { %16725 = vmatprep.subr.bf16.mxu0 %v16724_v52  ;;  %23853 = vst [vmem:[#allocation23_spill] sm:$0xff] %v20908_v40 }
 0x6ee   : > { %15740 = vmatmul.mubr.f32.gmra.mrb[34].mxu0 %v20884_v7 }
 0x6ef   : > { %15742 = vmatprep.mubr.f32.mxu0 %v20893_v51  ;;  %16727 = vmatpush3.bf16.msra.mxu0 %v16724_v52  ;;  %v16736_v52 = vpack.c.bf16 %v13037_v60, %v13036_v59  ;;  %v20920_v59 = vld [vmem:[#allocation3 + $0x6a] sm:$0xff] }
 0x6f0   : > { %16729 = vmatprep.subr.bf16.mxu0 %v16728_v44  ;;  %23855 = vst [vmem:[#allocation25_spill] sm:$0xff] %v20920_v59  ;;  %v13040_v60 = vld [vmem:[%s23504_s5 + $0x1e0] sm:$0xff] }
 0x6f2   : > { %15743 = vmatmul.mubr.f32.gmra.mrb[36].mxu0 %v20896_v61  ;;  %v20917_v61 = vld [vmem:[#allocation3 + $0x62] sm:$0xff] }
 0x6f3   : > { %15745 = vmatprep.mubr.f32.mxu0 %v20905_v17  ;;  %16731 = vmatpush3.bf16.msra.mxu0 %v16728_v44  ;;  %23854 = vst [vmem:[#allocation24_spill] sm:$0xff] %v20917_v61  ;;  %v16740_v44 = vpack.c.bf16 %v13039_v56, %v13038_v31  ;;  %v13041_v17 = vld [vmem:[%s23504_s5 + $0x1e8] sm:$0xff]  ;;  %v20932_v56 = vld [vmem:[#allocation3 + $0x82] sm:$0xff] }
 0x6f4   : > { %16733 = vmatprep.subr.bf16.mxu0 %v16732_v42  ;;  %23857 = vst [vmem:[#allocation27_spill] sm:$0xff] %v20932_v56  ;;  %v13042_v31 = vld [vmem:[%s23504_s5 + $0x1f0] sm:$0xff] }
 0x6f6   : > { %15746 = vmatmul.mubr.f32.gmra.mrb[38].mxu0 %v20908_v40  ;;  %v20929_v40 = vld [vmem:[#allocation3 + $0x7a] sm:$0xff] }
 0x6f7   : > { %15748 = vmatprep.mubr.f32.mxu0 %v20917_v61  ;;  %16735 = vmatpush3.bf16.msra.mxu0 %v16732_v42  ;;  %23856 = vst [vmem:[#allocation26_spill] sm:$0xff] %v20929_v40  ;;  %v16744_v42 = vpack.c.bf16 %v13041_v17, %v13040_v60  ;;  %v13043_v61 = vld [vmem:[%s23504_s5 + $0x1f8] sm:$0xff]  ;;  %v20944_v17 = vld [vmem:[#allocation3 + $0x9a] sm:$0xff]  ;;  %v13044_v60 = vld [vmem:[%s23504_s5 + $0x200] sm:$0xff] }
 0x6f8   : > { %16737 = vmatprep.subr.bf16.mxu0 %v16736_v52  ;;  %23859 = vst [vmem:[#allocation29_spill] sm:$0xff] %v20944_v17 }
 0x6fa   : > { %15749 = vmatmul.mubr.f32.gmra.mrb[40].mxu0 %v20920_v59  ;;  %v20941_v59 = vld [vmem:[#allocation3 + $0x92] sm:$0xff] }
 0x6fb   : > { %15751 = vmatprep.mubr.f32.mxu0 %v20929_v40  ;;  %16739 = vmatpush3.bf16.msra.mxu0 %v16736_v52  ;;  %23858 = vst [vmem:[#allocation28_spill] sm:$0xff] %v20941_v59  ;;  %v16748_v52 = vpack.c.bf16 %v13043_v61, %v13042_v31  ;;  %v13045_v40 = vld [vmem:[%s23504_s5 + $0x208] sm:$0xff]  ;;  %v20959_v31 = vld [vmem:[#allocation3 + $0xc2] sm:$0xff] }
 0x6fc   : > { %16741 = vmatprep.subr.bf16.mxu0 %v16740_v44  ;;  %v20956_v61 = vld [vmem:[#allocation3 + $0xb2] sm:$0xff]  ;;  %23860 = vst [vmem:[#allocation30_spill] sm:$0xff] %v20959_v31 }
 0x6fe   : > { %15752 = vmatmul.mubr.f32.gmra.mrb[42].mxu0 %v20932_v56  ;;  %v20953_v56 = vld [vmem:[#allocation3 + $0xaa] sm:$0xff] }
 0x6ff   : > { %15754 = vmatprep.mubr.f32.mxu0 %v20941_v59  ;;  %16743 = vmatpush3.bf16.msra.mxu0 %v16740_v44  ;;  %v16752_v44 = vpack.c.bf16 %v13045_v40, %v13044_v60  ;;  %v20962_v59 = vld [vmem:[#allocation3 + $0xca] sm:$0xff]  ;;  %v20971_v40 = vld [vmem:[#allocation3 + $0xf2] sm:$0xff]  ;;  %v20974_v60 = vld [vmem:[#allocation3 + $0xfa] sm:$0xff] }
 0x700   : > { %16745 = vmatprep.subr.bf16.mxu0 %v16744_v42  ;;  %23861 = vst [vmem:[#allocation31_spill] sm:$0xff] %v20962_v59  ;;  %23864 = vst [vmem:[#allocation34_spill] sm:$0xff] %v20971_v40 }
 0x701   : > { %23865 = vst [vmem:[#allocation35_spill] sm:$0xff] %v20974_v60 }
 0x702   : > { %15755 = vmatmul.mubr.f32.gmra.mrb[44].mxu0 %v20944_v17  ;;  %v20965_v17 = vld [vmem:[#allocation3 + $0xda] sm:$0xff] }
 0x703   : > { %15757 = vmatprep.mubr.f32.mxu0 %v20953_v56  ;;  %16747 = vmatpush3.bf16.msra.mxu0 %v16744_v42  ;;  %23862 = vst [vmem:[#allocation32_spill] sm:$0xff] %v20965_v17  ;;  %v20968_v42 = vld [vmem:[#allocation3 + $0xe2] sm:$0xff] }
 0x704   : > { %16749 = vmatprep.subr.bf16.mxu0 %v16748_v52  ;;  %23863 = vst [vmem:[#allocation33_spill] sm:$0xff] %v20968_v42 }
 0x706   : > { %15758 = vmatmul.mubr.f32.gmra.mrb[46].mxu0 %v20956_v61 }
 0x707   : > { %15760 = vmatprep.mubr.f32.mxu0 %v20959_v31  ;;  %16751 = vmatpush3.bf16.msra.mxu0 %v16748_v52  ;;  %v20977_v52 = vld [vmem:[#allocation3 + $0x10a] sm:$0xff] }
 0x708   : > { %16753 = vmatprep.subr.bf16.mxu0 %v16752_v44  ;;  %23866 = vst [vmem:[#allocation36_spill] sm:$0xff] %v20977_v52 }
 0x70a   : > { %15761 = vmatmul.mubr.f32.gmra.mrb[48].mxu0 %v20962_v59  ;;  %v20980_v59 = vld [vmem:[#allocation3 + $0x112] sm:$0xff] }
 0x70b   : > { %15763 = vmatprep.mubr.f32.mxu0 %v20965_v17  ;;  %23867 = vst [vmem:[#allocation37_spill] sm:$0xff] %v20980_v59  ;;  %v20983_v17 = vld [vmem:[#allocation3 + $0x122] sm:$0xff] }
 0x70c   : > { %23868 = vst [vmem:[#allocation38_spill] sm:$0xff] %v20983_v17 }
 0x70e   : > { %15764 = vmatmul.mubr.f32.gmra.mrb[50].mxu0 %v20968_v42  ;;  %v20986_v42 = vld [vmem:[#allocation3 + $0x12a] sm:$0xff] }
 0x70f   : > { %15766 = vmatprep.mubr.f32.mxu0 %v20971_v40  ;;  %23869 = vst [vmem:[#allocation39_spill] sm:$0xff] %v20986_v42  ;;  %v20989_v40 = vld [vmem:[#allocation3 + $0x13a] sm:$0xff] }
 0x710   : > { %23870 = vst [vmem:[#allocation40_spill] sm:$0xff] %v20989_v40 }
 0x712   : > { %15767 = vmatmul.mubr.f32.gmra.mrb[52].mxu0 %v20974_v60  ;;  %v20992_v60 = vld [vmem:[#allocation3 + $0x142] sm:$0xff] }
 0x713   : > { %15769 = vmatprep.mubr.f32.mxu0 %v20977_v52  ;;  %23871 = vst [vmem:[#allocation41_spill] sm:$0xff] %v20992_v60  ;;  %v20995_v52 = vld [vmem:[#allocation3 + $0x152] sm:$0xff] }
 0x714   : > { %23872 = vst [vmem:[#allocation42_spill] sm:$0xff] %v20995_v52 }
 0x716   : > { %15770 = vmatmul.mubr.f32.gmra.mrb[54].mxu0 %v20980_v59  ;;  %v20998_v59 = vld [vmem:[#allocation3 + $0x15a] sm:$0xff] }
 0x717   : > { %15772 = vmatprep.mubr.f32.mxu0 %v20983_v17  ;;  %23873 = vst [vmem:[#allocation17_spill] sm:$0xff] %v20998_v59  ;;  %v21001_v17 = vld [vmem:[#allocation3 + $0x16a] sm:$0xff] }
 0x718   : > { %23874 = vst [vmem:[#allocation18_spill] sm:$0xff] %v21001_v17 }
 0x71a   : > { %15773 = vmatmul.mubr.f32.gmra.mrb[56].mxu0 %v20986_v42  ;;  %v21004_v42 = vld [vmem:[#allocation3 + $0x172] sm:$0xff] }
 0x71b   : > { %15775 = vmatprep.mubr.f32.mxu0 %v20989_v40  ;;  %v13046_v40 = vld [vmem:[%s23504_s5 + $0x210] sm:$0xff] }
 0x71e   : > { %15776 = vmatmul.mubr.f32.gmra.mrb[58].mxu0 %v20992_v60  ;;  %v13047_v60 = vld [vmem:[%s23504_s5 + $0x218] sm:$0xff] }
 0x71f   : > { %15778 = vmatprep.mubr.f32.mxu0 %v20995_v52  ;;  %v16756_v52 = vpack.c.bf16 %v13047_v60, %v13046_v40  ;;  %v13051_v40 = vld [vmem:[%s23504_s5 + $0x238] sm:$0xff]  ;;  %v13054_v60 = vld [vmem:[%s23504_s5 + $0x250] sm:$0xff] }
 0x722   : > { %15779 = vmatmul.mubr.f32.gmra.mrb[60].mxu0 %v20998_v59  ;;  %v13048_v59 = vld [vmem:[%s23504_s5 + $0x220] sm:$0xff] }
 0x723   : > { %15781 = vmatprep.mubr.f32.mxu0 %v21001_v17  ;;  %v13049_v17 = vld [vmem:[%s23504_s5 + $0x228] sm:$0xff] }
 0x724   : > { %v16760_v31 = vpack.c.bf16 %v13049_v17, %v13048_v59  ;;  %v13053_v59 = vld [vmem:[%s23504_s5 + $0x248] sm:$0xff] }
 0x726   : > { %15782 = vmatmul.mubr.f32.gmra.mrb[62].mxu0 %v21004_v42 }
 0x727   : > { %15816 = vmatprep.mubr.f32.mxu0 %v20742_v30  ;;  %v13050_v30 = vld [vmem:[%s23504_s5 + $0x230] sm:$0xff] }
 0x72a   : > { %15817 = vmatmul.mubr.f32.vlgmr.msra.gmra.mrb[32].mxu0 %v20746_v36  ;;  %v16764_v36 = vpack.c.bf16 %v13051_v40, %v13050_v30  ;;  %v13057_v40 = vld [vmem:[%s23504_s5 + $0x268] sm:$0xff] }
 0x72b   : > { %15819 = vmatprep.mubr.f32.mxu0 %v20755_v6  ;;  %16755 = vmatpush3.bf16.msra.mxu0 %v16752_v44  ;;  %v13052_v44 = vld [vmem:[%s23504_s5 + $0x240] sm:$0xff] }
 0x72c   : > { %16757 = vmatprep.subr.bf16.mxu0 %v16756_v52  ;;  %v16768_v17 = vpack.c.bf16 %v13053_v59, %v13052_v44  ;;  %v13059_v59 = vld [vmem:[%s23504_s5 + $0x278] sm:$0xff] }
 0x72e   : > { %15820 = vmatmul.mubr.f32.gmra.mrb[34].mxu0 %v20758_v1 }
 0x72f   : > { %15822 = vmatprep.mubr.f32.mxu0 %v20767_v63  ;;  %16759 = vmatpush3.bf16.msra.mxu0 %v16756_v52  ;;  %v13055_v52 = vld [vmem:[%s23504_s5 + $0x258] sm:$0xff] }
 0x730   : > { %16761 = vmatprep.subr.bf16.mxu0 %v16760_v31  ;;  %v16772_v30 = vpack.c.bf16 %v13055_v52, %v13054_v60  ;;  %v13061_v52 = vld [vmem:[%s23504_s5 + $0x288] sm:$0xff] }
 0x732   : > { %15823 = vmatmul.mubr.f32.gmra.mrb[36].mxu0 %v20770_v21 }
 0x733   : > { %15825 = vmatprep.mubr.f32.mxu0 %v20779_v14  ;;  %16763 = vmatpush3.bf16.msra.mxu0 %v16760_v31  ;;  %v13056_v31 = vld [vmem:[%s23504_s5 + $0x260] sm:$0xff] }
 0x734   : > { %16765 = vmatprep.subr.bf16.mxu0 %v16764_v36  ;;  %v16776_v44 = vpack.c.bf16 %v13057_v40, %v13056_v31  ;;  %v21088_v40 = vld [vmem:[#allocation3 + $0x188] sm:$0xff] }
 0x735   : > { %23876 = vst [vmem:[#allocation44_spill] sm:$0xff] %v21088_v40 }
 0x736   : > { %15826 = vmatmul.mubr.f32.gmra.mrb[38].mxu0 %v20782_v35 }
 0x737   : > { %15828 = vmatprep.mubr.f32.mxu0 %v20791_v50  ;;  %16767 = vmatpush3.bf16.msra.mxu0 %v16764_v36  ;;  %v13058_v36 = vld [vmem:[%s23504_s5 + $0x270] sm:$0xff] }
 0x738   : > { %16769 = vmatprep.subr.bf16.mxu0 %v16768_v17  ;;  %v16780_v60 = vpack.c.bf16 %v13059_v59, %v13058_v36  ;;  %v13063_v36 = vld [vmem:[%s23504_s5 + $0x298] sm:$0xff]  ;;  %v8267_v59 = vld [vmem:[#allocation3 + $0x19] sm:$0xff] }
 0x73a   : > { %15829 = vmatmul.mubr.f32.gmra.mrb[40].mxu0 %v20794_v20 }
 0x73b   : > { %15831 = vmatprep.mubr.f32.mxu0 %v20803_v29  ;;  %16771 = vmatpush3.bf16.msra.mxu0 %v16768_v17  ;;  %v13060_v17 = vld [vmem:[%s23504_s5 + $0x280] sm:$0xff] }
 0x73c   : > { %16773 = vmatprep.subr.bf16.mxu0 %v16772_v30  ;;  %v16784_v31 = vpack.c.bf16 %v13061_v52, %v13060_v17  ;;  %v8268_v17 = vld [vmem:[#allocation3 + $0x21] sm:$0xff]  ;;  %v13064_v52 = vld [vmem:[%s23504_s5 + $0x2a0] sm:$0xff] }
 0x73e   : > { %15832 = vmatmul.mubr.f32.gmra.mrb[42].mxu0 %v20806_v34 }
 0x73f   : > { %15834 = vmatprep.mubr.f32.mxu0 %v20815_v22  ;;  %16775 = vmatpush3.bf16.msra.mxu0 %v16772_v30  ;;  %v21085_v30 = vld [vmem:[#allocation3 + $0x180] sm:$0xff] }
 0x740   : > { %16777 = vmatprep.subr.bf16.mxu0 %v16776_v44  ;;  %23875 = vst [vmem:[#allocation43_spill] sm:$0xff] %v21085_v30 }
 0x742   : > { %15835 = vmatmul.mubr.f32.gmra.mrb[44].mxu0 %v20818_v0 }
 0x743   : > { %15837 = vmatprep.mubr.f32.mxu0 %v20821_v55  ;;  %16779 = vmatpush3.bf16.msra.mxu0 %v16776_v44  ;;  %v13062_v44 = vld [vmem:[%s23504_s5 + $0x290] sm:$0xff] }
 0x744   : > { %16781 = vmatprep.subr.bf16.mxu0 %v16780_v60 }
 0x746   : > { %15838 = vmatmul.mubr.f32.gmra.mrb[46].mxu0 %v20824_v46 }
 0x747   : > { %15840 = vmatprep.mubr.f32.mxu0 %v20827_v54  ;;  %16783 = vmatpush3.bf16.msra.mxu0 %v16780_v60  ;;  %v16788_v60 = vpack.c.bf16 %v13063_v36, %v13062_v44  ;;  %v13066_v44 = vld [vmem:[%s23504_s5 + $0x2b0] sm:$0xff]  ;;  %v13067_v36 = vld [vmem:[%s23504_s5 + $0x2b8] sm:$0xff] }
 0x748   : > { %16785 = vmatprep.subr.bf16.mxu0 %v16784_v31 }
 0x74a   : > { %15841 = vmatmul.mubr.f32.gmra.mrb[48].mxu0 %v20830_v3 }
 0x74b   : > { %15843 = vmatprep.mubr.f32.mxu0 %v20833_v9 }
 0x74e   : > { %15844 = vmatmul.mubr.f32.gmra.mrb[50].mxu0 %v20836_v53 }
 0x74f   : > { %15846 = vmatprep.mubr.f32.mxu0 %v20839_v43 }
 0x752   : > { %15847 = vmatmul.mubr.f32.gmra.mrb[52].mxu0 %v20842_v62 }
 0x753   : > { %15849 = vmatprep.mubr.f32.mxu0 %v20845_v23 }
 0x756   : > { %15850 = vmatmul.mubr.f32.gmra.mrb[54].mxu0 %v20848_v16 }
 0x757   : > { %15852 = vmatprep.mubr.f32.mxu0 %v20851_v37 }
 0x75a   : > { %15853 = vmatmul.mubr.f32.gmra.mrb[56].mxu0 %v20854_v49 }
 0x75b   : > { %15855 = vmatprep.mubr.f32.mxu0 %v20857_v4 }
 0x75e   : > { %15856 = vmatmul.mubr.f32.gmra.mrb[58].mxu0 %v20860_v5 }
 0x75f   : > { %15858 = vmatprep.mubr.f32.mxu0 %v20863_v11  ;;  %v21106_v11 = vld [vmem:[#allocation3 + $0x39] sm:$0xff] }
 0x760   : > { %23877 = vst [vmem:[#allocation16_spill] sm:$0xff] %v21106_v11 }
 0x762   : > { %15859 = vmatmul.mubr.f32.gmra.mrb[60].mxu0 %v20866_v18  ;;  %v21103_v18 = vld [vmem:[#allocation3 + $0x31] sm:$0xff] }
 0x763   : > { %15861 = vmatprep.mubr.f32.mxu0 %v21085_v30  ;;  %v13065_v30 = vld [vmem:[%s23504_s5 + $0x2a8] sm:$0xff] }
 0x766   : > { %15862 = vmatmul.mubr.f32.gmra.mrb[62].mxu0 %v21088_v40  ;;  %v16792_v40 = vpack.c.bf16 %v13065_v30, %v13064_v52  ;;  %v21118_v30 = vld [vmem:[#allocation3 + $0x51] sm:$0xff] }
 0x767   : > { %15896 = vmatprep.mubr.f32.mxu0 %v8267_v59  ;;  %v21115_v59 = vld [vmem:[#allocation3 + $0x49] sm:$0xff]  ;;  %23879 = vst [vmem:[#allocation46_spill] sm:$0xff] %v21118_v30  ;;  %v13069_v52 = vld [vmem:[%s23504_s5 + $0x2c8] sm:$0xff] }
 0x768   : > { %23878 = vst [vmem:[#allocation45_spill] sm:$0xff] %v21115_v59 }
 0x76a   : > { %15897 = vmatmul.mubr.f32.vlgmr.msra.gmra.mrb[32].mxu0 %v8268_v17  ;;  %v13068_v17 = vld [vmem:[%s23504_s5 + $0x2c0] sm:$0xff] }
 0x76b   : > { %15899 = vmatprep.mubr.f32.mxu0 %v21103_v18  ;;  %16787 = vmatpush3.bf16.msra.mxu0 %v16784_v31  ;;  %v16796_v31 = vpack.c.bf16 %v13067_v36, %v13066_v44  ;;  %v21130_v44 = vld [vmem:[#allocation3 + $0x69] sm:$0xff]  ;;  %v13070_v36 = vld [vmem:[%s23504_s5 + $0x2d0] sm:$0xff] }
 0x76c   : > { %16789 = vmatprep.subr.bf16.mxu0 %v16788_v60 }
 0x76e   : > { %15900 = vmatmul.mubr.f32.gmra.mrb[34].mxu0 %v21106_v11  ;;  %v21127_v11 = vld [vmem:[#allocation3 + $0x61] sm:$0xff] }
 0x76f   : > { %15902 = vmatprep.mubr.f32.mxu0 %v21115_v59  ;;  %16791 = vmatpush3.bf16.msra.mxu0 %v16788_v60  ;;  %23880 = vst [vmem:[#allocation47_spill] sm:$0xff] %v21127_v11  ;;  %v16800_v60 = vpack.c.bf16 %v13069_v52, %v13068_v17  ;;  %v13071_v59 = vld [vmem:[%s23504_s5 + $0x2d8] sm:$0xff]  ;;  %v13072_v52 = vld [vmem:[%s23504_s5 + $0x2e0] sm:$0xff] }
 0x770   : > { %16793 = vmatprep.subr.bf16.mxu0 %v16792_v40  ;;  %v21142_v17 = vld [vmem:[#allocation3 + $0x81] sm:$0xff] }
 0x772   : > { %15903 = vmatmul.mubr.f32.gmra.mrb[36].mxu0 %v21118_v30  ;;  %v21139_v30 = vld [vmem:[#allocation3 + $0x79] sm:$0xff] }
 0x773   : > { %15905 = vmatprep.mubr.f32.mxu0 %v21127_v11  ;;  %16795 = vmatpush3.bf16.msra.mxu0 %v16792_v40  ;;  %23881 = vst [vmem:[#allocation48_spill] sm:$0xff] %v21139_v30  ;;  %v16804_v40 = vpack.c.bf16 %v13071_v59, %v13070_v36  ;;  %v13073_v11 = vld [vmem:[%s23504_s5 + $0x2e8] sm:$0xff]  ;;  %v13074_v59 = vld [vmem:[%s23504_s5 + $0x2f0] sm:$0xff]  ;;  %v13075_v36 = vld [vmem:[%s23504_s5 + $0x2f8] sm:$0xff] }
 0x774   : > { %16797 = vmatprep.subr.bf16.mxu0 %v16796_v31 }
 0x776   : > { %15906 = vmatmul.mubr.f32.gmra.mrb[38].mxu0 %v21130_v44 }
 0x777   : > { %15908 = vmatprep.mubr.f32.mxu0 %v21139_v30  ;;  %16799 = vmatpush3.bf16.msra.mxu0 %v16796_v31  ;;  %v16808_v30 = vpack.c.bf16 %v13073_v11, %v13072_v52  ;;  %v21152_v31 = vld [vmem:[#allocation3 + $0x99] sm:$0xff]  ;;  %v13076_v11 = vld [vmem:[%s23504_s5 + $0x300] sm:$0xff] }
 0x778   : > { %16801 = vmatprep.subr.bf16.mxu0 %v16800_v60 }
 0x77a   : > { %15909 = vmatmul.mubr.f32.gmra.mrb[40].mxu0 %v21142_v17 }
 0x77b   : > { %15911 = vmatprep.mubr.f32.mxu0 %v20622_v32  ;;  %16803 = vmatpush3.bf16.msra.mxu0 %v16800_v60  ;;  %v16812_v32 = vpack.c.bf16 %v13075_v36, %v13074_v59  ;;  %v13077_v60 = vld [vmem:[%s23504_s5 + $0x308] sm:$0xff]  ;;  %v23891_v36 = vld [vmem:[#allocation28_spill] sm:$0xff] }
 0x77c   : > { %16805 = vmatprep.subr.bf16.mxu0 %v16804_v40  ;;  %v16816_v52 = vpack.c.bf16 %v13077_v60, %v13076_v11  ;;  %v23890_v59 = vld [vmem:[#allocation27_spill] sm:$0xff]  ;;  %v13090_v11 = vld [vmem:[%s23504_s5 + $0x370] sm:$0xff]  ;;  %v13091_v60 = vld [vmem:[%s23504_s5 + $0x378] sm:$0xff] }
 0x77e   : > { %15912 = vmatmul.mubr.f32.gmra.mrb[42].mxu0 %v21152_v31 }
 0x77f   : > { %15914 = vmatprep.mubr.f32.mxu0 %v20630_v13  ;;  %16807 = vmatpush3.bf16.msra.mxu0 %v16804_v40  ;;  %v13078_v13 = vld [vmem:[%s23504_s5 + $0x310] sm:$0xff]  ;;  %v13089_v40 = vld [vmem:[%s23504_s5 + $0x368] sm:$0xff] }
 0x780   : > { %16809 = vmatprep.subr.bf16.mxu0 %v16808_v30 }
 0x782   : > { %15915 = vmatmul.mubr.f32.gmra.mrb[44].mxu0 %v20628_v26  ;;  %v23882_v26 = vmax.f32 %v20718_v24, 0.0  ;;  %v13087_v24 = vld [vmem:[%s23504_s5 + $0x358] sm:$0xff] }
 0x783   : > { %15917 = vmatprep.mubr.f32.mxu0 %v20640_v57  ;;  %16811 = vmatpush3.bf16.msra.mxu0 %v16808_v30  ;;  %v23883_v57 = vmax.f32 %v20714_v47, 0.0  ;;  %v13086_v47 = vld [vmem:[%s23504_s5 + $0x350] sm:$0xff]  ;;  %v13088_v30 = vld [vmem:[%s23504_s5 + $0x360] sm:$0xff] }
 0x784   : > { %16813 = vmatprep.subr.bf16.mxu0 %v16812_v32 }
 0x786   : > { %15918 = vmatmul.mubr.f32.gmra.mrb[46].mxu0 %v20637_v41  ;;  %v13079_v41 = vld [vmem:[%s23504_s5 + $0x318] sm:$0xff] }
 0x787   : > { %15920 = vmatprep.mubr.f32.mxu0 %v20650_v15  ;;  %16815 = vmatpush3.bf16.msra.mxu0 %v16812_v32  ;;  %v13080_v15 = vld [vmem:[%s23504_s5 + $0x320] sm:$0xff]  ;;  %v16840_v32 = vpack.c.bf16 %v13089_v40, %v13088_v30  ;;  %v13099_v40 = vld [vmem:[%s23504_s5 + $0x3b8] sm:$0xff] }
 0x788   : > { %16817 = vmatprep.subr.bf16.mxu0 %v16816_v52 }
 0x78a   : > { %15921 = vmatmul.mubr.f32.gmra.mrb[48].mxu0 %v20647_v12  ;;  %v16820_v12 = vpack.c.bf16 %v13079_v41, %v13078_v13  ;;  %v13092_v13 = vld [vmem:[%s23504_s5 + $0x380] sm:$0xff]  ;;  %v13093_v41 = vld [vmem:[%s23504_s5 + $0x388] sm:$0xff] }
 0x78b   : > { %15923 = vmatprep.mubr.f32.mxu0 %v20660_v45 }
 0x78e   : > { %15924 = vmatmul.mubr.f32.gmra.mrb[50].mxu0 %v20657_v48  ;;  %v13081_v48 = vld [vmem:[%s23504_s5 + $0x328] sm:$0xff] }
 0x78f   : > { %15926 = vmatprep.mubr.f32.mxu0 %v20670_v38  ;;  %v16824_v45 = vpack.c.bf16 %v13081_v48, %v13080_v15  ;;  %v13083_v38 = vld [vmem:[%s23504_s5 + $0x338] sm:$0xff]  ;;  %v23894_v15 = vld [vmem:[#allocation31_spill] sm:$0xff] }
 0x790   : > { %v23896_v48 = vld [vmem:[#allocation33_spill] sm:$0xff] }
 0x792   : > { %15927 = vmatmul.mubr.f32.gmra.mrb[52].mxu0 %v20667_v58  ;;  %v13082_v58 = vld [vmem:[%s23504_s5 + $0x330] sm:$0xff] }
 0x793   : > { %15929 = vmatprep.mubr.f32.mxu0 %v20680_v19  ;;  %v23885_v19 = vld [vmem:[#allocation22_spill] sm:$0xff] }
 0x796   : > { %15930 = vmatmul.mubr.f32.gmra.mrb[54].mxu0 %v20677_v10  ;;  %v23884_v10 = vld [vmem:[#allocation21_spill] sm:$0xff] }
 0x797   : > { %15932 = vmatprep.mubr.f32.mxu0 %v20690_v28  ;;  %v13084_v28 = vld [vmem:[%s23504_s5 + $0x340] sm:$0xff] }
 0x79a   : > { %15933 = vmatmul.mubr.f32.gmra.mrb[56].mxu0 %v20687_v27  ;;  %v16828_v27 = vpack.c.bf16 %v13083_v38, %v13082_v58  ;;  %v23898_v58 = vld [vmem:[#allocation35_spill] sm:$0xff]  ;;  %v23899_v38 = vld [vmem:[#allocation36_spill] sm:$0xff] }
 0x79b   : > { %15935 = vmatprep.mubr.f32.mxu0 %v20700_v8  ;;  %v23886_v8 = vld [vmem:[#allocation23_spill] sm:$0xff] }
 0x79e   : > { %15936 = vmatmul.mubr.f32.gmra.mrb[58].mxu0 %v20697_v2  ;;  %v13085_v2 = vld [vmem:[%s23504_s5 + $0x348] sm:$0xff] }
 0x79f   : > { %15938 = vmatprep.mubr.f32.mxu0 %v20710_v39  ;;  %v16832_v39 = vpack.c.bf16 %v13085_v2, %v13084_v28  ;;  %v23904_v28 = vld [vmem:[#allocation41_spill] sm:$0xff]  ;;  %v23905_v2 = vld [vmem:[#allocation42_spill] sm:$0xff] }
 0x7a2   : > { %15939 = vmatmul.mubr.f32.gmra.mrb[60].mxu0 %v20707_v25  ;;  %v23887_v25 = vld [vmem:[#allocation24_spill] sm:$0xff] }
 0x7a3   : > { %15941 = vmatprep.mubr.f32.mxu0 %v23882_v26  ;;  %v16844_v26 = vpack.c.bf16 %v13091_v60, %v13090_v11  ;;  %v13107_v11 = vld [vmem:[%s23504_s5 + $0x3f8] sm:$0xff]  ;;  %v13109_v60 = vld [vmem:[%s23504_s5 + $0x408] sm:$0xff] }
 0x7a6   : > { %15942 = vmatmul.mubr.f32.gmra.mrb[62].mxu0 %v23883_v57  ;;  %v23893_v57 = vld [vmem:[#allocation30_spill] sm:$0xff] }
 0x7a7   : > { %15976 = vmatprep.mubr.f32.mxu0 %v20881_v33  ;;  %v23888_v33 = vld [vmem:[#allocation25_spill] sm:$0xff] }
 0x7aa   : > { %15977 = vmatmul.mubr.f32.vlgmr.msra.gmra.mrb[32].mxu0 %v20884_v7  ;;  %v23889_v7 = vld [vmem:[#allocation26_spill] sm:$0xff] }
 0x7ab   : > { %15979 = vmatprep.mubr.f32.mxu0 %v20893_v51  ;;  %16819 = vmatpush3.bf16.msra.mxu0 %v16816_v52  ;;  %v16836_v51 = vpack.c.bf16 %v13087_v24, %v13086_v47  ;;  %v23892_v52 = vld [vmem:[#allocation29_spill] sm:$0xff]  ;;  %v13094_v24 = vld [vmem:[%s23504_s5 + $0x390] sm:$0xff] }
 0x7ac   : > { %16821 = vmatprep.subr.bf16.mxu0 %v16820_v12  ;;  %v21270_v47 = vld [vmem:[#allocation3 + $0x18a] sm:$0xff] }
 0x7ae   : > { %15980 = vmatmul.mubr.f32.gmra.mrb[34].mxu0 %v23884_v10  ;;  %v23901_v10 = vld [vmem:[#allocation38_spill] sm:$0xff] }
 0x7af   : > { %15982 = vmatprep.mubr.f32.mxu0 %v23885_v19  ;;  %16823 = vmatpush3.bf16.msra.mxu0 %v16820_v12  ;;  %v16848_v12 = vpack.c.bf16 %v13093_v41, %v13092_v13  ;;  %v23902_v19 = vld [vmem:[#allocation39_spill] sm:$0xff]  ;;  %v9876_v41 = vld [vmem:[%s23506_s7 + $0x40] sm:$0xff] }
 0x7b0   : > { %16825 = vmatprep.subr.bf16.mxu0 %v16824_v45 }
 0x7b2   : > { %15983 = vmatmul.mubr.f32.gmra.mrb[36].mxu0 %v23886_v8  ;;  %v23906_v8 = vld [vmem:[#allocation17_spill] sm:$0xff] }
 0x7b3   : > { %15985 = vmatprep.mubr.f32.mxu0 %v23887_v25  ;;  %16827 = vmatpush3.bf16.msra.mxu0 %v16824_v45  ;;  %v23897_v45 = vld [vmem:[#allocation34_spill] sm:$0xff] }
 0x7b4   : > { %16829 = vmatprep.subr.bf16.mxu0 %v16828_v27  ;;  %v23907_v25 = vld [vmem:[#allocation18_spill] sm:$0xff] }
 0x7b6   : > { %15986 = vmatmul.mubr.f32.gmra.mrb[38].mxu0 %v23888_v33  ;;  %v13095_v33 = vld [vmem:[%s23504_s5 + $0x398] sm:$0xff] }
 0x7b7   : > { %15988 = vmatprep.mubr.f32.mxu0 %v23889_v7  ;;  %16831 = vmatpush3.bf16.msra.mxu0 %v16828_v27  ;;  %v23903_v27 = vld [vmem:[#allocation40_spill] sm:$0xff]  ;;  %v16852_v7 = vpack.c.bf16 %v13095_v33, %v13094_v24  ;;  %v23915_v33 = vld [vmem:[#allocation47_spill] sm:$0xff] }
 0x7b8   : > { %16833 = vmatprep.subr.bf16.mxu0 %v16832_v39 }
 0x7ba   : > { %15989 = vmatmul.mubr.f32.gmra.mrb[40].mxu0 %v23890_v59  ;;  %v13101_v59 = vld [vmem:[%s23504_s5 + $0x3c8] sm:$0xff] }
 0x7bb   : > { %15991 = vmatprep.mubr.f32.mxu0 %v23891_v36  ;;  %16835 = vmatpush3.bf16.msra.mxu0 %v16832_v39  ;;  %v21267_v39 = vld [vmem:[#allocation3 + $0x182] sm:$0xff] }
 0x7bc   : > { %16837 = vmatprep.subr.bf16.mxu0 %v16836_v51  ;;  %v13103_v36 = vld [vmem:[%s23504_s5 + $0x3d8] sm:$0xff] }
 0x7be   : > { %15992 = vmatmul.mubr.f32.gmra.mrb[42].mxu0 %v23892_v52 }
 0x7bf   : > { %15994 = vmatprep.mubr.f32.mxu0 %v20953_v56  ;;  %16839 = vmatpush3.bf16.msra.mxu0 %v16836_v51  ;;  %v23895_v56 = vld [vmem:[#allocation32_spill] sm:$0xff]  ;;  %v13097_v51 = vld [vmem:[%s23504_s5 + $0x3a8] sm:$0xff] }
 0x7c0   : > { %16841 = vmatprep.subr.bf16.mxu0 %v16840_v32 }
 0x7c2   : > { %15995 = vmatmul.mubr.f32.gmra.mrb[44].mxu0 %v20956_v61  ;;  %v23900_v61 = vld [vmem:[#allocation37_spill] sm:$0xff] }
 0x7c3   : > { %15997 = vmatprep.mubr.f32.mxu0 %v23893_v57  ;;  %16843 = vmatpush3.bf16.msra.mxu0 %v16840_v32  ;;  %v13105_v32 = vld [vmem:[%s23504_s5 + $0x3e8] sm:$0xff]  ;;  %v9880_v57 = vld [vmem:[%s23506_s7 + $0x60] sm:$0xff] }
 0x7c4   : > { %16845 = vmatprep.subr.bf16.mxu0 %v16844_v26 }
 0x7c6   : > { %15998 = vmatmul.mubr.f32.gmra.mrb[46].mxu0 %v23894_v15  ;;  %v9885_v15 = vld [vmem:[%s23506_s7 + $0x88] sm:$0xff] }
 0x7c7   : > { %16000 = vmatprep.mubr.f32.mxu0 %v23895_v56  ;;  %16847 = vmatpush3.bf16.msra.mxu0 %v16844_v26  ;;  %v13112_v26 = vld [vmem:[%s23504_s5 + $0x420] sm:$0xff]  ;;  %v9889_v56 = vld [vmem:[%s23506_s7 + $0xa8] sm:$0xff] }
 0x7c8   : > { %16849 = vmatprep.subr.bf16.mxu0 %v16848_v12 }
 0x7ca   : > { %16001 = vmatmul.mubr.f32.gmra.mrb[48].mxu0 %v23896_v48  ;;  %v23912_v48 = vld [vmem:[#allocation16_spill] sm:$0xff] }
 0x7cb   : > { %16003 = vmatprep.mubr.f32.mxu0 %v23897_v45  ;;  %v16918_v45 = vpack.c.bf16 %v9880_v57, %v9876_v41  ;;  %v9928_v41 = vld [vmem:[%s23506_s7 + $0x1e0] sm:$0xff] }
 0x7ce   : > { %16004 = vmatmul.mubr.f32.gmra.mrb[50].mxu0 %v23898_v58  ;;  %v23913_v58 = vld [vmem:[#allocation45_spill] sm:$0xff] }
 0x7cf   : > { %16006 = vmatprep.mubr.f32.mxu0 %v23899_v38  ;;  %v9884_v38 = vld [vmem:[%s23506_s7 + $0x80] sm:$0xff] }
 0x7d2   : > { %16007 = vmatmul.mubr.f32.gmra.mrb[52].mxu0 %v23900_v61  ;;  %v9888_v61 = vld [vmem:[%s23506_s7 + $0xa0] sm:$0xff] }
 0x7d3   : > { %16009 = vmatprep.mubr.f32.mxu0 %v23901_v10  ;;  %v16922_v24 = vpack.c.bf16 %v9888_v61, %v9884_v38  ;;  %v9200_v61 = vld [vmem:[#allocation3 + $0xe1] sm:$0xff] }
 0x7d6   : > { %16010 = vmatmul.mubr.f32.gmra.mrb[54].mxu0 %v23902_v19  ;;  %v13114_v19 = vld [vmem:[%s23504_s5 + $0x430] sm:$0xff] }
 0x7d7   : > { %16012 = vmatprep.mubr.f32.mxu0 %v23903_v27  ;;  %v16920_v27 = vpack.c.bf16 %v9889_v56, %v9885_v15  ;;  %v9198_v15 = vld [vmem:[#allocation3 + $0xc9] sm:$0xff] }
 0x7d8   : > { %v11152_v56 = vld [vmem:[#allocation8 + $0x18] sm:$0xff] }
 0x7da   : > { %16013 = vmatmul.mubr.f32.gmra.mrb[56].mxu0 %v23904_v28  ;;  %v13115_v28 = vld [vmem:[%s23504_s5 + $0x438] sm:$0xff] }
 0x7db   : > { %16015 = vmatprep.mubr.f32.mxu0 %v23905_v2  ;;  %v9893_v2 = vld [vmem:[%s23506_s7 + $0xc8] sm:$0xff] }
 0x7de   : > { %16016 = vmatmul.mubr.f32.gmra.mrb[58].mxu0 %v23906_v8  ;;  %v9897_v8 = vld [vmem:[%s23506_s7 + $0xe8] sm:$0xff] }
 0x7df   : > { %16018 = vmatprep.mubr.f32.mxu0 %v23907_v25  ;;  %v23914_v25 = vld [vmem:[#allocation46_spill] sm:$0xff] }
 0x7e2   : > { %16019 = vmatmul.mubr.f32.gmra.mrb[60].mxu0 %v21004_v42  ;;  %v13096_v42 = vld [vmem:[%s23504_s5 + $0x3a0] sm:$0xff] }
 0x7e3   : > { %16021 = vmatprep.mubr.f32.mxu0 %v21267_v39  ;;  %v16856_v30 = vpack.c.bf16 %v13097_v51, %v13096_v42  ;;  %v9896_v42 = vld [vmem:[%s23506_s7 + $0xe0] sm:$0xff]  ;;  %v16892_v51 = vpack.c.bf16 %v13115_v28, %v13114_v19  ;;  %v9202_v19 = vld [vmem:[#allocation3 + $0xf9] sm:$0xff] }
 0x7e4   : > { %v9204_v28 = vld [vmem:[#allocation3 + $0x111] sm:$0xff] }
 0x7e6   : > { %16022 = vmatmul.mubr.f32.gmra.mrb[62].mxu0 %v21270_v47 }
 0x7e7   : > { %16056 = vmatprep.mubr.f32.mxu0 %v20755_v6  ;;  %v13098_v6 = vld [vmem:[%s23504_s5 + $0x3b0] sm:$0xff] }
 0x7ea   : > { %16057 = vmatmul.mubr.f32.vlgmr.msra.gmra.mrb[32].mxu0 %v20758_v1  ;;  %v16860_v1 = vpack.c.bf16 %v13099_v40, %v13098_v6  ;;  %v16924_v6 = vpack.c.bf16 %v9897_v8, %v9893_v2  ;;  %v13117_v40 = vld [vmem:[%s23504_s5 + $0x448] sm:$0xff]  ;;  %v9205_v2 = vld [vmem:[#allocation3 + $0x121] sm:$0xff]  ;;  %v9206_v8 = vld [vmem:[#allocation3 + $0x129] sm:$0xff] }
 0x7eb   : > { %16059 = vmatprep.mubr.f32.mxu0 %v20767_v63  ;;  %16851 = vmatpush3.bf16.msra.mxu0 %v16848_v12  ;;  %v13100_v63 = vld [vmem:[%s23504_s5 + $0x3c0] sm:$0xff]  ;;  %v13113_v12 = vld [vmem:[%s23504_s5 + $0x428] sm:$0xff] }
 0x7ec   : > { %16853 = vmatprep.subr.bf16.mxu0 %v16852_v7  ;;  %v16888_v10 = vpack.c.bf16 %v13113_v12, %v13112_v26  ;;  %v9197_v26 = vld [vmem:[#allocation3 + $0xc1] sm:$0xff] }
 0x7ee   : > { %16060 = vmatmul.mubr.f32.gmra.mrb[34].mxu0 %v20770_v21  ;;  %v16864_v21 = vpack.c.bf16 %v13101_v59, %v13100_v63  ;;  %v9905_v63 = vld [vmem:[%s23506_s7 + $0x128] sm:$0xff] }
 0x7ef   : > { %16062 = vmatprep.mubr.f32.mxu0 %v20779_v14  ;;  %16855 = vmatpush3.bf16.msra.mxu0 %v16852_v7  ;;  %v13102_v14 = vld [vmem:[%s23504_s5 + $0x3d0] sm:$0xff]  ;;  %v9892_v7 = vld [vmem:[%s23506_s7 + $0xc0] sm:$0xff] }
 0x7f0   : > { %16857 = vmatprep.subr.bf16.mxu0 %v16856_v30  ;;  %v16926_v59 = vpack.c.bf16 %v9896_v42, %v9892_v7  ;;  %v9210_v7 = vld [vmem:[#allocation3 + $0x159] sm:$0xff]  ;;  %v9211_v42 = vld [vmem:[#allocation3 + $0x169] sm:$0xff] }
 0x7f2   : > { %16063 = vmatmul.mubr.f32.gmra.mrb[36].mxu0 %v20782_v35  ;;  %v16868_v35 = vpack.c.bf16 %v13103_v36, %v13102_v14  ;;  %v9900_v14 = vld [vmem:[%s23506_s7 + $0x100] sm:$0xff] }
 0x7f3   : > { %16065 = vmatprep.mubr.f32.mxu0 %v20791_v50  ;;  %16859 = vmatpush3.bf16.msra.mxu0 %v16856_v30  ;;  %v13104_v50 = vld [vmem:[%s23504_s5 + $0x3e0] sm:$0xff] }
 0x7f4   : > { %16861 = vmatprep.subr.bf16.mxu0 %v16860_v1  ;;  %v13116_v30 = vld [vmem:[%s23504_s5 + $0x440] sm:$0xff] }
 0x7f5   : > { %v9904_v36 = vld [vmem:[%s23506_s7 + $0x120] sm:$0xff] }
 0x7f6   : > { %16066 = vmatmul.mubr.f32.gmra.mrb[38].mxu0 %v20794_v20  ;;  %v16872_v20 = vpack.c.bf16 %v13105_v32, %v13104_v50  ;;  %v13118_v50 = vld [vmem:[%s23504_s5 + $0x450] sm:$0xff]  ;;  %v13119_v32 = vld [vmem:[%s23504_s5 + $0x458] sm:$0xff] }
 0x7f7   : > { %16068 = vmatprep.mubr.f32.mxu0 %v20803_v29  ;;  %16863 = vmatpush3.bf16.msra.mxu0 %v16860_v1  ;;  %v13106_v29 = vld [vmem:[%s23504_s5 + $0x3f0] sm:$0xff]  ;;  %v9901_v1 = vld [vmem:[%s23506_s7 + $0x108] sm:$0xff] }
 0x7f8   : > { %16865 = vmatprep.subr.bf16.mxu0 %v16864_v21 }
 0x7fa   : > { %16069 = vmatmul.mubr.f32.gmra.mrb[40].mxu0 %v20806_v34  ;;  %v16876_v34 = vpack.c.bf16 %v13107_v11, %v13106_v29  ;;  %v9913_v29 = vld [vmem:[%s23506_s7 + $0x168] sm:$0xff] }
 0x7fb   : > { %16071 = vmatprep.mubr.f32.mxu0 %v20815_v22  ;;  %16867 = vmatpush3.bf16.msra.mxu0 %v16864_v21  ;;  %v13108_v22 = vld [vmem:[%s23504_s5 + $0x400] sm:$0xff]  ;;  %v23916_v21 = vld [vmem:[#allocation48_spill] sm:$0xff] }
 0x7fc   : > { %16869 = vmatprep.subr.bf16.mxu0 %v16868_v35  ;;  %v9193_v11 = vld [vmem:[#allocation3 + $0x91] sm:$0xff] }
 0x7fe   : > { %16072 = vmatmul.mubr.f32.gmra.mrb[42].mxu0 %v20818_v0  ;;  %v16880_v0 = vpack.c.bf16 %v13109_v60, %v13108_v22  ;;  %v9908_v22 = vld [vmem:[%s23506_s7 + $0x140] sm:$0xff] }
 0x7ff   : > { %16074 = vmatprep.mubr.f32.mxu0 %v20821_v55  ;;  %16871 = vmatpush3.bf16.msra.mxu0 %v16868_v35  ;;  %v23908_v55 = vld [vmem:[#allocation19_spill] sm:$0xff]  ;;  %v16896_v35 = vpack.c.bf16 %v13117_v40, %v13116_v30  ;;  %v9912_v60 = vld [vmem:[%s23506_s7 + $0x160] sm:$0xff]  ;;  %v9213_v30 = vld [vmem:[#allocation3 + $0x181] sm:$0xff] }
 0x800   : > { %16873 = vmatprep.subr.bf16.mxu0 %v16872_v20  ;;  %v9214_v40 = vld [vmem:[#allocation3 + $0x189] sm:$0xff] }
 0x802   : > { %16075 = vmatmul.mubr.f32.gmra.mrb[44].mxu0 %v20824_v46  ;;  %v23909_v46 = vld [vmem:[#allocation20_spill] sm:$0xff] }
 0x803   : > { %16077 = vmatprep.mubr.f32.mxu0 %v20827_v54  ;;  %16875 = vmatpush3.bf16.msra.mxu0 %v16872_v20  ;;  %v23910_v54 = vld [vmem:[#allocation43_spill] sm:$0xff] }
 0x804   : > { %16877 = vmatprep.subr.bf16.mxu0 %v16876_v34  ;;  %v9909_v20 = vld [vmem:[%s23506_s7 + $0x148] sm:$0xff] }
 0x806   : > { %16078 = vmatmul.mubr.f32.gmra.mrb[46].mxu0 %v20830_v3  ;;  %v23911_v3 = vld [vmem:[#allocation44_spill] sm:$0xff] }
 0x807   : > { %16080 = vmatprep.mubr.f32.mxu0 %v20833_v9  ;;  %16879 = vmatpush3.bf16.msra.mxu0 %v16876_v34  ;;  %v21351_v9 = vld [vmem:[#allocation3] sm:$0xff]  ;;  %v16930_v34 = vpack.c.bf16 %v9904_v36, %v9900_v14  ;;  %v11164_v14 = vld [vmem:[#allocation8 + $0x78] sm:$0xff] }
 0x808   : > { %16881 = vmatprep.subr.bf16.mxu0 %v16880_v0  ;;  %v9491_v36 = vld [vmem:[#allocation3 + $0x32] sm:$0xff] }
 0x80a   : > { %16081 = vmatmul.mubr.f32.gmra.mrb[48].mxu0 %v20836_v53  ;;  %v13110_v53 = vld [vmem:[%s23504_s5 + $0x410] sm:$0xff] }
 0x80b   : > { %16083 = vmatprep.mubr.f32.mxu0 %v20839_v43  ;;  %v13111_v43 = vld [vmem:[%s23504_s5 + $0x418] sm:$0xff] }
 0x80c   : > { %v16884_v52 = vpack.c.bf16 %v13111_v43, %v13110_v53  ;;  %v9195_v53 = vld [vmem:[#allocation3 + $0xa9] sm:$0xff]  ;;  %v16934_v43 = vpack.c.bf16 %v9912_v60, %v9908_v22 }
 0x80e   : > { %16084 = vmatmul.mubr.f32.gmra.mrb[50].mxu0 %v20842_v62  ;;  %v9869_v62 = vld [vmem:[%s23506_s7 + $0x8] sm:$0xff] }
 0x80f   : > { %16086 = vmatprep.mubr.f32.mxu0 %v20845_v23  ;;  %v9873_v23 = vld [vmem:[%s23506_s7 + $0x28] sm:$0xff] }
 0x812   : > { %16087 = vmatmul.mubr.f32.gmra.mrb[52].mxu0 %v20848_v16  ;;  %v9868_v16 = vld [vmem:[%s23506_s7] sm:$0xff] }
 0x813   : > { %16089 = vmatprep.mubr.f32.mxu0 %v20851_v37  ;;  %v16912_v37 = vpack.c.bf16 %v9873_v23, %v9869_v62  ;;  %v9916_v62 = vld [vmem:[%s23506_s7 + $0x180] sm:$0xff] }
 0x814   : > { %v9920_v23 = vld [vmem:[%s23506_s7 + $0x1a0] sm:$0xff] }
 0x815   : > { %16913 = vmatprep.subr.bf16.mxu1 %v16912_v37 }
 0x816   : > { %16090 = vmatmul.mubr.f32.gmra.mrb[54].mxu0 %v20854_v49  ;;  %v9872_v49 = vld [vmem:[%s23506_s7 + $0x20] sm:$0xff] }
 0x817   : > { %16092 = vmatprep.mubr.f32.mxu0 %v20857_v4  ;;  %v9877_v4 = vld [vmem:[%s23506_s7 + $0x48] sm:$0xff]  ;;  %v16914_v13 = vpack.c.bf16 %v9872_v49, %v9868_v16 }
 0x818   : > { %v9196_v16 = vld [vmem:[#allocation3 + $0xb1] sm:$0xff] }
 0x819   : > { %16915 = vmatpush1.bf16.msra.mxu1 %v16914_v13  ;;  %v16938_v13 = vpack.c.bf16 %v9920_v23, %v9916_v62  ;;  %v11175_v62 = vld [vmem:[#allocation8 + $0xd0] sm:$0xff] }
 0x81a   : > { %16093 = vmatmul.mubr.f32.gmra.mrb[56].mxu0 %v20860_v5  ;;  %v9881_v5 = vld [vmem:[%s23506_s7 + $0x68] sm:$0xff]  ;;  %v11179_v23 = vld [vmem:[#allocation8 + $0xf0] sm:$0xff] }
 0x81b   : > { %16095 = vmatprep.mubr.f32.mxu0 %v23908_v55  ;;  %v13120_v55 = vld [vmem:[%s23504_s5 + $0x460] sm:$0xff] }
 0x81e   : > { %16096 = vmatmul.mubr.f32.gmra.mrb[58].mxu0 %v23909_v46  ;;  %v13121_v46 = vld [vmem:[%s23504_s5 + $0x468] sm:$0xff] }
 0x81f   : > { %16098 = vmatprep.mubr.f32.mxu0 %v23910_v54  ;;  %v9917_v54 = vld [vmem:[%s23506_s7 + $0x188] sm:$0xff]  ;;  %v16904_v37 = vpack.c.bf16 %v13121_v46, %v13120_v55  ;;  %v11171_v55 = vld [vmem:[#allocation8 + $0xb0] sm:$0xff]  ;;  %v11176_v46 = vld [vmem:[#allocation8 + $0xd8] sm:$0xff] }
 0x822   : > { %16099 = vmatmul.mubr.f32.gmra.mrb[60].mxu0 %v23911_v3  ;;  %v9921_v3 = vld [vmem:[%s23506_s7 + $0x1a8] sm:$0xff] }
 0x823   : > { %16101 = vmatprep.mubr.f32.mxu0 %v21351_v9  ;;  %v16936_v49 = vpack.c.bf16 %v9921_v3, %v9917_v54  ;;  %v11180_v54 = vld [vmem:[#allocation8 + $0xf8] sm:$0xff]  ;;  %v9495_v3 = vld [vmem:[#allocation3 + $0x62] sm:$0xff] }
 0x826   : > { %16102 = vmatmul.mubr.f32.gmra.mrb[62].mxu0 %v21351_v9 }
 0x827   : > { %16136 = vmatprep.mubr.f32.mxu0 %v21103_v18  ;;  %v16916_v18 = vpack.c.bf16 %v9881_v5, %v9877_v4  ;;  %v13123_v4 = vld [vmem:[%s23504_s5 + $0x478] sm:$0xff]  ;;  %v9925_v5 = vld [vmem:[%s23506_s7 + $0x1c8] sm:$0xff] }
 0x829   : > { %16917 = vmatprep.subr.bf16.mxu1 %v16916_v18  ;;  %v9924_v18 = vld [vmem:[%s23506_s7 + $0x1c0] sm:$0xff] }
 0x82a   : > { %16137 = vmatmul.mubr.f32.vlgmr.msra.gmra.mrb[32].mxu0 %v23912_v48  ;;  %16919 = vmatpush1.bf16.msra.mxu1 %v16918_v45  ;;  %v11156_v48 = vld [vmem:[#allocation8 + $0x38] sm:$0xff]  ;;  %v9199_v45 = vld [vmem:[#allocation3 + $0xd9] sm:$0xff] }
 0x82b   : > { %16139 = vmatprep.mubr.f32.mxu0 %v23913_v58  ;;  %16883 = vmatpush3.bf16.msra.mxu0 %v16880_v0  ;;  %v16900_v0 = vpack.c.bf16 %v13119_v32, %v13118_v50  ;;  %v16942_v58 = vpack.c.bf16 %v9928_v41, %v9924_v18  ;;  %v17104_v38 = vpack.c.bf16 %v11156_v48, %v11152_v56  ;;  %v11163_v32 = vld [vmem:[#allocation8 + $0x70] sm:$0xff]  ;;  %v11192_v18 = vld [vmem:[#allocation8 + $0x158] sm:$0xff] }
 0x82c   : > { %16885 = vmatprep.subr.bf16.mxu0 %v16884_v52  ;;  %16921 = vmatprep.subr.bf16.mxu1 %v16920_v27  ;;  %v9203_v27 = vld [vmem:[#allocation3 + $0x109] sm:$0xff] }
 0x82d   : > { %v11196_v41 = vld [vmem:[#allocation8 + $0x178] sm:$0xff]  ;;  %v11191_v56 = vld [vmem:[#allocation8 + $0x150] sm:$0xff] }
 0x82e   : > { %16140 = vmatmul.mubr.f32.gmra.mrb[34].mxu0 %v23914_v25  ;;  %16923 = vmatpush1.bf16.msra.mxu1 %v16922_v24  ;;  %v9207_v25 = vld [vmem:[#allocation3 + $0x139] sm:$0xff]  ;;  %v9208_v24 = vld [vmem:[#allocation3 + $0x141] sm:$0xff] }
 0x82f   : > { %16142 = vmatprep.mubr.f32.mxu0 %v23915_v33  ;;  %16887 = vmatpush3.bf16.msra.mxu0 %v16884_v52  ;;  %v9929_v52 = vld [vmem:[%s23506_s7 + $0x1e8] sm:$0xff]  ;;  %v11195_v48 = vld [vmem:[#allocation8 + $0x170] sm:$0xff] }
 0x830   : > { %16889 = vmatprep.subr.bf16.mxu0 %v16888_v10  ;;  %16925 = vmatprep.subr.bf16.mxu1 %v16924_v6  ;;  %v16940_v12 = vpack.c.bf16 %v9929_v52, %v9925_v5  ;;  %v9209_v33 = vld [vmem:[#allocation3 + $0x151] sm:$0xff]  ;;  %v9215_v6 = vld [vmem:[#allocation3 + $0x199] sm:$0xff]  ;;  %v11183_v52 = vld [vmem:[#allocation8 + $0x110] sm:$0xff] }
 0x832   : > { %16143 = vmatmul.mubr.f32.gmra.mrb[36].mxu0 %v21130_v44  ;;  %v16928_v44 = vpack.c.bf16 %v9905_v63, %v9901_v1  ;;  %16927 = vmatpush1.bf16.msra.mxu1 %v16926_v59  ;;  %v9216_v1 = vld [vmem:[#allocation3 + $0x1a1] sm:$0xff] }
 0x833   : > { %16145 = vmatprep.mubr.f32.mxu0 %v23916_v21  ;;  %16891 = vmatpush3.bf16.msra.mxu0 %v16888_v10  ;;  %v9201_v10 = vld [vmem:[#allocation3 + $0xf1] sm:$0xff]  ;;  %v11151_v63 = vld [vmem:[#allocation8 + $0x10] sm:$0xff] }
 0x834   : > { %16893 = vmatprep.subr.bf16.mxu0 %v16892_v51  ;;  %16929 = vmatprep.subr.bf16.mxu1 %v16928_v44  ;;  %v11155_v59 = vld [vmem:[#allocation8 + $0x30] sm:$0xff]  ;;  %v11160_v21 = vld [vmem:[#allocation8 + $0x58] sm:$0xff] }
 0x835   : > { %v17108_v50 = vpack.c.bf16 %v11164_v14, %v11160_v21  ;;  %v11159_v44 = vld [vmem:[#allocation8 + $0x50] sm:$0xff]  ;;  %v9515_v21 = vld [vmem:[#allocation3 + $0x152] sm:$0xff]  ;;  %v9516_v14 = vld [vmem:[#allocation3 + $0x15a] sm:$0xff] }
 0x836   : > { %16146 = vmatmul.mubr.f32.gmra.mrb[38].mxu0 %v21142_v17  ;;  %v16932_v17 = vpack.c.bf16 %v9913_v29, %v9909_v20  ;;  %16931 = vmatpush1.bf16.msra.mxu1 %v16930_v34  ;;  %v9492_v20 = vld [vmem:[#allocation3 + $0x3a] sm:$0xff]  ;;  %v11168_v29 = vld [vmem:[#allocation8 + $0x98] sm:$0xff]  ;;  %v17110_v22 = vpack.c.bf16 %v11163_v32, %v11159_v44  ;;  %v9522_v44 = vld [vmem:[#allocation3 + $0x1a2] sm:$0xff] }
 0x837   : > { %16148 = vmatprep.mubr.f32.mxu0 %v9193_v11  ;;  %16895 = vmatpush3.bf16.msra.mxu0 %v16892_v51  ;;  %v9212_v51 = vld [vmem:[#allocation3 + $0x171] sm:$0xff] }
 0x838   : > { %16897 = vmatprep.subr.bf16.mxu0 %v16896_v35  ;;  %16933 = vmatprep.subr.bf16.mxu1 %v16932_v17  ;;  %v11172_v11 = vld [vmem:[#allocation8 + $0xb8] sm:$0xff] }
 0x839   : > { %v9493_v34 = vld [vmem:[#allocation3 + $0x4a] sm:$0xff]  ;;  %v17112_v60 = vpack.c.bf16 %v11172_v11, %v11168_v29  ;;  %v9494_v17 = vld [vmem:[#allocation3 + $0x52] sm:$0xff] }
 0x83a   : > { %16149 = vmatmul.mubr.f32.gmra.mrb[40].mxu0 %v21152_v31  ;;  %v13122_v31 = vld [vmem:[%s23504_s5 + $0x470] sm:$0xff]  ;;  %16935 = vmatpush1.bf16.msra.mxu1 %v16934_v43  ;;  %v17116_v43 = vpack.c.bf16 %v11180_v54, %v11176_v46  ;;  %v11208_v32 = vld [vmem:[#allocation8 + $0x1d8] sm:$0xff] }
 0x83b   : > { %16151 = vmatprep.mubr.f32.mxu0 %v9195_v53  ;;  %16899 = vmatpush3.bf16.msra.mxu0 %v16896_v35  ;;  %v16908_v57 = vpack.c.bf16 %v13123_v4, %v13122_v31  ;;  %v17106_v35 = vpack.c.bf16 %v11155_v59, %v11151_v63  ;;  %v11188_v31 = vld [vmem:[#allocation8 + $0x138] sm:$0xff]  ;;  %v17118_v4 = vpack.c.bf16 %v11179_v23, %v11175_v62  ;;  %v9513_v63 = vld [vmem:[#allocation3 + $0x13a] sm:$0xff]  ;;  %v9514_v59 = vld [vmem:[#allocation3 + $0x142] sm:$0xff] }
 0x83c   : > { %16901 = vmatprep.subr.bf16.mxu0 %v16900_v0  ;;  %16937 = vmatprep.subr.bf16.mxu1 %v16936_v49  ;;  %v9497_v49 = vld [vmem:[#allocation3 + $0x7a] sm:$0xff]  ;;  %v11207_v11 = vld [vmem:[#allocation8 + $0x1d0] sm:$0xff] }
 0x83d   : > { %v9874_v46 = vld [vmem:[%s23506_s7 + $0x30] sm:$0xff] }
 0x83e   : > { %16152 = vmatmul.mubr.f32.gmra.mrb[42].mxu0 %v9196_v16  ;;  %16939 = vmatpush1.bf16.msra.mxu1 %v16938_v13  ;;  %v9496_v16 = vld [vmem:[#allocation3 + $0x6a] sm:$0xff]  ;;  %v9498_v13 = vld [vmem:[#allocation3 + $0x82] sm:$0xff] }
 0x83f   : > { %16154 = vmatprep.mubr.f32.mxu0 %v9197_v26  ;;  %16903 = vmatpush3.bf16.msra.mxu0 %v16900_v0  ;;  %v11167_v0 = vld [vmem:[#allocation8 + $0x90] sm:$0xff] }
 0x840   : > { %16905 = vmatprep.subr.bf16.mxu0 %v16904_v37  ;;  %16941 = vmatprep.subr.bf16.mxu1 %v16940_v12  ;;  %v17114_v53 = vpack.c.bf16 %v11171_v55, %v11167_v0  ;;  %v11187_v26 = vld [vmem:[#allocation8 + $0x130] sm:$0xff]  ;;  %v21514_v0 = vld [vmem:[%s23505_s6] ss:$0 sm:$0xff] }
 0x841   : > { %v17122_v12 = vpack.c.bf16 %v11187_v26, %v11183_v52  ;;  %v9887_v52 = vld [vmem:[%s23506_s7 + $0x98] sm:$0xff] }
 0x842   : > { %16155 = vmatmul.mubr.f32.gmra.mrb[44].mxu0 %v9198_v15  ;;  %16943 = vmatpush1.bf16.msra.mxu1 %v16942_v58  ;;  %v17124_v15 = vpack.c.bf16 %v11196_v41, %v11192_v18  ;;  %v11200_v58 = vld [vmem:[#allocation8 + $0x198] sm:$0xff] }
 0x843   : > { %16157 = vmatprep.mubr.f32.mxu0 %v9199_v45  ;;  %16907 = vmatpush3.bf16.msra.mxu0 %v16904_v37  ;;  %v11184_v37 = vld [vmem:[#allocation8 + $0x118] sm:$0xff]  ;;  %v9500_v45 = vld [vmem:[#allocation3 + $0x9a] sm:$0xff] }
 0x844   : > { %16909 = vmatprep.subr.bf16.mxu0 %v16908_v57  ;;  %v17120_v5 = vpack.c.bf16 %v11188_v31, %v11184_v37  ;;  %v9891_v26 = vld [vmem:[%s23506_s7 + $0xb8] sm:$0xff] }
 0x846   : > { %16158 = vmatmul.mubr.f32.gmra.mrb[46].mxu0 %v9200_v61  ;;  %v9501_v61 = vld [vmem:[#allocation3 + $0xaa] sm:$0xff] }
 0x847   : > { %16160 = vmatprep.mubr.f32.mxu0 %v9201_v10  ;;  %16911 = vmatpush3.bf16.msra.mxu0 %v16908_v57  ;;  %v9499_v57 = vld [vmem:[#allocation3 + $0x92] sm:$0xff]  ;;  %v17126_v10 = vpack.c.bf16 %v11195_v48, %v11191_v56  ;;  %v9886_v56 = vld [vmem:[%s23506_s7 + $0x90] sm:$0xff] }
 0x848   : > { %17105 = vmatprep.subr.bf16.mxu0 %v17104_v38  ;;  %v11204_v38 = vld [vmem:[#allocation8 + $0x1b8] sm:$0xff]  ;;  %v9890_v48 = vld [vmem:[%s23506_s7 + $0xb0] sm:$0xff] }
 0x84a   : > { %16161 = vmatmul.mubr.f32.gmra.mrb[48].mxu0 %v9202_v19  ;;  %v17128_v19 = vpack.c.bf16 %v11204_v38, %v11200_v58  ;;  %v9895_v58 = vld [vmem:[%s23506_s7 + $0xd8] sm:$0xff] }
 0x84b   : > { %16163 = vmatprep.mubr.f32.mxu0 %v9203_v27  ;;  %v11199_v27 = vld [vmem:[#allocation8 + $0x190] sm:$0xff] }
 0x84c   : > { %v9899_v38 = vld [vmem:[%s23506_s7 + $0xf8] sm:$0xff] }
 0x84e   : > { %16164 = vmatmul.mubr.f32.gmra.mrb[50].mxu0 %v9204_v28  ;;  %v11203_v28 = vld [vmem:[#allocation8 + $0x1b0] sm:$0xff] }
 0x84f   : > { %16166 = vmatprep.mubr.f32.mxu0 %v9205_v2  ;;  %v9502_v2 = vld [vmem:[#allocation3 + $0xb2] sm:$0xff] }
 0x852   : > { %16167 = vmatmul.mubr.f32.gmra.mrb[52].mxu0 %v9206_v8  ;;  %v9503_v8 = vld [vmem:[#allocation3 + $0xc2] sm:$0xff] }
 0x853   : > { %16169 = vmatprep.mubr.f32.mxu0 %v9207_v25  ;;  %v17130_v25 = vpack.c.bf16 %v11203_v28, %v11199_v27  ;;  %v16954_v27 = vpack.c.bf16 %v9890_v48, %v9886_v56 }
 0x856   : > { %16170 = vmatmul.mubr.f32.gmra.mrb[54].mxu0 %v9208_v24  ;;  %v9504_v24 = vld [vmem:[#allocation3 + $0xca] sm:$0xff] }
 0x857   : > { %16172 = vmatprep.mubr.f32.mxu0 %v9209_v33  ;;  %v9505_v33 = vld [vmem:[#allocation3 + $0xda] sm:$0xff] }
 0x85a   : > { %16173 = vmatmul.mubr.f32.gmra.mrb[56].mxu0 %v9210_v7  ;;  %v9506_v7 = vld [vmem:[#allocation3 + $0xe2] sm:$0xff] }
 0x85b   : > { %16175 = vmatprep.mubr.f32.mxu0 %v9211_v42  ;;  %v9507_v42 = vld [vmem:[#allocation3 + $0xf2] sm:$0xff] }
 0x85e   : > { %16176 = vmatmul.mubr.f32.gmra.mrb[58].mxu0 %v9212_v51  ;;  %v9508_v51 = vld [vmem:[#allocation3 + $0xfa] sm:$0xff] }
 0x85f   : > { %16178 = vmatprep.mubr.f32.mxu0 %v9213_v30  ;;  %v9509_v30 = vld [vmem:[#allocation3 + $0x10a] sm:$0xff] }
 0x862   : > { %16179 = vmatmul.mubr.f32.gmra.mrb[60].mxu0 %v9214_v40  ;;  %v9511_v40 = vld [vmem:[#allocation3 + $0x122] sm:$0xff] }
 0x863   : > { %16181 = vmatprep.mubr.f32.mxu0 %v9215_v6  ;;  %v9510_v6 = vld [vmem:[#allocation3 + $0x112] sm:$0xff] }
 0x866   : > { %16182 = vmatmul.mubr.f32.gmra.mrb[62].mxu0 %v9216_v1  ;;  %v9512_v1 = vld [vmem:[#allocation3 + $0x12a] sm:$0xff] }
 0x867   : > { %16216 = vmatprep.mubr.f32.mxu0 %v9491_v36  ;;  %v9517_v36 = vld [vmem:[#allocation3 + $0x16a] sm:$0xff] }
 0x86a   : > { %16217 = vmatmul.mubr.f32.vlgmr.msra.gmra.mrb[32].mxu0 %v9492_v20  ;;  %v11212_v20 = vld [vmem:[#allocation8 + $0x1f8] sm:$0xff] }
 0x86b   : > { %16219 = vmatprep.mubr.f32.mxu0 %v9493_v34  ;;  %17107 = vmatpush1.bf16.msra.mxu0 %v17106_v35  ;;  %v9518_v35 = vld [vmem:[#allocation3 + $0x172] sm:$0xff]  ;;  %v17132_v29 = vpack.c.bf16 %v11212_v20, %v11208_v32  ;;  %v11211_v34 = vld [vmem:[#allocation8 + $0x1f0] sm:$0xff] }
 0x86c   : > { %17109 = vmatprep.subr.bf16.mxu0 %v17108_v50  ;;  %v9521_v50 = vld [vmem:[#allocation3 + $0x19a] sm:$0xff] }
 0x86d   : > { %v9910_v20 = vld [vmem:[%s23506_s7 + $0x150] sm:$0xff] }
 0x86e   : > { %16220 = vmatmul.mubr.f32.gmra.mrb[34].mxu0 %v9494_v17  ;;  %v9870_v17 = vld [vmem:[%s23506_s7 + $0x10] sm:$0xff] }
 0x86f   : > { %16222 = vmatprep.mubr.f32.mxu0 %v9495_v3  ;;  %17111 = vmatpush1.bf16.msra.mxu0 %v17110_v22  ;;  %v17134_v22 = vpack.c.bf16 %v11211_v34, %v11207_v11  ;;  %v9879_v3 = vld [vmem:[%s23506_s7 + $0x58] sm:$0xff]  ;;  %v16946_v62 = vpack.c.bf16 %v9874_v46, %v9870_v17  ;;  %v9918_v46 = vld [vmem:[%s23506_s7 + $0x190] sm:$0xff] }
 0x870   : > { %17113 = vmatprep.subr.bf16.mxu0 %v17112_v60  ;;  %v9919_v11 = vld [vmem:[%s23506_s7 + $0x198] sm:$0xff] }
 0x871   : > { %v9923_v34 = vld [vmem:[%s23506_s7 + $0x1b8] sm:$0xff] }
 0x872   : > { %16223 = vmatmul.mubr.f32.gmra.mrb[36].mxu0 %v9496_v16  ;;  %v16968_v17 = vpack.c.bf16 %v9923_v34, %v9919_v11 }
 0x873   : > { %16225 = vmatprep.mubr.f32.mxu0 %v9497_v49  ;;  %17115 = vmatpush1.bf16.msra.mxu0 %v17114_v53  ;;  %v9883_v53 = vld [vmem:[%s23506_s7 + $0x78] sm:$0xff] }
 0x874   : > { %17117 = vmatprep.subr.bf16.mxu0 %v17116_v43  ;;  %v16948_v31 = vpack.c.bf16 %v9883_v53, %v9879_v3  ;;  %v9927_v3 = vld [vmem:[%s23506_s7 + $0x1d8] sm:$0xff] }
 0x875   : > { %v9931_v53 = vld [vmem:[%s23506_s7 + $0x1f8] sm:$0xff] }
 0x876   : > { %16226 = vmatmul.mubr.f32.gmra.mrb[38].mxu0 %v9498_v13 }
 0x877   : > { %16228 = vmatprep.mubr.f32.mxu0 %v9499_v57  ;;  %17119 = vmatpush1.bf16.msra.mxu0 %v17118_v4  ;;  %v9878_v4 = vld [vmem:[%s23506_s7 + $0x50] sm:$0xff] }
 0x878   : > { %17121 = vmatprep.subr.bf16.mxu0 %v17120_v5  ;;  %v9882_v5 = vld [vmem:[%s23506_s7 + $0x70] sm:$0xff] }
 0x879   : > { %v16950_v57 = vpack.c.bf16 %v9882_v5, %v9878_v4  ;;  %v9926_v4 = vld [vmem:[%s23506_s7 + $0x1d0] sm:$0xff] }
 0x87a   : > { %16229 = vmatmul.mubr.f32.gmra.mrb[40].mxu0 %v9500_v45  ;;  %v23653_v45 = vmov 0.0|0.0   ;;  %v9930_v5 = vld [vmem:[%s23506_s7 + $0x1f0] sm:$0xff] }
 0x87b   : > { %16231 = vmatprep.mubr.f32.mxu0 %v9501_v61  ;;  %17123 = vmatpush1.bf16.msra.mxu0 %v17122_v12 }
 0x87c   : > { %17125 = vmatprep.subr.bf16.mxu0 %v17124_v15  ;;  %v16952_v15 = vpack.c.bf16 %v9891_v26, %v9887_v52  ;;  %v11909_v52 = vld [vmem:[%s23512_s13 + $0x100] sm:$0xff]  ;;  %v11910_v26 = vld [vmem:[%s23512_s13 + $0x108] sm:$0xff] }
 0x87e   : > { %16232 = vmatmul.mubr.f32.gmra.mrb[42].mxu0 %v9502_v2  ;;  %v16956_v2 = vpack.c.bf16 %v9899_v38, %v9895_v58  ;;  %v11911_v38 = vld [vmem:[%s23512_s13 + $0x110] sm:$0xff] }
 0x87f   : > { %16234 = vmatprep.mubr.f32.mxu0 %v9503_v8  ;;  %17127 = vmatpush1.bf16.msra.mxu0 %v17126_v10  ;;  %v9894_v8 = vld [vmem:[%s23506_s7 + $0xd0] sm:$0xff] }
 0x880   : > { %17129 = vmatprep.subr.bf16.mxu0 %v17128_v19 }
 0x882   : > { %16235 = vmatmul.mubr.f32.gmra.mrb[44].mxu0 %v9504_v24  ;;  %v9903_v24 = vld [vmem:[%s23506_s7 + $0x118] sm:$0xff] }
 0x883   : > { %16237 = vmatprep.mubr.f32.mxu0 %v9505_v33  ;;  %17131 = vmatpush1.bf16.msra.mxu0 %v17130_v25  ;;  %v9898_v25 = vld [vmem:[%s23506_s7 + $0xf0] sm:$0xff]  ;;  %v9907_v33 = vld [vmem:[%s23506_s7 + $0x138] sm:$0xff] }
 0x884   : > { %17133 = vmatprep.subr.bf16.mxu0 %v17132_v29  ;;  %v9914_v29 = vld [vmem:[%s23506_s7 + $0x170] sm:$0xff] }
 0x886   : > { %16238 = vmatmul.mubr.f32.gmra.mrb[46].mxu0 %v9506_v7 }
 0x887   : > { %16240 = vmatprep.mubr.f32.mxu0 %v9507_v42  ;;  %17135 = vmatpush1.bf16.msra.mxu0 %v17134_v22 }
 0x888   : > { %17184 = vmatprep.subr.bf16.mxu0 %v23653_v45 }
 0x88a   : > { %16241 = vmatmul.mubr.f32.gmra.mrb[48].mxu0 %v9508_v51 }
 0x88b   : > { %16243 = vmatprep.mubr.f32.mxu0 %v9509_v30  ;;  %v16958_v30 = vpack.c.bf16 %v9898_v25, %v9894_v8 }
 0x88e   : > { %16244 = vmatmul.mubr.f32.gmra.mrb[50].mxu0 %v9510_v6 }
 0x88f   : > { %16246 = vmatprep.mubr.f32.mxu0 %v9511_v40  ;;  %v16960_v40 = vpack.c.bf16 %v9907_v33, %v9903_v24  ;;  %v11913_v33 = vld [vmem:[%s23512_s13 + $0x120] sm:$0xff] }
 0x892   : > { %16247 = vmatmul.mubr.f32.gmra.mrb[52].mxu0 %v9512_v1  ;;  %v9902_v1 = vld [vmem:[%s23506_s7 + $0x110] sm:$0xff] }
 0x893   : > { %16249 = vmatprep.mubr.f32.mxu0 %v9513_v63  ;;  %v9906_v63 = vld [vmem:[%s23506_s7 + $0x130] sm:$0xff] }
 0x896   : > { %16250 = vmatmul.mubr.f32.gmra.mrb[54].mxu0 %v9514_v59  ;;  %v9911_v59 = vld [vmem:[%s23506_s7 + $0x158] sm:$0xff] }
 0x897   : > { %16252 = vmatprep.mubr.f32.mxu0 %v9515_v21  ;;  %v9915_v21 = vld [vmem:[%s23506_s7 + $0x178] sm:$0xff] }
 0x898   : > { %v16964_v32 = vpack.c.bf16 %v9915_v21, %v9911_v59  ;;  %v11915_v21 = vld [vmem:[%s23512_s13 + $0x130] sm:$0xff] }
 0x89a   : > { %16253 = vmatmul.mubr.f32.gmra.mrb[56].mxu0 %v9516_v14 }
 0x89b   : > { %16255 = vmatprep.mubr.f32.mxu0 %v9517_v36 }
 0x89e   : > { %16256 = vmatmul.mubr.f32.gmra.mrb[58].mxu0 %v9518_v35 }
 0x89f   : > { %16258 = vmatprep.mubr.f32.mxu0 %v21267_v39  ;;  %v9871_v39 = vld [vmem:[%s23506_s7 + $0x18] sm:$0xff] }
 0x8a2   : > { %16259 = vmatmul.mubr.f32.gmra.mrb[60].mxu0 %v21270_v47  ;;  %v9875_v47 = vld [vmem:[%s23506_s7 + $0x38] sm:$0xff] }
 0x8a3   : > { %16261 = vmatprep.mubr.f32.mxu0 %v9521_v50  ;;  %v16944_v60 = vpack.c.bf16 %v9875_v47, %v9871_v39  ;;  %v16962_v50 = vpack.c.bf16 %v9906_v63, %v9902_v1 }
 0x8a5   : > { %16945 = vmatprep.subr.bf16.mxu1 %v16944_v60  ;;  %v16966_v60 = vpack.c.bf16 %v9914_v29, %v9910_v20 }
 0x8a6   : > { %16262 = vmatmul.mubr.f32.gmra.mrb[62].mxu0 %v9522_v44 }
 0x8a7   : > { %11556 = vmatprep.mubr.f32.mxu0 %v21351_v9 }
 0x93d   : > { %v16218_v55 = vpop.f32.mrb[32].mxu0 }
 0x93e   : > { %v9606_v54 = vpop.f32.mrb[33].mxu0  ;;  %v9805_v23 = vadd.f32 %v16218_v55, %v21514_v0 }
 0x93f   : > { %v9804_v43 = vadd.f32 %v21514_v0, %v9606_v54  ;;  %v9922_v54 = vld [vmem:[%s23506_s7 + $0x1b0] sm:$0xff] }
 0x940   : > { %v21547_v13 = vmax.f32 %v9805_v23, 0.0 }
 0x941   : > { %v21530_v16 = vmax.f32 %v9804_v43, 0.0  ;;  %v16221_v37 = vpop.f32.mrb[34].mxu0 }
 0x942   : > { %v9616_v49 = vpop.f32.mrb[35].mxu0  ;;  %v9807_v61 = vadd.f32 %v16221_v37, %v21514_v0  ;;  %v16970_v37 = vpack.c.bf16 %v9922_v54, %v9918_v46 }
 0x943   : > { %10019 = vmatmul.mubr.f32.vlgmr.msra.gmra.mrb[32].mxu1 %v21530_v16  ;;  %11557 = vmatmul.mubr.f32.vlgmr.msra.gmra.mrb[64].mxu0 %v21530_v16  ;;  %v9806_v18 = vadd.f32 %v21514_v0, %v9616_v49  ;;  %v16972_v49 = vpack.c.bf16 %v9931_v53, %v9927_v3 }
 0x944   : > { %16947 = vmatpush1.bf16.msra.mxu1 %v16946_v62  ;;  %10024 = vmatprep.mubr.f32.mxu1 %v21351_v9  ;;  %v21587_v7 = vmax.f32 %v9807_v61, 0.0  ;;  %v11912_v61 = vld [vmem:[%s23512_s13 + $0x118] sm:$0xff] }
 0x945   : > { %v16224_v41 = vpop.f32.mrb[36].mxu0  ;;  %11562 = vmatprep.mubr.f32.mxu0 %v21351_v9  ;;  %16949 = vmatprep.subr.bf16.mxu1 %v16948_v31  ;;  %v21569_v10 = vmax.f32 %v9806_v18, 0.0 }
 0x946   : > { %v9626_v12 = vpop.f32.mrb[37].mxu0  ;;  %v9809_v14 = vadd.f32 %v16224_v41, %v21514_v0 }
 0x947   : > { %10025 = vmatmul.mubr.f32.gmra.mrb[34].mxu1 %v21547_v13  ;;  %11563 = vmatmul.mubr.f32.gmra.mrb[66].mxu0 %v21547_v13  ;;  %v9808_v42 = vadd.f32 %v21514_v0, %v9626_v12  ;;  %v16974_v12 = vpack.c.bf16 %v9930_v5, %v9926_v4 }
 0x948   : > { %10030 = vmatprep.mubr.f32.mxu1 %v21351_v9  ;;  %11568 = vmatprep.mubr.f32.mxu0 %v21351_v9  ;;  %v21631_v22 = vmax.f32 %v9809_v14, 0.0  ;;  %v11916_v14 = vld [vmem:[%s23512_s13 + $0x138] sm:$0xff] }
 0x949   : > { %v16227_v19 = vpop.f32.mrb[38].mxu0  ;;  %16951 = vmatpush1.bf16.msra.mxu1 %v16950_v57  ;;  %v21609_v36 = vmax.f32 %v9808_v42, 0.0  ;;  %v11914_v42 = vld [vmem:[%s23512_s13 + $0x128] sm:$0xff]  ;;  %v21752_v20 = vpack.c.bf16 %v11916_v14, %v11915_v21 }
 0x94a   : > { %v9636_v28 = vpop.f32.mrb[39].mxu0  ;;  %16953 = vmatprep.subr.bf16.mxu1 %v16952_v15  ;;  %v9811_v43 = vadd.f32 %v16227_v19, %v21514_v0  ;;  %v21680_v15 = vpack.c.bf16 %v11910_v26, %v11909_v52 }
 0x94b   : > { %10031 = vmatmul.mubr.f32.gmra.mrb[36].mxu1 %v21569_v10  ;;  %11569 = vmatmul.mubr.f32.gmra.mrb[68].mxu0 %v21569_v10  ;;  %v9810_v39 = vadd.f32 %v21514_v0, %v9636_v28  ;;  %23920 = vst [vmem:[#allocation23_spill] sm:$0xff] %v21752_v20 }
 0x94c   : > { %10036 = vmatprep.mubr.f32.mxu1 %v21351_v9  ;;  %11574 = vmatprep.mubr.f32.mxu0 %v21351_v9  ;;  %v21677_v18 = vmax.f32 %v9811_v43, 0.0  ;;  %23917 = vst [vmem:[#allocation15_spill] sm:$0xff] %v21680_v15 }
 0x94d   : > { %v21590_v51 = vpop.f32.mrb[40].mxu0  ;;  %16955 = vmatpush1.bf16.msra.mxu1 %v16954_v27  ;;  %v21655_v62 = vmax.f32 %v9810_v39, 0.0  ;;  %17186 = vmatpush1.bf16.msra.mxu0 %v21680_v15  ;;  %v11918_v39 = vld [vmem:[%s23512_s13 + $0x148] sm:$0xff] }
 0x94e   : > { %v9646_v6 = vpop.f32.mrb[41].mxu0  ;;  %16957 = vmatprep.subr.bf16.mxu1 %v16956_v2  ;;  %v9813_v19 = vadd.f32 %v21590_v51, %v21514_v0  ;;  %v21703_v2 = vpack.c.bf16 %v11912_v61, %v11911_v38  ;;  %17187 = vmatprep.subr.bf16.mxu0 %v23653_v45 }
 0x94f   : > { %10037 = vmatmul.mubr.f32.gmra.mrb[38].mxu1 %v21587_v7  ;;  %11575 = vmatmul.mubr.f32.gmra.mrb[70].mxu0 %v21587_v7  ;;  %v9812_v41 = vadd.f32 %v21514_v0, %v9646_v6 }
 0x950   : > { %10042 = vmatprep.mubr.f32.mxu1 %v21351_v9  ;;  %11580 = vmatprep.mubr.f32.mxu0 %v21351_v9  ;;  %23918 = vst [vmem:[#allocation21_spill] sm:$0xff] %v21703_v2  ;;  %v21723_v51 = vmax.f32 %v9813_v19, 0.0 }
 0x951   : > { %v21611_v35 = vpop.f32.mrb[42].mxu0  ;;  %16959 = vmatpush1.bf16.msra.mxu1 %v16958_v30  ;;  %v21700_v27 = vmax.f32 %v9812_v41, 0.0  ;;  %17189 = vmatpush1.bf16.msra.mxu0 %v21703_v2 }
 0x952   : > { %v21613_v44 = vpop.f32.mrb[43].mxu0  ;;  %16961 = vmatprep.subr.bf16.mxu1 %v16960_v40  ;;  %v21728_v40 = vpack.c.bf16 %v11914_v42, %v11913_v33  ;;  %17190 = vmatprep.subr.bf16.mxu0 %v23653_v45  ;;  %v21835_v33 = vld [vmem:[#allocation3] sm:$0xff]  ;;  %v11924_v42 = vld [vmem:[%s23512_s13 + $0x178] sm:$0xff] }
 0x953   : > { %10043 = vmatmul.mubr.f32.gmra.mrb[40].mxu1 %v21609_v36  ;;  %11581 = vmatmul.mubr.f32.gmra.mrb[72].mxu0 %v21609_v36  ;;  %v9814_v30 = vadd.f32 %v21514_v0, %v21613_v44 }
 0x954   : > { %10048 = vmatprep.mubr.f32.mxu1 %v21351_v9  ;;  %11586 = vmatprep.mubr.f32.mxu0 %v21351_v9  ;;  %23919 = vst [vmem:[#allocation22_spill] sm:$0xff] %v21728_v40 }
 0x955   : > { %v21634_v47 = vpop.f32.mrb[44].mxu0  ;;  %16963 = vmatpush1.bf16.msra.mxu1 %v16962_v50  ;;  %v9815_v50 = vadd.f32 %v21611_v35, %v21514_v0  ;;  %v21749_v44 = vmax.f32 %v9814_v30, 0.0  ;;  %17192 = vmatpush1.bf16.msra.mxu0 %v21728_v40  ;;  %v11917_v35 = vld [vmem:[%s23512_s13 + $0x140] sm:$0xff] }
 0x956   : > { %v21636_v55 = vpop.f32.mrb[45].mxu0  ;;  %16965 = vmatprep.subr.bf16.mxu1 %v16964_v32  ;;  %17193 = vmatprep.subr.bf16.mxu0 %v23653_v45  ;;  %v21776_v54 = vpack.c.bf16 %v11918_v39, %v11917_v35  ;;  %v11927_v39 = vld [vmem:[%s23512_s13 + $0x190] sm:$0xff] }
 0x957   : > { %10049 = vmatmul.mubr.f32.gmra.mrb[42].mxu1 %v21631_v22  ;;  %11587 = vmatmul.mubr.f32.gmra.mrb[74].mxu0 %v21631_v22 }
 0x958   : > { %10054 = vmatprep.mubr.f32.mxu1 %v21351_v9  ;;  %11592 = vmatprep.mubr.f32.mxu0 %v21351_v9  ;;  %23921 = vst [vmem:[#allocation24_spill] sm:$0xff] %v21776_v54 }
 0x959   : > { %v21657_v23 = vpop.f32.mrb[46].mxu0  ;;  %16967 = vmatpush1.bf16.msra.mxu1 %v16966_v60  ;;  %v21771_v60 = vmax.f32 %v9815_v50, 0.0  ;;  %17195 = vmatpush1.bf16.msra.mxu0 %v21752_v20 }
 0x95a   : > { %v21659_v31 = vpop.f32.mrb[47].mxu0  ;;  %16969 = vmatprep.subr.bf16.mxu1 %v16968_v17  ;;  %v9816_v17 = vadd.f32 %v21514_v0, %v21636_v55  ;;  %17196 = vmatprep.subr.bf16.mxu0 %v23653_v45  ;;  %v11919_v55 = vld [vmem:[%s23512_s13 + $0x150] sm:$0xff]  ;;  %v9819_v30 = vadd.f32 %v21657_v23, %v21514_v0  ;;  %v11925_v23 = vld [vmem:[%s23512_s13 + $0x180] sm:$0xff] }
 0x95b   : > { %10055 = vmatmul.mubr.f32.gmra.mrb[44].mxu1 %v21655_v62  ;;  %11593 = vmatmul.mubr.f32.gmra.mrb[76].mxu0 %v21655_v62  ;;  %v9818_v38 = vadd.f32 %v21514_v0, %v21659_v31  ;;  %v11923_v31 = vld [vmem:[%s23512_s13 + $0x170] sm:$0xff] }
 0x95c   : > { %10060 = vmatprep.mubr.f32.mxu1 %v21351_v9  ;;  %11598 = vmatprep.mubr.f32.mxu0 %v21351_v9  ;;  %v21797_v4 = vmax.f32 %v9816_v17, 0.0  ;;  %v21850_v21 = vpack.c.bf16 %v11924_v42, %v11923_v31  ;;  %v21869_v35 = vmax.f32 %v9819_v30, 0.0  ;;  %v11928_v17 = vld [vmem:[%s23512_s13 + $0x198] sm:$0xff]  ;;  %v11937_v30 = vld [vmem:[%s23512_s13 + $0x1e0] sm:$0xff] }
 0x95d   : > { %v16242_v57 = vpop.f32.mrb[48].mxu0  ;;  %16971 = vmatpush1.bf16.msra.mxu1 %v16970_v37  ;;  %v11920_v37 = vld [vmem:[%s23512_s13 + $0x158] sm:$0xff]  ;;  %17198 = vmatpush1.bf16.msra.mxu0 %v21776_v54 }
 0x95e   : > { %v21683_v56 = vadd.f32 %v16242_v57, %v21514_v0  ;;  %v9686_v48 = vpop.f32.mrb[49].mxu0  ;;  %16973 = vmatprep.subr.bf16.mxu1 %v16972_v49  ;;  %v9817_v49 = vadd.f32 %v21634_v47, %v21514_v0  ;;  %v21800_v52 = vpack.c.bf16 %v11920_v37, %v11919_v55  ;;  %17199 = vmatprep.subr.bf16.mxu0 %v23653_v45  ;;  %v11921_v47 = vld [vmem:[%s23512_s13 + $0x160] sm:$0xff] }
 0x95f   : > { %v21686_v58 = vadd.f32 %v21514_v0, %v9686_v48  ;;  %10061 = vmatmul.mubr.f32.gmra.mrb[46].mxu1 %v21677_v18  ;;  %11599 = vmatmul.mubr.f32.gmra.mrb[78].mxu0 %v21677_v18  ;;  %23924 = vst [vmem:[#allocation27_spill] sm:$0xff] %v21850_v21  ;;  %v11929_v55 = vld [vmem:[%s23512_s13 + $0x1a0] sm:$0xff] }
 0x960   : > { %10066 = vmatprep.mubr.f32.mxu1 %v21351_v9  ;;  %11604 = vmatprep.mubr.f32.mxu0 %v21351_v9  ;;  %23922 = vst [vmem:[#allocation25_spill] sm:$0xff] %v21800_v52  ;;  %v21819_v48 = vmax.f32 %v9817_v49, 0.0  ;;  %v21903_v37 = vmax.f32 %v21683_v56, 0.0  ;;  %v11932_v56 = vld [vmem:[%s23512_s13 + $0x1b8] sm:$0xff] }
 0x961   : > { %v16245_v28 = vpop.f32.mrb[50].mxu0  ;;  %16975 = vmatpush1.bf16.msra.mxu1 %v16974_v12  ;;  %v11922_v12 = vld [vmem:[%s23512_s13 + $0x168] sm:$0xff]  ;;  %17201 = vmatpush1.bf16.msra.mxu0 %v21800_v52 }
 0x962   : > { %v21706_v8 = vadd.f32 %v16245_v28, %v21514_v0  ;;  %v9696_v25 = vpop.f32.mrb[51].mxu0  ;;  %16976 = vmatprep.subr.bf16.mxu1 %v23653_v45  ;;  %v21824_v19 = vpack.c.bf16 %v11922_v12, %v11921_v47  ;;  %17202 = vmatprep.subr.bf16.mxu0 %v23653_v45  ;;  %23927 = vst [vmem:[#allocation30_spill] sm:$0xff] %v21903_v37  ;;  %v11933_v12 = vld [vmem:[%s23512_s13 + $0x1c0] sm:$0xff] }
 0x963   : > { %v21711_v24 = vadd.f32 %v21514_v0, %v9696_v25  ;;  %10067 = vmatmul.mubr.f32.gmra.mrb[48].mxu1 %v21700_v27  ;;  %11605 = vmatmul.mubr.f32.gmra.mrb[80].mxu0 %v21700_v27 }
 0x964   : > { %10072 = vmatprep.mubr.f32.mxu1 %v21351_v9  ;;  %11610 = vmatprep.mubr.f32.mxu0 %v21351_v9  ;;  %23923 = vst [vmem:[#allocation26_spill] sm:$0xff] %v21824_v19 }
 0x965   : > { %v16248_v6 = vpop.f32.mrb[52].mxu0  ;;  %17204 = vmatpush1.bf16.msra.mxu0 %v21824_v19 }
 0x966   : > { %v21731_v1 = vadd.f32 %v16248_v6, %v21514_v0  ;;  %v9706_v63 = vpop.f32.mrb[53].mxu0  ;;  %v21847_v6 = vmax.f32 %v9818_v38, 0.0  ;;  %17205 = vmatprep.subr.bf16.mxu0 %v23653_v45  ;;  %v21937_v38 = vmax.f32 %v21706_v8, 0.0  ;;  %v11936_v8 = vld [vmem:[%s23512_s13 + $0x1d8] sm:$0xff] }
 0x967   : > { %v21735_v59 = vadd.f32 %v21514_v0, %v9706_v63  ;;  %10073 = vmatmul.mubr.f32.gmra.mrb[50].mxu1 %v21723_v51  ;;  %11611 = vmatmul.mubr.f32.gmra.mrb[82].mxu0 %v21723_v51 }
 0x968   : > { %10078 = vmatprep.mubr.f32.mxu1 %v21351_v9  ;;  %11616 = vmatprep.mubr.f32.mxu0 %v21351_v9  ;;  %23931 = vst [vmem:[#allocation34_spill] sm:$0xff] %v21937_v38 }
 0x969   : > { %v16251_v32 = vpop.f32.mrb[54].mxu0  ;;  %17207 = vmatpush1.bf16.msra.mxu0 %v21850_v21  ;;  %v21954_v31 = vmax.f32 %v21735_v59, 0.0  ;;  %v11938_v59 = vld [vmem:[%s23512_s13 + $0x1e8] sm:$0xff] }
 0x96a   : > { %v21755_v29 = vadd.f32 %v16251_v32, %v21514_v0  ;;  %v9716_v11 = vpop.f32.mrb[55].mxu0  ;;  %17208 = vmatprep.subr.bf16.mxu0 %v23653_v45 }
 0x96b   : > { %v21759_v34 = vadd.f32 %v21514_v0, %v9716_v11  ;;  %10079 = vmatmul.mubr.f32.gmra.mrb[52].mxu1 %v21749_v44  ;;  %11617 = vmatmul.mubr.f32.gmra.mrb[84].mxu0 %v21749_v44  ;;  %v11926_v11 = vld [vmem:[%s23512_s13 + $0x188] sm:$0xff]  ;;  %23933 = vst [vmem:[#allocation36_spill] sm:$0xff] %v21954_v31 }
 0x96c   : > { %10084 = vmatprep.mubr.f32.mxu1 %v21351_v9  ;;  %11622 = vmatprep.mubr.f32.mxu0 %v21351_v9 }
 0x96d   : > { %v16254_v46 = vpop.f32.mrb[56].mxu0 }
 0x96e   : > { %v21779_v3 = vadd.f32 %v16254_v46, %v21514_v0  ;;  %v9726_v53 = vpop.f32.mrb[57].mxu0  ;;  %v21886_v46 = vmax.f32 %v21686_v58, 0.0  ;;  %v11930_v58 = vld [vmem:[%s23512_s13 + $0x1a8] sm:$0xff] }
 0x96f   : > { %v21783_v43 = vadd.f32 %v21514_v0, %v9726_v53  ;;  %10085 = vmatmul.mubr.f32.gmra.mrb[54].mxu1 %v21771_v60  ;;  %11623 = vmatmul.mubr.f32.gmra.mrb[86].mxu0 %v21771_v60  ;;  %v21889_v53 = vpack.c.bf16 %v11928_v17, %v11927_v39  ;;  %v21906_v49 = vpack.c.bf16 %v11930_v58, %v11929_v55  ;;  %v21999_v17 = vmax.f32 %v21755_v29, 0.0  ;;  %v10596_v55 = vld [vmem:[%s23508_s9] sm:$0xff] }
 0x970   : > { %10090 = vmatprep.mubr.f32.mxu1 %v21351_v9  ;;  %11628 = vmatprep.mubr.f32.mxu0 %v21351_v9  ;;  %v22014_v29 = vmax.f32 %v21779_v3, 0.0 }
 0x971   : > { %v16257_v5 = vpop.f32.mrb[58].mxu0  ;;  %23926 = vst [vmem:[#allocation29_spill] sm:$0xff] %v21889_v53  ;;  %23928 = vst [vmem:[#allocation31_spill] sm:$0xff] %v21906_v49 }
 0x972   : > { %v21803_v26 = vadd.f32 %v16257_v5, %v21514_v0  ;;  %v9736_v41 = vpop.f32.mrb[59].mxu0  ;;  %v11931_v5 = vld [vmem:[%s23512_s13 + $0x1b0] sm:$0xff]  ;;  %23939 = vst [vmem:[#allocation42_spill] sm:$0xff] %v21999_v17  ;;  %23941 = vst [vmem:[#allocation18_spill] sm:$0xff] %v22014_v29 }
 0x973   : > { %v21807_v57 = vadd.f32 %v21514_v0, %v9736_v41  ;;  %10091 = vmatmul.mubr.f32.gmra.mrb[56].mxu1 %v21797_v4  ;;  %11629 = vmatmul.mubr.f32.gmra.mrb[88].mxu0 %v21797_v4  ;;  %v21920_v41 = vmax.f32 %v21711_v24, 0.0  ;;  %v21923_v47 = vpack.c.bf16 %v11932_v56, %v11931_v5  ;;  %v11934_v24 = vld [vmem:[%s23512_s13 + $0x1c8] sm:$0xff]  ;;  %v10599_v5 = vld [vmem:[%s23508_s9 + $0x18] sm:$0xff] }
 0x974   : > { %10096 = vmatprep.mubr.f32.mxu1 %v21351_v9  ;;  %11634 = vmatprep.mubr.f32.mxu0 %v21351_v9  ;;  %v22028_v3 = vmax.f32 %v21803_v26, 0.0 }
 0x975   : > { %v16260_v61 = vpop.f32.mrb[60].mxu0  ;;  %23929 = vst [vmem:[#allocation32_spill] sm:$0xff] %v21920_v41  ;;  %23930 = vst [vmem:[#allocation33_spill] sm:$0xff] %v21923_v47 }
 0x976   : > { %v21827_v9 = vadd.f32 %v16260_v61, %v21514_v0  ;;  %v9746_v28 = vpop.f32.mrb[61].mxu0  ;;  %v21940_v61 = vpack.c.bf16 %v11934_v24, %v11933_v12  ;;  %23943 = vst [vmem:[#allocation20_spill] sm:$0xff] %v22028_v3  ;;  %v10600_v12 = vld [vmem:[%s23508_s9 + $0x20] sm:$0xff]  ;;  %v10601_v24 = vld [vmem:[%s23508_s9 + $0x28] sm:$0xff] }
 0x977   : > { %v21831_v25 = vadd.f32 %v21514_v0, %v9746_v28  ;;  %10097 = vmatmul.mubr.f32.gmra.mrb[58].mxu1 %v21819_v48  ;;  %11635 = vmatmul.mubr.f32.gmra.mrb[90].mxu0 %v21819_v48  ;;  %v11935_v28 = vld [vmem:[%s23512_s13 + $0x1d0] sm:$0xff] }
 0x978   : > { %10102 = vmatprep.mubr.f32.mxu1 %v21835_v33  ;;  %11640 = vmatprep.mubr.f32.mxu0 %v21835_v33  ;;  %23932 = vst [vmem:[#allocation35_spill] sm:$0xff] %v21940_v61  ;;  %v21957_v42 = vpack.c.bf16 %v11936_v8, %v11935_v28  ;;  %v22042_v26 = vmax.f32 %v21827_v9, 0.0  ;;  %v16983_v28 = vpack.c.bf16 %v10601_v24, %v10600_v12  ;;  %v10602_v8 = vld [vmem:[%s23508_s9 + $0x30] sm:$0xff] }
 0x979   : > { %v16263_v63 = vpop.f32.mrb[62].mxu0  ;;  %v10610_v24 = vld [vmem:[%s23508_s9 + $0x70] sm:$0xff] }
 0x97a   : > { %v21853_v14 = vadd.f32 %v16263_v63, %v21514_v0  ;;  %v9756_v50 = vpop.f32.mrb[63].mxu0  ;;  %23934 = vst [vmem:[#allocation37_spill] sm:$0xff] %v21957_v42  ;;  %v21971_v63 = vmax.f32 %v21731_v1, 0.0  ;;  %v11940_v1 = vld [vmem:[%s23512_s13 + $0x1f8] sm:$0xff]  ;;  %23945 = vst [vmem:[#allocation44_spill] sm:$0xff] %v22042_v26 }
 0x97b   : > { %v21857_v32 = vadd.f32 %v21514_v0, %v9756_v50  ;;  %10103 = vmatmul.mubr.f32.gmra.mrb[60].mxu1 %v21847_v6  ;;  %11641 = vmatmul.mubr.f32.gmra.mrb[92].mxu0 %v21847_v6  ;;  %v21872_v0 = vpack.c.bf16 %v11926_v11, %v11925_v23  ;;  %v21974_v50 = vpack.c.bf16 %v11938_v59, %v11937_v30  ;;  %v11939_v23 = vld [vmem:[%s23512_s13 + $0x1f0] sm:$0xff]  ;;  %v21988_v11 = vmax.f32 %v21759_v34, 0.0  ;;  %v10603_v30 = vld [vmem:[%s23508_s9 + $0x38] sm:$0xff] }
 0x97c   : > { %10108 = vmatprep.mubr.f32.mxu1 %v21835_v33  ;;  %11646 = vmatprep.mubr.f32.mxu0 %v21835_v33  ;;  %23935 = vst [vmem:[#allocation38_spill] sm:$0xff] %v21971_v63  ;;  %v21991_v39 = vpack.c.bf16 %v11940_v1, %v11939_v23  ;;  %v22007_v34 = vmax.f32 %v21783_v43, 0.0  ;;  %v22021_v43 = vmax.f32 %v21807_v57, 0.0  ;;  %v22035_v57 = vmax.f32 %v21831_v25, 0.0  ;;  %v10604_v23 = vld [vmem:[%s23508_s9 + $0x40] sm:$0xff]  ;;  %v10605_v1 = vld [vmem:[%s23508_s9 + $0x48] sm:$0xff] }
 0x97d   : > { %23925 = vst [vmem:[#allocation28_spill] sm:$0xff] %v21872_v0  ;;  %17210 = vmatpush1.bf16.msra.mxu0 %v21872_v0  ;;  %23936 = vst [vmem:[#allocation39_spill] sm:$0xff] %v21974_v50  ;;  %v22049_v25 = vmax.f32 %v21857_v32, 0.0  ;;  %v22056_v9 = vmax.f32 %v21853_v14, 0.0  ;;  %v10597_v32 = vld [vmem:[%s23508_s9 + $0x8] sm:$0xff]  ;;  %v10598_v14 = vld [vmem:[%s23508_s9 + $0x10] sm:$0xff]  ;;  %v16986_v59 = vpack.c.bf16 %v10603_v30, %v10602_v8 }
 0x97e   : > { %17211 = vmatprep.subr.bf16.mxu0 %v23653_v45  ;;  %23937 = vst [vmem:[#allocation40_spill] sm:$0xff] %v21988_v11  ;;  %23938 = vst [vmem:[#allocation41_spill] sm:$0xff] %v21991_v39  ;;  %v16977_v58 = vpack.c.bf16 %v10597_v32, %v10596_v55  ;;  %v16980_v56 = vpack.c.bf16 %v10599_v5, %v10598_v14  ;;  %v16989_v55 = vpack.c.bf16 %v10605_v1, %v10604_v23  ;;  %v10606_v32 = vld [vmem:[%s23508_s9 + $0x50] sm:$0xff]  ;;  %v10608_v5 = vld [vmem:[%s23508_s9 + $0x60] sm:$0xff] }
 0x97f   : > { %10109 = vmatmul.mubr.f32.gmra.mrb[62].mxu1 %v21869_v35  ;;  %11647 = vmatmul.mubr.f32.gmra.mrb[94].mxu0 %v21869_v35  ;;  %23940 = vst [vmem:[#allocation17_spill] sm:$0xff] %v22007_v34  ;;  %23942 = vst [vmem:[#allocation19_spill] sm:$0xff] %v22021_v43  ;;  %v10612_v30 = vld [vmem:[%s23508_s9 + $0x80] sm:$0xff]  ;;  %v10614_v1 = vld [vmem:[%s23508_s9 + $0x90] sm:$0xff] }
 0x980   : > { %10114 = vmatprep.mubr.f32.mxu1 %v21835_v33  ;;  %11652 = vmatprep.mubr.f32.mxu0 %v21835_v33  ;;  %23944 = vst [vmem:[#allocation43_spill] sm:$0xff] %v22035_v57  ;;  %23946 = vst [vmem:[#allocation16_spill] sm:$0xff] %v22049_v25 }
 0x981   : > { %17213 = vmatpush1.bf16.msra.mxu0 %v21889_v53  ;;  %23947 = vst [vmem:[#allocation45_spill] sm:$0xff] %v22056_v9 }
 0x982   : > { %17214 = vmatprep.subr.bf16.mxu0 %v23653_v45 }
 0x983   : > { %10115 = vmatmul.mubr.f32.gmra.mrb[64].mxu1 %v21886_v46  ;;  %11653 = vmatmul.mubr.f32.gmra.mrb[96].mxu0 %v21886_v46 }
 0x984   : > { %10120 = vmatprep.mubr.f32.mxu1 %v21835_v33  ;;  %11658 = vmatprep.mubr.f32.mxu0 %v21835_v33 }
 0x985   : > { %17216 = vmatpush1.bf16.msra.mxu0 %v21906_v49 }
 0x986   : > { %17217 = vmatprep.subr.bf16.mxu0 %v23653_v45 }
 0x987   : > { %10121 = vmatmul.mubr.f32.gmra.mrb[66].mxu1 %v21903_v37  ;;  %11659 = vmatmul.mubr.f32.gmra.mrb[98].mxu0 %v21903_v37 }
 0x988   : > { %10126 = vmatprep.mubr.f32.mxu1 %v21835_v33  ;;  %11664 = vmatprep.mubr.f32.mxu0 %v21835_v33 }
 0x989   : > { %17219 = vmatpush1.bf16.msra.mxu0 %v21923_v47 }
 0x98a   : > { %17220 = vmatprep.subr.bf16.mxu0 %v23653_v45 }
 0x98b   : > { %10127 = vmatmul.mubr.f32.gmra.mrb[68].mxu1 %v21920_v41  ;;  %11665 = vmatmul.mubr.f32.gmra.mrb[100].mxu0 %v21920_v41 }
 0x98c   : > { %10132 = vmatprep.mubr.f32.mxu1 %v21835_v33  ;;  %11670 = vmatprep.mubr.f32.mxu0 %v21835_v33 }
 0x98d   : > { %17222 = vmatpush1.bf16.msra.mxu0 %v21940_v61 }
 0x98e   : > { %17223 = vmatprep.subr.bf16.mxu0 %v23653_v45 }
 0x98f   : > { %10133 = vmatmul.mubr.f32.gmra.mrb[70].mxu1 %v21937_v38  ;;  %11671 = vmatmul.mubr.f32.gmra.mrb[102].mxu0 %v21937_v38 }
 0x990   : > { %10138 = vmatprep.mubr.f32.mxu1 %v21835_v33  ;;  %11676 = vmatprep.mubr.f32.mxu0 %v21835_v33 }
 0x991   : > { %17225 = vmatpush1.bf16.msra.mxu0 %v21957_v42 }
 0x992   : > { %17226 = vmatprep.subr.bf16.mxu0 %v23653_v45 }
 0x993   : > { %10139 = vmatmul.mubr.f32.gmra.mrb[72].mxu1 %v21954_v31  ;;  %11677 = vmatmul.mubr.f32.gmra.mrb[104].mxu0 %v21954_v31 }
 0x994   : > { %10144 = vmatprep.mubr.f32.mxu1 %v21835_v33  ;;  %11682 = vmatprep.mubr.f32.mxu0 %v21835_v33 }
 0x995   : > { %17228 = vmatpush1.bf16.msra.mxu0 %v21974_v50 }
 0x996   : > { %17229 = vmatprep.subr.bf16.mxu0 %v23653_v45 }
 0x997   : > { %10145 = vmatmul.mubr.f32.gmra.mrb[74].mxu1 %v21971_v63  ;;  %11683 = vmatmul.mubr.f32.gmra.mrb[106].mxu0 %v21971_v63 }
 0x998   : > { %10150 = vmatprep.mubr.f32.mxu1 %v21835_v33  ;;  %11688 = vmatprep.mubr.f32.mxu0 %v21835_v33 }
 0x999   : > { %17231 = vmatpush1.bf16.msra.mxu0 %v21991_v39 }
 0x99b   : > { %10151 = vmatmul.mubr.f32.gmra.mrb[76].mxu1 %v21988_v11  ;;  %11689 = vmatmul.mubr.f32.gmra.mrb[108].mxu0 %v21988_v11 }
 0x99c   : > { %10156 = vmatprep.mubr.f32.mxu1 %v21835_v33  ;;  %11694 = vmatprep.mubr.f32.mxu0 %v21835_v33 }
 0x99f   : > { %10157 = vmatmul.mubr.f32.gmra.mrb[78].mxu1 %v21999_v17  ;;  %11695 = vmatmul.mubr.f32.gmra.mrb[110].mxu0 %v21999_v17 }
 0x9a0   : > { %10162 = vmatprep.mubr.f32.mxu1 %v21835_v33  ;;  %11700 = vmatprep.mubr.f32.mxu0 %v21835_v33 }
 0x9a3   : > { %10163 = vmatmul.mubr.f32.gmra.mrb[80].mxu1 %v22007_v34  ;;  %11701 = vmatmul.mubr.f32.gmra.mrb[112].mxu0 %v22007_v34 }
 0x9a4   : > { %10168 = vmatprep.mubr.f32.mxu1 %v21835_v33  ;;  %11706 = vmatprep.mubr.f32.mxu0 %v21835_v33 }
 0x9a7   : > { %10169 = vmatmul.mubr.f32.gmra.mrb[82].mxu1 %v22014_v29  ;;  %11707 = vmatmul.mubr.f32.gmra.mrb[114].mxu0 %v22014_v29 }
 0x9a8   : > { %10174 = vmatprep.mubr.f32.mxu1 %v21835_v33  ;;  %11712 = vmatprep.mubr.f32.mxu0 %v21835_v33 }
 0x9ab   : > { %10175 = vmatmul.mubr.f32.gmra.mrb[84].mxu1 %v22021_v43  ;;  %11713 = vmatmul.mubr.f32.gmra.mrb[116].mxu0 %v22021_v43 }
 0x9ac   : > { %10180 = vmatprep.mubr.f32.mxu1 %v21835_v33  ;;  %11718 = vmatprep.mubr.f32.mxu0 %v21835_v33 }
 0x9af   : > { %10181 = vmatmul.mubr.f32.gmra.mrb[86].mxu1 %v22028_v3  ;;  %11719 = vmatmul.mubr.f32.gmra.mrb[118].mxu0 %v22028_v3 }
 0x9b0   : > { %10186 = vmatprep.mubr.f32.mxu1 %v21835_v33  ;;  %11724 = vmatprep.mubr.f32.mxu0 %v21835_v33 }
 0x9b3   : > { %10187 = vmatmul.mubr.f32.gmra.mrb[88].mxu1 %v22035_v57  ;;  %11725 = vmatmul.mubr.f32.gmra.mrb[120].mxu0 %v22035_v57 }
 0x9b4   : > { %10192 = vmatprep.mubr.f32.mxu1 %v21835_v33  ;;  %11730 = vmatprep.mubr.f32.mxu0 %v21835_v33 }
 0x9b7   : > { %10193 = vmatmul.mubr.f32.gmra.mrb[90].mxu1 %v22042_v26  ;;  %11731 = vmatmul.mubr.f32.gmra.mrb[122].mxu0 %v22042_v26 }
 0x9b8   : > { %10198 = vmatprep.mubr.f32.mxu1 %v21835_v33  ;;  %11736 = vmatprep.mubr.f32.mxu0 %v21835_v33 }
 0x9bb   : > { %10199 = vmatmul.mubr.f32.gmra.mrb[92].mxu1 %v22049_v25  ;;  %11737 = vmatmul.mubr.f32.gmra.mrb[124].mxu0 %v22049_v25 }
 0x9bc   : > { %10204 = vmatprep.mubr.f32.mxu1 %v21835_v33  ;;  %11742 = vmatprep.mubr.f32.mxu0 %v21835_v33 }
 0x9bf   : > { %10205 = vmatmul.mubr.f32.gmra.mrb[94].mxu1 %v22056_v9  ;;  %11743 = vmatmul.mubr.f32.gmra.mrb[126].mxu0 %v22056_v9 }
 0x9c0   : > { %10275 = vmatprep.mubr.f32.mxu1 %v21835_v33 }
 0x9c3   : > { %10276 = vmatmul.mubr.f32.vlgmr.msra.gmra.mrb[96].mxu1 %v21530_v16 }
 0x9c4   : > { %16978 = vmatpush1.bf16.msra.mxu1 %v16977_v58  ;;  %10281 = vmatprep.mubr.f32.mxu1 %v21835_v33  ;;  %v10607_v58 = vld [vmem:[%s23508_s9 + $0x58] sm:$0xff] }
 0x9c5   : > { %16979 = vmatprep.subr.bf16.mxu1 %v23653_v45  ;;  %v16992_v14 = vpack.c.bf16 %v10607_v58, %v10606_v32  ;;  %v10616_v58 = vld [vmem:[%s23508_s9 + $0xa0] sm:$0xff] }
 0x9c7   : > { %10282 = vmatmul.mubr.f32.gmra.mrb[98].mxu1 %v21547_v13 }
 0x9c8   : > { %10287 = vmatprep.mubr.f32.mxu1 %v21835_v33  ;;  %16981 = vmatpush1.bf16.msra.mxu1 %v16980_v56  ;;  %v10609_v56 = vld [vmem:[%s23508_s9 + $0x68] sm:$0xff] }
 0x9c9   : > { %16982 = vmatprep.subr.bf16.mxu1 %v23653_v45  ;;  %v16995_v12 = vpack.c.bf16 %v10609_v56, %v10608_v5  ;;  %v10618_v56 = vld [vmem:[%s23508_s9 + $0xb0] sm:$0xff] }
 0x9cb   : > { %10288 = vmatmul.mubr.f32.gmra.mrb[100].mxu1 %v21569_v10 }
 0x9cc   : > { %10293 = vmatprep.mubr.f32.mxu1 %v21835_v33  ;;  %16984 = vmatpush1.bf16.msra.mxu1 %v16983_v28  ;;  %v10611_v28 = vld [vmem:[%s23508_s9 + $0x78] sm:$0xff] }
 0x9cd   : > { %16985 = vmatprep.subr.bf16.mxu1 %v23653_v45  ;;  %v16998_v8 = vpack.c.bf16 %v10611_v28, %v10610_v24  ;;  %v10620_v28 = vld [vmem:[%s23508_s9 + $0xc0] sm:$0xff] }
 0x9cf   : > { %10294 = vmatmul.mubr.f32.gmra.mrb[102].mxu1 %v21587_v7 }
 0x9d0   : > { %10299 = vmatprep.mubr.f32.mxu1 %v21835_v33  ;;  %16987 = vmatpush1.bf16.msra.mxu1 %v16986_v59  ;;  %v10613_v59 = vld [vmem:[%s23508_s9 + $0x88] sm:$0xff] }
 0x9d1   : > { %16988 = vmatprep.subr.bf16.mxu1 %v23653_v45  ;;  %v17001_v23 = vpack.c.bf16 %v10613_v59, %v10612_v30  ;;  %v10622_v59 = vld [vmem:[%s23508_s9 + $0xd0] sm:$0xff] }
 0x9d3   : > { %10300 = vmatmul.mubr.f32.gmra.mrb[104].mxu1 %v21609_v36 }
 0x9d4   : > { %10305 = vmatprep.mubr.f32.mxu1 %v21835_v33  ;;  %16990 = vmatpush1.bf16.msra.mxu1 %v16989_v55  ;;  %v10615_v55 = vld [vmem:[%s23508_s9 + $0x98] sm:$0xff] }
 0x9d5   : > { %16991 = vmatprep.subr.bf16.mxu1 %v23653_v45  ;;  %v17004_v32 = vpack.c.bf16 %v10615_v55, %v10614_v1  ;;  %v10624_v55 = vld [vmem:[%s23508_s9 + $0xe0] sm:$0xff] }
 0x9d7   : > { %10306 = vmatmul.mubr.f32.gmra.mrb[106].mxu1 %v21631_v22 }
 0x9d8   : > { %10311 = vmatprep.mubr.f32.mxu1 %v21835_v33  ;;  %16993 = vmatpush1.bf16.msra.mxu1 %v16992_v14  ;;  %v10617_v14 = vld [vmem:[%s23508_s9 + $0xa8] sm:$0xff] }
 0x9d9   : > { %16994 = vmatprep.subr.bf16.mxu1 %v23653_v45  ;;  %v17007_v5 = vpack.c.bf16 %v10617_v14, %v10616_v58  ;;  %v10626_v14 = vld [vmem:[%s23508_s9 + $0xf0] sm:$0xff] }
 0x9db   : > { %10312 = vmatmul.mubr.f32.gmra.mrb[108].mxu1 %v21655_v62 }
 0x9dc   : > { %10317 = vmatprep.mubr.f32.mxu1 %v21835_v33  ;;  %16996 = vmatpush1.bf16.msra.mxu1 %v16995_v12  ;;  %v10619_v12 = vld [vmem:[%s23508_s9 + $0xb8] sm:$0xff] }
 0x9dd   : > { %16997 = vmatprep.subr.bf16.mxu1 %v23653_v45  ;;  %v17010_v24 = vpack.c.bf16 %v10619_v12, %v10618_v56  ;;  %v9934_v12 = vlaneseq }
 0x9df   : > { %10318 = vmatmul.mubr.f32.gmra.mrb[110].mxu1 %v21677_v18 }
 0x9e0   : > { %10323 = vmatprep.mubr.f32.mxu1 %v21835_v33  ;;  %16999 = vmatpush1.bf16.msra.mxu1 %v16998_v8  ;;  %v10621_v8 = vld [vmem:[%s23508_s9 + $0xc8] sm:$0xff] }
 0x9e1   : > { %17000 = vmatprep.subr.bf16.mxu1 %v23653_v45  ;;  %v17013_v30 = vpack.c.bf16 %v10621_v8, %v10620_v28  ;;  %v11213_v8 = vld [vmem:[#allocation9] sm:$0xf] }
 0x9e3   : > { %10324 = vmatmul.mubr.f32.gmra.mrb[112].mxu1 %v21700_v27 }
 0x9e4   : > { %10329 = vmatprep.mubr.f32.mxu1 %v21835_v33  ;;  %17002 = vmatpush1.bf16.msra.mxu1 %v17001_v23  ;;  %v10623_v23 = vld [vmem:[%s23508_s9 + $0xd8] sm:$0xff] }
 0x9e5   : > { %17003 = vmatprep.subr.bf16.mxu1 %v23653_v45  ;;  %v17016_v1 = vpack.c.bf16 %v10623_v23, %v10622_v59 }
 0x9e7   : > { %10330 = vmatmul.mubr.f32.gmra.mrb[114].mxu1 %v21723_v51 }
 0x9e8   : > { %10335 = vmatprep.mubr.f32.mxu1 %v21835_v33  ;;  %17005 = vmatpush1.bf16.msra.mxu1 %v17004_v32  ;;  %v10625_v32 = vld [vmem:[%s23508_s9 + $0xe8] sm:$0xff] }
 0x9e9   : > { %17006 = vmatprep.subr.bf16.mxu1 %v23653_v45  ;;  %v17019_v58 = vpack.c.bf16 %v10625_v32, %v10624_v55 }
 0x9eb   : > { %10336 = vmatmul.mubr.f32.gmra.mrb[116].mxu1 %v21749_v44 }
 0x9ec   : > { %10341 = vmatprep.mubr.f32.mxu1 %v21835_v33  ;;  %17008 = vmatpush1.bf16.msra.mxu1 %v17007_v5  ;;  %v10627_v5 = vld [vmem:[%s23508_s9 + $0xf8] sm:$0xff] }
 0x9ed   : > { %17009 = vmatprep.subr.bf16.mxu1 %v23653_v45  ;;  %v17022_v56 = vpack.c.bf16 %v10627_v5, %v10626_v14 }
 0x9ef   : > { %10342 = vmatmul.mubr.f32.gmra.mrb[118].mxu1 %v21771_v60 }
 0x9f0   : > { %10347 = vmatprep.mubr.f32.mxu1 %v21835_v33  ;;  %17011 = vmatpush1.bf16.msra.mxu1 %v17010_v24  ;;  %v22210_v24 = vshrl.u32 %v9934_v12, 7 }
 0x9f1   : > { %17012 = vmatprep.subr.bf16.mxu1 %v23653_v45 }
 0x9f2   : > { %v23651_v28 = vsub.s32 2, %v22210_v24 }
 0x9f3   : > { %10348 = vmatmul.mubr.f32.gmra.mrb[120].mxu1 %v21797_v4 }
 0x9f4   : > { %10353 = vmatprep.mubr.f32.mxu1 %v21835_v33  ;;  %17014 = vmatpush1.bf16.msra.mxu1 %v17013_v30  ;;  %v23652_v30 = vsub.s32 3, %v22210_v24  ;;  %v22220_v59 = vrot.slane %v11213_v8, %v23651_v28 }
 0x9f5   : > { %17015 = vmatprep.subr.bf16.mxu1 %v23653_v45 }
 0x9f6   : > { %v22225_v23 = vrot.slane %v11213_v8, %v23652_v30 }
 0x9f7   : > { %10354 = vmatmul.mubr.f32.gmra.mrb[122].mxu1 %v21819_v48 }
 0x9f8   : > { %10359 = vmatprep.mubr.f32.mxu1 %v21835_v33  ;;  %17017 = vmatpush1.bf16.msra.mxu1 %v17016_v1 }
 0x9f9   : > { %17018 = vmatprep.subr.bf16.mxu1 %v23653_v45 }
 0x9fb   : > { %10360 = vmatmul.mubr.f32.gmra.mrb[124].mxu1 %v21847_v6 }
 0x9fc   : > { %10365 = vmatprep.mubr.f32.mxu1 %v21835_v33  ;;  %17020 = vmatpush1.bf16.msra.mxu1 %v17019_v58 }
 0x9fd   : > { %17021 = vmatprep.subr.bf16.mxu1 %v23653_v45 }
 0x9ff   : > { %10366 = vmatmul.mubr.f32.gmra.mrb[126].mxu1 %v21869_v35 }
 0xa00   : > { %10371 = vmatprep.mubr.f32.mxu1 %v21835_v33  ;;  %17023 = vmatpush1.bf16.msra.mxu1 %v17022_v56 }
 0xa01   : > { %17024 = vmatprep.subr.bf16.mxu1 %v23653_v45 }
 0xa03   : > { %10372 = vmatmul.mubr.f32.gmra.mrb[128].mxu1 %v21886_v46 }
 0xa04   : > { %10377 = vmatprep.mubr.f32.mxu1 %v21835_v33 }
 0xa07   : > { %10378 = vmatmul.mubr.f32.gmra.mrb[130].mxu1 %v21903_v37 }
 0xa08   : > { %10383 = vmatprep.mubr.f32.mxu1 %v21835_v33 }
 0xa0b   : > { %10384 = vmatmul.mubr.f32.gmra.mrb[132].mxu1 %v21920_v41 }
 0xa0c   : > { %10389 = vmatprep.mubr.f32.mxu1 %v21835_v33 }
 0xa0f   : > { %10390 = vmatmul.mubr.f32.gmra.mrb[134].mxu1 %v21937_v38 }
 0xa10   : > { %10395 = vmatprep.mubr.f32.mxu1 %v21835_v33 }
 0xa13   : > { %10396 = vmatmul.mubr.f32.gmra.mrb[136].mxu1 %v21954_v31 }
 0xa14   : > { %10401 = vmatprep.mubr.f32.mxu1 %v21835_v33 }
 0xa16   : > { %v22227_v1 = vpop.f32.mrb[32].mxu1  ;;  %v11558_v55 = vpop.f32.mrb[64].mxu0 }
 0xa17   : > { %v11559_v32 = vadd.f32 %v11558_v55, %v22220_v59  ;;  %v22230_v58 = vpop.f32.mrb[33].mxu1  ;;  %10402 = vmatmul.mubr.f32.gmra.mrb[138].mxu1 %v21971_v63  ;;  %v11560_v14 = vpop.f32.mrb[65].mxu0 }
 0xa18   : > { %v11561_v5 = vadd.f32 %v11560_v14, %v22225_v23  ;;  %10407 = vmatprep.mubr.f32.mxu1 %v21835_v33 }
 0xa19   : > { %v11751_v8 = vmax.f32 %v11559_v32, 0.0 }
 0xa1a   : > { %v11752_v56 = vmax.f32 %v11561_v5, 0.0  ;;  %v22235_v12 = vpop.f32.mrb[34].mxu1  ;;  %v11564_v28 = vpop.f32.mrb[66].mxu0 }
 0xa1b   : > { %v11565_v30 = vadd.f32 %v11564_v28, %v22220_v59  ;;  %v22238_v45 = vpop.f32.mrb[35].mxu1  ;;  %10408 = vmatmul.mubr.f32.gmra.mrb[140].mxu1 %v21988_v11  ;;  %v11566_v55 = vpop.f32.mrb[67].mxu0 }
 0xa1c   : > { %v11567_v39 = vadd.f32 %v11566_v55, %v22225_v23  ;;  %12237 = vmatprep.mubr.f32.mxu0 %v11752_v56  ;;  %10413 = vmatprep.mubr.f32.mxu1 %v21835_v33 }
 0xa1d   : > { %12238 = vmatmul.mubr.f32.vlgmr.msra.gmra.mrb[128].mxu0 %v11751_v8  ;;  %v11755_v42 = vmax.f32 %v11565_v30, 0.0 }
 0xa1e   : > { %v11756_v14 = vmax.f32 %v11567_v39, 0.0  ;;  %v22243_v50 = vpop.f32.mrb[36].mxu1  ;;  %v11570_v5 = vpop.f32.mrb[68].mxu0 }
 0xa1f   : > { %v11571_v32 = vadd.f32 %v11570_v5, %v22220_v59  ;;  %v22246_v61 = vpop.f32.mrb[37].mxu1  ;;  %10414 = vmatmul.mubr.f32.gmra.mrb[142].mxu1 %v21999_v17  ;;  %v11572_v28 = vpop.f32.mrb[69].mxu0 }
 0xa20   : > { %v11573_v47 = vadd.f32 %v11572_v28, %v22225_v23  ;;  %12242 = vmatprep.mubr.f32.mxu0 %v11756_v14  ;;  %10419 = vmatprep.mubr.f32.mxu1 %v21835_v33 }
 0xa21   : > { %12243 = vmatmul.mubr.f32.gmra.mrb[130].mxu0 %v11755_v42  ;;  %v11759_v55 = vmax.f32 %v11571_v32, 0.0 }
 0xa22   : > { %v11760_v56 = vmax.f32 %v11573_v47, 0.0  ;;  %v22251_v8 = vpop.f32.mrb[38].mxu1  ;;  %v11576_v39 = vpop.f32.mrb[70].mxu0 }
 0xa23   : > { %v11577_v30 = vadd.f32 %v11576_v39, %v22220_v59  ;;  %v22254_v49 = vpop.f32.mrb[39].mxu1  ;;  %10420 = vmatmul.mubr.f32.gmra.mrb[144].mxu1 %v22007_v34  ;;  %v11578_v5 = vpop.f32.mrb[71].mxu0 }
 0xa24   : > { %v11579_v53 = vadd.f32 %v11578_v5, %v22225_v23  ;;  %12247 = vmatprep.mubr.f32.mxu0 %v11760_v56  ;;  %10425 = vmatprep.mubr.f32.mxu1 %v21835_v33 }
 0xa25   : > { %12248 = vmatmul.mubr.f32.gmra.mrb[132].mxu0 %v11759_v55  ;;  %v11763_v28 = vmax.f32 %v11577_v30, 0.0 }
 0xa26   : > { %v11764_v14 = vmax.f32 %v11579_v53, 0.0  ;;  %v22259_v42 = vpop.f32.mrb[40].mxu1  ;;  %v11582_v47 = vpop.f32.mrb[72].mxu0 }
 0xa27   : > { %v11583_v32 = vadd.f32 %v11582_v47, %v22220_v59  ;;  %v22262_v0 = vpop.f32.mrb[41].mxu1  ;;  %10426 = vmatmul.mubr.f32.gmra.mrb[146].mxu1 %v22014_v29  ;;  %v11584_v39 = vpop.f32.mrb[73].mxu0 }
 0xa28   : > { %v11585_v21 = vadd.f32 %v11584_v39, %v22225_v23  ;;  %12252 = vmatprep.mubr.f32.mxu0 %v11764_v14  ;;  %10431 = vmatprep.mubr.f32.mxu1 %v21835_v33 }
 0xa29   : > { %12253 = vmatmul.mubr.f32.gmra.mrb[134].mxu0 %v11763_v28  ;;  %v11767_v5 = vmax.f32 %v11583_v32, 0.0 }
 0xa2a   : > { %v11768_v56 = vmax.f32 %v11585_v21, 0.0  ;;  %v22267_v55 = vpop.f32.mrb[42].mxu1  ;;  %v11588_v53 = vpop.f32.mrb[74].mxu0 }
 0xa2b   : > { %v11589_v30 = vadd.f32 %v11588_v53, %v22220_v59  ;;  %v22270_v19 = vpop.f32.mrb[43].mxu1  ;;  %10432 = vmatmul.mubr.f32.gmra.mrb[148].mxu1 %v22021_v43  ;;  %v11590_v47 = vpop.f32.mrb[75].mxu0 }
 0xa2c   : > { %v11591_v52 = vadd.f32 %v11590_v47, %v22225_v23  ;;  %12257 = vmatprep.mubr.f32.mxu0 %v11768_v56  ;;  %10437 = vmatprep.mubr.f32.mxu1 %v21835_v33  ;;  %v23674_v56 = vsub.s32 1, %v22210_v24 }
 0xa2d   : > { %12258 = vmatmul.mubr.f32.gmra.mrb[136].mxu0 %v11767_v5  ;;  %v11771_v39 = vmax.f32 %v11589_v30, 0.0  ;;  %v9932_v30 = vld [vmem:[#allocation6] sm:$0xf] }
 0xa2e   : > { %v11772_v14 = vmax.f32 %v11591_v52, 0.0  ;;  %v22275_v28 = vpop.f32.mrb[44].mxu1  ;;  %v11594_v21 = vpop.f32.mrb[76].mxu0 }
 0xa2f   : > { %v11595_v32 = vadd.f32 %v11594_v21, %v22220_v59  ;;  %v22278_v54 = vpop.f32.mrb[45].mxu1  ;;  %10438 = vmatmul.mubr.f32.gmra.mrb[150].mxu1 %v22028_v3  ;;  %v11596_v53 = vpop.f32.mrb[77].mxu0 }
 0xa30   : > { %v11597_v20 = vadd.f32 %v11596_v53, %v22225_v23  ;;  %12262 = vmatprep.mubr.f32.mxu0 %v11772_v14  ;;  %10443 = vmatprep.mubr.f32.mxu1 %v21835_v33 }
 0xa31   : > { %12263 = vmatmul.mubr.f32.gmra.mrb[138].mxu0 %v11771_v39  ;;  %v11775_v40 = vmax.f32 %v11595_v32, 0.0  ;;  %v23678_v39 = vsub.s32 0, %v22210_v24 }
 0xa32   : > { %v11776_v52 = vmax.f32 %v11597_v20, 0.0  ;;  %v22284_v5 = vpop.f32.mrb[46].mxu1  ;;  %v11600_v47 = vpop.f32.mrb[78].mxu0  ;;  %v22295_v20 = vrot.slane %v9932_v30, %v23674_v56 }
 0xa33   : > { %v11601_v21 = vadd.f32 %v11600_v47, %v22220_v59  ;;  %v22287_v2 = vpop.f32.mrb[47].mxu1  ;;  %10444 = vmatmul.mubr.f32.gmra.mrb[152].mxu1 %v22035_v57  ;;  %v11602_v15 = vpop.f32.mrb[79].mxu0 }
 0xa34   : > { %v11603_v14 = vadd.f32 %v11602_v15, %v22225_v23  ;;  %12267 = vmatprep.mubr.f32.mxu0 %v11776_v52  ;;  %10449 = vmatprep.mubr.f32.mxu1 %v21835_v33 }
 0xa35   : > { %12268 = vmatmul.mubr.f32.gmra.mrb[140].mxu0 %v11775_v40  ;;  %v11779_v3 = vmax.f32 %v11601_v21, 0.0  ;;  %v22307_v40 = vrot.slane %v9932_v30, %v23678_v39  ;;  %v10023_v21 = vadd.f32 %v22230_v58, %v22295_v20  ;;  %v10629_v58 = vld [vmem:[%s23508_s9 + $0x108] sm:$0xff] }
 0xa36   : > { %v11780_v32 = vmax.f32 %v11603_v14, 0.0  ;;  %v22297_v53 = vpop.f32.mrb[48].mxu1  ;;  %v11606_v47 = vpop.f32.mrb[80].mxu0 }
 0xa37   : > { %v11607_v57 = vadd.f32 %v11606_v47, %v22220_v59  ;;  %v22300_v43 = vpop.f32.mrb[49].mxu1  ;;  %10450 = vmatmul.mubr.f32.gmra.mrb[154].mxu1 %v22042_v26  ;;  %v11608_v15 = vpop.f32.mrb[81].mxu0 }
 0xa38   : > { %v11609_v52 = vadd.f32 %v11608_v15, %v22225_v23  ;;  %12272 = vmatprep.mubr.f32.mxu0 %v11780_v32  ;;  %10455 = vmatprep.mubr.f32.mxu1 %v21835_v33 }
 0xa39   : > { %12273 = vmatmul.mubr.f32.gmra.mrb[142].mxu0 %v11779_v3  ;;  %v11783_v29 = vmax.f32 %v11607_v57, 0.0  ;;  %v10021_v3 = vadd.f32 %v22227_v1, %v22307_v40  ;;  %v10628_v57 = vld [vmem:[%s23508_s9 + $0x100] sm:$0xff] }
 0xa3a   : > { %v11784_v14 = vmax.f32 %v11609_v52, 0.0  ;;  %v22311_v47 = vpop.f32.mrb[50].mxu1  ;;  %v11612_v56 = vpop.f32.mrb[82].mxu0  ;;  %v17025_v17 = vpack.c.bf16 %v10629_v58, %v10628_v57 }
 0xa3b   : > { %v11613_v26 = vadd.f32 %v11612_v56, %v22220_v59  ;;  %v22314_v34 = vpop.f32.mrb[51].mxu1  ;;  %10456 = vmatmul.mubr.f32.gmra.mrb[156].mxu1 %v22049_v25  ;;  %v11614_v32 = vpop.f32.mrb[83].mxu0  ;;  %v10029_v56 = vadd.f32 %v22238_v45, %v22295_v20  ;;  %v10468_v11 = vmax.f32 %v10021_v3, 0.0  ;;  %v10027_v45 = vadd.f32 %v22235_v12, %v22307_v40  ;;  %v10631_v3 = vld [vmem:[%s23508_s9 + $0x118] sm:$0xff] }
 0xa3c   : > { %v11615_v15 = vadd.f32 %v11614_v32, %v22225_v23  ;;  %12277 = vmatprep.mubr.f32.mxu0 %v11784_v14  ;;  %10461 = vmatprep.mubr.f32.mxu1 %v21835_v33  ;;  %v10469_v33 = vmax.f32 %v10023_v21, 0.0 }
 0xa3d   : > { %12278 = vmatmul.mubr.f32.gmra.mrb[144].mxu0 %v11783_v29  ;;  %v11787_v32 = vmax.f32 %v11613_v26, 0.0  ;;  %v10035_v26 = vadd.f32 %v22246_v61, %v22295_v20  ;;  %v10473_v63 = vmax.f32 %v10029_v56, 0.0  ;;  %v10033_v56 = vadd.f32 %v22243_v50, %v22307_v40  ;;  %v10633_v50 = vld [vmem:[%s23508_s9 + $0x128] sm:$0xff] }
 0xa3e   : > { %v11788_v30 = vmax.f32 %v11615_v15, 0.0  ;;  %v22329_v52 = vpop.f32.mrb[52].mxu1  ;;  %v11618_v14 = vpop.f32.mrb[84].mxu0 }
 0xa3f   : > { %v22331_v39 = vpop.f32.mrb[53].mxu1  ;;  %10462 = vmatmul.mubr.f32.gmra.mrb[158].mxu1 %v22056_v9  ;;  %v11620_v29 = vpop.f32.mrb[85].mxu0  ;;  %v11619_v1 = vadd.f32 %v11618_v14, %v22220_v59  ;;  %v10630_v14 = vld [vmem:[%s23508_s9 + $0x110] sm:$0xff]  ;;  %v10477_v31 = vmax.f32 %v10035_v26, 0.0  ;;  %v10039_v26 = vadd.f32 %v22251_v8, %v22307_v40  ;;  %v10635_v8 = vld [vmem:[%s23508_s9 + $0x138] sm:$0xff] }
 0xa40   : > { %v11621_v25 = vadd.f32 %v11620_v29, %v22225_v23  ;;  %10731 = vmatprep.mubr.f32.mxu1 %v10469_v33  ;;  %12282 = vmatprep.mubr.f32.mxu0 %v11788_v30  ;;  %v10472_v30 = vmax.f32 %v10027_v45, 0.0  ;;  %v23948_v33 = vmov 0.0|0.0   ;;  %v10041_v29 = vadd.f32 %v22254_v49, %v22295_v20 }
 0xa41   : > { %12283 = vmatmul.mubr.f32.gmra.mrb[146].mxu0 %v11787_v32  ;;  %v11791_v58 = vmax.f32 %v11619_v1, 0.0  ;;  %v17028_v32 = vpack.c.bf16 %v10631_v3, %v10630_v14  ;;  %v10476_v3 = vmax.f32 %v10033_v56, 0.0 }
 0xa42   : > { %v11792_v21 = vmax.f32 %v11621_v25, 0.0  ;;  %v22340_v15 = vpop.f32.mrb[54].mxu1  ;;  %v11624_v9 = vpop.f32.mrb[86].mxu0  ;;  %v10481_v38 = vmax.f32 %v10041_v29, 0.0  ;;  %v10045_v29 = vadd.f32 %v22259_v42, %v22307_v40  ;;  %v10637_v42 = vld [vmem:[%s23508_s9 + $0x148] sm:$0xff] }
 0xa43   : > { %v22348_v57 = vpop.f32.mrb[55].mxu1  ;;  %10732 = vmatmul.mubr.f32.vlgmr.msra.gmra.mrb[160].mxu1 %v10468_v11  ;;  %v11626_v12 = vpop.f32.mrb[87].mxu0  ;;  %v11625_v61 = vadd.f32 %v11624_v9, %v22220_v59 }
 0xa44   : > { %v11627_v25 = vadd.f32 %v11626_v12, %v22225_v23  ;;  %10736 = vmatprep.mubr.f32.mxu1 %v10473_v63  ;;  %17026 = vmatpush1.bf16.msra.mxu1 %v17025_v17  ;;  %v10632_v63 = vld [vmem:[%s23508_s9 + $0x120] sm:$0xff] }
 0xa45   : > { %12287 = vmatprep.mubr.f32.mxu0 %v11792_v21  ;;  %17027 = vmatprep.subr.bf16.mxu1 %v23948_v33  ;;  %v11795_v21 = vmax.f32 %v11625_v61, 0.0  ;;  %v17031_v12 = vpack.c.bf16 %v10633_v50, %v10632_v63  ;;  %v10480_v63 = vmax.f32 %v10039_v26, 0.0 }
 0xa46   : > { %v11796_v11 = vmax.f32 %v11627_v25, 0.0  ;;  %12288 = vmatmul.mubr.f32.gmra.mrb[148].mxu0 %v11791_v58  ;;  %v22357_v1 = vpop.f32.mrb[56].mxu1  ;;  %v11630_v9 = vpop.f32.mrb[88].mxu0  ;;  %v10047_v58 = vadd.f32 %v22262_v0, %v22295_v20 }
 0xa47   : > { %v22365_v17 = vpop.f32.mrb[57].mxu1  ;;  %10737 = vmatmul.mubr.f32.gmra.mrb[162].mxu1 %v10472_v30  ;;  %v11632_v45 = vpop.f32.mrb[89].mxu0  ;;  %v11631_v49 = vadd.f32 %v11630_v9, %v22220_v59 }
 0xa48   : > { %v11633_v14 = vadd.f32 %v11632_v45, %v22225_v23  ;;  %10741 = vmatprep.mubr.f32.mxu1 %v10477_v31  ;;  %12292 = vmatprep.mubr.f32.mxu0 %v11796_v11  ;;  %v10634_v31 = vld [vmem:[%s23508_s9 + $0x130] sm:$0xff]  ;;  %v10053_v45 = vadd.f32 %v22270_v19, %v22295_v20 }
 0xa49   : > { %17029 = vmatpush1.bf16.msra.mxu1 %v17028_v32  ;;  %v11799_v32 = vmax.f32 %v11631_v49, 0.0  ;;  %v17034_v50 = vpack.c.bf16 %v10635_v8, %v10634_v31  ;;  %v10484_v31 = vmax.f32 %v10045_v29, 0.0 }
 0xa4a   : > { %v11800_v25 = vmax.f32 %v11633_v14, 0.0  ;;  %12293 = vmatmul.mubr.f32.gmra.mrb[150].mxu0 %v11795_v21  ;;  %v22373_v30 = vpop.f32.mrb[58].mxu1  ;;  %v11636_v61 = vpop.f32.mrb[90].mxu0  ;;  %17030 = vmatprep.subr.bf16.mxu1 %v23948_v33 }
 0xa4b   : > { %v22382_v56 = vpop.f32.mrb[59].mxu1  ;;  %10742 = vmatmul.mubr.f32.gmra.mrb[164].mxu1 %v10476_v3  ;;  %v11638_v0 = vpop.f32.mrb[91].mxu0  ;;  %v11637_v11 = vadd.f32 %v11636_v61, %v22220_v59  ;;  %v10485_v3 = vmax.f32 %v10047_v58, 0.0  ;;  %v10051_v58 = vadd.f32 %v22267_v55, %v22307_v40  ;;  %v10639_v55 = vld [vmem:[%s23508_s9 + $0x158] sm:$0xff] }
 0xa4c   : > { %v11639_v9 = vadd.f32 %v11638_v0, %v22225_v23  ;;  %10746 = vmatprep.mubr.f32.mxu1 %v10481_v38  ;;  %12297 = vmatprep.mubr.f32.mxu0 %v11800_v25  ;;  %v10636_v38 = vld [vmem:[%s23508_s9 + $0x140] sm:$0xff]  ;;  %v10059_v0 = vadd.f32 %v22278_v54, %v22295_v20 }
 0xa4d   : > { %17032 = vmatpush1.bf16.msra.mxu1 %v17031_v12  ;;  %v11803_v12 = vmax.f32 %v11637_v11, 0.0  ;;  %v17037_v8 = vpack.c.bf16 %v10637_v42, %v10636_v38  ;;  %v10488_v38 = vmax.f32 %v10051_v58, 0.0 }
 0xa4e   : > { %v11804_v21 = vmax.f32 %v11639_v9, 0.0  ;;  %12298 = vmatmul.mubr.f32.gmra.mrb[152].mxu0 %v11799_v32  ;;  %v22390_v14 = vpop.f32.mrb[60].mxu1  ;;  %v11642_v49 = vpop.f32.mrb[92].mxu0  ;;  %17033 = vmatprep.subr.bf16.mxu1 %v23948_v33 }
 0xa4f   : > { %v22399_v26 = vpop.f32.mrb[61].mxu1  ;;  %10747 = vmatmul.mubr.f32.gmra.mrb[166].mxu1 %v10480_v63  ;;  %v11644_v19 = vpop.f32.mrb[93].mxu0  ;;  %v11643_v25 = vadd.f32 %v11642_v49, %v22220_v59  ;;  %v10489_v63 = vmax.f32 %v10053_v45, 0.0  ;;  %v10057_v45 = vadd.f32 %v22275_v28, %v22307_v40  ;;  %v10641_v28 = vld [vmem:[%s23508_s9 + $0x168] sm:$0xff] }
 0xa50   : > { %v11645_v61 = vadd.f32 %v11644_v19, %v22225_v23  ;;  %10751 = vmatprep.mubr.f32.mxu1 %v10485_v3  ;;  %12302 = vmatprep.mubr.f32.mxu0 %v11804_v21  ;;  %v10638_v21 = vld [vmem:[%s23508_s9 + $0x150] sm:$0xff]  ;;  %v10065_v19 = vadd.f32 %v22287_v2, %v22295_v20 }
 0xa51   : > { %17035 = vmatpush1.bf16.msra.mxu1 %v17034_v50  ;;  %v11807_v50 = vmax.f32 %v11643_v25, 0.0  ;;  %v17040_v42 = vpack.c.bf16 %v10639_v55, %v10638_v21  ;;  %v10492_v21 = vmax.f32 %v10057_v45, 0.0 }
 0xa52   : > { %v11808_v32 = vmax.f32 %v11645_v61, 0.0  ;;  %12303 = vmatmul.mubr.f32.gmra.mrb[154].mxu0 %v11803_v12  ;;  %v22407_v9 = vpop.f32.mrb[62].mxu1  ;;  %v11648_v11 = vpop.f32.mrb[94].mxu0  ;;  %17036 = vmatprep.subr.bf16.mxu1 %v23948_v33 }
 0xa53   : > { %v22416_v29 = vpop.f32.mrb[63].mxu1  ;;  %10752 = vmatmul.mubr.f32.gmra.mrb[168].mxu1 %v10484_v31  ;;  %v11650_v54 = vpop.f32.mrb[95].mxu0  ;;  %v11649_v49 = vadd.f32 %v11648_v11, %v22220_v59  ;;  %v10493_v31 = vmax.f32 %v10059_v0, 0.0  ;;  %v10063_v0 = vadd.f32 %v22284_v5, %v22307_v40  ;;  %v10643_v5 = vld [vmem:[%s23508_s9 + $0x178] sm:$0xff] }
 0xa54   : > { %v11651_v3 = vadd.f32 %v11650_v54, %v22225_v23  ;;  %10756 = vmatprep.mubr.f32.mxu1 %v10489_v63  ;;  %12307 = vmatprep.mubr.f32.mxu0 %v11808_v32  ;;  %v10640_v32 = vld [vmem:[%s23508_s9 + $0x160] sm:$0xff]  ;;  %v10071_v54 = vadd.f32 %v22300_v43, %v22295_v20 }
 0xa55   : > { %17038 = vmatpush1.bf16.msra.mxu1 %v17037_v8  ;;  %v11811_v8 = vmax.f32 %v11649_v49, 0.0  ;;  %v17043_v55 = vpack.c.bf16 %v10641_v28, %v10640_v32  ;;  %v10496_v32 = vmax.f32 %v10063_v0, 0.0 }
 0xa56   : > { %v11812_v12 = vmax.f32 %v11651_v3, 0.0  ;;  %12308 = vmatmul.mubr.f32.gmra.mrb[156].mxu0 %v11807_v50  ;;  %v22424_v61 = vpop.f32.mrb[64].mxu1  ;;  %v11654_v25 = vpop.f32.mrb[96].mxu0  ;;  %17039 = vmatprep.subr.bf16.mxu1 %v23948_v33 }
 0xa57   : > { %v22433_v58 = vpop.f32.mrb[65].mxu1  ;;  %10757 = vmatmul.mubr.f32.gmra.mrb[170].mxu1 %v10488_v38  ;;  %v11656_v2 = vpop.f32.mrb[97].mxu0  ;;  %v11655_v11 = vadd.f32 %v11654_v25, %v22220_v59  ;;  %v10497_v38 = vmax.f32 %v10065_v19, 0.0  ;;  %v10069_v19 = vadd.f32 %v22297_v53, %v22307_v40  ;;  %v10645_v53 = vld [vmem:[%s23508_s9 + $0x188] sm:$0xff] }
 0xa58   : > { %v11657_v63 = vadd.f32 %v11656_v2, %v22225_v23  ;;  %10761 = vmatprep.mubr.f32.mxu1 %v10493_v31  ;;  %12312 = vmatprep.mubr.f32.mxu0 %v11812_v12  ;;  %v10642_v12 = vld [vmem:[%s23508_s9 + $0x170] sm:$0xff]  ;;  %v10077_v2 = vadd.f32 %v22314_v34, %v22295_v20 }
 0xa59   : > { %17041 = vmatpush1.bf16.msra.mxu1 %v17040_v42  ;;  %v11815_v42 = vmax.f32 %v11655_v11, 0.0  ;;  %v17046_v28 = vpack.c.bf16 %v10643_v5, %v10642_v12  ;;  %v10500_v12 = vmax.f32 %v10069_v19, 0.0 }
 0xa5a   : > { %v11816_v50 = vmax.f32 %v11657_v63, 0.0  ;;  %12313 = vmatmul.mubr.f32.gmra.mrb[158].mxu0 %v11811_v8  ;;  %v22441_v3 = vpop.f32.mrb[66].mxu1  ;;  %v11660_v49 = vpop.f32.mrb[98].mxu0  ;;  %17042 = vmatprep.subr.bf16.mxu1 %v23948_v33 }
 0xa5b   : > { %v22450_v45 = vpop.f32.mrb[67].mxu1  ;;  %10762 = vmatmul.mubr.f32.gmra.mrb[172].mxu1 %v10492_v21  ;;  %v11662_v43 = vpop.f32.mrb[99].mxu0  ;;  %v11661_v25 = vadd.f32 %v11660_v49, %v22220_v59  ;;  %v10501_v21 = vmax.f32 %v10071_v54, 0.0  ;;  %v10075_v54 = vadd.f32 %v22311_v47, %v22307_v40  ;;  %v10647_v47 = vld [vmem:[%s23508_s9 + $0x198] sm:$0xff] }
 0xa5c   : > { %v11663_v31 = vadd.f32 %v11662_v43, %v22225_v23  ;;  %10766 = vmatprep.mubr.f32.mxu1 %v10497_v38  ;;  %12317 = vmatprep.mubr.f32.mxu0 %v11816_v50  ;;  %v10644_v50 = vld [vmem:[%s23508_s9 + $0x180] sm:$0xff]  ;;  %v10083_v43 = vadd.f32 %v22331_v39, %v22295_v20 }
 0xa5d   : > { %17044 = vmatpush1.bf16.msra.mxu1 %v17043_v55  ;;  %v11819_v55 = vmax.f32 %v11661_v25, 0.0  ;;  %v17049_v5 = vpack.c.bf16 %v10645_v53, %v10644_v50  ;;  %v10504_v50 = vmax.f32 %v10075_v54, 0.0 }
 0xa5e   : > { %v11820_v8 = vmax.f32 %v11663_v31, 0.0  ;;  %12318 = vmatmul.mubr.f32.gmra.mrb[160].mxu0 %v11815_v42  ;;  %v22458_v63 = vpop.f32.mrb[68].mxu1  ;;  %v11666_v11 = vpop.f32.mrb[100].mxu0  ;;  %17045 = vmatprep.subr.bf16.mxu1 %v23948_v33 }
 0xa5f   : > { %v22467_v0 = vpop.f32.mrb[69].mxu1  ;;  %10767 = vmatmul.mubr.f32.gmra.mrb[174].mxu1 %v10496_v32  ;;  %v11668_v34 = vpop.f32.mrb[101].mxu0  ;;  %v11667_v49 = vadd.f32 %v11666_v11, %v22220_v59  ;;  %v10505_v32 = vmax.f32 %v10077_v2, 0.0  ;;  %v10081_v2 = vadd.f32 %v22329_v52, %v22307_v40  ;;  %v10649_v52 = vld [vmem:[%s23508_s9 + $0x1a8] sm:$0xff] }
 0xa60   : > { %v11669_v38 = vadd.f32 %v11668_v34, %v22225_v23  ;;  %10771 = vmatprep.mubr.f32.mxu1 %v10501_v21  ;;  %12322 = vmatprep.mubr.f32.mxu0 %v11820_v8  ;;  %v10646_v8 = vld [vmem:[%s23508_s9 + $0x190] sm:$0xff]  ;;  %v10089_v34 = vadd.f32 %v22348_v57, %v22295_v20 }
 0xa61   : > { %17047 = vmatpush1.bf16.msra.mxu1 %v17046_v28  ;;  %v11823_v28 = vmax.f32 %v11667_v49, 0.0  ;;  %v17052_v53 = vpack.c.bf16 %v10647_v47, %v10646_v8  ;;  %v10508_v8 = vmax.f32 %v10081_v2, 0.0 }
 0xa62   : > { %v11824_v42 = vmax.f32 %v11669_v38, 0.0  ;;  %12323 = vmatmul.mubr.f32.gmra.mrb[162].mxu0 %v11819_v55  ;;  %v22475_v31 = vpop.f32.mrb[70].mxu1  ;;  %v11672_v25 = vpop.f32.mrb[102].mxu0  ;;  %17048 = vmatprep.subr.bf16.mxu1 %v23948_v33 }
 0xa63   : > { %v22484_v19 = vpop.f32.mrb[71].mxu1  ;;  %10772 = vmatmul.mubr.f32.gmra.mrb[176].mxu1 %v10500_v12  ;;  %v11674_v39 = vpop.f32.mrb[103].mxu0  ;;  %v11673_v11 = vadd.f32 %v11672_v25, %v22220_v59  ;;  %v10509_v12 = vmax.f32 %v10083_v43, 0.0  ;;  %v10087_v43 = vadd.f32 %v22340_v15, %v22307_v40  ;;  %v10651_v15 = vld [vmem:[%s23508_s9 + $0x1b8] sm:$0xff] }
 0xa64   : > { %v11675_v21 = vadd.f32 %v11674_v39, %v22225_v23  ;;  %10776 = vmatprep.mubr.f32.mxu1 %v10505_v32  ;;  %12327 = vmatprep.mubr.f32.mxu0 %v11824_v42  ;;  %v10648_v42 = vld [vmem:[%s23508_s9 + $0x1a0] sm:$0xff]  ;;  %v10095_v39 = vadd.f32 %v22365_v17, %v22295_v20 }
 0xa65   : > { %17050 = vmatpush1.bf16.msra.mxu1 %v17049_v5  ;;  %v11827_v5 = vmax.f32 %v11673_v11, 0.0  ;;  %v17055_v47 = vpack.c.bf16 %v10649_v52, %v10648_v42  ;;  %v10512_v42 = vmax.f32 %v10087_v43, 0.0 }
 0xa66   : > { %v11828_v55 = vmax.f32 %v11675_v21, 0.0  ;;  %12328 = vmatmul.mubr.f32.gmra.mrb[164].mxu0 %v11823_v28  ;;  %v22492_v38 = vpop.f32.mrb[72].mxu1  ;;  %v11678_v49 = vpop.f32.mrb[104].mxu0  ;;  %17051 = vmatprep.subr.bf16.mxu1 %v23948_v33 }
 0xa67   : > { %v22501_v54 = vpop.f32.mrb[73].mxu1  ;;  %10777 = vmatmul.mubr.f32.gmra.mrb[178].mxu1 %v10504_v50  ;;  %v11680_v57 = vpop.f32.mrb[105].mxu0  ;;  %v11679_v25 = vadd.f32 %v11678_v49, %v22220_v59  ;;  %v10513_v50 = vmax.f32 %v10089_v34, 0.0  ;;  %v10093_v34 = vadd.f32 %v22357_v1, %v22307_v40  ;;  %v10653_v1 = vld [vmem:[%s23508_s9 + $0x1c8] sm:$0xff] }
 0xa68   : > { %v11681_v32 = vadd.f32 %v11680_v57, %v22225_v23  ;;  %10781 = vmatprep.mubr.f32.mxu1 %v10509_v12  ;;  %12332 = vmatprep.mubr.f32.mxu0 %v11828_v55  ;;  %v10650_v55 = vld [vmem:[%s23508_s9 + $0x1b0] sm:$0xff]  ;;  %v10101_v57 = vadd.f32 %v22382_v56, %v22295_v20 }
 0xa69   : > { %17053 = vmatpush1.bf16.msra.mxu1 %v17052_v53  ;;  %v11831_v53 = vmax.f32 %v11679_v25, 0.0  ;;  %v17058_v52 = vpack.c.bf16 %v10651_v15, %v10650_v55  ;;  %v10516_v55 = vmax.f32 %v10093_v34, 0.0 }
 0xa6a   : > { %v11832_v28 = vmax.f32 %v11681_v32, 0.0  ;;  %12333 = vmatmul.mubr.f32.gmra.mrb[166].mxu0 %v11827_v5  ;;  %v22509_v21 = vpop.f32.mrb[74].mxu1  ;;  %v11684_v11 = vpop.f32.mrb[106].mxu0  ;;  %17054 = vmatprep.subr.bf16.mxu1 %v23948_v33 }
 0xa6b   : > { %v22518_v2 = vpop.f32.mrb[75].mxu1  ;;  %10782 = vmatmul.mubr.f32.gmra.mrb[180].mxu1 %v10508_v8  ;;  %v11686_v17 = vpop.f32.mrb[107].mxu0  ;;  %v11685_v49 = vadd.f32 %v11684_v11, %v22220_v59  ;;  %v10517_v8 = vmax.f32 %v10095_v39, 0.0  ;;  %v10099_v39 = vadd.f32 %v22373_v30, %v22307_v40  ;;  %v10655_v30 = vld [vmem:[%s23508_s9 + $0x1d8] sm:$0xff] }
 0xa6c   : > { %v11687_v12 = vadd.f32 %v11686_v17, %v22225_v23  ;;  %10786 = vmatprep.mubr.f32.mxu1 %v10513_v50  ;;  %12337 = vmatprep.mubr.f32.mxu0 %v11832_v28  ;;  %v10652_v28 = vld [vmem:[%s23508_s9 + $0x1c0] sm:$0xff]  ;;  %v10107_v17 = vadd.f32 %v22399_v26, %v22295_v20 }
 0xa6d   : > { %17056 = vmatpush1.bf16.msra.mxu1 %v17055_v47  ;;  %v11835_v47 = vmax.f32 %v11685_v49, 0.0  ;;  %v17061_v15 = vpack.c.bf16 %v10653_v1, %v10652_v28  ;;  %v10520_v28 = vmax.f32 %v10099_v39, 0.0 }
 0xa6e   : > { %v11836_v5 = vmax.f32 %v11687_v12, 0.0  ;;  %12338 = vmatmul.mubr.f32.gmra.mrb[168].mxu0 %v11831_v53  ;;  %v22526_v32 = vpop.f32.mrb[76].mxu1  ;;  %v11690_v25 = vpop.f32.mrb[108].mxu0  ;;  %17057 = vmatprep.subr.bf16.mxu1 %v23948_v33 }
 0xa6f   : > { %v22535_v43 = vpop.f32.mrb[77].mxu1  ;;  %10787 = vmatmul.mubr.f32.gmra.mrb[182].mxu1 %v10512_v42  ;;  %v11692_v56 = vpop.f32.mrb[109].mxu0  ;;  %v11691_v11 = vadd.f32 %v11690_v25, %v22220_v59  ;;  %v10521_v42 = vmax.f32 %v10101_v57, 0.0  ;;  %v10105_v57 = vadd.f32 %v22390_v14, %v22307_v40  ;;  %v10657_v14 = vld [vmem:[%s23508_s9 + $0x1e8] sm:$0xff] }
 0xa70   : > { %v11693_v50 = vadd.f32 %v11692_v56, %v22225_v23  ;;  %10791 = vmatprep.mubr.f32.mxu1 %v10517_v8  ;;  %12342 = vmatprep.mubr.f32.mxu0 %v11836_v5  ;;  %v10654_v5 = vld [vmem:[%s23508_s9 + $0x1d0] sm:$0xff]  ;;  %v10113_v56 = vadd.f32 %v22416_v29, %v22295_v20 }
 0xa71   : > { %17059 = vmatpush1.bf16.msra.mxu1 %v17058_v52  ;;  %v11839_v52 = vmax.f32 %v11691_v11, 0.0  ;;  %v17064_v1 = vpack.c.bf16 %v10655_v30, %v10654_v5  ;;  %v10524_v5 = vmax.f32 %v10105_v57, 0.0 }
 0xa72   : > { %v11840_v53 = vmax.f32 %v11693_v50, 0.0  ;;  %12343 = vmatmul.mubr.f32.gmra.mrb[170].mxu0 %v11835_v47  ;;  %v22543_v12 = vpop.f32.mrb[78].mxu1  ;;  %v11696_v49 = vpop.f32.mrb[110].mxu0  ;;  %17060 = vmatprep.subr.bf16.mxu1 %v23948_v33 }
 0xa73   : > { %v22552_v34 = vpop.f32.mrb[79].mxu1  ;;  %10792 = vmatmul.mubr.f32.gmra.mrb[184].mxu1 %v10516_v55  ;;  %v11698_v26 = vpop.f32.mrb[111].mxu0  ;;  %v11697_v25 = vadd.f32 %v11696_v49, %v22220_v59  ;;  %v10525_v55 = vmax.f32 %v10107_v17, 0.0  ;;  %v10111_v17 = vadd.f32 %v22407_v9, %v22307_v40  ;;  %v10659_v9 = vld [vmem:[%s23508_s9 + $0x1f8] sm:$0xff] }
 0xa74   : > { %v11699_v8 = vadd.f32 %v11698_v26, %v22225_v23  ;;  %10796 = vmatprep.mubr.f32.mxu1 %v10521_v42  ;;  %12347 = vmatprep.mubr.f32.mxu0 %v11840_v53  ;;  %v10656_v53 = vld [vmem:[%s23508_s9 + $0x1e0] sm:$0xff]  ;;  %v10119_v26 = vadd.f32 %v22433_v58, %v22295_v20 }
 0xa75   : > { %17062 = vmatpush1.bf16.msra.mxu1 %v17061_v15  ;;  %v11843_v15 = vmax.f32 %v11697_v25, 0.0  ;;  %v17067_v30 = vpack.c.bf16 %v10657_v14, %v10656_v53  ;;  %v10117_v14 = vadd.f32 %v22424_v61, %v22307_v40 }
 0xa76   : > { %v11844_v47 = vmax.f32 %v11699_v8, 0.0  ;;  %12348 = vmatmul.mubr.f32.gmra.mrb[172].mxu0 %v11839_v52  ;;  %v22560_v50 = vpop.f32.mrb[80].mxu1  ;;  %v11702_v11 = vpop.f32.mrb[112].mxu0  ;;  %17063 = vmatprep.subr.bf16.mxu1 %v23948_v33  ;;  %v10533_v37 = vmax.f32 %v10119_v26, 0.0  ;;  %v10131_v26 = vadd.f32 %v22467_v0, %v22295_v20 }
 0xa77   : > { %v22569_v39 = vpop.f32.mrb[81].mxu1  ;;  %10797 = vmatmul.mubr.f32.gmra.mrb[186].mxu1 %v10520_v28  ;;  %v11704_v29 = vpop.f32.mrb[113].mxu0  ;;  %v11703_v49 = vadd.f32 %v11702_v11, %v22220_v59  ;;  %v10529_v28 = vmax.f32 %v10113_v56, 0.0  ;;  %v11154_v11 = vld [vmem:[#allocation8 + $0x28] sm:$0xff] }
 0xa78   : > { %v11705_v42 = vadd.f32 %v11704_v29, %v22225_v23  ;;  %10801 = vmatprep.mubr.f32.mxu1 %v10525_v55  ;;  %12352 = vmatprep.mubr.f32.mxu0 %v11844_v47  ;;  %v10658_v47 = vld [vmem:[%s23508_s9 + $0x1f0] sm:$0xff]  ;;  %v10528_v29 = vmax.f32 %v10111_v17, 0.0 }
 0xa79   : > { %17065 = vmatpush1.bf16.msra.mxu1 %v17064_v1  ;;  %v11150_v1 = vld [vmem:[#allocation8 + $0x8] sm:$0xff]  ;;  %v11847_v55 = vmax.f32 %v11703_v49, 0.0 }
 0xa7a   : > { %v11848_v52 = vmax.f32 %v11705_v42, 0.0  ;;  %12353 = vmatmul.mubr.f32.gmra.mrb[174].mxu0 %v11843_v15  ;;  %v22577_v8 = vpop.f32.mrb[82].mxu1  ;;  %v11708_v25 = vpop.f32.mrb[114].mxu0  ;;  %17066 = vmatprep.subr.bf16.mxu1 %v23948_v33  ;;  %v17070_v15 = vpack.c.bf16 %v10659_v9, %v10658_v47  ;;  %v10125_v42 = vadd.f32 %v22450_v45, %v22295_v20  ;;  %v10123_v45 = vadd.f32 %v22441_v3, %v22307_v40 }
 0xa7b   : > { %v22586_v57 = vpop.f32.mrb[83].mxu1  ;;  %10802 = vmatmul.mubr.f32.gmra.mrb[188].mxu1 %v10524_v5  ;;  %v11710_v58 = vpop.f32.mrb[115].mxu0  ;;  %v11709_v53 = vadd.f32 %v11708_v25, %v22220_v59  ;;  %v17072_v25 = vpack.c.bf16 %v11154_v11, %v11150_v1  ;;  %v10532_v47 = vmax.f32 %v10117_v14, 0.0  ;;  %v10129_v3 = vadd.f32 %v22458_v63, %v22307_v40 }
 0xa7c   : > { %v11711_v56 = vadd.f32 %v11710_v58, %v22225_v23  ;;  %10806 = vmatprep.mubr.f32.mxu1 %v10529_v28  ;;  %12357 = vmatprep.mubr.f32.mxu0 %v11848_v52  ;;  %v10537_v11 = vmax.f32 %v10125_v42, 0.0  ;;  %v10536_v0 = vmax.f32 %v10123_v45, 0.0  ;;  %v10141_v45 = vadd.f32 %v22492_v38, %v22307_v40 }
 0xa7d   : > { %17068 = vmatpush1.bf16.msra.mxu1 %v17067_v30  ;;  %v11851_v61 = vmax.f32 %v11709_v53, 0.0  ;;  %v10540_v63 = vmax.f32 %v10129_v3, 0.0  ;;  %v10147_v3 = vadd.f32 %v22509_v21, %v22307_v40  ;;  %v10155_v38 = vadd.f32 %v22535_v43, %v22295_v20 }
 0xa7e   : > { %v11852_v5 = vmax.f32 %v11711_v56, 0.0  ;;  %12358 = vmatmul.mubr.f32.gmra.mrb[176].mxu0 %v11847_v55  ;;  %v22594_v41 = vpop.f32.mrb[84].mxu1  ;;  %v11714_v49 = vpop.f32.mrb[116].mxu0  ;;  %17069 = vmatprep.subr.bf16.mxu1 %v23948_v33  ;;  %v10137_v56 = vadd.f32 %v22484_v19, %v22295_v20  ;;  %v10161_v21 = vadd.f32 %v22552_v34, %v22295_v20  ;;  %v10165_v34 = vadd.f32 %v22560_v50, %v22307_v40 }
 0xa7f   : > { %v22597_v28 = vpop.f32.mrb[85].mxu1  ;;  %10807 = vmatmul.mubr.f32.gmra.mrb[190].mxu1 %v10528_v29  ;;  %v11716_v52 = vpop.f32.mrb[117].mxu0  ;;  %v11715_v17 = vadd.f32 %v11714_v49, %v22220_v59  ;;  %v10135_v49 = vadd.f32 %v22475_v31, %v22307_v40  ;;  %v10149_v31 = vadd.f32 %v22518_v2, %v22295_v20  ;;  %v10557_v43 = vmax.f32 %v10155_v38, 0.0 }
 0xa80   : > { %v11717_v30 = vadd.f32 %v11716_v52, %v22225_v23  ;;  %10811 = vmatprep.mubr.f32.mxu1 %v10533_v37  ;;  %12362 = vmatprep.mubr.f32.mxu0 %v11852_v5 }
 0xa81   : > { %17071 = vmatpush1.bf16.msra.mxu1 %v17070_v15  ;;  %v11855_v53 = vmax.f32 %v11715_v17, 0.0  ;;  %v10541_v15 = vmax.f32 %v10131_v26, 0.0 }
 0xa82   : > { %v11856_v9 = vmax.f32 %v11717_v30, 0.0  ;;  %12363 = vmatmul.mubr.f32.gmra.mrb[178].mxu0 %v11851_v61  ;;  %v22605_v58 = vpop.f32.mrb[86].mxu1  ;;  %v22607_v1 = vpop.f32.mrb[118].mxu0  ;;  %17073 = vmatprep.subr.bf16.mxu1 %v17072_v25  ;;  %v10143_v25 = vadd.f32 %v22501_v54, %v22295_v20  ;;  %v10545_v61 = vmax.f32 %v10137_v56, 0.0 }
 0xa83   : > { %23949 = vst [vmem:[#allocation46_spill] sm:$0xff] %v22607_v1  ;;  %v22609_v55 = vpop.f32.mrb[87].mxu1  ;;  %10812 = vmatmul.mubr.f32.gmra.mrb[192].mxu1 %v10532_v47  ;;  %v22611_v37 = vpop.f32.mrb[119].mxu0  ;;  %v10544_v47 = vmax.f32 %v10135_v49, 0.0  ;;  %v11178_v1 = vld [vmem:[#allocation8 + $0xe8] sm:$0xff] }
 0xa84   : > { %10816 = vmatprep.mubr.f32.mxu1 %v10537_v11  ;;  %12367 = vmatprep.mubr.f32.mxu0 %v11856_v9  ;;  %v10549_v9 = vmax.f32 %v10143_v25, 0.0  ;;  %v10153_v25 = vadd.f32 %v22526_v32, %v22307_v40  ;;  %v10561_v32 = vmax.f32 %v10161_v21, 0.0  ;;  %v10564_v21 = vmax.f32 %v10165_v34, 0.0 }
 0xa86   : > { %12368 = vmatmul.mubr.f32.gmra.mrb[180].mxu0 %v11855_v53  ;;  %v22617_v14 = vpop.f32.mrb[88].mxu1  ;;  %v22619_v29 = vpop.f32.mrb[120].mxu0 }
 0xa87   : > { %23950 = vst [vmem:[#allocation47_spill] sm:$0xff] %v22619_v29  ;;  %v22621_v42 = vpop.f32.mrb[89].mxu1  ;;  %10817 = vmatmul.mubr.f32.gmra.mrb[194].mxu1 %v10536_v0  ;;  %v22623_v5 = vpop.f32.mrb[121].mxu0  ;;  %v10548_v0 = vmax.f32 %v10141_v45, 0.0  ;;  %v11170_v29 = vld [vmem:[#allocation8 + $0xa8] sm:$0xff] }
 0xa88   : > { %23951 = vst [vmem:[#allocation48_spill] sm:$0xff] %v22623_v5  ;;  %10821 = vmatprep.mubr.f32.mxu1 %v10541_v15  ;;  %v10553_v15 = vmax.f32 %v10149_v31, 0.0  ;;  %v10159_v31 = vadd.f32 %v22543_v12, %v22307_v40 }
 0xa8a   : > { %v22629_v19 = vpop.f32.mrb[90].mxu1  ;;  %v22631_v52 = vpop.f32.mrb[122].mxu0  ;;  %v10560_v38 = vmax.f32 %v10159_v31, 0.0 }
 0xa8b   : > { %23952 = vst [vmem:[#allocation49_spill] sm:$0xff] %v22631_v52  ;;  %v22633_v17 = vpop.f32.mrb[91].mxu1  ;;  %10822 = vmatmul.mubr.f32.gmra.mrb[196].mxu1 %v10540_v63  ;;  %v22635_v30 = vpop.f32.mrb[123].mxu0 }
 0xa8c   : > { %23953 = vst [vmem:[#allocation50_spill] sm:$0xff] %v22635_v30  ;;  %10826 = vmatprep.mubr.f32.mxu1 %v10545_v61  ;;  %v10552_v61 = vmax.f32 %v10147_v3, 0.0  ;;  %v11166_v30 = vld [vmem:[#allocation8 + $0x88] sm:$0xff] }
 0xa8e   : > { %v22641_v26 = vpop.f32.mrb[92].mxu1  ;;  %v22643_v54 = vpop.f32.mrb[124].mxu0 }
 0xa8f   : > { %23954 = vst [vmem:[#allocation51_spill] sm:$0xff] %v22643_v54  ;;  %v22645_v11 = vpop.f32.mrb[93].mxu1  ;;  %10827 = vmatmul.mubr.f32.gmra.mrb[198].mxu1 %v10544_v47  ;;  %v22647_v53 = vpop.f32.mrb[125].mxu0 }
 0xa90   : > { %23955 = vst [vmem:[#allocation52_spill] sm:$0xff] %v22647_v53  ;;  %10831 = vmatprep.mubr.f32.mxu1 %v10549_v9  ;;  %v10556_v9 = vmax.f32 %v10153_v25, 0.0  ;;  %v11161_v53 = vld [vmem:[#allocation8 + $0x60] sm:$0xff] }
 0xa92   : > { %v22653_v56 = vpop.f32.mrb[94].mxu1  ;;  %v22655_v2 = vpop.f32.mrb[126].mxu0 }
 0xa93   : > { %23956 = vst [vmem:[#allocation53_spill] sm:$0xff] %v22655_v2  ;;  %v22657_v49 = vpop.f32.mrb[95].mxu1  ;;  %10832 = vmatmul.mubr.f32.gmra.mrb[200].mxu1 %v10548_v0  ;;  %v22659_v63 = vpop.f32.mrb[127].mxu0  ;;  %v10167_v0 = vadd.f32 %v22569_v39, %v22295_v20  ;;  %v10171_v39 = vadd.f32 %v22577_v8, %v22307_v40  ;;  %v10185_v8 = vadd.f32 %v22609_v55, %v22295_v20 }
 0xa94   : > { %23957 = vst [vmem:[#allocation54_spill] sm:$0xff] %v22659_v63  ;;  %10836 = vmatprep.mubr.f32.mxu1 %v10553_v15  ;;  %v10189_v55 = vadd.f32 %v22617_v14, %v22307_v40  ;;  %v10203_v14 = vadd.f32 %v22645_v11, %v22295_v20 }
 0xa95   : > { %v10565_v12 = vmax.f32 %v10167_v0, 0.0  ;;  %v10568_v0 = vmax.f32 %v10171_v39, 0.0 }
 0xa96   : > { %v22665_v45 = vpop.f32.mrb[96].mxu1  ;;  %v10589_v2 = vmax.f32 %v10203_v14, 0.0 }
 0xa97   : > { %v22667_v47 = vpop.f32.mrb[97].mxu1  ;;  %10837 = vmatmul.mubr.f32.gmra.mrb[202].mxu1 %v10552_v61  ;;  %v10173_v61 = vadd.f32 %v22586_v57, %v22295_v20  ;;  %v10177_v57 = vadd.f32 %v22594_v41, %v22307_v40  ;;  %v10191_v41 = vadd.f32 %v22621_v42, %v22295_v20  ;;  %v10195_v42 = vadd.f32 %v22629_v19, %v22307_v40 }
 0xa98   : > { %10841 = vmatprep.mubr.f32.mxu1 %v10557_v43 }
 0xa99   : > { %v10569_v50 = vmax.f32 %v10173_v61, 0.0  ;;  %v10183_v61 = vadd.f32 %v22605_v58, %v22307_v40  ;;  %v10197_v58 = vadd.f32 %v22633_v17, %v22295_v20  ;;  %v10201_v17 = vadd.f32 %v22641_v26, %v22307_v40 }
 0xa9a   : > { %v22673_v15 = vpop.f32.mrb[98].mxu1 }
 0xa9b   : > { %v22675_v3 = vpop.f32.mrb[99].mxu1  ;;  %10842 = vmatmul.mubr.f32.gmra.mrb[204].mxu1 %v10556_v9  ;;  %v10179_v9 = vadd.f32 %v22597_v28, %v22295_v20  ;;  %v10572_v28 = vmax.f32 %v10177_v57, 0.0  ;;  %v10581_v57 = vmax.f32 %v10191_v41, 0.0  ;;  %v10584_v41 = vmax.f32 %v10195_v42, 0.0 }
 0xa9c   : > { %10846 = vmatprep.mubr.f32.mxu1 %v10561_v32  ;;  %v10588_v26 = vmax.f32 %v10201_v17, 0.0 }
 0xa9e   : > { %v22681_v43 = vpop.f32.mrb[100].mxu1 }
 0xa9f   : > { %v22683_v25 = vpop.f32.mrb[101].mxu1  ;;  %10847 = vmatmul.mubr.f32.gmra.mrb[206].mxu1 %v10560_v38 }
 0xaa0   : > { %10851 = vmatprep.mubr.f32.mxu1 %v10565_v12  ;;  %v10573_v12 = vmax.f32 %v10179_v9, 0.0  ;;  %v10576_v9 = vmax.f32 %v10183_v61, 0.0  ;;  %v10585_v61 = vmax.f32 %v10197_v58, 0.0  ;;  %v10209_v58 = vadd.f32 %v22657_v49, %v22295_v20  ;;  %v11149_v49 = vld [vmem:[#allocation8] sm:$0xff] }
 0xaa2   : > { %v22689_v32 = vpop.f32.mrb[102].mxu1  ;;  %v10593_v14 = vmax.f32 %v10209_v58, 0.0 }
 0xaa3   : > { %v22691_v31 = vpop.f32.mrb[103].mxu1  ;;  %10852 = vmatmul.mubr.f32.gmra.mrb[208].mxu1 %v10564_v21 }
 0xaa4   : > { %10856 = vmatprep.mubr.f32.mxu1 %v10569_v50  ;;  %v10577_v50 = vmax.f32 %v10185_v8, 0.0  ;;  %v10580_v8 = vmax.f32 %v10189_v55, 0.0  ;;  %v23958_v55 = vsub.s32 3, %v22210_v24 }
 0xaa6   : > { %v22695_v38 = vpop.f32.mrb[104].mxu1 }
 0xaa7   : > { %v22699_v34 = vpop.f32.mrb[105].mxu1  ;;  %10857 = vmatmul.mubr.f32.gmra.mrb[210].mxu1 %v10568_v0 }
 0xaa8   : > { %10861 = vmatprep.mubr.f32.mxu1 %v10573_v12 }
 0xaaa   : > { %v22703_v21 = vpop.f32.mrb[106].mxu1 }
 0xaab   : > { %v22707_v39 = vpop.f32.mrb[107].mxu1  ;;  %10862 = vmatmul.mubr.f32.gmra.mrb[212].mxu1 %v10572_v28 }
 0xaac   : > { %10866 = vmatprep.mubr.f32.mxu1 %v10577_v50 }
 0xaae   : > { %v22711_v0 = vpop.f32.mrb[108].mxu1 }
 0xaaf   : > { %v22715_v12 = vpop.f32.mrb[109].mxu1  ;;  %10867 = vmatmul.mubr.f32.gmra.mrb[214].mxu1 %v10576_v9  ;;  %v18256_v9 = vld [vmem:[#allocation6] sm:$0xf] }
 0xab0   : > { %10871 = vmatprep.mubr.f32.mxu1 %v10581_v57  ;;  %v22729_v57 = vrot.slane %v18256_v9, %v23958_v55 }
 0xab2   : > { %v22719_v28 = vpop.f32.mrb[110].mxu1  ;;  %v10280_v55 = vadd.f32 %v22667_v47, %v22729_v57  ;;  %v11158_v47 = vld [vmem:[#allocation8 + $0x48] sm:$0xff] }
 0xab3   : > { %v22723_v50 = vpop.f32.mrb[111].mxu1  ;;  %10872 = vmatmul.mubr.f32.gmra.mrb[216].mxu1 %v10580_v8  ;;  %v23959_v8 = vsub.s32 2, %v22210_v24 }
 0xab4   : > { %10876 = vmatprep.mubr.f32.mxu1 %v10585_v61  ;;  %v10207_v61 = vadd.f32 %v22653_v56, %v22307_v40  ;;  %v10471_v17 = vmax.f32 %v10280_v55, 0.0  ;;  %v10286_v40 = vadd.f32 %v22675_v3, %v22729_v57  ;;  %v10292_v3 = vadd.f32 %v22683_v25, %v22729_v57 }
 0xab5   : > { %v22739_v42 = vrot.slane %v18256_v9, %v23959_v8  ;;  %v11162_v9 = vld [vmem:[#allocation8 + $0x68] sm:$0xff]  ;;  %v10298_v25 = vadd.f32 %v22691_v31, %v22729_v57  ;;  %v10304_v31 = vadd.f32 %v22699_v34, %v22729_v57  ;;  %v10310_v34 = vadd.f32 %v22707_v39, %v22729_v57 }
 0xab6   : > { %v22731_v19 = vpop.f32.mrb[112].mxu1  ;;  %v10475_v55 = vmax.f32 %v10286_v40, 0.0  ;;  %v10479_v40 = vmax.f32 %v10292_v3, 0.0  ;;  %v11186_v3 = vld [vmem:[#allocation8 + $0x128] sm:$0xff]  ;;  %v10316_v39 = vadd.f32 %v22715_v12, %v22729_v57  ;;  %v10322_v12 = vadd.f32 %v22723_v50, %v22729_v57 }
 0xab7   : > { %v22735_v11 = vpop.f32.mrb[113].mxu1  ;;  %10877 = vmatmul.mubr.f32.gmra.mrb[218].mxu1 %v10584_v41  ;;  %v10278_v20 = vadd.f32 %v22665_v45, %v22739_v42  ;;  %v11153_v41 = vld [vmem:[#allocation8 + $0x20] sm:$0xff]  ;;  %v10284_v45 = vadd.f32 %v22673_v15, %v22739_v42  ;;  %v10290_v15 = vadd.f32 %v22681_v43, %v22739_v42 }
 0xab8   : > { %10881 = vmatprep.mubr.f32.mxu1 %v10589_v2  ;;  %v10592_v2 = vmax.f32 %v10207_v61, 0.0  ;;  %v17074_v58 = vpack.c.bf16 %v11153_v41, %v11149_v49  ;;  %v17076_v61 = vpack.c.bf16 %v11162_v9, %v11158_v47  ;;  %v17080_v49 = vpack.c.bf16 %v11170_v29, %v11166_v30  ;;  %v11165_v41 = vld [vmem:[#allocation8 + $0x80] sm:$0xff]  ;;  %v11174_v9 = vld [vmem:[#allocation8 + $0xc8] sm:$0xff] }
 0xab9   : > { %v10296_v29 = vadd.f32 %v22689_v32, %v22739_v42  ;;  %v17084_v30 = vpack.c.bf16 %v11178_v1, %v11174_v9  ;;  %v11173_v43 = vld [vmem:[#allocation8 + $0xc0] sm:$0xff]  ;;  %v10302_v1 = vadd.f32 %v22695_v38, %v22739_v42  ;;  %v11194_v9 = vld [vmem:[#allocation8 + $0x168] sm:$0xff]  ;;  %v10308_v38 = vadd.f32 %v22703_v21, %v22739_v42 }
 0xaba   : > { %v22745_v63 = vpop.f32.mrb[114].mxu1  ;;  %v10314_v21 = vadd.f32 %v22711_v0, %v22739_v42  ;;  %v10320_v0 = vadd.f32 %v22719_v28, %v22739_v42  ;;  %v10328_v50 = vadd.f32 %v22735_v11, %v22729_v57  ;;  %v10326_v28 = vadd.f32 %v22731_v19, %v22739_v42 }
 0xabb   : > { %v22747_v54 = vpop.f32.mrb[115].mxu1  ;;  %10882 = vmatmul.mubr.f32.gmra.mrb[220].mxu1 %v10588_v26  ;;  %v10470_v26 = vmax.f32 %v10278_v20, 0.0 }
 0xabc   : > { %10886 = vmatprep.mubr.f32.mxu1 %v10593_v14  ;;  %v11157_v14 = vld [vmem:[#allocation8 + $0x40] sm:$0xff] }
 0xabd   : > { %v17078_v20 = vpack.c.bf16 %v11161_v53, %v11157_v14 }
 0xabe   : > { %v22753_v56 = vpop.f32.mrb[116].mxu1 }
 0xabf   : > { %v22755_v8 = vpop.f32.mrb[117].mxu1  ;;  %10887 = vmatmul.mubr.f32.gmra.mrb[222].mxu1 %v10592_v2  ;;  %v10474_v2 = vmax.f32 %v10284_v45, 0.0  ;;  %v11177_v45 = vld [vmem:[#allocation8 + $0xe0] sm:$0xff] }
 0xac0   : > { %10956 = vmatprep.mubr.f32.mxu1 %v10471_v17  ;;  %v11169_v17 = vld [vmem:[#allocation8 + $0xa0] sm:$0xff]  ;;  %v10340_v19 = vadd.f32 %v22755_v8, %v22729_v57 }
 0xac1   : > { %v17082_v53 = vpack.c.bf16 %v11169_v17, %v11165_v41  ;;  %v11185_v41 = vld [vmem:[#allocation8 + $0x120] sm:$0xff]  ;;  %v10487_v17 = vmax.f32 %v10304_v31, 0.0 }
 0xac2   : > { %v22761_v52 = vpop.f32.mrb[118].mxu1 }
 0xac3   : > { %v22763_v5 = vpop.f32.mrb[119].mxu1  ;;  %10957 = vmatmul.mubr.f32.vlgmr.msra.gmra.mrb[160].mxu1 %v10470_v26 }
 0xac4   : > { %10961 = vmatprep.mubr.f32.mxu1 %v10475_v55  ;;  %17075 = vmatpush1.bf16.msra.mxu1 %v17074_v58  ;;  %v10478_v58 = vmax.f32 %v10290_v15, 0.0  ;;  %v11182_v55 = vld [vmem:[#allocation8 + $0x108] sm:$0xff]  ;;  %v10482_v15 = vmax.f32 %v10296_v29, 0.0  ;;  %v10486_v29 = vmax.f32 %v10302_v1, 0.0  ;;  %v10490_v1 = vmax.f32 %v10308_v38, 0.0 }
 0xac5   : > { %17077 = vmatprep.subr.bf16.mxu1 %v17076_v61  ;;  %v10483_v61 = vmax.f32 %v10298_v25, 0.0  ;;  %v17088_v32 = vpack.c.bf16 %v11186_v3, %v11182_v55  ;;  %v11190_v25 = vld [vmem:[#allocation8 + $0x148] sm:$0xff]  ;;  %v10494_v38 = vmax.f32 %v10314_v21, 0.0  ;;  %v10334_v21 = vadd.f32 %v22747_v54, %v22729_v57 }
 0xac6   : > { %v22769_v47 = vpop.f32.mrb[120].mxu1  ;;  %v11198_v55 = vld [vmem:[#allocation8 + $0x188] sm:$0xff] }
 0xac7   : > { %v22771_v26 = vpop.f32.mrb[121].mxu1  ;;  %10962 = vmatmul.mubr.f32.gmra.mrb[162].mxu1 %v10474_v2  ;;  %v11202_v3 = vld [vmem:[#allocation8 + $0x1a8] sm:$0xff] }
 0xac8   : > { %10966 = vmatprep.mubr.f32.mxu1 %v10479_v40  ;;  %17079 = vmatpush1.bf16.msra.mxu1 %v17078_v20  ;;  %v17086_v20 = vpack.c.bf16 %v11177_v45, %v11173_v43  ;;  %v11189_v43 = vld [vmem:[#allocation8 + $0x140] sm:$0xff] }
 0xac9   : > { %17081 = vmatprep.subr.bf16.mxu1 %v17080_v49  ;;  %v11181_v49 = vld [vmem:[#allocation8 + $0x100] sm:$0xff] }
 0xaca   : > { %v22777_v14 = vpop.f32.mrb[122].mxu1  ;;  %v11193_v45 = vld [vmem:[#allocation8 + $0x160] sm:$0xff] }
 0xacb   : > { %v22779_v2 = vpop.f32.mrb[123].mxu1  ;;  %10967 = vmatmul.mubr.f32.gmra.mrb[164].mxu1 %v10478_v58 }
 0xacc   : > { %10971 = vmatprep.mubr.f32.mxu1 %v10483_v61  ;;  %17083 = vmatpush1.bf16.msra.mxu1 %v17082_v53  ;;  %v17090_v53 = vpack.c.bf16 %v11185_v41, %v11181_v49  ;;  %v10491_v61 = vmax.f32 %v10310_v34, 0.0  ;;  %v11197_v49 = vld [vmem:[#allocation8 + $0x180] sm:$0xff] }
 0xacd   : > { %17085 = vmatprep.subr.bf16.mxu1 %v17084_v30  ;;  %v17092_v30 = vpack.c.bf16 %v11194_v9, %v11190_v25  ;;  %v11201_v41 = vld [vmem:[#allocation8 + $0x1a0] sm:$0xff]  ;;  %v11206_v25 = vld [vmem:[#allocation8 + $0x1c8] sm:$0xff] }
 0xace   : > { %v22785_v40 = vpop.f32.mrb[124].mxu1  ;;  %v11210_v9 = vld [vmem:[#allocation8 + $0x1e8] sm:$0xff] }
 0xacf   : > { %v22787_v58 = vpop.f32.mrb[125].mxu1  ;;  %10972 = vmatmul.mubr.f32.gmra.mrb[166].mxu1 %v10482_v15 }
 0xad0   : > { %10976 = vmatprep.mubr.f32.mxu1 %v10487_v17  ;;  %17087 = vmatpush1.bf16.msra.mxu1 %v17086_v20  ;;  %v17094_v20 = vpack.c.bf16 %v11193_v45, %v11189_v43  ;;  %v10495_v17 = vmax.f32 %v10316_v39, 0.0  ;;  %v11205_v43 = vld [vmem:[#allocation8 + $0x1c0] sm:$0xff] }
 0xad1   : > { %17089 = vmatprep.subr.bf16.mxu1 %v17088_v32  ;;  %v17096_v32 = vpack.c.bf16 %v11202_v3, %v11198_v55  ;;  %v11209_v45 = vld [vmem:[#allocation8 + $0x1e0] sm:$0xff] }
 0xad2   : > { %v22793_v31 = vpop.f32.mrb[126].mxu1  ;;  %v17102_v3 = vpack.c.bf16 %v11209_v45, %v11205_v43  ;;  %v10352_v45 = vadd.f32 %v22771_v26, %v22729_v57 }
 0xad3   : > { %v22795_v15 = vpop.f32.mrb[127].mxu1  ;;  %10977 = vmatmul.mubr.f32.gmra.mrb[168].mxu1 %v10486_v29 }
 0xad4   : > { %10981 = vmatprep.mubr.f32.mxu1 %v10491_v61  ;;  %17091 = vmatpush1.bf16.msra.mxu1 %v17090_v53  ;;  %v17098_v53 = vpack.c.bf16 %v11201_v41, %v11197_v49  ;;  %v10499_v61 = vmax.f32 %v10322_v12, 0.0  ;;  %v10502_v49 = vmax.f32 %v10326_v28, 0.0  ;;  %v10332_v41 = vadd.f32 %v22745_v63, %v22739_v42 }
 0xad5   : > { %17093 = vmatprep.subr.bf16.mxu1 %v17092_v30  ;;  %v17100_v30 = vpack.c.bf16 %v11210_v9, %v11206_v25  ;;  %v10338_v9 = vadd.f32 %v22753_v56, %v22739_v42  ;;  %v10346_v63 = vadd.f32 %v22763_v5, %v22729_v57 }
 0xad6   : > { %v22801_v34 = vpop.f32.mrb[128].mxu1  ;;  %v10506_v25 = vmax.f32 %v10332_v41, 0.0 }
 0xad7   : > { %v22803_v29 = vpop.f32.mrb[129].mxu1  ;;  %10982 = vmatmul.mubr.f32.gmra.mrb[170].mxu1 %v10490_v1  ;;  %v10503_v1 = vmax.f32 %v10328_v50, 0.0  ;;  %v10510_v8 = vmax.f32 %v10338_v9, 0.0  ;;  %v10515_v43 = vmax.f32 %v10346_v63, 0.0  ;;  %v10350_v50 = vadd.f32 %v22769_v47, %v22739_v42 }
 0xad8   : > { %10986 = vmatprep.mubr.f32.mxu1 %v10495_v17  ;;  %17095 = vmatpush1.bf16.msra.mxu1 %v17094_v20  ;;  %v10498_v20 = vmax.f32 %v10320_v0, 0.0  ;;  %v10507_v17 = vmax.f32 %v10334_v21, 0.0  ;;  %v10356_v21 = vadd.f32 %v22777_v14, %v22739_v42  ;;  %v10364_v47 = vadd.f32 %v22787_v58, %v22729_v57 }
 0xad9   : > { %17097 = vmatprep.subr.bf16.mxu1 %v17096_v32  ;;  %v10362_v9 = vadd.f32 %v22785_v40, %v22739_v42  ;;  %v10370_v14 = vadd.f32 %v22795_v15, %v22729_v57  ;;  %v10376_v40 = vadd.f32 %v22803_v29, %v22729_v57 }
 0xada   : > { %v22809_v39 = vpop.f32.mrb[130].mxu1  ;;  %v10527_v63 = vmax.f32 %v10364_v47, 0.0 }
 0xadb   : > { %v22811_v55 = vpop.f32.mrb[131].mxu1  ;;  %10987 = vmatmul.mubr.f32.gmra.mrb[172].mxu1 %v10494_v38 }
 0xadc   : > { %10991 = vmatprep.mubr.f32.mxu1 %v10499_v61  ;;  %17099 = vmatpush1.bf16.msra.mxu1 %v17098_v53  ;;  %v10511_v53 = vmax.f32 %v10340_v19, 0.0 }
 0xadd   : > { %17101 = vmatprep.subr.bf16.mxu1 %v17100_v30  ;;  %v10344_v30 = vadd.f32 %v22761_v52, %v22739_v42 }
 0xade   : > { %v22817_v32 = vpop.f32.mrb[132].mxu1 }
 0xadf   : > { %v22819_v11 = vpop.f32.mrb[133].mxu1  ;;  %10992 = vmatmul.mubr.f32.gmra.mrb[174].mxu1 %v10498_v20  ;;  %v10514_v5 = vmax.f32 %v10344_v30, 0.0  ;;  %v10358_v20 = vadd.f32 %v22779_v2, %v22729_v57 }
 0xae0   : > { %10996 = vmatprep.mubr.f32.mxu1 %v10503_v1  ;;  %17103 = vmatpush1.bf16.msra.mxu1 %v17102_v3  ;;  %v10519_v3 = vmax.f32 %v10352_v45, 0.0  ;;  %v10518_v1 = vmax.f32 %v10350_v50, 0.0  ;;  %v10368_v45 = vadd.f32 %v22793_v31, %v22739_v42  ;;  %v10531_v50 = vmax.f32 %v10370_v14, 0.0 }
 0xae1   : > { %17136 = vmatprep.subr.bf16.mxu1 %v23948_v33  ;;  %v10523_v41 = vmax.f32 %v10358_v20, 0.0  ;;  %v10382_v31 = vadd.f32 %v22811_v55, %v22729_v57 }
 0xae2   : > { %v22826_v12 = vpop.f32.mrb[134].mxu1 }
 0xae3   : > { %v22828_v54 = vpop.f32.mrb[135].mxu1  ;;  %10997 = vmatmul.mubr.f32.gmra.mrb[176].mxu1 %v10502_v49  ;;  %v10539_v14 = vmax.f32 %v10382_v31, 0.0  ;;  %v10392_v31 = vadd.f32 %v22826_v12, %v22739_v42 }
 0xae4   : > { %11001 = vmatprep.mubr.f32.mxu1 %v10507_v17 }
 0xae6   : > { %v22834_v38 = vpop.f32.mrb[136].mxu1 }
 0xae7   : > { %v22836_v0 = vpop.f32.mrb[137].mxu1  ;;  %11002 = vmatmul.mubr.f32.gmra.mrb[178].mxu1 %v10506_v25  ;;  %v10522_v25 = vmax.f32 %v10356_v21, 0.0  ;;  %v10374_v21 = vadd.f32 %v22801_v34, %v22739_v42  ;;  %v10388_v34 = vadd.f32 %v22819_v11, %v22729_v57 }
 0xae8   : > { %11006 = vmatprep.mubr.f32.mxu1 %v10511_v53 }
 0xaea   : > { %v22842_v61 = vpop.f32.mrb[138].mxu1 }
 0xaeb   : > { %v22844_v56 = vpop.f32.mrb[139].mxu1  ;;  %11007 = vmatmul.mubr.f32.gmra.mrb[180].mxu1 %v10510_v8 }
 0xaec   : > { %11011 = vmatprep.mubr.f32.mxu1 %v10515_v43  ;;  %v10526_v43 = vmax.f32 %v10362_v9, 0.0  ;;  %v10534_v9 = vmax.f32 %v10374_v21, 0.0  ;;  %v10406_v12 = vadd.f32 %v22844_v56, %v22729_v57 }
 0xaee   : > { %v22850_v28 = vpop.f32.mrb[140].mxu1 }
 0xaef   : > { %v22852_v52 = vpop.f32.mrb[141].mxu1  ;;  %11012 = vmatmul.mubr.f32.gmra.mrb[182].mxu1 %v10514_v5 }
 0xaf0   : > { %11016 = vmatprep.mubr.f32.mxu1 %v10519_v3  ;;  %v22854_v26 = vpop.f32.mrb[128].mxu0 }
 0xaf1   : > { %v12241_v49 = vpop.f32.mrb[129].mxu0 }
 0xaf2   : > { %v22860_v17 = vpop.f32.mrb[142].mxu1 }
 0xaf3   : > { %v22862_v2 = vpop.f32.mrb[143].mxu1  ;;  %11017 = vmatmul.mubr.f32.gmra.mrb[184].mxu1 %v10518_v1  ;;  %v10530_v1 = vmax.f32 %v10368_v45, 0.0 }
 0xaf4   : > { %11021 = vmatprep.mubr.f32.mxu1 %v10523_v41  ;;  %v22864_v19 = vpop.f32.mrb[130].mxu0  ;;  %v10535_v41 = vmax.f32 %v10376_v40, 0.0 }
 0xaf5   : > { %v12246_v53 = vpop.f32.mrb[131].mxu0 }
 0xaf6   : > { %v22870_v8 = vpop.f32.mrb[144].mxu1  ;;  %v10380_v53 = vadd.f32 %v22809_v39, %v22739_v42  ;;  %v10394_v39 = vadd.f32 %v22828_v54, %v22729_v57 }
 0xaf7   : > { %v22872_v58 = vpop.f32.mrb[145].mxu1  ;;  %11022 = vmatmul.mubr.f32.gmra.mrb[186].mxu1 %v10522_v25 }
 0xaf8   : > { %11026 = vmatprep.mubr.f32.mxu1 %v10527_v63  ;;  %v22874_v30 = vpop.f32.mrb[132].mxu0 }
 0xaf9   : > { %v12251_v5 = vpop.f32.mrb[133].mxu0 }
 0xafa   : > { %v22880_v3 = vpop.f32.mrb[146].mxu1  ;;  %v10538_v5 = vmax.f32 %v10380_v53, 0.0  ;;  %v10547_v53 = vmax.f32 %v10394_v39, 0.0 }
 0xafb   : > { %v22882_v15 = vpop.f32.mrb[147].mxu1  ;;  %11027 = vmatmul.mubr.f32.gmra.mrb[188].mxu1 %v10526_v43 }
 0xafc   : > { %11031 = vmatprep.mubr.f32.mxu1 %v10531_v50  ;;  %v22884_v20 = vpop.f32.mrb[134].mxu0  ;;  %v10386_v50 = vadd.f32 %v22817_v32, %v22739_v42  ;;  %v10400_v32 = vadd.f32 %v22836_v0, %v22729_v57 }
 0xafd   : > { %v12256_v49 = vpop.f32.mrb[135].mxu0 }
 0xafe   : > { %v22890_v47 = vpop.f32.mrb[148].mxu1 }
 0xaff   : > { %v22892_v29 = vpop.f32.mrb[149].mxu1  ;;  %11032 = vmatmul.mubr.f32.gmra.mrb[190].mxu1 %v10530_v1  ;;  %v10543_v1 = vmax.f32 %v10388_v34, 0.0  ;;  %v10546_v34 = vmax.f32 %v10392_v31, 0.0  ;;  %v10404_v31 = vadd.f32 %v22842_v61, %v22739_v42  ;;  %v10418_v61 = vadd.f32 %v22862_v2, %v22729_v57 }
 0xb00   : > { %11036 = vmatprep.mubr.f32.mxu1 %v10535_v41  ;;  %v22894_v25 = vpop.f32.mrb[136].mxu0  ;;  %v10542_v41 = vmax.f32 %v10386_v50, 0.0 }
 0xb01   : > { %v12261_v63 = vpop.f32.mrb[137].mxu0 }
 0xb02   : > { %v22900_v43 = vpop.f32.mrb[150].mxu1 }
 0xb03   : > { %v22902_v55 = vpop.f32.mrb[151].mxu1  ;;  %11037 = vmatmul.mubr.f32.gmra.mrb[192].mxu1 %v10534_v9 }
 0xb04   : > { %11041 = vmatprep.mubr.f32.mxu1 %v10539_v14  ;;  %v22904_v45 = vpop.f32.mrb[138].mxu0 }
 0xb05   : > { %v12266_v40 = vpop.f32.mrb[139].mxu0 }
 0xb06   : > { %v22910_v21 = vpop.f32.mrb[152].mxu1  ;;  %v10551_v40 = vmax.f32 %v10400_v32, 0.0 }
 0xb07   : > { %v22912_v11 = vpop.f32.mrb[153].mxu1  ;;  %11042 = vmatmul.mubr.f32.gmra.mrb[194].mxu1 %v10538_v5  ;;  %v10398_v5 = vadd.f32 %v22834_v38, %v22739_v42  ;;  %v10412_v38 = vadd.f32 %v22852_v52, %v22729_v57 }
 0xb08   : > { %11046 = vmatprep.mubr.f32.mxu1 %v10543_v1  ;;  %v22914_v49 = vpop.f32.mrb[140].mxu0 }
 0xb09   : > { %v12271_v9 = vpop.f32.mrb[141].mxu0 }
 0xb0a   : > { %v22920_v63 = vpop.f32.mrb[154].mxu1 }
 0xb0b   : > { %v22922_v54 = vpop.f32.mrb[155].mxu1  ;;  %11047 = vmatmul.mubr.f32.gmra.mrb[196].mxu1 %v10542_v41  ;;  %v10550_v41 = vmax.f32 %v10398_v5, 0.0  ;;  %v10410_v5 = vadd.f32 %v22850_v28, %v22739_v42 }
 0xb0c   : > { %11051 = vmatprep.mubr.f32.mxu1 %v10547_v53  ;;  %v22924_v14 = vpop.f32.mrb[142].mxu0  ;;  %v10555_v53 = vmax.f32 %v10406_v12, 0.0  ;;  %v10416_v12 = vadd.f32 %v22860_v17, %v22739_v42 }
 0xb0d   : > { %v12276_v50 = vpop.f32.mrb[143].mxu0  ;;  %v10558_v52 = vmax.f32 %v10410_v5, 0.0 }
 0xb0e   : > { %v22930_v1 = vpop.f32.mrb[156].mxu1  ;;  %v10562_v28 = vmax.f32 %v10416_v12, 0.0 }
 0xb0f   : > { %v22932_v0 = vpop.f32.mrb[157].mxu1  ;;  %11052 = vmatmul.mubr.f32.gmra.mrb[198].mxu1 %v10546_v34  ;;  %v10554_v34 = vmax.f32 %v10404_v31, 0.0  ;;  %v10424_v31 = vadd.f32 %v22872_v58, %v22729_v57  ;;  %v10428_v58 = vadd.f32 %v22880_v3, %v22739_v42 }
 0xb10   : > { %11056 = vmatprep.mubr.f32.mxu1 %v10551_v40  ;;  %v22934_v39 = vpop.f32.mrb[144].mxu0 }
 0xb11   : > { %23960 = vst [vmem:[#allocation55_spill] sm:$0xff] %v22934_v39  ;;  %v12281_v9 = vpop.f32.mrb[145].mxu0  ;;  %v10559_v39 = vmax.f32 %v10412_v38, 0.0  ;;  %v10422_v38 = vadd.f32 %v22870_v8, %v22739_v42  ;;  %v10570_v12 = vmax.f32 %v10428_v58, 0.0 }
 0xb12   : > { %v22940_v32 = vpop.f32.mrb[158].mxu1 }
 0xb13   : > { %v22942_v56 = vpop.f32.mrb[159].mxu1  ;;  %11057 = vmatmul.mubr.f32.gmra.mrb[200].mxu1 %v10550_v41  ;;  %v10563_v41 = vmax.f32 %v10418_v61, 0.0  ;;  %v10566_v5 = vmax.f32 %v10422_v38, 0.0 }
 0xb14   : > { %11061 = vmatprep.mubr.f32.mxu1 %v10555_v53  ;;  %v22944_v50 = vpop.f32.mrb[146].mxu0 }
 0xb15   : > { %v12286_v40 = vpop.f32.mrb[147].mxu0 }
 0xb17   : > { %11062 = vmatmul.mubr.f32.gmra.mrb[202].mxu1 %v10554_v34  ;;  %v10430_v34 = vadd.f32 %v22882_v15, %v22729_v57  ;;  %v10434_v15 = vadd.f32 %v22890_v47, %v22739_v42 }
 0xb18   : > { %11066 = vmatprep.mubr.f32.mxu1 %v10559_v39  ;;  %v10567_v39 = vmax.f32 %v10424_v31, 0.0 }
 0xb19   : > { %v22952_v9 = vpop.f32.mrb[148].mxu0  ;;  %v10571_v61 = vmax.f32 %v10430_v34, 0.0  ;;  %v10448_v34 = vadd.f32 %v22912_v11, %v22729_v57  ;;  %v10452_v11 = vadd.f32 %v22920_v63, %v22739_v42 }
 0xb1a   : > { %v12291_v53 = vpop.f32.mrb[149].mxu0 }
 0xb1b   : > { %11067 = vmatmul.mubr.f32.gmra.mrb[204].mxu1 %v10558_v52  ;;  %v10436_v52 = vadd.f32 %v22892_v29, %v22729_v57  ;;  %v10442_v53 = vadd.f32 %v22902_v55, %v22729_v57  ;;  %v10440_v29 = vadd.f32 %v22900_v43, %v22739_v42  ;;  %v10446_v55 = vadd.f32 %v22910_v21, %v22739_v42 }
 0xb1c   : > { %11071 = vmatprep.mubr.f32.mxu1 %v10563_v41  ;;  %v10583_v58 = vmax.f32 %v10448_v34, 0.0 }
 0xb1d   : > { %v22958_v2 = vpop.f32.mrb[150].mxu0  ;;  %v10575_v31 = vmax.f32 %v10436_v52, 0.0  ;;  %v10582_v52 = vmax.f32 %v10446_v55, 0.0 }
 0xb1e   : > { %v12296_v17 = vpop.f32.mrb[151].mxu0 }
 0xb1f   : > { %11072 = vmatmul.mubr.f32.gmra.mrb[206].mxu1 %v10562_v28  ;;  %v10574_v28 = vmax.f32 %v10434_v15, 0.0  ;;  %v10578_v17 = vmax.f32 %v10440_v29, 0.0  ;;  %v10460_v15 = vadd.f32 %v22932_v0, %v22729_v57  ;;  %v10464_v0 = vadd.f32 %v22940_v32, %v22739_v42 }
 0xb20   : > { %11076 = vmatprep.mubr.f32.mxu1 %v10567_v39  ;;  %v10579_v39 = vmax.f32 %v10442_v53, 0.0 }
 0xb21   : > { %v22964_v40 = vpop.f32.mrb[152].mxu0 }
 0xb22   : > { %v12301_v8 = vpop.f32.mrb[153].mxu0 }
 0xb23   : > { %11077 = vmatmul.mubr.f32.gmra.mrb[208].mxu1 %v10566_v5 }
 0xb24   : > { %11081 = vmatprep.mubr.f32.mxu1 %v10571_v61  ;;  %v10454_v61 = vadd.f32 %v22922_v54, %v22729_v57  ;;  %v10458_v54 = vadd.f32 %v22930_v1, %v22739_v42  ;;  %v10594_v1 = vmax.f32 %v10464_v0, 0.0  ;;  %v23010_v42 = vld [vmem:[#allocation3] sm:$0xff]  ;;  %v11885_v0 = vld [vmem:[%s23512_s13 + $0x40] sm:$0xff] }
 0xb25   : > { %v22970_v41 = vpop.f32.mrb[154].mxu0 }
 0xb26   : > { %v12306_v3 = vpop.f32.mrb[155].mxu0  ;;  %v10590_v29 = vmax.f32 %v10458_v54, 0.0 }
 0xb27   : > { %11082 = vmatmul.mubr.f32.gmra.mrb[210].mxu1 %v10570_v12  ;;  %v10587_v12 = vmax.f32 %v10454_v61, 0.0  ;;  %v10591_v3 = vmax.f32 %v10460_v15, 0.0  ;;  %v11879_v61 = vld [vmem:[%s23512_s13 + $0x10] sm:$0xff]  ;;  %v11881_v15 = vld [vmem:[%s23512_s13 + $0x20] sm:$0xff] }
 0xb28   : > { %11086 = vmatprep.mubr.f32.mxu1 %v10575_v31  ;;  %v10586_v31 = vmax.f32 %v10452_v11, 0.0 }
 0xb29   : > { %v22976_v38 = vpop.f32.mrb[156].mxu0 }
 0xb2a   : > { %v12311_v47 = vpop.f32.mrb[157].mxu0 }
 0xb2b   : > { %11087 = vmatmul.mubr.f32.gmra.mrb[212].mxu1 %v10574_v28  ;;  %v10466_v28 = vadd.f32 %v22942_v56, %v22729_v57  ;;  %v11877_v57 = vld [vmem:[%s23512_s13] sm:$0xff]  ;;  %v11878_v56 = vld [vmem:[%s23512_s13 + $0x8] sm:$0xff] }
 0xb2c   : > { %11091 = vmatprep.mubr.f32.mxu1 %v10579_v39  ;;  %v17137_v32 = vpack.c.bf16 %v11878_v56, %v11877_v57  ;;  %v11887_v57 = vld [vmem:[%s23512_s13 + $0x50] sm:$0xff]  ;;  %v11888_v56 = vld [vmem:[%s23512_s13 + $0x58] sm:$0xff] }
 0xb2d   : > { %v22982_v5 = vpop.f32.mrb[158].mxu0  ;;  %v10595_v34 = vmax.f32 %v10466_v28, 0.0  ;;  %v11884_v28 = vld [vmem:[%s23512_s13 + $0x38] sm:$0xff] }
 0xb2e   : > { %v12316_v43 = vpop.f32.mrb[159].mxu0 }
 0xb2f   : > { %11092 = vmatmul.mubr.f32.gmra.mrb[214].mxu1 %v10578_v17  ;;  %v11880_v43 = vld [vmem:[%s23512_s13 + $0x18] sm:$0xff] }
 0xb30   : > { %11096 = vmatprep.mubr.f32.mxu1 %v10583_v58  ;;  %v17140_v11 = vpack.c.bf16 %v11880_v43, %v11879_v61  ;;  %v11889_v61 = vld [vmem:[%s23512_s13 + $0x60] sm:$0xff]  ;;  %v11890_v43 = vld [vmem:[%s23512_s13 + $0x68] sm:$0xff] }
 0xb31   : > { %v22988_v8 = vpop.f32.mrb[160].mxu0 }
 0xb32   : > { %v12321_v21 = vpop.f32.mrb[161].mxu0 }
 0xb33   : > { %11097 = vmatmul.mubr.f32.gmra.mrb[216].mxu1 %v10582_v52  ;;  %v11882_v21 = vld [vmem:[%s23512_s13 + $0x28] sm:$0xff] }
 0xb34   : > { %11101 = vmatprep.mubr.f32.mxu1 %v10587_v12 }
 0xb35   : > { %v22994_v53 = vpop.f32.mrb[162].mxu0 }
 0xb36   : > { %v12326_v63 = vpop.f32.mrb[163].mxu0 }
 0xb37   : > { %11102 = vmatmul.mubr.f32.gmra.mrb[218].mxu1 %v10586_v31 }
 0xb38   : > { %11106 = vmatprep.mubr.f32.mxu1 %v10591_v3  ;;  %v11883_v3 = vld [vmem:[%s23512_s13 + $0x30] sm:$0xff] }
 0xb39   : > { %v23000_v39 = vpop.f32.mrb[164].mxu0 }
 0xb3a   : > { %v12331_v47 = vpop.f32.mrb[165].mxu0 }
 0xb3b   : > { %11107 = vmatmul.mubr.f32.gmra.mrb[220].mxu1 %v10590_v29 }
 0xb3c   : > { %11111 = vmatprep.mubr.f32.mxu1 %v10595_v34  ;;  %v11886_v34 = vld [vmem:[%s23512_s13 + $0x48] sm:$0xff] }
 0xb3d   : > { %v23002_v17 = vpop.f32.mrb[166].mxu0 }
 0xb3e   : > { %v12336_v55 = vpop.f32.mrb[167].mxu0 }
 0xb3f   : > { %11112 = vmatmul.mubr.f32.gmra.mrb[222].mxu1 %v10594_v1 }
 0xb40   : > { %11299 = vmatprep.mubr.f32.mxu1 %v23010_v42 }
 0xb41   : > { %v23013_v58 = vpop.f32.mrb[168].mxu0 }
 0xb42   : > { %v12341_v52 = vpop.f32.mrb[169].mxu0 }
 0xb43   : > { %11300 = vmatmul.mubr.f32.vlgmr.msra.gmra.mrb[224].mxu1 %v21530_v16  ;;  %v17143_v16 = vpack.c.bf16 %v11882_v21, %v11881_v15  ;;  %v11891_v15 = vld [vmem:[%s23512_s13 + $0x70] sm:$0xff]  ;;  %v11892_v21 = vld [vmem:[%s23512_s13 + $0x78] sm:$0xff] }
 0xb44   : > { %11305 = vmatprep.mubr.f32.mxu1 %v23010_v42  ;;  %17138 = vmatpush1.bf16.msra.mxu1 %v17137_v32 }
 0xb45   : > { %v23023_v12 = vpop.f32.mrb[170].mxu0  ;;  %17139 = vmatprep.subr.bf16.mxu1 %v23948_v33 }
 0xb46   : > { %v12346_v31 = vpop.f32.mrb[171].mxu0 }
 0xb47   : > { %11306 = vmatmul.mubr.f32.gmra.mrb[226].mxu1 %v21547_v13  ;;  %v17146_v13 = vpack.c.bf16 %v11884_v28, %v11883_v3  ;;  %v11896_v28 = vld [vmem:[%s23512_s13 + $0x98] sm:$0xff] }
 0xb48   : > { %11311 = vmatprep.mubr.f32.mxu1 %v23010_v42  ;;  %17141 = vmatpush1.bf16.msra.mxu1 %v17140_v11 }
 0xb49   : > { %v23034_v54 = vpop.f32.mrb[172].mxu0  ;;  %17142 = vmatprep.subr.bf16.mxu1 %v23948_v33 }
 0xb4a   : > { %v12351_v63 = vpop.f32.mrb[173].mxu0 }
 0xb4b   : > { %11312 = vmatmul.mubr.f32.gmra.mrb[228].mxu1 %v21569_v10  ;;  %v17149_v10 = vpack.c.bf16 %v11886_v34, %v11885_v0 }
 0xb4c   : > { %11317 = vmatprep.mubr.f32.mxu1 %v23010_v42  ;;  %17144 = vmatpush1.bf16.msra.mxu1 %v17143_v16  ;;  %v11893_v16 = vld [vmem:[%s23512_s13 + $0x80] sm:$0xff] }
 0xb4d   : > { %v23045_v29 = vpop.f32.mrb[174].mxu0  ;;  %17145 = vmatprep.subr.bf16.mxu1 %v23948_v33 }
 0xb4e   : > { %v12356_v47 = vpop.f32.mrb[175].mxu0 }
 0xb4f   : > { %11318 = vmatmul.mubr.f32.gmra.mrb[230].mxu1 %v21587_v7  ;;  %v17152_v7 = vpack.c.bf16 %v11888_v56, %v11887_v57  ;;  %v11904_v47 = vld [vmem:[%s23512_s13 + $0xd8] sm:$0xff]  ;;  %v23963_v57 = vld [vmem:[#allocation34_spill] sm:$0xff] }
 0xb50   : > { %11323 = vmatprep.mubr.f32.mxu1 %v23010_v42  ;;  %17147 = vmatpush1.bf16.msra.mxu1 %v17146_v13  ;;  %v11905_v56 = vld [vmem:[%s23512_s13 + $0xe0] sm:$0xff] }
 0xb51   : > { %v23056_v1 = vpop.f32.mrb[176].mxu0  ;;  %17148 = vmatprep.subr.bf16.mxu1 %v23948_v33 }
 0xb52   : > { %v12361_v55 = vpop.f32.mrb[177].mxu0 }
 0xb53   : > { %11324 = vmatmul.mubr.f32.gmra.mrb[232].mxu1 %v21609_v36  ;;  %v17155_v36 = vpack.c.bf16 %v11890_v43, %v11889_v61  ;;  %v11906_v55 = vld [vmem:[%s23512_s13 + $0xe8] sm:$0xff]  ;;  %v23964_v61 = vld [vmem:[#allocation36_spill] sm:$0xff]  ;;  %v23169_v43 = vld [vmem:[%s23509_s10] ss:$0 sm:$0xff] }
 0xb54   : > { %11329 = vmatprep.mubr.f32.mxu1 %v23010_v42  ;;  %17150 = vmatpush1.bf16.msra.mxu1 %v17149_v10 }
 0xb55   : > { %v23067_v32 = vpop.f32.mrb[178].mxu0  ;;  %17151 = vmatprep.subr.bf16.mxu1 %v23948_v33 }
 0xb56   : > { %v12366_v52 = vpop.f32.mrb[179].mxu0 }
 0xb57   : > { %11330 = vmatmul.mubr.f32.gmra.mrb[234].mxu1 %v21631_v22  ;;  %v17158_v22 = vpack.c.bf16 %v11892_v21, %v11891_v15  ;;  %v23965_v21 = vld [vmem:[#allocation38_spill] sm:$0xff] }
 0xb58   : > { %11335 = vmatprep.mubr.f32.mxu1 %v23010_v42  ;;  %17153 = vmatpush1.bf16.msra.mxu1 %v17152_v7  ;;  %v17179_v7 = vpack.c.bf16 %v11906_v55, %v11905_v56 }
 0xb59   : > { %v23078_v11 = vpop.f32.mrb[180].mxu0  ;;  %17154 = vmatprep.subr.bf16.mxu1 %v23948_v33 }
 0xb5a   : > { %v12371_v31 = vpop.f32.mrb[181].mxu0 }
 0xb5b   : > { %11336 = vmatmul.mubr.f32.gmra.mrb[236].mxu1 %v21655_v62  ;;  %v11894_v62 = vld [vmem:[%s23512_s13 + $0x88] sm:$0xff]  ;;  %v11907_v31 = vld [vmem:[%s23512_s13 + $0xf0] sm:$0xff] }
 0xb5c   : > { %11341 = vmatprep.mubr.f32.mxu1 %v23010_v42  ;;  %17156 = vmatpush1.bf16.msra.mxu1 %v17155_v36  ;;  %v17161_v3 = vpack.c.bf16 %v11894_v62, %v11893_v16 }
 0xb5d   : > { %17157 = vmatprep.subr.bf16.mxu1 %v23948_v33 }
 0xb5f   : > { %11342 = vmatmul.mubr.f32.gmra.mrb[238].mxu1 %v21677_v18  ;;  %v11895_v18 = vld [vmem:[%s23512_s13 + $0x90] sm:$0xff] }
 0xb60   : > { %11347 = vmatprep.mubr.f32.mxu1 %v23010_v42  ;;  %17159 = vmatpush1.bf16.msra.mxu1 %v17158_v22  ;;  %v17164_v63 = vpack.c.bf16 %v11896_v28, %v11895_v18  ;;  %v11908_v22 = vld [vmem:[%s23512_s13 + $0xf8] sm:$0xff]  ;;  %v23966_v28 = vld [vmem:[#allocation40_spill] sm:$0xff] }
 0xb61   : > { %17160 = vmatprep.subr.bf16.mxu1 %v23948_v33  ;;  %v17182_v16 = vpack.c.bf16 %v11908_v22, %v11907_v31 }
 0xb63   : > { %11348 = vmatmul.mubr.f32.gmra.mrb[240].mxu1 %v21700_v27  ;;  %v11897_v27 = vld [vmem:[%s23512_s13 + $0xa0] sm:$0xff] }
 0xb64   : > { %11353 = vmatprep.mubr.f32.mxu1 %v23010_v42  ;;  %17162 = vmatpush1.bf16.msra.mxu1 %v17161_v3 }
 0xb65   : > { %17163 = vmatprep.subr.bf16.mxu1 %v23948_v33 }
 0xb67   : > { %11354 = vmatmul.mubr.f32.gmra.mrb[242].mxu1 %v21723_v51  ;;  %v11898_v51 = vld [vmem:[%s23512_s13 + $0xa8] sm:$0xff] }
 0xb68   : > { %11359 = vmatprep.mubr.f32.mxu1 %v23010_v42  ;;  %17165 = vmatpush1.bf16.msra.mxu1 %v17164_v63  ;;  %v17167_v13 = vpack.c.bf16 %v11898_v51, %v11897_v27 }
 0xb69   : > { %17166 = vmatprep.subr.bf16.mxu1 %v23948_v33 }
 0xb6b   : > { %11360 = vmatmul.mubr.f32.gmra.mrb[244].mxu1 %v21749_v44  ;;  %v11899_v44 = vld [vmem:[%s23512_s13 + $0xb0] sm:$0xff] }
 0xb6c   : > { %11365 = vmatprep.mubr.f32.mxu1 %v23010_v42  ;;  %17168 = vmatpush1.bf16.msra.mxu1 %v17167_v13  ;;  %v23967_v13 = vld [vmem:[#allocation42_spill] sm:$0xff] }
 0xb6d   : > { %17169 = vmatprep.subr.bf16.mxu1 %v23948_v33 }
 0xb6f   : > { %11366 = vmatmul.mubr.f32.gmra.mrb[246].mxu1 %v21771_v60  ;;  %v11900_v60 = vld [vmem:[%s23512_s13 + $0xb8] sm:$0xff] }
 0xb70   : > { %11371 = vmatprep.mubr.f32.mxu1 %v23010_v42  ;;  %v17170_v0 = vpack.c.bf16 %v11900_v60, %v11899_v44 }
 0xb72   : > { %17171 = vmatpush1.bf16.msra.mxu1 %v17170_v0 }
 0xb73   : > { %11372 = vmatmul.mubr.f32.gmra.mrb[248].mxu1 %v21797_v4  ;;  %17172 = vmatprep.subr.bf16.mxu1 %v23948_v33  ;;  %v11901_v4 = vld [vmem:[%s23512_s13 + $0xc0] sm:$0xff] }
 0xb74   : > { %11377 = vmatprep.mubr.f32.mxu1 %v23010_v42 }
 0xb77   : > { %11378 = vmatmul.mubr.f32.gmra.mrb[250].mxu1 %v21819_v48  ;;  %v11902_v48 = vld [vmem:[%s23512_s13 + $0xc8] sm:$0xff] }
 0xb78   : > { %11383 = vmatprep.mubr.f32.mxu1 %v23010_v42  ;;  %v17173_v34 = vpack.c.bf16 %v11902_v48, %v11901_v4  ;;  %v23968_v4 = vld [vmem:[#allocation17_spill] sm:$0xff] }
 0xb7a   : > { %17174 = vmatpush1.bf16.msra.mxu1 %v17173_v34 }
 0xb7b   : > { %11384 = vmatmul.mubr.f32.gmra.mrb[252].mxu1 %v21847_v6  ;;  %17175 = vmatprep.subr.bf16.mxu1 %v23948_v33  ;;  %v23961_v6 = vld [vmem:[#allocation30_spill] sm:$0xff] }
 0xb7c   : > { %11389 = vmatprep.mubr.f32.mxu1 %v23010_v42 }
 0xb7f   : > { %11390 = vmatmul.mubr.f32.gmra.mrb[254].mxu1 %v21869_v35  ;;  %v11903_v35 = vld [vmem:[%s23512_s13 + $0xd0] sm:$0xff] }
 0xb80   : > { %11395 = vmatprep.mubr.f32.mxu1 %v23010_v42  ;;  %v17176_v10 = vpack.c.bf16 %v11904_v47, %v11903_v35  ;;  %v23969_v35 = vld [vmem:[#allocation18_spill] sm:$0xff] }
 0xb82   : > { %17177 = vmatpush1.bf16.msra.mxu1 %v17176_v10 }
 0xb83   : > { %11396 = vmatmul.mubr.f32.gmra.mrb[0].mxu1 %v21886_v46  ;;  %v23962_v46 = vld [vmem:[#allocation32_spill] sm:$0xff]  ;;  %17178 = vmatprep.subr.bf16.mxu1 %v23948_v33 }
 0xb84   : > { %11401 = vmatprep.mubr.f32.mxu1 %v23010_v42 }
 0xb86   : > { %17180 = vmatpush1.bf16.msra.mxu1 %v17179_v7 }
 0xb87   : > { %11402 = vmatmul.mubr.f32.gmra.mrb[2].mxu1 %v23961_v6  ;;  %17181 = vmatprep.subr.bf16.mxu1 %v23948_v33 }
 0xb88   : > { %11407 = vmatprep.mubr.f32.mxu1 %v23010_v42 }
 0xb8a   : > { %17183 = vmatpush1.bf16.msra.mxu1 %v17182_v16 }
 0xb8b   : > { %11408 = vmatmul.mubr.f32.gmra.mrb[4].mxu1 %v23962_v46  ;;  %17232 = vmatprep.subr.bf16.mxu1 %v23948_v33 }
 0xb8c   : > { %11413 = vmatprep.mubr.f32.mxu1 %v23010_v42 }
 0xb8f   : > { %11414 = vmatmul.mubr.f32.gmra.mrb[6].mxu1 %v23963_v57  ;;  %v23970_v57 = vld [vmem:[#allocation19_spill] sm:$0xff] }
 0xb90   : > { %11419 = vmatprep.mubr.f32.mxu1 %v23010_v42 }
 0xb93   : > { %11420 = vmatmul.mubr.f32.gmra.mrb[8].mxu1 %v23964_v61  ;;  %v23971_v61 = vld [vmem:[#allocation20_spill] sm:$0xff] }
 0xb94   : > { %11425 = vmatprep.mubr.f32.mxu1 %v23010_v42 }
 0xb96   : > { %v10958_v52 = vpop.f32.mrb[160].mxu1 }
 0xb97   : > { %v17264_v36 = vadd.f32 %v23169_v43, %v10958_v52  ;;  %v10960_v15 = vpop.f32.mrb[161].mxu1  ;;  %11426 = vmatmul.mubr.f32.gmra.mrb[10].mxu1 %v23965_v21  ;;  %v23972_v21 = vld [vmem:[#allocation43_spill] sm:$0xff] }
 0xb98   : > { %11431 = vmatprep.mubr.f32.mxu1 %v23010_v42 }
 0xb99   : > { %11117 = vst [vmem:[%s23177_s28] sm:$0xff] %v17264_v36 }
 0xb9a   : > { %v10963_v62 = vpop.f32.mrb[162].mxu1 }
 0xb9b   : > { %v17265_v3 = vadd.f32 %v23169_v43, %v10963_v62  ;;  %v10965_v18 = vpop.f32.mrb[163].mxu1  ;;  %11432 = vmatmul.mubr.f32.gmra.mrb[12].mxu1 %v23966_v28  ;;  %v23973_v62 = vld [vmem:[#allocation44_spill] sm:$0xff] }
 0xb9c   : > { %11437 = vmatprep.mubr.f32.mxu1 %v23010_v42 }
 0xb9d   : > { %11118 = vst [vmem:[%s23177_s28 + $0x8] sm:$0xff] %v17265_v3 }
 0xb9e   : > { %v10968_v63 = vpop.f32.mrb[164].mxu1 }
 0xb9f   : > { %v17266_v27 = vadd.f32 %v23169_v43, %v10968_v63  ;;  %v10970_v51 = vpop.f32.mrb[165].mxu1  ;;  %11438 = vmatmul.mubr.f32.gmra.mrb[14].mxu1 %v23967_v13  ;;  %v23974_v63 = vld [vmem:[#allocation16_spill] sm:$0xff] }
 0xba0   : > { %11443 = vmatprep.mubr.f32.mxu1 %v23010_v42 }
 0xba1   : > { %11119 = vst [vmem:[%s23177_s28 + $0x10] sm:$0xff] %v17266_v27 }
 0xba2   : > { %v10973_v44 = vpop.f32.mrb[166].mxu1 }
 0xba3   : > { %v17267_v60 = vadd.f32 %v23169_v43, %v10973_v44  ;;  %v10975_v0 = vpop.f32.mrb[167].mxu1  ;;  %11444 = vmatmul.mubr.f32.gmra.mrb[16].mxu1 %v23968_v4  ;;  %v23975_v44 = vld [vmem:[#allocation45_spill] sm:$0xff] }
 0xba4   : > { %11449 = vmatprep.mubr.f32.mxu1 %v23010_v42 }
 0xba5   : > { %11120 = vst [vmem:[%s23177_s28 + $0x18] sm:$0xff] %v17267_v60 }
 0xba6   : > { %v10978_v48 = vpop.f32.mrb[168].mxu1 }
 0xba7   : > { %v17268_v34 = vadd.f32 %v23169_v43, %v10978_v48  ;;  %v10980_v6 = vpop.f32.mrb[169].mxu1  ;;  %11450 = vmatmul.mubr.f32.gmra.mrb[18].mxu1 %v23969_v35 }
 0xba8   : > { %11455 = vmatprep.mubr.f32.mxu1 %v23010_v42 }
 0xba9   : > { %11121 = vst [vmem:[%s23177_s28 + $0x20] sm:$0xff] %v17268_v34 }
 0xbaa   : > { %v10983_v47 = vpop.f32.mrb[170].mxu1 }
 0xbab   : > { %v17269_v10 = vadd.f32 %v23169_v43, %v10983_v47  ;;  %v10985_v46 = vpop.f32.mrb[171].mxu1  ;;  %11456 = vmatmul.mubr.f32.gmra.mrb[20].mxu1 %v23970_v57 }
 0xbac   : > { %11461 = vmatprep.mubr.f32.mxu1 %v23010_v42 }
 0xbad   : > { %11122 = vst [vmem:[%s23177_s28 + $0x28] sm:$0xff] %v17269_v10 }
 0xbae   : > { %v10988_v56 = vpop.f32.mrb[172].mxu1 }
 0xbaf   : > { %v17270_v55 = vadd.f32 %v23169_v43, %v10988_v56  ;;  %v10990_v7 = vpop.f32.mrb[173].mxu1  ;;  %11462 = vmatmul.mubr.f32.gmra.mrb[22].mxu1 %v23971_v61 }
 0xbb0   : > { %11467 = vmatprep.mubr.f32.mxu1 %v23010_v42 }
 0xbb1   : > { %11123 = vst [vmem:[%s23177_s28 + $0x30] sm:$0xff] %v17270_v55 }
 0xbb2   : > { %v10993_v52 = vpop.f32.mrb[174].mxu1 }
 0xbb3   : > { %v17271_v36 = vadd.f32 %v23169_v43, %v10993_v52  ;;  %v10995_v15 = vpop.f32.mrb[175].mxu1  ;;  %11468 = vmatmul.mubr.f32.gmra.mrb[24].mxu1 %v23972_v21 }
 0xbb4   : > { %11473 = vmatprep.mubr.f32.mxu1 %v23010_v42 }
 0xbb5   : > { %11124 = vst [vmem:[%s23177_s28 + $0x38] sm:$0xff] %v17271_v36 }
 0xbb6   : > { %v10998_v31 = vpop.f32.mrb[176].mxu1 }
 0xbb7   : > { %v17272_v22 = vadd.f32 %v23169_v43, %v10998_v31  ;;  %v11000_v16 = vpop.f32.mrb[177].mxu1  ;;  %11474 = vmatmul.mubr.f32.gmra.mrb[26].mxu1 %v23973_v62 }
 0xbb8   : > { %11479 = vmatprep.mubr.f32.mxu1 %v23010_v42 }
 0xbb9   : > { %11125 = vst [vmem:[%s23177_s28 + $0x40] sm:$0xff] %v17272_v22 }
 0xbba   : > { %v11003_v3 = vpop.f32.mrb[178].mxu1 }
 0xbbb   : > { %v17273_v18 = vadd.f32 %v23169_v43, %v11003_v3  ;;  %v11005_v28 = vpop.f32.mrb[179].mxu1  ;;  %11480 = vmatmul.mubr.f32.gmra.mrb[28].mxu1 %v23974_v63 }
 0xbbc   : > { %11485 = vmatprep.mubr.f32.mxu1 %v23010_v42 }
 0xbbd   : > { %11126 = vst [vmem:[%s23177_s28 + $0x48] sm:$0xff] %v17273_v18 }
 0xbbe   : > { %v11008_v27 = vpop.f32.mrb[180].mxu1 }
 0xbbf   : > { %v17274_v51 = vadd.f32 %v23169_v43, %v11008_v27  ;;  %v11010_v13 = vpop.f32.mrb[181].mxu1  ;;  %11486 = vmatmul.mubr.f32.gmra.mrb[30].mxu1 %v23975_v44 }
 0xbc1   : > { %11127 = vst [vmem:[%s23177_s28 + $0x50] sm:$0xff] %v17274_v51 }
 0xbc2   : > { %v11013_v60 = vpop.f32.mrb[182].mxu1 }
 0xbc3   : > { %v17275_v0 = vadd.f32 %v23169_v43, %v11013_v60  ;;  %v11015_v4 = vpop.f32.mrb[183].mxu1 }
 0xbc5   : > { %11128 = vst [vmem:[%s23177_s28 + $0x58] sm:$0xff] %v17275_v0 }
 0xbc6   : > { %v11018_v48 = vpop.f32.mrb[184].mxu1 }
 0xbc7   : > { %v17276_v34 = vadd.f32 %v23169_v43, %v11018_v48  ;;  %v11020_v42 = vpop.f32.mrb[185].mxu1 }
 0xbc9   : > { %11129 = vst [vmem:[%s23177_s28 + $0x60] sm:$0xff] %v17276_v34 }
 0xbca   : > { %v11023_v6 = vpop.f32.mrb[186].mxu1 }
 0xbcb   : > { %v17277_v35 = vadd.f32 %v23169_v43, %v11023_v6  ;;  %v11025_v47 = vpop.f32.mrb[187].mxu1 }
 0xbcd   : > { %11130 = vst [vmem:[%s23177_s28 + $0x68] sm:$0xff] %v17277_v35 }
 0xbce   : > { %v11028_v10 = vpop.f32.mrb[188].mxu1 }
 0xbcf   : > { %v17278_v46 = vadd.f32 %v23169_v43, %v11028_v10  ;;  %v11030_v57 = vpop.f32.mrb[189].mxu1 }
 0xbd1   : > { %11131 = vst [vmem:[%s23177_s28 + $0x70] sm:$0xff] %v17278_v46 }
 0xbd2   : > { %v11033_v56 = vpop.f32.mrb[190].mxu1 }
 0xbd3   : > { %v17279_v55 = vadd.f32 %v23169_v43, %v11033_v56  ;;  %v11035_v7 = vpop.f32.mrb[191].mxu1 }
 0xbd5   : > { %11132 = vst [vmem:[%s23177_s28 + $0x78] sm:$0xff] %v17279_v55 }
 0xbd6   : > { %v11038_v61 = vpop.f32.mrb[192].mxu1 }
 0xbd7   : > { %v17280_v52 = vadd.f32 %v23169_v43, %v11038_v61  ;;  %v11040_v36 = vpop.f32.mrb[193].mxu1 }
 0xbd9   : > { %11133 = vst [vmem:[%s23177_s28 + $0x80] sm:$0xff] %v17280_v52 }
 0xbda   : > { %v11043_v15 = vpop.f32.mrb[194].mxu1 }
 0xbdb   : > { %v17281_v21 = vadd.f32 %v23169_v43, %v11043_v15  ;;  %v11045_v31 = vpop.f32.mrb[195].mxu1 }
 0xbdd   : > { %11134 = vst [vmem:[%s23177_s28 + $0x88] sm:$0xff] %v17281_v21 }
 0xbde   : > { %v11048_v22 = vpop.f32.mrb[196].mxu1 }
 0xbdf   : > { %v17282_v16 = vadd.f32 %v23169_v43, %v11048_v22  ;;  %v11050_v62 = vpop.f32.mrb[197].mxu1 }
 0xbe1   : > { %11135 = vst [vmem:[%s23177_s28 + $0x90] sm:$0xff] %v17282_v16 }
 0xbe2   : > { %v11053_v3 = vpop.f32.mrb[198].mxu1 }
 0xbe3   : > { %v17283_v18 = vadd.f32 %v23169_v43, %v11053_v3  ;;  %v11055_v28 = vpop.f32.mrb[199].mxu1 }
 0xbe5   : > { %11136 = vst [vmem:[%s23177_s28 + $0x98] sm:$0xff] %v17283_v18 }
 0xbe6   : > { %v11058_v63 = vpop.f32.mrb[200].mxu1 }
 0xbe7   : > { %v17284_v27 = vadd.f32 %v23169_v43, %v11058_v63  ;;  %v11060_v51 = vpop.f32.mrb[201].mxu1 }
 0xbe9   : > { %11137 = vst [vmem:[%s23177_s28 + $0xa0] sm:$0xff] %v17284_v27 }
 0xbea   : > { %v11063_v13 = vpop.f32.mrb[202].mxu1 }
 0xbeb   : > { %v17285_v44 = vadd.f32 %v23169_v43, %v11063_v13  ;;  %v11065_v60 = vpop.f32.mrb[203].mxu1 }
 0xbec   : > { %v23976_v60 = vsub.s32 0, %v22210_v24 }
 0xbed   : > { %11138 = vst [vmem:[%s23177_s28 + $0xa8] sm:$0xff] %v17285_v44  ;;  %v18258_v44 = vld [vmem:[#allocation9] sm:$0xf] }
 0xbee   : > { %v11068_v0 = vpop.f32.mrb[204].mxu1 }
 0xbef   : > { %v17286_v4 = vadd.f32 %v23169_v43, %v11068_v0  ;;  %v11070_v48 = vpop.f32.mrb[205].mxu1  ;;  %v23272_v0 = vrot.slane %v18258_v44, %v23976_v60 }
 0xbf1   : > { %11139 = vst [vmem:[%s23177_s28 + $0xb0] sm:$0xff] %v17286_v4  ;;  %v23977_v4 = vsub.s32 1, %v22210_v24 }
 0xbf2   : > { %v11073_v34 = vpop.f32.mrb[206].mxu1 }
 0xbf3   : > { %v17287_v42 = vadd.f32 %v23169_v43, %v11073_v34  ;;  %v11075_v6 = vpop.f32.mrb[207].mxu1  ;;  %v23276_v48 = vrot.slane %v18258_v44, %v23977_v4 }
 0xbf5   : > { %11140 = vst [vmem:[%s23177_s28 + $0xb8] sm:$0xff] %v17287_v42 }
 0xbf6   : > { %v11078_v35 = vpop.f32.mrb[208].mxu1 }
 0xbf7   : > { %v17288_v47 = vadd.f32 %v23169_v43, %v11078_v35  ;;  %v11080_v10 = vpop.f32.mrb[209].mxu1 }
 0xbf9   : > { %11141 = vst [vmem:[%s23177_s28 + $0xc0] sm:$0xff] %v17288_v47 }
 0xbfa   : > { %v11083_v46 = vpop.f32.mrb[210].mxu1 }
 0xbfb   : > { %v17289_v57 = vadd.f32 %v23169_v43, %v11083_v46  ;;  %v11085_v56 = vpop.f32.mrb[211].mxu1 }
 0xbfd   : > { %11142 = vst [vmem:[%s23177_s28 + $0xc8] sm:$0xff] %v17289_v57 }
 0xbfe   : > { %v11088_v55 = vpop.f32.mrb[212].mxu1 }
 0xbff   : > { %v17290_v7 = vadd.f32 %v23169_v43, %v11088_v55  ;;  %v11090_v61 = vpop.f32.mrb[213].mxu1 }
 0xc01   : > { %11143 = vst [vmem:[%s23177_s28 + $0xd0] sm:$0xff] %v17290_v7  ;;  %v23978_v7 = vld [vmem:[#allocation15_spill] sm:$0xff] }
 0xc02   : > { %v11093_v52 = vpop.f32.mrb[214].mxu1 }
 0xc03   : > { %v17291_v36 = vadd.f32 %v23169_v43, %v11093_v52  ;;  %v11095_v15 = vpop.f32.mrb[215].mxu1 }
 0xc05   : > { %11144 = vst [vmem:[%s23177_s28 + $0xd8] sm:$0xff] %v17291_v36 }
 0xc06   : > { %v11098_v21 = vpop.f32.mrb[216].mxu1 }
 0xc07   : > { %v17292_v31 = vadd.f32 %v23169_v43, %v11098_v21  ;;  %v11100_v22 = vpop.f32.mrb[217].mxu1 }
 0xc08   : > { %v23979_v22 = vld [vmem:[#allocation21_spill] sm:$0xff] }
 0xc09   : > { %11145 = vst [vmem:[%s23177_s28 + $0xe0] sm:$0xff] %v17292_v31 }
 0xc0a   : > { %v11103_v16 = vpop.f32.mrb[218].mxu1 }
 0xc0b   : > { %v17293_v62 = vadd.f32 %v23169_v43, %v11103_v16  ;;  %v11105_v3 = vpop.f32.mrb[219].mxu1 }
 0xc0d   : > { %11146 = vst [vmem:[%s23177_s28 + $0xe8] sm:$0xff] %v17293_v62 }
 0xc0e   : > { %v11108_v18 = vpop.f32.mrb[220].mxu1 }
 0xc0f   : > { %v17294_v28 = vadd.f32 %v23169_v43, %v11108_v18  ;;  %v11110_v63 = vpop.f32.mrb[221].mxu1 }
 0xc11   : > { %11147 = vst [vmem:[%s23177_s28 + $0xf0] sm:$0xff] %v17294_v28 }
 0xc12   : > { %v11113_v27 = vpop.f32.mrb[222].mxu1 }
 0xc13   : > { %v17295_v51 = vadd.f32 %v23169_v43, %v11113_v27  ;;  %v11115_v13 = vpop.f32.mrb[223].mxu1  ;;  %v23980_v27 = vld [vmem:[#allocation22_spill] sm:$0xff] }
 0xc15   : > { %11148 = vst [vmem:[%s23177_s28 + $0xf8] sm:$0xff] %v17295_v51 }
 0xc16   : > { %v11301_v34 = vpop.f32.mrb[224].mxu1 }
 0xc17   : > { %v11302_v42 = vadd.f32 %v11301_v34, %v23272_v0  ;;  %v11303_v6 = vpop.f32.mrb[225].mxu1 }
 0xc18   : > { %v11304_v35 = vadd.f32 %v11303_v6, %v23276_v48 }
 0xc19   : > { %v11749_v43 = vmax.f32 %v11302_v42, 0.0  ;;  %v23981_v42 = vld [vmem:[#allocation23_spill] sm:$0xff] }
 0xc1a   : > { %v11750_v47 = vmax.f32 %v11304_v35, 0.0  ;;  %v11307_v10 = vpop.f32.mrb[226].mxu1 }
 0xc1b   : > { %v11308_v46 = vadd.f32 %v11307_v10, %v23272_v0  ;;  %v11309_v57 = vpop.f32.mrb[227].mxu1 }
 0xc1c   : > { %v11310_v56 = vadd.f32 %v11309_v57, %v23276_v48  ;;  %12012 = vmatprep.mubr.f32.mxu1 %v11750_v47  ;;  %v23982_v57 = vld [vmem:[#allocation24_spill] sm:$0xff] }
 0xc1d   : > { %12013 = vmatmul.mubr.f32.vlgmr.msra.gmra.mrb[32].mxu1 %v11749_v43  ;;  %v11753_v61 = vmax.f32 %v11308_v46, 0.0 }
 0xc1e   : > { %v11754_v24 = vmax.f32 %v11310_v56, 0.0  ;;  %v11313_v55 = vpop.f32.mrb[228].mxu1  ;;  %17248 = vmatpush1.bf16.msra.mxu1 %v23978_v7 }
 0xc1f   : > { %v11314_v52 = vadd.f32 %v11313_v55, %v23272_v0  ;;  %v11315_v36 = vpop.f32.mrb[229].mxu1  ;;  %17233 = vmatprep.subr.bf16.mxu1 %v23948_v33 }
 0xc20   : > { %v11316_v15 = vadd.f32 %v11315_v36, %v23276_v48  ;;  %12017 = vmatprep.mubr.f32.mxu1 %v11754_v24  ;;  %v23983_v36 = vld [vmem:[#allocation25_spill] sm:$0xff] }
 0xc21   : > { %12018 = vmatmul.mubr.f32.gmra.mrb[34].mxu1 %v11753_v61  ;;  %v11757_v16 = vmax.f32 %v11314_v52, 0.0 }
 0xc22   : > { %v11758_v21 = vmax.f32 %v11316_v15, 0.0  ;;  %v11319_v31 = vpop.f32.mrb[230].mxu1  ;;  %17249 = vmatpush1.bf16.msra.mxu1 %v23979_v22 }
 0xc23   : > { %v11320_v62 = vadd.f32 %v11319_v31, %v23272_v0  ;;  %v11321_v3 = vpop.f32.mrb[231].mxu1  ;;  %17234 = vmatprep.subr.bf16.mxu1 %v23948_v33 }
 0xc24   : > { %v11322_v18 = vadd.f32 %v11321_v3, %v23276_v48  ;;  %12022 = vmatprep.mubr.f32.mxu1 %v11758_v21  ;;  %v23984_v3 = vld [vmem:[#allocation26_spill] sm:$0xff] }
 0xc25   : > { %12023 = vmatmul.mubr.f32.gmra.mrb[36].mxu1 %v11757_v16  ;;  %v11761_v51 = vmax.f32 %v11320_v62, 0.0 }
 0xc26   : > { %v11762_v28 = vmax.f32 %v11322_v18, 0.0  ;;  %v11325_v63 = vpop.f32.mrb[232].mxu1  ;;  %17250 = vmatpush1.bf16.msra.mxu1 %v23980_v27 }
 0xc27   : > { %v11326_v13 = vadd.f32 %v11325_v63, %v23272_v0  ;;  %v11327_v44 = vpop.f32.mrb[233].mxu1  ;;  %17235 = vmatprep.subr.bf16.mxu1 %v23948_v33 }
 0xc28   : > { %v11328_v60 = vadd.f32 %v11327_v44, %v23276_v48  ;;  %12027 = vmatprep.mubr.f32.mxu1 %v11762_v28  ;;  %v23985_v44 = vld [vmem:[#allocation27_spill] sm:$0xff] }
 0xc29   : > { %12028 = vmatmul.mubr.f32.gmra.mrb[38].mxu1 %v11761_v51  ;;  %v11765_v6 = vmax.f32 %v11326_v13, 0.0 }
 0xc2a   : > { %v11766_v4 = vmax.f32 %v11328_v60, 0.0  ;;  %v11331_v34 = vpop.f32.mrb[234].mxu1  ;;  %17251 = vmatpush1.bf16.msra.mxu1 %v23981_v42 }
 0xc2b   : > { %v11332_v35 = vadd.f32 %v11331_v34, %v23272_v0  ;;  %v11333_v47 = vpop.f32.mrb[235].mxu1  ;;  %17236 = vmatprep.subr.bf16.mxu1 %v23948_v33 }
 0xc2c   : > { %v11334_v10 = vadd.f32 %v11333_v47, %v23276_v48  ;;  %12032 = vmatprep.mubr.f32.mxu1 %v11766_v4  ;;  %v23986_v47 = vld [vmem:[#allocation28_spill] sm:$0xff] }
 0xc2d   : > { %12033 = vmatmul.mubr.f32.gmra.mrb[40].mxu1 %v11765_v6  ;;  %v11769_v56 = vmax.f32 %v11332_v35, 0.0 }
 0xc2e   : > { %v11770_v43 = vmax.f32 %v11334_v10, 0.0  ;;  %v11337_v46 = vpop.f32.mrb[236].mxu1  ;;  %17252 = vmatpush1.bf16.msra.mxu1 %v23982_v57 }
 0xc2f   : > { %v11338_v24 = vadd.f32 %v11337_v46, %v23272_v0  ;;  %v11339_v55 = vpop.f32.mrb[237].mxu1  ;;  %17237 = vmatprep.subr.bf16.mxu1 %v23948_v33 }
 0xc30   : > { %v11340_v7 = vadd.f32 %v11339_v55, %v23276_v48  ;;  %12037 = vmatprep.mubr.f32.mxu1 %v11770_v43  ;;  %v23987_v55 = vld [vmem:[#allocation29_spill] sm:$0xff] }
 0xc31   : > { %12038 = vmatmul.mubr.f32.gmra.mrb[42].mxu1 %v11769_v56  ;;  %v11773_v15 = vmax.f32 %v11338_v24, 0.0 }
 0xc32   : > { %v11774_v61 = vmax.f32 %v11340_v7, 0.0  ;;  %v11343_v52 = vpop.f32.mrb[238].mxu1  ;;  %17253 = vmatpush1.bf16.msra.mxu1 %v23983_v36 }
 0xc33   : > { %v11344_v21 = vadd.f32 %v11343_v52, %v23272_v0  ;;  %v11345_v31 = vpop.f32.mrb[239].mxu1  ;;  %17238 = vmatprep.subr.bf16.mxu1 %v23948_v33 }
 0xc34   : > { %v11346_v22 = vadd.f32 %v11345_v31, %v23276_v48  ;;  %12042 = vmatprep.mubr.f32.mxu1 %v11774_v61  ;;  %v23988_v31 = vld [vmem:[#allocation31_spill] sm:$0xff] }
 0xc35   : > { %12043 = vmatmul.mubr.f32.gmra.mrb[44].mxu1 %v11773_v15  ;;  %v11777_v18 = vmax.f32 %v11344_v21, 0.0 }
 0xc36   : > { %v11778_v16 = vmax.f32 %v11346_v22, 0.0  ;;  %v11349_v62 = vpop.f32.mrb[240].mxu1  ;;  %17254 = vmatpush1.bf16.msra.mxu1 %v23984_v3 }
 0xc37   : > { %v11350_v28 = vadd.f32 %v11349_v62, %v23272_v0  ;;  %v11351_v63 = vpop.f32.mrb[241].mxu1  ;;  %17239 = vmatprep.subr.bf16.mxu1 %v23948_v33 }
 0xc38   : > { %v11352_v27 = vadd.f32 %v11351_v63, %v23276_v48  ;;  %12047 = vmatprep.mubr.f32.mxu1 %v11778_v16  ;;  %v23989_v63 = vld [vmem:[#allocation33_spill] sm:$0xff] }
 0xc39   : > { %12048 = vmatmul.mubr.f32.gmra.mrb[46].mxu1 %v11777_v18  ;;  %v11781_v60 = vmax.f32 %v11350_v28, 0.0 }
 0xc3a   : > { %v11782_v51 = vmax.f32 %v11352_v27, 0.0  ;;  %v11355_v13 = vpop.f32.mrb[242].mxu1  ;;  %17255 = vmatpush1.bf16.msra.mxu1 %v23985_v44 }
 0xc3b   : > { %v11356_v4 = vadd.f32 %v11355_v13, %v23272_v0  ;;  %v11357_v34 = vpop.f32.mrb[243].mxu1  ;;  %17240 = vmatprep.subr.bf16.mxu1 %v23948_v33 }
 0xc3c   : > { %v11358_v42 = vadd.f32 %v11357_v34, %v23276_v48  ;;  %12052 = vmatprep.mubr.f32.mxu1 %v11782_v51  ;;  %v23990_v34 = vld [vmem:[#allocation35_spill] sm:$0xff] }
 0xc3d   : > { %12053 = vmatmul.mubr.f32.gmra.mrb[48].mxu1 %v11781_v60  ;;  %v11785_v10 = vmax.f32 %v11356_v4, 0.0 }
 0xc3e   : > { %v11786_v6 = vmax.f32 %v11358_v42, 0.0  ;;  %v11361_v35 = vpop.f32.mrb[244].mxu1  ;;  %17256 = vmatpush1.bf16.msra.mxu1 %v23986_v47 }
 0xc3f   : > { %v11362_v43 = vadd.f32 %v11361_v35, %v23272_v0  ;;  %v11363_v46 = vpop.f32.mrb[245].mxu1  ;;  %17241 = vmatprep.subr.bf16.mxu1 %v23948_v33 }
 0xc40   : > { %v11364_v57 = vadd.f32 %v11363_v46, %v23276_v48  ;;  %12057 = vmatprep.mubr.f32.mxu1 %v11786_v6  ;;  %v23991_v46 = vld [vmem:[#allocation37_spill] sm:$0xff] }
 0xc41   : > { %12058 = vmatmul.mubr.f32.gmra.mrb[50].mxu1 %v11785_v10  ;;  %v11789_v7 = vmax.f32 %v11362_v43, 0.0 }
 0xc42   : > { %v11790_v56 = vmax.f32 %v11364_v57, 0.0  ;;  %v11367_v24 = vpop.f32.mrb[246].mxu1  ;;  %17257 = vmatpush1.bf16.msra.mxu1 %v23987_v55 }
 0xc43   : > { %v11368_v61 = vadd.f32 %v11367_v24, %v23272_v0  ;;  %v11369_v52 = vpop.f32.mrb[247].mxu1  ;;  %17242 = vmatprep.subr.bf16.mxu1 %v23948_v33 }
 0xc44   : > { %v11370_v36 = vadd.f32 %v11369_v52, %v23276_v48  ;;  %12062 = vmatprep.mubr.f32.mxu1 %v11790_v56  ;;  %v23992_v52 = vld [vmem:[#allocation39_spill] sm:$0xff] }
 0xc45   : > { %12063 = vmatmul.mubr.f32.gmra.mrb[52].mxu1 %v11789_v7  ;;  %v11793_v22 = vmax.f32 %v11368_v61, 0.0 }
 0xc46   : > { %v11794_v15 = vmax.f32 %v11370_v36, 0.0  ;;  %v11373_v21 = vpop.f32.mrb[248].mxu1  ;;  %17258 = vmatpush1.bf16.msra.mxu1 %v23988_v31 }
 0xc47   : > { %v11374_v16 = vadd.f32 %v11373_v21, %v23272_v0  ;;  %v11375_v62 = vpop.f32.mrb[249].mxu1  ;;  %17243 = vmatprep.subr.bf16.mxu1 %v23948_v33 }
 0xc48   : > { %v11376_v3 = vadd.f32 %v11375_v62, %v23276_v48  ;;  %12067 = vmatprep.mubr.f32.mxu1 %v11794_v15  ;;  %v23993_v62 = vld [vmem:[#allocation41_spill] sm:$0xff] }
 0xc49   : > { %12068 = vmatmul.mubr.f32.gmra.mrb[54].mxu1 %v11793_v22  ;;  %v11797_v27 = vmax.f32 %v11374_v16, 0.0 }
 0xc4a   : > { %v11798_v18 = vmax.f32 %v11376_v3, 0.0  ;;  %v11379_v28 = vpop.f32.mrb[250].mxu1  ;;  %17259 = vmatpush1.bf16.msra.mxu1 %v23989_v63 }
 0xc4b   : > { %v11380_v51 = vadd.f32 %v11379_v28, %v23272_v0  ;;  %v11381_v13 = vpop.f32.mrb[251].mxu1  ;;  %17244 = vmatprep.subr.bf16.mxu1 %v23948_v33 }
 0xc4c   : > { %v11382_v44 = vadd.f32 %v11381_v13, %v23276_v48  ;;  %12072 = vmatprep.mubr.f32.mxu1 %v11798_v18 }
 0xc4d   : > { %12073 = vmatmul.mubr.f32.gmra.mrb[56].mxu1 %v11797_v27  ;;  %v11801_v42 = vmax.f32 %v11380_v51, 0.0 }
 0xc4e   : > { %v11802_v60 = vmax.f32 %v11382_v44, 0.0  ;;  %v11385_v4 = vpop.f32.mrb[252].mxu1  ;;  %17260 = vmatpush1.bf16.msra.mxu1 %v23990_v34 }
 0xc4f   : > { %v11386_v6 = vadd.f32 %v11385_v4, %v23272_v0  ;;  %v11387_v35 = vpop.f32.mrb[253].mxu1  ;;  %17245 = vmatprep.subr.bf16.mxu1 %v23948_v33 }
 0xc50   : > { %v11388_v47 = vadd.f32 %v11387_v35, %v23276_v48  ;;  %12077 = vmatprep.mubr.f32.mxu1 %v11802_v60 }
 0xc51   : > { %12078 = vmatmul.mubr.f32.gmra.mrb[58].mxu1 %v11801_v42  ;;  %v11805_v57 = vmax.f32 %v11386_v6, 0.0 }
 0xc52   : > { %v11806_v10 = vmax.f32 %v11388_v47, 0.0  ;;  %v11391_v43 = vpop.f32.mrb[254].mxu1  ;;  %17261 = vmatpush1.bf16.msra.mxu1 %v23991_v46 }
 0xc53   : > { %v11392_v56 = vadd.f32 %v11391_v43, %v23272_v0  ;;  %v11393_v24 = vpop.f32.mrb[255].mxu1  ;;  %17246 = vmatprep.subr.bf16.mxu1 %v23948_v33 }
 0xc54   : > { %v11394_v55 = vadd.f32 %v11393_v24, %v23276_v48  ;;  %12082 = vmatprep.mubr.f32.mxu1 %v11806_v10 }
 0xc55   : > { %12083 = vmatmul.mubr.f32.gmra.mrb[60].mxu1 %v11805_v57  ;;  %v11809_v36 = vmax.f32 %v11392_v56, 0.0 }
 0xc56   : > { %v11810_v7 = vmax.f32 %v11394_v55, 0.0  ;;  %v11397_v61 = vpop.f32.mrb[0].mxu1  ;;  %17262 = vmatpush1.bf16.msra.mxu1 %v23992_v52 }
 0xc57   : > { %v11398_v15 = vadd.f32 %v11397_v61, %v23272_v0  ;;  %v11399_v21 = vpop.f32.mrb[1].mxu1  ;;  %17247 = vmatprep.subr.bf16.mxu1 %v23948_v33 }
 0xc58   : > { %v11400_v31 = vadd.f32 %v11399_v21, %v23276_v48  ;;  %12087 = vmatprep.mubr.f32.mxu1 %v11810_v7 }
 0xc59   : > { %12088 = vmatmul.mubr.f32.gmra.mrb[62].mxu1 %v11809_v36  ;;  %v11813_v3 = vmax.f32 %v11398_v15, 0.0 }
 0xc5a   : > { %v11814_v22 = vmax.f32 %v11400_v31, 0.0  ;;  %v11403_v16 = vpop.f32.mrb[2].mxu1  ;;  %17263 = vmatpush1.bf16.msra.mxu1 %v23993_v62 }
 0xc5b   : > { %v11404_v18 = vadd.f32 %v11403_v16, %v23272_v0  ;;  %v11405_v28 = vpop.f32.mrb[3].mxu1 }
 0xc5c   : > { %v11406_v63 = vadd.f32 %v11405_v28, %v23276_v48  ;;  %12092 = vmatprep.mubr.f32.mxu1 %v11814_v22 }
 0xc5d   : > { %12093 = vmatmul.mubr.f32.gmra.mrb[64].mxu1 %v11813_v3  ;;  %v11817_v13 = vmax.f32 %v11404_v18, 0.0 }
 0xc5e   : > { %v11818_v27 = vmax.f32 %v11406_v63, 0.0  ;;  %v11409_v51 = vpop.f32.mrb[4].mxu1 }
 0xc5f   : > { %v11410_v33 = vadd.f32 %v11409_v51, %v23272_v0  ;;  %v11411_v44 = vpop.f32.mrb[5].mxu1 }
 0xc60   : > { %v11412_v60 = vadd.f32 %v11411_v44, %v23276_v48  ;;  %12097 = vmatprep.mubr.f32.mxu1 %v11818_v27 }
 0xc61   : > { %12098 = vmatmul.mubr.f32.gmra.mrb[66].mxu1 %v11817_v13  ;;  %v11821_v42 = vmax.f32 %v11410_v33, 0.0 }
 0xc62   : > { %v11822_v4 = vmax.f32 %v11412_v60, 0.0  ;;  %v11415_v34 = vpop.f32.mrb[6].mxu1 }
 0xc63   : > { %v11416_v6 = vadd.f32 %v11415_v34, %v23272_v0  ;;  %v11417_v35 = vpop.f32.mrb[7].mxu1 }
 0xc64   : > { %v11418_v47 = vadd.f32 %v11417_v35, %v23276_v48  ;;  %12102 = vmatprep.mubr.f32.mxu1 %v11822_v4 }
 0xc65   : > { %12103 = vmatmul.mubr.f32.gmra.mrb[68].mxu1 %v11821_v42  ;;  %v11825_v46 = vmax.f32 %v11416_v6, 0.0 }
 0xc66   : > { %v11826_v10 = vmax.f32 %v11418_v47, 0.0  ;;  %v11421_v43 = vpop.f32.mrb[8].mxu1 }
 0xc67   : > { %v11422_v57 = vadd.f32 %v11421_v43, %v23272_v0  ;;  %v11423_v56 = vpop.f32.mrb[9].mxu1 }
 0xc68   : > { %v11424_v24 = vadd.f32 %v11423_v56, %v23276_v48  ;;  %12107 = vmatprep.mubr.f32.mxu1 %v11826_v10 }
 0xc69   : > { %12108 = vmatmul.mubr.f32.gmra.mrb[70].mxu1 %v11825_v46  ;;  %v11829_v61 = vmax.f32 %v11422_v57, 0.0 }
 0xc6a   : > { %v11830_v55 = vmax.f32 %v11424_v24, 0.0  ;;  %v11427_v7 = vpop.f32.mrb[10].mxu1 }
 0xc6b   : > { %v11428_v52 = vadd.f32 %v11427_v7, %v23272_v0  ;;  %v11429_v36 = vpop.f32.mrb[11].mxu1 }
 0xc6c   : > { %v11430_v15 = vadd.f32 %v11429_v36, %v23276_v48  ;;  %12112 = vmatprep.mubr.f32.mxu1 %v11830_v55 }
 0xc6d   : > { %12113 = vmatmul.mubr.f32.gmra.mrb[72].mxu1 %v11829_v61  ;;  %v11833_v22 = vmax.f32 %v11428_v52, 0.0 }
 0xc6e   : > { %v11834_v21 = vmax.f32 %v11430_v15, 0.0  ;;  %v11433_v31 = vpop.f32.mrb[12].mxu1 }
 0xc6f   : > { %v11434_v16 = vadd.f32 %v11433_v31, %v23272_v0  ;;  %v11435_v62 = vpop.f32.mrb[13].mxu1 }
 0xc70   : > { %v11436_v3 = vadd.f32 %v11435_v62, %v23276_v48  ;;  %12117 = vmatprep.mubr.f32.mxu1 %v11834_v21 }
 0xc71   : > { %12118 = vmatmul.mubr.f32.gmra.mrb[74].mxu1 %v11833_v22  ;;  %v11837_v63 = vmax.f32 %v11434_v16, 0.0 }
 0xc72   : > { %v11838_v18 = vmax.f32 %v11436_v3, 0.0  ;;  %v11439_v28 = vpop.f32.mrb[14].mxu1 }
 0xc73   : > { %v11440_v27 = vadd.f32 %v11439_v28, %v23272_v0  ;;  %v11441_v51 = vpop.f32.mrb[15].mxu1 }
 0xc74   : > { %v11442_v13 = vadd.f32 %v11441_v51, %v23276_v48  ;;  %12122 = vmatprep.mubr.f32.mxu1 %v11838_v18 }
 0xc75   : > { %12123 = vmatmul.mubr.f32.gmra.mrb[76].mxu1 %v11837_v63  ;;  %v11841_v60 = vmax.f32 %v11440_v27, 0.0 }
 0xc76   : > { %v11842_v33 = vmax.f32 %v11442_v13, 0.0  ;;  %v11445_v44 = vpop.f32.mrb[16].mxu1 }
 0xc77   : > { %v11446_v4 = vadd.f32 %v11445_v44, %v23272_v0  ;;  %v11447_v34 = vpop.f32.mrb[17].mxu1 }
 0xc78   : > { %v11448_v42 = vadd.f32 %v11447_v34, %v23276_v48  ;;  %12127 = vmatprep.mubr.f32.mxu1 %v11842_v33 }
 0xc79   : > { %12128 = vmatmul.mubr.f32.gmra.mrb[78].mxu1 %v11841_v60  ;;  %v11845_v47 = vmax.f32 %v11446_v4, 0.0 }
 0xc7a   : > { %v11846_v6 = vmax.f32 %v11448_v42, 0.0  ;;  %v11451_v35 = vpop.f32.mrb[18].mxu1 }
 0xc7b   : > { %v11452_v10 = vadd.f32 %v11451_v35, %v23272_v0  ;;  %v11453_v43 = vpop.f32.mrb[19].mxu1 }
 0xc7c   : > { %v11454_v46 = vadd.f32 %v11453_v43, %v23276_v48  ;;  %12132 = vmatprep.mubr.f32.mxu1 %v11846_v6 }
 0xc7d   : > { %12133 = vmatmul.mubr.f32.gmra.mrb[80].mxu1 %v11845_v47  ;;  %v11849_v24 = vmax.f32 %v11452_v10, 0.0 }
 0xc7e   : > { %v11850_v57 = vmax.f32 %v11454_v46, 0.0  ;;  %v11457_v56 = vpop.f32.mrb[20].mxu1 }
 0xc7f   : > { %v11458_v55 = vadd.f32 %v11457_v56, %v23272_v0  ;;  %v11459_v7 = vpop.f32.mrb[21].mxu1 }
 0xc80   : > { %v11460_v61 = vadd.f32 %v11459_v7, %v23276_v48  ;;  %12137 = vmatprep.mubr.f32.mxu1 %v11850_v57 }
 0xc81   : > { %12138 = vmatmul.mubr.f32.gmra.mrb[82].mxu1 %v11849_v24  ;;  %v11853_v15 = vmax.f32 %v11458_v55, 0.0  ;;  %v11723_v24 = vadd.f32 %v22611_v37, %v22225_v23 }
 0xc82   : > { %v11854_v52 = vmax.f32 %v11460_v61, 0.0  ;;  %v11463_v36 = vpop.f32.mrb[22].mxu1  ;;  %v23994_v61 = vld [vmem:[#allocation46_spill] sm:$0xff] }
 0xc83   : > { %v11464_v21 = vadd.f32 %v11463_v36, %v23272_v0  ;;  %v11465_v31 = vpop.f32.mrb[23].mxu1 }
 0xc84   : > { %v11466_v22 = vadd.f32 %v11465_v31, %v23276_v48  ;;  %12142 = vmatprep.mubr.f32.mxu1 %v11854_v52  ;;  %v11721_v52 = vadd.f32 %v23994_v61, %v22220_v59 }
 0xc85   : > { %12143 = vmatmul.mubr.f32.gmra.mrb[84].mxu1 %v11853_v15  ;;  %v11857_v3 = vmax.f32 %v11464_v21, 0.0  ;;  %v11860_v15 = vmax.f32 %v11723_v24, 0.0  ;;  %v23995_v21 = vld [vmem:[#allocation48_spill] sm:$0xff] }
 0xc86   : > { %v11858_v16 = vmax.f32 %v11466_v22, 0.0  ;;  %v11469_v62 = vpop.f32.mrb[24].mxu1  ;;  %v11729_v31 = vadd.f32 %v23995_v21, %v22225_v23  ;;  %v23996_v22 = vld [vmem:[#allocation47_spill] sm:$0xff] }
 0xc87   : > { %v11470_v18 = vadd.f32 %v11469_v62, %v23272_v0  ;;  %v11471_v28 = vpop.f32.mrb[25].mxu1  ;;  %v11727_v37 = vadd.f32 %v23996_v22, %v22220_v59 }
 0xc88   : > { %v11472_v63 = vadd.f32 %v11471_v28, %v23276_v48  ;;  %12147 = vmatprep.mubr.f32.mxu1 %v11858_v16  ;;  %v11864_v16 = vmax.f32 %v11729_v31, 0.0 }
 0xc89   : > { %12148 = vmatmul.mubr.f32.gmra.mrb[86].mxu1 %v11857_v3  ;;  %v11861_v13 = vmax.f32 %v11470_v18, 0.0  ;;  %v11863_v3 = vmax.f32 %v11727_v37, 0.0  ;;  %v23998_v18 = vld [vmem:[#allocation49_spill] sm:$0xff] }
 0xc8a   : > { %v11862_v27 = vmax.f32 %v11472_v63, 0.0  ;;  %v11475_v51 = vpop.f32.mrb[26].mxu1  ;;  %v11733_v28 = vadd.f32 %v23998_v18, %v22220_v59 }
 0xc8b   : > { %v11476_v33 = vadd.f32 %v11475_v51, %v23272_v0  ;;  %v11477_v44 = vpop.f32.mrb[27].mxu1 }
 0xc8c   : > { %v11478_v60 = vadd.f32 %v11477_v44, %v23276_v48  ;;  %12152 = vmatprep.mubr.f32.mxu1 %v11862_v27  ;;  %v23999_v27 = vld [vmem:[#allocation52_spill] sm:$0xff] }
 0xc8d   : > { %12153 = vmatmul.mubr.f32.gmra.mrb[88].mxu1 %v11861_v13  ;;  %v11865_v42 = vmax.f32 %v11476_v33, 0.0  ;;  %v11741_v51 = vadd.f32 %v23999_v27, %v22225_v23  ;;  %v11867_v13 = vmax.f32 %v11733_v28, 0.0  ;;  %v24000_v33 = vld [vmem:[#allocation51_spill] sm:$0xff] }
 0xc8e   : > { %v11866_v4 = vmax.f32 %v11478_v60, 0.0  ;;  %v11481_v34 = vpop.f32.mrb[28].mxu1  ;;  %v11739_v44 = vadd.f32 %v24000_v33, %v22220_v59 }
 0xc8f   : > { %v11482_v6 = vadd.f32 %v11481_v34, %v23272_v0  ;;  %v11483_v35 = vpop.f32.mrb[29].mxu1  ;;  %v11872_v60 = vmax.f32 %v11741_v51, 0.0 }
 0xc90   : > { %v11484_v47 = vadd.f32 %v11483_v35, %v23276_v48  ;;  %12157 = vmatprep.mubr.f32.mxu1 %v11866_v4  ;;  %v24001_v4 = vld [vmem:[#allocation54_spill] sm:$0xff] }
 0xc91   : > { %12158 = vmatmul.mubr.f32.gmra.mrb[90].mxu1 %v11865_v42  ;;  %v11869_v46 = vmax.f32 %v11482_v6, 0.0  ;;  %v11747_v34 = vadd.f32 %v24001_v4, %v22225_v23  ;;  %v11871_v42 = vmax.f32 %v11739_v44, 0.0  ;;  %v24002_v6 = vld [vmem:[#allocation53_spill] sm:$0xff] }
 0xc92   : > { %v11870_v10 = vmax.f32 %v11484_v47, 0.0  ;;  %v11487_v43 = vpop.f32.mrb[30].mxu1  ;;  %v11745_v35 = vadd.f32 %v24002_v6, %v22220_v59 }
 0xc93   : > { %v11488_v57 = vadd.f32 %v11487_v43, %v23272_v0  ;;  %v11489_v56 = vpop.f32.mrb[31].mxu1  ;;  %v11859_v0 = vmax.f32 %v11721_v52, 0.0  ;;  %v11876_v47 = vmax.f32 %v11747_v34, 0.0  ;;  %v23397_v43 = vld [vmem:[%s23513_s14] ss:$0 sm:$0xff] }
 0xc94   : > { %v11490_v55 = vadd.f32 %v11489_v56, %v23276_v48  ;;  %12162 = vmatprep.mubr.f32.mxu1 %v11870_v10  ;;  %v23997_v48 = vld [vmem:[#allocation50_spill] sm:$0xff]  ;;  %v11875_v10 = vmax.f32 %v11745_v35, 0.0 }
 0xc95   : > { %12163 = vmatmul.mubr.f32.gmra.mrb[92].mxu1 %v11869_v46  ;;  %v11873_v36 = vmax.f32 %v11488_v57, 0.0  ;;  %v11735_v62 = vadd.f32 %v23997_v48, %v22225_v23 }
 0xc96   : > { %v11874_v7 = vmax.f32 %v11490_v55, 0.0 }
 0xc97   : > { %v11868_v63 = vmax.f32 %v11735_v62, 0.0 }
 0xc98   : > { %12167 = vmatprep.mubr.f32.mxu1 %v11874_v7 }
 0xc99   : > { %12168 = vmatmul.mubr.f32.gmra.mrb[94].mxu1 %v11873_v36 }
 0xc9a   : > { %12372 = vmatprep.mubr.f32.mxu1 %v11860_v15 }
 0xc9d   : > { %12373 = vmatmul.mubr.f32.vlgmr.msra.gmra.mrb[86].mxu1 %v11859_v0 }
 0xc9e   : > { %12377 = vmatprep.mubr.f32.mxu1 %v11864_v16 }
 0xca1   : > { %12378 = vmatmul.mubr.f32.gmra.mrb[88].mxu1 %v11863_v3 }
 0xca2   : > { %12382 = vmatprep.mubr.f32.mxu1 %v11868_v63 }
 0xca5   : > { %12383 = vmatmul.mubr.f32.gmra.mrb[90].mxu1 %v11867_v13 }
 0xca6   : > { %12387 = vmatprep.mubr.f32.mxu1 %v11872_v60  ;;  %v24004_v60 = vld [vmem:[#allocation55_spill] sm:$0xff] }
 0xca9   : > { %12388 = vmatmul.mubr.f32.gmra.mrb[92].mxu1 %v11871_v42 }
 0xcaa   : > { %12392 = vmatprep.mubr.f32.mxu1 %v11876_v47 }
 0xcad   : > { %12393 = vmatmul.mubr.f32.gmra.mrb[94].mxu1 %v11875_v10 }
 0xcf0   : > { %v12014_v46 = vpop.f32.mrb[32].mxu1 }
 0xcf1   : > { %v12015_v57 = vadd.f32 %v23397_v43, %v12014_v46  ;;  %v12016_v23 = vpop.f32.mrb[33].mxu1 }
 0xcf3   : > { %v12240_v59 = vadd.f32 %v22854_v26, %v12015_v57 }
 0xcf4   : > { %v12019_v56 = vpop.f32.mrb[34].mxu1 }
 0xcf5   : > { %12398 = vst [vmem:[%s23404_s0] sm:$0xff] %v12240_v59  ;;  %v12020_v24 = vadd.f32 %v23397_v43, %v12019_v56  ;;  %v12021_v55 = vpop.f32.mrb[35].mxu1 }
 0xcf7   : > { %v12245_v7 = vadd.f32 %v22864_v19, %v12020_v24 }
 0xcf8   : > { %v12024_v61 = vpop.f32.mrb[36].mxu1 }
 0xcf9   : > { %12399 = vst [vmem:[%s23404_s0 + $0x8] sm:$0xff] %v12245_v7  ;;  %v12025_v52 = vadd.f32 %v23397_v43, %v12024_v61  ;;  %v12026_v36 = vpop.f32.mrb[37].mxu1 }
 0xcfb   : > { %v12250_v15 = vadd.f32 %v22874_v30, %v12025_v52 }
 0xcfc   : > { %v12029_v21 = vpop.f32.mrb[38].mxu1 }
 0xcfd   : > { %12400 = vst [vmem:[%s23404_s0 + $0x10] sm:$0xff] %v12250_v15  ;;  %v12030_v26 = vadd.f32 %v23397_v43, %v12029_v21  ;;  %v12031_v31 = vpop.f32.mrb[39].mxu1 }
 0xcff   : > { %v12255_v0 = vadd.f32 %v22884_v20, %v12030_v26 }
 0xd00   : > { %v12034_v22 = vpop.f32.mrb[40].mxu1 }
 0xd01   : > { %12401 = vst [vmem:[%s23404_s0 + $0x18] sm:$0xff] %v12255_v0  ;;  %v12035_v19 = vadd.f32 %v23397_v43, %v12034_v22  ;;  %v12036_v37 = vpop.f32.mrb[41].mxu1 }
 0xd03   : > { %v12260_v16 = vadd.f32 %v22894_v25, %v12035_v19 }
 0xd04   : > { %v12039_v48 = vpop.f32.mrb[42].mxu1 }
 0xd05   : > { %12402 = vst [vmem:[%s23404_s0 + $0x20] sm:$0xff] %v12260_v16  ;;  %v12040_v30 = vadd.f32 %v23397_v43, %v12039_v48  ;;  %v12041_v62 = vpop.f32.mrb[43].mxu1 }
 0xd07   : > { %v12265_v3 = vadd.f32 %v22904_v45, %v12040_v30 }
 0xd08   : > { %v12044_v18 = vpop.f32.mrb[44].mxu1 }
 0xd09   : > { %12403 = vst [vmem:[%s23404_s0 + $0x28] sm:$0xff] %v12265_v3  ;;  %v12045_v20 = vadd.f32 %v23397_v43, %v12044_v18  ;;  %v12046_v28 = vpop.f32.mrb[45].mxu1 }
 0xd0b   : > { %v12270_v63 = vadd.f32 %v22914_v49, %v12045_v20 }
 0xd0c   : > { %v12049_v27 = vpop.f32.mrb[46].mxu1 }
 0xd0d   : > { %12404 = vst [vmem:[%s23404_s0 + $0x30] sm:$0xff] %v12270_v63  ;;  %v12050_v25 = vadd.f32 %v23397_v43, %v12049_v27  ;;  %v12051_v51 = vpop.f32.mrb[47].mxu1 }
 0xd0f   : > { %v12275_v13 = vadd.f32 %v22924_v14, %v12050_v25 }
 0xd10   : > { %v12054_v33 = vpop.f32.mrb[48].mxu1 }
 0xd11   : > { %12405 = vst [vmem:[%s23404_s0 + $0x38] sm:$0xff] %v12275_v13  ;;  %v12055_v45 = vadd.f32 %v23397_v43, %v12054_v33  ;;  %v12056_v44 = vpop.f32.mrb[49].mxu1 }
 0xd13   : > { %v12280_v4 = vadd.f32 %v24004_v60, %v12055_v45 }
 0xd14   : > { %v12059_v34 = vpop.f32.mrb[50].mxu1 }
 0xd15   : > { %12406 = vst [vmem:[%s23404_s0 + $0x40] sm:$0xff] %v12280_v4  ;;  %v12060_v49 = vadd.f32 %v23397_v43, %v12059_v34  ;;  %v12061_v42 = vpop.f32.mrb[51].mxu1 }
 0xd17   : > { %v12285_v6 = vadd.f32 %v22944_v50, %v12060_v49 }
 0xd18   : > { %v12064_v35 = vpop.f32.mrb[52].mxu1 }
 0xd19   : > { %12407 = vst [vmem:[%s23404_s0 + $0x48] sm:$0xff] %v12285_v6  ;;  %v12065_v14 = vadd.f32 %v23397_v43, %v12064_v35  ;;  %v12066_v47 = vpop.f32.mrb[53].mxu1 }
 0xd1b   : > { %v12290_v10 = vadd.f32 %v22952_v9, %v12065_v14 }
 0xd1c   : > { %v12069_v46 = vpop.f32.mrb[54].mxu1 }
 0xd1d   : > { %12408 = vst [vmem:[%s23404_s0 + $0x50] sm:$0xff] %v12290_v10  ;;  %v12070_v57 = vadd.f32 %v23397_v43, %v12069_v46  ;;  %v12071_v23 = vpop.f32.mrb[55].mxu1 }
 0xd1f   : > { %v12295_v59 = vadd.f32 %v22958_v2, %v12070_v57 }
 0xd20   : > { %v12074_v56 = vpop.f32.mrb[56].mxu1 }
 0xd21   : > { %12409 = vst [vmem:[%s23404_s0 + $0x58] sm:$0xff] %v12295_v59  ;;  %v12075_v50 = vadd.f32 %v23397_v43, %v12074_v56  ;;  %v12076_v24 = vpop.f32.mrb[57].mxu1 }
 0xd23   : > { %v12300_v55 = vadd.f32 %v22964_v40, %v12075_v50 }
 0xd24   : > { %v12079_v7 = vpop.f32.mrb[58].mxu1 }
 0xd25   : > { %12410 = vst [vmem:[%s23404_s0 + $0x60] sm:$0xff] %v12300_v55  ;;  %v12080_v9 = vadd.f32 %v23397_v43, %v12079_v7  ;;  %v12081_v61 = vpop.f32.mrb[59].mxu1 }
 0xd27   : > { %v12305_v52 = vadd.f32 %v22970_v41, %v12080_v9 }
 0xd28   : > { %v12084_v36 = vpop.f32.mrb[60].mxu1 }
 0xd29   : > { %12411 = vst [vmem:[%s23404_s0 + $0x68] sm:$0xff] %v12305_v52  ;;  %v12085_v2 = vadd.f32 %v23397_v43, %v12084_v36  ;;  %v12086_v15 = vpop.f32.mrb[61].mxu1 }
 0xd2b   : > { %v12310_v21 = vadd.f32 %v22976_v38, %v12085_v2 }
 0xd2c   : > { %v12089_v26 = vpop.f32.mrb[62].mxu1 }
 0xd2d   : > { %12412 = vst [vmem:[%s23404_s0 + $0x70] sm:$0xff] %v12310_v21  ;;  %v12090_v40 = vadd.f32 %v23397_v43, %v12089_v26  ;;  %v12091_v31 = vpop.f32.mrb[63].mxu1 }
 0xd2f   : > { %v12315_v0 = vadd.f32 %v22982_v5, %v12090_v40 }
 0xd30   : > { %v12094_v22 = vpop.f32.mrb[64].mxu1 }
 0xd31   : > { %12413 = vst [vmem:[%s23404_s0 + $0x78] sm:$0xff] %v12315_v0  ;;  %v12095_v41 = vadd.f32 %v23397_v43, %v12094_v22  ;;  %v12096_v19 = vpop.f32.mrb[65].mxu1 }
 0xd33   : > { %v12320_v37 = vadd.f32 %v22988_v8, %v12095_v41 }
 0xd34   : > { %v12099_v16 = vpop.f32.mrb[66].mxu1 }
 0xd35   : > { %12414 = vst [vmem:[%s23404_s0 + $0x80] sm:$0xff] %v12320_v37  ;;  %v12100_v38 = vadd.f32 %v23397_v43, %v12099_v16  ;;  %v12101_v48 = vpop.f32.mrb[67].mxu1 }
 0xd37   : > { %v12325_v30 = vadd.f32 %v22994_v53, %v12100_v38 }
 0xd38   : > { %v12104_v62 = vpop.f32.mrb[68].mxu1 }
 0xd39   : > { %12415 = vst [vmem:[%s23404_s0 + $0x88] sm:$0xff] %v12325_v30  ;;  %v12105_v5 = vadd.f32 %v23397_v43, %v12104_v62  ;;  %v12106_v3 = vpop.f32.mrb[69].mxu1 }
 0xd3b   : > { %v12330_v18 = vadd.f32 %v23000_v39, %v12105_v5 }
 0xd3c   : > { %v12109_v20 = vpop.f32.mrb[70].mxu1 }
 0xd3d   : > { %12416 = vst [vmem:[%s23404_s0 + $0x90] sm:$0xff] %v12330_v18  ;;  %v12110_v8 = vadd.f32 %v23397_v43, %v12109_v20  ;;  %v12111_v28 = vpop.f32.mrb[71].mxu1 }
 0xd3f   : > { %v12335_v63 = vadd.f32 %v23002_v17, %v12110_v8 }
 0xd40   : > { %v12114_v27 = vpop.f32.mrb[72].mxu1 }
 0xd41   : > { %12417 = vst [vmem:[%s23404_s0 + $0x98] sm:$0xff] %v12335_v63  ;;  %v12115_v53 = vadd.f32 %v23397_v43, %v12114_v27  ;;  %v12116_v25 = vpop.f32.mrb[73].mxu1 }
 0xd43   : > { %v12340_v51 = vadd.f32 %v23013_v58, %v12115_v53 }
 0xd44   : > { %v12119_v13 = vpop.f32.mrb[74].mxu1 }
 0xd45   : > { %12418 = vst [vmem:[%s23404_s0 + $0xa0] sm:$0xff] %v12340_v51  ;;  %v12120_v39 = vadd.f32 %v23397_v43, %v12119_v13  ;;  %v12121_v33 = vpop.f32.mrb[75].mxu1 }
 0xd47   : > { %v12345_v45 = vadd.f32 %v23023_v12, %v12120_v39 }
 0xd48   : > { %v12124_v44 = vpop.f32.mrb[76].mxu1 }
 0xd49   : > { %12419 = vst [vmem:[%s23404_s0 + $0xa8] sm:$0xff] %v12345_v45  ;;  %v12125_v17 = vadd.f32 %v23397_v43, %v12124_v44  ;;  %v12126_v60 = vpop.f32.mrb[77].mxu1 }
 0xd4b   : > { %v12350_v4 = vadd.f32 %v23034_v54, %v12125_v17 }
 0xd4c   : > { %v12129_v34 = vpop.f32.mrb[78].mxu1 }
 0xd4d   : > { %12420 = vst [vmem:[%s23404_s0 + $0xb0] sm:$0xff] %v12350_v4  ;;  %v12130_v58 = vadd.f32 %v23397_v43, %v12129_v34  ;;  %v12131_v49 = vpop.f32.mrb[79].mxu1 }
 0xd4f   : > { %v12355_v42 = vadd.f32 %v23045_v29, %v12130_v58 }
 0xd50   : > { %v12134_v6 = vpop.f32.mrb[80].mxu1 }
 0xd51   : > { %12421 = vst [vmem:[%s23404_s0 + $0xb8] sm:$0xff] %v12355_v42  ;;  %v12135_v12 = vadd.f32 %v23397_v43, %v12134_v6  ;;  %v12136_v35 = vpop.f32.mrb[81].mxu1 }
 0xd53   : > { %v12360_v14 = vadd.f32 %v23056_v1, %v12135_v12 }
 0xd54   : > { %v12139_v47 = vpop.f32.mrb[82].mxu1 }
 0xd55   : > { %12422 = vst [vmem:[%s23404_s0 + $0xc0] sm:$0xff] %v12360_v14  ;;  %v12140_v54 = vadd.f32 %v23397_v43, %v12139_v47  ;;  %v12141_v10 = vpop.f32.mrb[83].mxu1 }
 0xd57   : > { %v12365_v46 = vadd.f32 %v23067_v32, %v12140_v54 }
 0xd58   : > { %v12144_v57 = vpop.f32.mrb[84].mxu1 }
 0xd59   : > { %12423 = vst [vmem:[%s23404_s0 + $0xc8] sm:$0xff] %v12365_v46  ;;  %v12145_v29 = vadd.f32 %v23397_v43, %v12144_v57  ;;  %v12146_v23 = vpop.f32.mrb[85].mxu1 }
 0xd5b   : > { %v12370_v59 = vadd.f32 %v23078_v11, %v12145_v29 }
 0xd5d   : > { %12424 = vst [vmem:[%s23404_s0 + $0xd0] sm:$0xff] %v12370_v59 }
 0xd70   : > { %v12374_v56 = vpop.f32.mrb[86].mxu1 }
 0xd71   : > { %v17350_v1 = vadd.f32 %v23397_v43, %v12374_v56  ;;  %v12376_v50 = vpop.f32.mrb[87].mxu1 }
 0xd73   : > { %12425 = vst [vmem:[%s23404_s0 + $0xd8] sm:$0xff] %v17350_v1 }
 0xd74   : > { %v12379_v24 = vpop.f32.mrb[88].mxu1 }
 0xd75   : > { %v17351_v55 = vadd.f32 %v23397_v43, %v12379_v24  ;;  %v12381_v32 = vpop.f32.mrb[89].mxu1 }
 0xd77   : > { %12426 = vst [vmem:[%s23404_s0 + $0xe0] sm:$0xff] %v17351_v55 }
 0xd78   : > { %v12384_v7 = vpop.f32.mrb[90].mxu1 }
 0xd79   : > { %v17352_v9 = vadd.f32 %v23397_v43, %v12384_v7  ;;  %v12386_v61 = vpop.f32.mrb[91].mxu1 }
 0xd7b   : > { %12427 = vst [vmem:[%s23404_s0 + $0xe8] sm:$0xff] %v17352_v9 }
 0xd7c   : > { %v12389_v52 = vpop.f32.mrb[92].mxu1 }
 0xd7d   : > { %v17353_v11 = vadd.f32 %v23397_v43, %v12389_v52  ;;  %v12391_v36 = vpop.f32.mrb[93].mxu1 }
 0xd7f   : > { %12428 = vst [vmem:[%s23404_s0 + $0xf0] sm:$0xff] %v17353_v11 }
 0xd80   : > { %v12394_v2 = vpop.f32.mrb[94].mxu1 }
 0xd81   : > { %v17354_v15 = vadd.f32 %v23397_v43, %v12394_v2  ;;  %v12396_v21 = vpop.f32.mrb[95].mxu1 }
 0xd83   : > { %12429 = vst [vmem:[%s23404_s0 + $0xf8] sm:$0xff] %v17354_v15 }
 0xd84 PF: > { %s24005_s1 = sld [smem:[#allocation14_spill]] }
 0xd8a   : > { %s30_s21 = sadd.s32 1, %s24005_s1  }
 0xd8b   : > { %p27_p11 = scmp.ge.s32.totalorder %s30_s21, 4  }
 0xd8d   :  { %29 = sbr.rel (!%p27_p11) target bundleno = 8 (0x8), region = 167 }
 0xd94   :  { %12467 = vsyncpa [#allocation5], 1 }
 0xd95   :  { %12469 = vsyncpa [#allocation5 + $0x1], 1 }
 0xd96   :  { %12470 = vsyncpa [#allocation7], 1 }
 0xd97   :  { %12471 = vsyncpa [#allocation10], 1 }

</bundles_post_ra>
